<compile_context>
chip_gen: v7x
topology: tpu7x:2x2x1
jax: 0.10.0
libtpu: 0.0.40
codegen_flags: <defaults>
</compile_context>

<pallas_src>
import functools

import numpy as np
import jax
import jax.numpy as jnp
from jax.experimental import pallas as pl
from jax.experimental.pallas import tpu as pltpu


# --------------------------------------------------------------------------
# Init-time builders: fold conv / conv-transpose structure into matrices.
# All convolutions in this model are k=4, stride=2, padding=1.
# Activation layout inside the kernel: 2D (H, W*C) with C fastest (lane axis).
# --------------------------------------------------------------------------
def _conv_matrices(w, hin, win, ho, wo):
    """Forward Conv2d(k=4, s=2, p=1). w: (Cout, Cin, 4, 4) numpy.

    Returns S (4, ho, hin) row-tap selectors and M (4, win*Cin, wo*Cout)
    banded weight matrices so that  out = sum_ki (S[ki] @ act) @ M[ki].
    Out-of-range taps (zero padding) are simply omitted."""
    cout, cin, k, _ = w.shape
    S_all = np.zeros((k, ho, hin), np.float32)
    M_all = np.zeros((k, win * cin, wo * cout), np.float32)
    for ki in range(k):
        hrow = 2 * np.arange(ho) + ki - 1
        ok = (hrow >= 0) & (hrow < hin)
        S_all[ki, np.arange(ho)[ok], hrow[ok]] = 1.0
        for kj in range(k):
            wcol = 2 * np.arange(wo) + kj - 1
            okw = (wcol >= 0) & (wcol < win)
            wi_v = wcol[okw]
            wo_v = np.arange(wo)[okw]
            rows = wi_v[:, None] * cin + np.arange(cin)[None, :]       # (nv, cin)
            cols = wo_v[:, None] * cout + np.arange(cout)[None, :]     # (nv, cout)
            M_all[ki][rows[:, :, None], cols[:, None, :]] = \
                w[:, :, ki, kj].T[None, :, :]                          # value W[co,ci,ki,kj]
    return S_all, M_all


def _convt_matrices(w, hin, win, ho, wo):
    """ConvTranspose2d(k=4, s=2, p=1). w: (Cin, Cout, 4, 4) numpy.

    Returns T (4, ho, hin) row-scatter matrices and N (4, win*Cin, wo*Cout)
    column scatter/weight matrices so that out = sum_ki T[ki] @ (act @ N[ki]).
    No zero-dilated intermediate is ever materialized."""
    cin, cout, k, _ = w.shape
    T_all = np.zeros((k, ho, hin), np.float32)
    N_all = np.zeros((k, win * cin, wo * cout), np.float32)
    for ki in range(k):
        orow = 2 * np.arange(hin) + ki - 1
        ok = (orow >= 0) & (orow < ho)
        T_all[ki, orow[ok], np.arange(hin)[ok]] = 1.0
        for kj in range(k):
            ocol = 2 * np.arange(win) + kj - 1
            okw = (ocol >= 0) & (ocol < wo)
            iw_v = np.arange(win)[okw]
            ow_v = ocol[okw]
            rows = iw_v[:, None] * cin + np.arange(cin)[None, :]       # (nv, cin)
            cols = ow_v[:, None] * cout + np.arange(cout)[None, :]     # (nv, cout)
            N_all[ki][rows[:, :, None], cols[:, None, :]] = \
                w[:, :, ki, kj][None, :, :]                            # value W[ci,co,ki,kj]
    return T_all, N_all


def _latent_matrices(lat_w, lat_b, hdim, wdim, cdim):
    """Linear(C*H*W -> L) consuming the (H, W*C) layout.

    PyTorch's NCHW flatten order is folded into the per-row matrices:
        z = lat_b + sum_h  act[h:h+1, :] @ V[h]."""
    L = lat_w.shape[0]
    V = np.zeros((hdim, wdim * cdim, L), np.float32)
    wi = np.arange(wdim)
    ci = np.arange(cdim)
    for hh in range(hdim):
        src = (ci[None, :] * (hdim * wdim) + hh * wdim + wi[:, None]).reshape(-1)
        V[hh] = lat_w[:, src].T
    return V, lat_b.reshape(1, L).astype(np.float32)


def _decoder_matrices(dec_w, dec_b, hdim, wdim, cdim):
    """Linear(L -> C*H*W) producing the (H, W*C) layout row by row."""
    L = dec_w.shape[1]
    Wd = np.zeros((hdim, L, wdim * cdim), np.float32)
    Bd = np.zeros((hdim, 1, wdim * cdim), np.float32)
    wi = np.arange(wdim)
    ci = np.arange(cdim)
    for hh in range(hdim):
        src = (ci[None, :] * (hdim * wdim) + hh * wdim + wi[:, None]).reshape(-1)
        Wd[hh] = dec_w[src, :].T
        Bd[hh, 0] = dec_b[src]
    return Wd, Bd


def init_params(latent_dim, key):
    """Raw PyTorch-layout parameters."""
    ks = jax.random.split(key, 12)
    s = 0.05
    return {
        "conv1_w": jax.random.normal(ks[0], (32, 1, 4, 4), jnp.float32) * s,
        "conv1_b": jax.random.normal(ks[1], (32,), jnp.float32) * s,
        "conv2_w": jax.random.normal(ks[2], (64, 32, 4, 4), jnp.float32) * s,
        "conv2_b": jax.random.normal(ks[3], (64,), jnp.float32) * s,
        "lat_w": jax.random.normal(ks[4], (latent_dim, 64 * 7 * 7), jnp.float32) * s,
        "lat_b": jax.random.normal(ks[5], (latent_dim,), jnp.float32) * s,
        "dec_w": jax.random.normal(ks[6], (64 * 7 * 7, latent_dim), jnp.float32) * s,
        "dec_b": jax.random.normal(ks[7], (64 * 7 * 7,), jnp.float32) * s,
        "convt1_w": jax.random.normal(ks[8], (64, 32, 4, 4), jnp.float32) * s,
        "convt1_b": jax.random.normal(ks[9], (32,), jnp.float32) * s,
        "convt2_w": jax.random.normal(ks[10], (32, 1, 4, 4), jnp.float32) * s,
        "convt2_b": jax.random.normal(ks[11], (1,), jnp.float32) * s,
    }


def prepare_params(params, latent_dim):
    """One-time host-side transform of PyTorch weights into kernel operands.
    bf16 for MXU operands, f32 for bias rows (added in the f32 epilogue)."""
    f = lambda k: np.asarray(params[k], dtype=np.float32)
    S1, M1 = _conv_matrices(f("conv1_w"), hin=28, win=28, ho=14, wo=14)
    S2, M2 = _conv_matrices(f("conv2_w"), hin=14, win=14, ho=7, wo=7)
    Vlat, blat = _latent_matrices(f("lat_w"), f("lat_b"), hdim=7, wdim=7, cdim=64)
    Wdec, Bdec = _decoder_matrices(f("dec_w"), f("dec_b"), hdim=7, wdim=7, cdim=64)
    T1, N1 = _convt_matrices(f("convt1_w"), hin=7, win=7, ho=14, wo=14)
    T2, N2 = _convt_matrices(f("convt2_w"), hin=14, win=14, ho=28, wo=28)
    b1 = np.tile(f("conv1_b"), 14).reshape(1, -1)     # col = wo*32 + co
    b2 = np.tile(f("conv2_b"), 7).reshape(1, -1)
    bt1 = np.tile(f("convt1_b"), 14).reshape(1, -1)
    bt2 = np.tile(f("convt2_b"), 28).reshape(1, -1)
    bf = lambda a: jnp.asarray(a, jnp.bfloat16)
    f32 = lambda a: jnp.asarray(a, jnp.float32)
    return {
        "S1": bf(S1), "M1": bf(M1), "b1": f32(b1),
        "S2": bf(S2), "M2": bf(M2), "b2": f32(b2),
        "Vlat": bf(Vlat), "blat": f32(blat),
        "Wdec": bf(Wdec), "bdec": f32(Bdec),
        "T1": bf(T1), "N1": bf(N1), "bt1": f32(bt1),
        "T2": bf(T2), "N2": bf(N2), "bt2": f32(bt2),
    }


# --------------------------------------------------------------------------
# The single fused Pallas kernel (one grid step = one image).
# --------------------------------------------------------------------------
def _ae_kernel(*refs, with_decoder):
    (x_ref, S1, M1, b1, S2, M2, b2, Vlat, blat, Wdec, bdec,
     T1, N1, bt1, T2, N2, bt2) = refs[:17]
    if with_decoder:
        z_ref, y_ref, dec_scr = refs[17:]
    else:
        (z_ref,) = refs[17:]

    bf16 = jnp.bfloat16
    f32 = jnp.float32

    def mm(a, b):  # bf16 x bf16 -> f32 accumulation on the MXU
        return jnp.dot(a.astype(bf16), b.astype(bf16),
                       preferred_element_type=f32)

    # ------------------------------ encoder ------------------------------
    x = x_ref[0].astype(bf16)                        # (28, 28): rows=h, cols=w (Cin=1)

    # Conv2d(1, 32, k=4, s=2, p=1) -> layout (14, 14*32), cols = w*32 + c
    a1 = jnp.zeros((14, 14 * 32), f32)
    for ki in range(4):
        rows = mm(S1[ki], x)                         # stride-2 row taps (14, 28)
        a1 = a1 + mm(rows, M1[ki])                   # width taps + channel contraction
    a1 = jnp.maximum(a1 + b1[...], 0.0)

    # Conv2d(32, 64, k=4, s=2, p=1) -> layout (7, 7*64)
    a2 = jnp.zeros((7, 7 * 64), f32)
    for ki in range(4):
        rows = mm(S2[ki], a1)                        # (7, 448)
        a2 = a2 + mm(rows, M2[ki])
    a2 = jnp.maximum(a2 + b2[...], 0.0)

    # Linear(3136 -> latent); PyTorch NCHW-flatten order is baked into Vlat.
    z = blat[...]                                    # (1, L) f32
    for h in range(7):
        z = z + mm(a2[h:h + 1, :], Vlat[h])
    z_ref[0] = z

    if not with_decoder:
        return

    # ------------------------------ decoder ------------------------------
    zb = z.astype(bf16)
    for h in range(7):                               # Linear(latent -> 3136), row h of (7, 7*64)
        dec_scr[h:h + 1, :] = mm(zb, Wdec[h]) + bdec[h]
    d = jnp.maximum(dec_scr[...], 0.0)               # (7, 448)

    # ConvTranspose2d(64, 32, k=4, s=2, p=1) -> (14, 14*32)
    c1 = jnp.zeros((14, 14 * 32), f32)
    for ki in range(4):
        t = mm(d, N1[ki])                            # width/channel scatter (7, 448)
        c1 = c1 + mm(T1[ki], t)                      # row scatter           (14, 448)
    c1 = jnp.maximum(c1 + bt1[...], 0.0)

    # ConvTranspose2d(32, 1, k=4, s=2, p=1) -> (28, 28)
    y = jnp.zeros((28, 28), f32)
    for ki in range(4):
        t = mm(c1, N2[ki])                           # (14, 28)
        y = y + mm(T2[ki], t)                        # (28, 28)
    y = y + bt2[...]

    # numerically stable sigmoid, f32 epilogue
    e = jnp.exp(-jnp.abs(y))
    y = jnp.where(y >= 0.0, 1.0, e) / (1.0 + e)
    y_ref[0] = y.astype(y_ref.dtype)


_PARAM_ORDER = ("S1", "M1", "b1", "S2", "M2", "b2", "Vlat", "blat",
                "Wdec", "bdec", "T1", "N1", "bt1", "T2", "N2", "bt2")


def _resident_spec(shape):
    n = len(shape)
    return pl.BlockSpec(shape, lambda i, _n=n: (0,) * _n)


def make_forward(latent_dim, with_decoder):
    """fwd(prepared, x_nchw) -> reconstruction (or latent if with_decoder=False)."""

    def fwd(prepared, x):
        B = x.shape[0]
        assert x.shape[1:] == (1, 28, 28), x.shape
        x2 = x.reshape(B, 28, 28).astype(jnp.float32)

        in_specs = [pl.BlockSpec((1, 28, 28), lambda i: (i, 0, 0))]
        args = [x2]
        for k in _PARAM_ORDER:
            a = prepared[k]
            in_specs.append(_resident_spec(a.shape))
            args.append(a)

        out_shape = [jax.ShapeDtypeStruct((B, 1, latent_dim), jnp.float32)]
        out_specs = [pl.BlockSpec((1, 1, latent_dim), lambda i: (i, 0, 0))]
        scratch = []
        if with_decoder:
            out_shape.append(jax.ShapeDtypeStruct((B, 28, 28), jnp.float32))
            out_specs.append(pl.BlockSpec((1, 28, 28), lambda i: (i, 0, 0)))
            scratch.append(pltpu.VMEM((7, 7 * 64), jnp.float32))

        outs = pl.pallas_call(
            functools.partial(_ae_kernel, with_decoder=with_decoder),
            out_shape=tuple(out_shape),
            grid_spec=pltpu.PrefetchScalarGridSpec(
                num_scalar_prefetch=0,
                grid=(B,),                                 # one image per grid step
                in_specs=in_specs,
                out_specs=tuple(out_specs),
                scratch_shapes=scratch,
            ),
            compiler_params=pltpu.CompilerParams(
                dimension_semantics=("parallel",),         # v7x: split batch over 2 TCs
                vmem_limit_bytes=32 * 1024 * 1024,
            ),
        )(*args)

        if with_decoder:
            return outs[1].reshape(B, 1, 28, 28)
        return outs[0].reshape(B, latent_dim)

    return fwd


# --------------------------------------------------------------------------
# Pure-JAX f32 reference (matches the PyTorch module) for validation.
# --------------------------------------------------------------------------
def _reference_forward(params, x, return_latent=False):
    dn = ("NCHW", "OIHW", "NCHW")
    h = jax.lax.conv_general_dilated(x, params["conv1_w"], (2, 2),
                                     [(1, 1), (1, 1)], dimension_numbers=dn)
    h = jax.nn.relu(h + params["conv1_b"].reshape(1, -1, 1, 1))
    h = jax.lax.conv_general_dilated(h, params["conv2_w"], (2, 2),
                                     [(1, 1), (1, 1)], dimension_numbers=dn)
    h = jax.nn.relu(h + params["conv2_b"].reshape(1, -1, 1, 1))
    hf = h.reshape(x.shape[0], -1)
    z = hf @ params["lat_w"].T + params["lat_b"]
    if return_latent:
        return z
    d = jax.nn.relu(z @ params["dec_w"].T + params["dec_b"])
    d = d.reshape(-1, 64, 7, 7)
    w1t = jnp.flip(params["convt1_w"], (2, 3)).transpose(1, 0, 2, 3)
    d = jax.lax.conv_general_dilated(d, w1t, (1, 1), [(2, 2), (2, 2)],
                                     lhs_dilation=(2, 2), dimension_numbers=dn)
    d = jax.nn.relu(d + params["convt1_b"].reshape(1, -1, 1, 1))
    w2t = jnp.flip(params["convt2_w"], (2, 3)).transpose(1, 0, 2, 3)
    d = jax.lax.conv_general_dilated(d, w2t, (1, 1), [(2, 2), (2, 2)],
                                     lhs_dilation=(2, 2), dimension_numbers=dn)
    return jax.nn.sigmoid(d + params["convt2_b"].reshape(1, -1, 1, 1))


if __name__ == "__main__":
    latent_dim = 32
    key = jax.random.PRNGKey(0)
    k_param, k_x = jax.random.split(key)

    params = init_params(latent_dim, k_param)
    prepared = prepare_params(params, latent_dim)

    x = jax.random.uniform(k_x, (2, 1, 28, 28), jnp.float32)

    fwd_full = jax.jit(make_forward(latent_dim, with_decoder=True))
    fwd_latent = jax.jit(make_forward(latent_dim, with_decoder=False))

    recon = jax.block_until_ready(fwd_full(prepared, x))
    z = jax.block_until_ready(fwd_latent(prepared, x))

    assert recon.shape == (2, 1, 28, 28), recon.shape
    assert z.shape == (2, latent_dim), z.shape
    assert bool(jnp.all((recon >= 0.0) & (recon <= 1.0)))

    # validate against a pure-JAX f32 reference of the same PyTorch module
    ref_recon = _reference_forward(params, x, return_latent=False)
    ref_z = _reference_forward(params, x, return_latent=True)
    assert float(jnp.max(jnp.abs(recon - ref_recon))) < 2e-2
    assert float(jnp.max(jnp.abs(z - ref_z))) < 2e-2

    print("KERNEL_OK")
</pallas_src>

<mosaic_0001>
module attributes {stable_mosaic.version = 11 : i64} {
  func.func @_ae_kernel(%arg0: i32, %arg1: memref<1x28x28xf32, #tpu.memory_space<vmem>>, %arg2: memref<4x14x28xbf16, #tpu.memory_space<vmem>>, %arg3: memref<4x28x448xbf16, #tpu.memory_space<vmem>>, %arg4: memref<1x448xf32, #tpu.memory_space<vmem>>, %arg5: memref<4x7x14xbf16, #tpu.memory_space<vmem>>, %arg6: memref<4x448x448xbf16, #tpu.memory_space<vmem>>, %arg7: memref<1x448xf32, #tpu.memory_space<vmem>>, %arg8: memref<7x448x32xbf16, #tpu.memory_space<vmem>>, %arg9: memref<1x32xf32, #tpu.memory_space<vmem>>, %arg10: memref<7x32x448xbf16, #tpu.memory_space<vmem>>, %arg11: memref<7x1x448xf32, #tpu.memory_space<vmem>>, %arg12: memref<4x14x7xbf16, #tpu.memory_space<vmem>>, %arg13: memref<4x448x448xbf16, #tpu.memory_space<vmem>>, %arg14: memref<1x448xf32, #tpu.memory_space<vmem>>, %arg15: memref<4x28x14xbf16, #tpu.memory_space<vmem>>, %arg16: memref<4x448x28xbf16, #tpu.memory_space<vmem>>, %arg17: memref<1x28xf32, #tpu.memory_space<vmem>>, %arg18: memref<1x1x32xf32, #tpu.memory_space<vmem>>, %arg19: memref<1x28x28xf32, #tpu.memory_space<vmem>>, %arg20: memref<7x448xf32, #tpu.memory_space<vmem>>) attributes {dimension_semantics = [#tpu.dimension_semantics<parallel>], iteration_bounds = array<i64: 2>, scalar_prefetch = 0 : i64, scratch_operands = 1 : i64, tpu.core_type = #tpu.core_type<tc>, window_params = [{transform_indices = @transform_0, window_bounds = array<i64: 1, 28, 28>}, {pipeline_mode = #tpu.pipeline_mode<synchronous>, transform_indices = @transform_1, window_bounds = array<i64: 4, 14, 28>}, {pipeline_mode = #tpu.pipeline_mode<synchronous>, transform_indices = @transform_2, window_bounds = array<i64: 4, 28, 448>}, {pipeline_mode = #tpu.pipeline_mode<synchronous>, transform_indices = @transform_3, window_bounds = array<i64: 1, 448>}, {pipeline_mode = #tpu.pipeline_mode<synchronous>, transform_indices = @transform_4, window_bounds = array<i64: 4, 7, 14>}, {pipeline_mode = #tpu.pipeline_mode<synchronous>, transform_indices = @transform_5, window_bounds = array<i64: 4, 448, 448>}, {pipeline_mode = #tpu.pipeline_mode<synchronous>, transform_indices = @transform_6, window_bounds = array<i64: 1, 448>}, {pipeline_mode = #tpu.pipeline_mode<synchronous>, transform_indices = @transform_7, window_bounds = array<i64: 7, 448, 32>}, {pipeline_mode = #tpu.pipeline_mode<synchronous>, transform_indices = @transform_8, window_bounds = array<i64: 1, 32>}, {pipeline_mode = #tpu.pipeline_mode<synchronous>, transform_indices = @transform_9, window_bounds = array<i64: 7, 32, 448>}, {pipeline_mode = #tpu.pipeline_mode<synchronous>, transform_indices = @transform_10, window_bounds = array<i64: 7, 1, 448>}, {pipeline_mode = #tpu.pipeline_mode<synchronous>, transform_indices = @transform_11, window_bounds = array<i64: 4, 14, 7>}, {pipeline_mode = #tpu.pipeline_mode<synchronous>, transform_indices = @transform_12, window_bounds = array<i64: 4, 448, 448>}, {pipeline_mode = #tpu.pipeline_mode<synchronous>, transform_indices = @transform_13, window_bounds = array<i64: 1, 448>}, {pipeline_mode = #tpu.pipeline_mode<synchronous>, transform_indices = @transform_14, window_bounds = array<i64: 4, 28, 14>}, {pipeline_mode = #tpu.pipeline_mode<synchronous>, transform_indices = @transform_15, window_bounds = array<i64: 4, 448, 28>}, {pipeline_mode = #tpu.pipeline_mode<synchronous>, transform_indices = @transform_16, window_bounds = array<i64: 1, 28>}, {transform_indices = @transform_17, window_bounds = array<i64: 1, 1, 32>}, {transform_indices = @transform_18, window_bounds = array<i64: 1, 28, 28>}]} {
    %c0 = arith.constant 0 : index
    %c0_0 = arith.constant 0 : index
    %c0_1 = arith.constant 0 : index
    %0 = vector.load %arg1[%c0, %c0_0, %c0_1] : memref<1x28x28xf32, #tpu.memory_space<vmem>>, vector<1x28x28xf32>
    %1 = vector.shape_cast %0 : vector<1x28x28xf32> to vector<28x28xf32>
    %2 = arith.truncf %1 : vector<28x28xf32> to vector<28x28xbf16>
    %cst = arith.constant 0.000000e+00 : f32
    %3 = vector.broadcast %cst : f32 to vector<14x448xf32>
    %c0_2 = arith.constant 0 : index
    %c0_3 = arith.constant 0 : index
    %c0_4 = arith.constant 0 : index
    %4 = vector.load %arg2[%c0_2, %c0_3, %c0_4] : memref<4x14x28xbf16, #tpu.memory_space<vmem>>, vector<1x14x28xbf16>
    %5 = vector.shape_cast %4 : vector<1x14x28xbf16> to vector<14x28xbf16>
    %cst_5 = arith.constant dense<0.000000e+00> : vector<14x28xf32>
    %6 = tpu.matmul %5, %2, %cst_5 {dimension_numbers = #tpu.dot_dimension_numbers<[1], [0], [0], [1], [0, 0, 1, 1], [], []>} : vector<14x28xbf16>, vector<28x28xbf16>, vector<14x28xf32> -> vector<14x28xf32>
    %c0_6 = arith.constant 0 : index
    %c0_7 = arith.constant 0 : index
    %c0_8 = arith.constant 0 : index
    %7 = vector.load %arg3[%c0_6, %c0_7, %c0_8] : memref<4x28x448xbf16, #tpu.memory_space<vmem>>, vector<1x28x448xbf16>
    %8 = vector.shape_cast %7 : vector<1x28x448xbf16> to vector<28x448xbf16>
    %9 = arith.truncf %6 : vector<14x28xf32> to vector<14x28xbf16>
    %cst_9 = arith.constant dense<0.000000e+00> : vector<14x448xf32>
    %10 = tpu.matmul %9, %8, %cst_9 {dimension_numbers = #tpu.dot_dimension_numbers<[1], [0], [0], [1], [0, 0, 1, 1], [], []>} : vector<14x28xbf16>, vector<28x448xbf16>, vector<14x448xf32> -> vector<14x448xf32>
    %11 = arith.addf %3, %10 : vector<14x448xf32>
    %c1 = arith.constant 1 : index
    %c0_10 = arith.constant 0 : index
    %c0_11 = arith.constant 0 : index
    %12 = vector.load %arg2[%c1, %c0_10, %c0_11] : memref<4x14x28xbf16, #tpu.memory_space<vmem>>, vector<1x14x28xbf16>
    %13 = vector.shape_cast %12 : vector<1x14x28xbf16> to vector<14x28xbf16>
    %cst_12 = arith.constant dense<0.000000e+00> : vector<14x28xf32>
    %14 = tpu.matmul %13, %2, %cst_12 {dimension_numbers = #tpu.dot_dimension_numbers<[1], [0], [0], [1], [0, 0, 1, 1], [], []>} : vector<14x28xbf16>, vector<28x28xbf16>, vector<14x28xf32> -> vector<14x28xf32>
    %c1_13 = arith.constant 1 : index
    %c0_14 = arith.constant 0 : index
    %c0_15 = arith.constant 0 : index
    %15 = vector.load %arg3[%c1_13, %c0_14, %c0_15] : memref<4x28x448xbf16, #tpu.memory_space<vmem>>, vector<1x28x448xbf16>
    %16 = vector.shape_cast %15 : vector<1x28x448xbf16> to vector<28x448xbf16>
    %17 = arith.truncf %14 : vector<14x28xf32> to vector<14x28xbf16>
    %cst_16 = arith.constant dense<0.000000e+00> : vector<14x448xf32>
    %18 = tpu.matmul %17, %16, %cst_16 {dimension_numbers = #tpu.dot_dimension_numbers<[1], [0], [0], [1], [0, 0, 1, 1], [], []>} : vector<14x28xbf16>, vector<28x448xbf16>, vector<14x448xf32> -> vector<14x448xf32>
    %19 = arith.addf %11, %18 : vector<14x448xf32>
    %c2 = arith.constant 2 : index
    %c0_17 = arith.constant 0 : index
    %c0_18 = arith.constant 0 : index
    %20 = vector.load %arg2[%c2, %c0_17, %c0_18] : memref<4x14x28xbf16, #tpu.memory_space<vmem>>, vector<1x14x28xbf16>
    %21 = vector.shape_cast %20 : vector<1x14x28xbf16> to vector<14x28xbf16>
    %cst_19 = arith.constant dense<0.000000e+00> : vector<14x28xf32>
    %22 = tpu.matmul %21, %2, %cst_19 {dimension_numbers = #tpu.dot_dimension_numbers<[1], [0], [0], [1], [0, 0, 1, 1], [], []>} : vector<14x28xbf16>, vector<28x28xbf16>, vector<14x28xf32> -> vector<14x28xf32>
    %c2_20 = arith.constant 2 : index
    %c0_21 = arith.constant 0 : index
    %c0_22 = arith.constant 0 : index
    %23 = vector.load %arg3[%c2_20, %c0_21, %c0_22] : memref<4x28x448xbf16, #tpu.memory_space<vmem>>, vector<1x28x448xbf16>
    %24 = vector.shape_cast %23 : vector<1x28x448xbf16> to vector<28x448xbf16>
    %25 = arith.truncf %22 : vector<14x28xf32> to vector<14x28xbf16>
    %cst_23 = arith.constant dense<0.000000e+00> : vector<14x448xf32>
    %26 = tpu.matmul %25, %24, %cst_23 {dimension_numbers = #tpu.dot_dimension_numbers<[1], [0], [0], [1], [0, 0, 1, 1], [], []>} : vector<14x28xbf16>, vector<28x448xbf16>, vector<14x448xf32> -> vector<14x448xf32>
    %27 = arith.addf %19, %26 : vector<14x448xf32>
    %c3 = arith.constant 3 : index
    %c0_24 = arith.constant 0 : index
    %c0_25 = arith.constant 0 : index
    %28 = vector.load %arg2[%c3, %c0_24, %c0_25] : memref<4x14x28xbf16, #tpu.memory_space<vmem>>, vector<1x14x28xbf16>
    %29 = vector.shape_cast %28 : vector<1x14x28xbf16> to vector<14x28xbf16>
    %cst_26 = arith.constant dense<0.000000e+00> : vector<14x28xf32>
    %30 = tpu.matmul %29, %2, %cst_26 {dimension_numbers = #tpu.dot_dimension_numbers<[1], [0], [0], [1], [0, 0, 1, 1], [], []>} : vector<14x28xbf16>, vector<28x28xbf16>, vector<14x28xf32> -> vector<14x28xf32>
    %c3_27 = arith.constant 3 : index
    %c0_28 = arith.constant 0 : index
    %c0_29 = arith.constant 0 : index
    %31 = vector.load %arg3[%c3_27, %c0_28, %c0_29] : memref<4x28x448xbf16, #tpu.memory_space<vmem>>, vector<1x28x448xbf16>
    %32 = vector.shape_cast %31 : vector<1x28x448xbf16> to vector<28x448xbf16>
    %33 = arith.truncf %30 : vector<14x28xf32> to vector<14x28xbf16>
    %cst_30 = arith.constant dense<0.000000e+00> : vector<14x448xf32>
    %34 = tpu.matmul %33, %32, %cst_30 {dimension_numbers = #tpu.dot_dimension_numbers<[1], [0], [0], [1], [0, 0, 1, 1], [], []>} : vector<14x28xbf16>, vector<28x448xbf16>, vector<14x448xf32> -> vector<14x448xf32>
    %35 = arith.addf %27, %34 : vector<14x448xf32>
    %c0_31 = arith.constant 0 : index
    %c0_32 = arith.constant 0 : index
    %36 = vector.load %arg4[%c0_31, %c0_32] : memref<1x448xf32, #tpu.memory_space<vmem>>, vector<1x448xf32>
    %37 = vector.broadcast %36 : vector<1x448xf32> to vector<14x448xf32>
    %38 = arith.addf %35, %37 : vector<14x448xf32>
    %cst_33 = arith.constant 0.000000e+00 : f32
    %39 = vector.broadcast %cst_33 : f32 to vector<14x448xf32>
    %40 = arith.maximumf %38, %39 : vector<14x448xf32>
    %cst_34 = arith.constant 0.000000e+00 : f32
    %41 = vector.broadcast %cst_34 : f32 to vector<7x448xf32>
    %c0_35 = arith.constant 0 : index
    %c0_36 = arith.constant 0 : index
    %c0_37 = arith.constant 0 : index
    %42 = vector.load %arg5[%c0_35, %c0_36, %c0_37] : memref<4x7x14xbf16, #tpu.memory_space<vmem>>, vector<1x7x14xbf16>
    %43 = vector.shape_cast %42 : vector<1x7x14xbf16> to vector<7x14xbf16>
    %44 = arith.truncf %40 : vector<14x448xf32> to vector<14x448xbf16>
    %cst_38 = arith.constant dense<0.000000e+00> : vector<7x448xf32>
    %45 = tpu.matmul %43, %44, %cst_38 {dimension_numbers = #tpu.dot_dimension_numbers<[1], [0], [0], [1], [0, 0, 1, 1], [], []>} : vector<7x14xbf16>, vector<14x448xbf16>, vector<7x448xf32> -> vector<7x448xf32>
    %c0_39 = arith.constant 0 : index
    %c0_40 = arith.constant 0 : index
    %c0_41 = arith.constant 0 : index
    %46 = vector.load %arg6[%c0_39, %c0_40, %c0_41] : memref<4x448x448xbf16, #tpu.memory_space<vmem>>, vector<1x448x448xbf16>
    %47 = vector.shape_cast %46 : vector<1x448x448xbf16> to vector<448x448xbf16>
    %48 = arith.truncf %45 : vector<7x448xf32> to vector<7x448xbf16>
    %cst_42 = arith.constant dense<0.000000e+00> : vector<7x448xf32>
    %49 = tpu.matmul %48, %47, %cst_42 {dimension_numbers = #tpu.dot_dimension_numbers<[1], [0], [0], [1], [0, 0, 1, 1], [], []>} : vector<7x448xbf16>, vector<448x448xbf16>, vector<7x448xf32> -> vector<7x448xf32>
    %50 = arith.addf %41, %49 : vector<7x448xf32>
    %c1_43 = arith.constant 1 : index
    %c0_44 = arith.constant 0 : index
    %c0_45 = arith.constant 0 : index
    %51 = vector.load %arg5[%c1_43, %c0_44, %c0_45] : memref<4x7x14xbf16, #tpu.memory_space<vmem>>, vector<1x7x14xbf16>
    %52 = vector.shape_cast %51 : vector<1x7x14xbf16> to vector<7x14xbf16>
    %53 = arith.truncf %40 : vector<14x448xf32> to vector<14x448xbf16>
    %cst_46 = arith.constant dense<0.000000e+00> : vector<7x448xf32>
    %54 = tpu.matmul %52, %53, %cst_46 {dimension_numbers = #tpu.dot_dimension_numbers<[1], [0], [0], [1], [0, 0, 1, 1], [], []>} : vector<7x14xbf16>, vector<14x448xbf16>, vector<7x448xf32> -> vector<7x448xf32>
    %c1_47 = arith.constant 1 : index
    %c0_48 = arith.constant 0 : index
    %c0_49 = arith.constant 0 : index
    %55 = vector.load %arg6[%c1_47, %c0_48, %c0_49] : memref<4x448x448xbf16, #tpu.memory_space<vmem>>, vector<1x448x448xbf16>
    %56 = vector.shape_cast %55 : vector<1x448x448xbf16> to vector<448x448xbf16>
    %57 = arith.truncf %54 : vector<7x448xf32> to vector<7x448xbf16>
    %cst_50 = arith.constant dense<0.000000e+00> : vector<7x448xf32>
    %58 = tpu.matmul %57, %56, %cst_50 {dimension_numbers = #tpu.dot_dimension_numbers<[1], [0], [0], [1], [0, 0, 1, 1], [], []>} : vector<7x448xbf16>, vector<448x448xbf16>, vector<7x448xf32> -> vector<7x448xf32>
    %59 = arith.addf %50, %58 : vector<7x448xf32>
    %c2_51 = arith.constant 2 : index
    %c0_52 = arith.constant 0 : index
    %c0_53 = arith.constant 0 : index
    %60 = vector.load %arg5[%c2_51, %c0_52, %c0_53] : memref<4x7x14xbf16, #tpu.memory_space<vmem>>, vector<1x7x14xbf16>
    %61 = vector.shape_cast %60 : vector<1x7x14xbf16> to vector<7x14xbf16>
    %62 = arith.truncf %40 : vector<14x448xf32> to vector<14x448xbf16>
    %cst_54 = arith.constant dense<0.000000e+00> : vector<7x448xf32>
    %63 = tpu.matmul %61, %62, %cst_54 {dimension_numbers = #tpu.dot_dimension_numbers<[1], [0], [0], [1], [0, 0, 1, 1], [], []>} : vector<7x14xbf16>, vector<14x448xbf16>, vector<7x448xf32> -> vector<7x448xf32>
    %c2_55 = arith.constant 2 : index
    %c0_56 = arith.constant 0 : index
    %c0_57 = arith.constant 0 : index
    %64 = vector.load %arg6[%c2_55, %c0_56, %c0_57] : memref<4x448x448xbf16, #tpu.memory_space<vmem>>, vector<1x448x448xbf16>
    %65 = vector.shape_cast %64 : vector<1x448x448xbf16> to vector<448x448xbf16>
    %66 = arith.truncf %63 : vector<7x448xf32> to vector<7x448xbf16>
    %cst_58 = arith.constant dense<0.000000e+00> : vector<7x448xf32>
    %67 = tpu.matmul %66, %65, %cst_58 {dimension_numbers = #tpu.dot_dimension_numbers<[1], [0], [0], [1], [0, 0, 1, 1], [], []>} : vector<7x448xbf16>, vector<448x448xbf16>, vector<7x448xf32> -> vector<7x448xf32>
    %68 = arith.addf %59, %67 : vector<7x448xf32>
    %c3_59 = arith.constant 3 : index
    %c0_60 = arith.constant 0 : index
    %c0_61 = arith.constant 0 : index
    %69 = vector.load %arg5[%c3_59, %c0_60, %c0_61] : memref<4x7x14xbf16, #tpu.memory_space<vmem>>, vector<1x7x14xbf16>
    %70 = vector.shape_cast %69 : vector<1x7x14xbf16> to vector<7x14xbf16>
    %71 = arith.truncf %40 : vector<14x448xf32> to vector<14x448xbf16>
    %cst_62 = arith.constant dense<0.000000e+00> : vector<7x448xf32>
    %72 = tpu.matmul %70, %71, %cst_62 {dimension_numbers = #tpu.dot_dimension_numbers<[1], [0], [0], [1], [0, 0, 1, 1], [], []>} : vector<7x14xbf16>, vector<14x448xbf16>, vector<7x448xf32> -> vector<7x448xf32>
    %c3_63 = arith.constant 3 : index
    %c0_64 = arith.constant 0 : index
    %c0_65 = arith.constant 0 : index
    %73 = vector.load %arg6[%c3_63, %c0_64, %c0_65] : memref<4x448x448xbf16, #tpu.memory_space<vmem>>, vector<1x448x448xbf16>
    %74 = vector.shape_cast %73 : vector<1x448x448xbf16> to vector<448x448xbf16>
    %75 = arith.truncf %72 : vector<7x448xf32> to vector<7x448xbf16>
    %cst_66 = arith.constant dense<0.000000e+00> : vector<7x448xf32>
    %76 = tpu.matmul %75, %74, %cst_66 {dimension_numbers = #tpu.dot_dimension_numbers<[1], [0], [0], [1], [0, 0, 1, 1], [], []>} : vector<7x448xbf16>, vector<448x448xbf16>, vector<7x448xf32> -> vector<7x448xf32>
    %77 = arith.addf %68, %76 : vector<7x448xf32>
    %c0_67 = arith.constant 0 : index
    %c0_68 = arith.constant 0 : index
    %78 = vector.load %arg7[%c0_67, %c0_68] : memref<1x448xf32, #tpu.memory_space<vmem>>, vector<1x448xf32>
    %79 = vector.broadcast %78 : vector<1x448xf32> to vector<7x448xf32>
    %80 = arith.addf %77, %79 : vector<7x448xf32>
    %cst_69 = arith.constant 0.000000e+00 : f32
    %81 = vector.broadcast %cst_69 : f32 to vector<7x448xf32>
    %82 = arith.maximumf %80, %81 : vector<7x448xf32>
    %c0_70 = arith.constant 0 : index
    %c0_71 = arith.constant 0 : index
    %83 = vector.load %arg9[%c0_70, %c0_71] : memref<1x32xf32, #tpu.memory_space<vmem>>, vector<1x32xf32>
    %84 = vector.extract_strided_slice %82 {offsets = [0, 0], sizes = [1, 448], strides = [1, 1]} : vector<7x448xf32> to vector<1x448xf32>
    %c0_72 = arith.constant 0 : index
    %c0_73 = arith.constant 0 : index
    %c0_74 = arith.constant 0 : index
    %85 = vector.load %arg8[%c0_72, %c0_73, %c0_74] : memref<7x448x32xbf16, #tpu.memory_space<vmem>>, vector<1x448x32xbf16>
    %86 = vector.shape_cast %85 : vector<1x448x32xbf16> to vector<448x32xbf16>
    %87 = arith.truncf %84 : vector<1x448xf32> to vector<1x448xbf16>
    %cst_75 = arith.constant dense<0.000000e+00> : vector<1x32xf32>
    %88 = tpu.matmul %87, %86, %cst_75 {dimension_numbers = #tpu.dot_dimension_numbers<[1], [0], [0], [1], [0, 0, 1, 1], [], []>} : vector<1x448xbf16>, vector<448x32xbf16>, vector<1x32xf32> -> vector<1x32xf32>
    %89 = arith.addf %83, %88 : vector<1x32xf32>
    %90 = vector.extract_strided_slice %82 {offsets = [1, 0], sizes = [1, 448], strides = [1, 1]} : vector<7x448xf32> to vector<1x448xf32>
    %c1_76 = arith.constant 1 : index
    %c0_77 = arith.constant 0 : index
    %c0_78 = arith.constant 0 : index
    %91 = vector.load %arg8[%c1_76, %c0_77, %c0_78] : memref<7x448x32xbf16, #tpu.memory_space<vmem>>, vector<1x448x32xbf16>
    %92 = vector.shape_cast %91 : vector<1x448x32xbf16> to vector<448x32xbf16>
    %93 = arith.truncf %90 : vector<1x448xf32> to vector<1x448xbf16>
    %cst_79 = arith.constant dense<0.000000e+00> : vector<1x32xf32>
    %94 = tpu.matmul %93, %92, %cst_79 {dimension_numbers = #tpu.dot_dimension_numbers<[1], [0], [0], [1], [0, 0, 1, 1], [], []>} : vector<1x448xbf16>, vector<448x32xbf16>, vector<1x32xf32> -> vector<1x32xf32>
    %95 = arith.addf %89, %94 : vector<1x32xf32>
    %96 = vector.extract_strided_slice %82 {offsets = [2, 0], sizes = [1, 448], strides = [1, 1]} : vector<7x448xf32> to vector<1x448xf32>
    %c2_80 = arith.constant 2 : index
    %c0_81 = arith.constant 0 : index
    %c0_82 = arith.constant 0 : index
    %97 = vector.load %arg8[%c2_80, %c0_81, %c0_82] : memref<7x448x32xbf16, #tpu.memory_space<vmem>>, vector<1x448x32xbf16>
    %98 = vector.shape_cast %97 : vector<1x448x32xbf16> to vector<448x32xbf16>
    %99 = arith.truncf %96 : vector<1x448xf32> to vector<1x448xbf16>
    %cst_83 = arith.constant dense<0.000000e+00> : vector<1x32xf32>
    %100 = tpu.matmul %99, %98, %cst_83 {dimension_numbers = #tpu.dot_dimension_numbers<[1], [0], [0], [1], [0, 0, 1, 1], [], []>} : vector<1x448xbf16>, vector<448x32xbf16>, vector<1x32xf32> -> vector<1x32xf32>
    %101 = arith.addf %95, %100 : vector<1x32xf32>
    %102 = vector.extract_strided_slice %82 {offsets = [3, 0], sizes = [1, 448], strides = [1, 1]} : vector<7x448xf32> to vector<1x448xf32>
    %c3_84 = arith.constant 3 : index
    %c0_85 = arith.constant 0 : index
    %c0_86 = arith.constant 0 : index
    %103 = vector.load %arg8[%c3_84, %c0_85, %c0_86] : memref<7x448x32xbf16, #tpu.memory_space<vmem>>, vector<1x448x32xbf16>
    %104 = vector.shape_cast %103 : vector<1x448x32xbf16> to vector<448x32xbf16>
    %105 = arith.truncf %102 : vector<1x448xf32> to vector<1x448xbf16>
    %cst_87 = arith.constant dense<0.000000e+00> : vector<1x32xf32>
    %106 = tpu.matmul %105, %104, %cst_87 {dimension_numbers = #tpu.dot_dimension_numbers<[1], [0], [0], [1], [0, 0, 1, 1], [], []>} : vector<1x448xbf16>, vector<448x32xbf16>, vector<1x32xf32> -> vector<1x32xf32>
    %107 = arith.addf %101, %106 : vector<1x32xf32>
    %108 = vector.extract_strided_slice %82 {offsets = [4, 0], sizes = [1, 448], strides = [1, 1]} : vector<7x448xf32> to vector<1x448xf32>
    %c4 = arith.constant 4 : index
    %c0_88 = arith.constant 0 : index
    %c0_89 = arith.constant 0 : index
    %109 = vector.load %arg8[%c4, %c0_88, %c0_89] : memref<7x448x32xbf16, #tpu.memory_space<vmem>>, vector<1x448x32xbf16>
    %110 = vector.shape_cast %109 : vector<1x448x32xbf16> to vector<448x32xbf16>
    %111 = arith.truncf %108 : vector<1x448xf32> to vector<1x448xbf16>
    %cst_90 = arith.constant dense<0.000000e+00> : vector<1x32xf32>
    %112 = tpu.matmul %111, %110, %cst_90 {dimension_numbers = #tpu.dot_dimension_numbers<[1], [0], [0], [1], [0, 0, 1, 1], [], []>} : vector<1x448xbf16>, vector<448x32xbf16>, vector<1x32xf32> -> vector<1x32xf32>
    %113 = arith.addf %107, %112 : vector<1x32xf32>
    %114 = vector.extract_strided_slice %82 {offsets = [5, 0], sizes = [1, 448], strides = [1, 1]} : vector<7x448xf32> to vector<1x448xf32>
    %c5 = arith.constant 5 : index
    %c0_91 = arith.constant 0 : index
    %c0_92 = arith.constant 0 : index
    %115 = vector.load %arg8[%c5, %c0_91, %c0_92] : memref<7x448x32xbf16, #tpu.memory_space<vmem>>, vector<1x448x32xbf16>
    %116 = vector.shape_cast %115 : vector<1x448x32xbf16> to vector<448x32xbf16>
    %117 = arith.truncf %114 : vector<1x448xf32> to vector<1x448xbf16>
    %cst_93 = arith.constant dense<0.000000e+00> : vector<1x32xf32>
    %118 = tpu.matmul %117, %116, %cst_93 {dimension_numbers = #tpu.dot_dimension_numbers<[1], [0], [0], [1], [0, 0, 1, 1], [], []>} : vector<1x448xbf16>, vector<448x32xbf16>, vector<1x32xf32> -> vector<1x32xf32>
    %119 = arith.addf %113, %118 : vector<1x32xf32>
    %120 = vector.extract_strided_slice %82 {offsets = [6, 0], sizes = [1, 448], strides = [1, 1]} : vector<7x448xf32> to vector<1x448xf32>
    %c6 = arith.constant 6 : index
    %c0_94 = arith.constant 0 : index
    %c0_95 = arith.constant 0 : index
    %121 = vector.load %arg8[%c6, %c0_94, %c0_95] : memref<7x448x32xbf16, #tpu.memory_space<vmem>>, vector<1x448x32xbf16>
    %122 = vector.shape_cast %121 : vector<1x448x32xbf16> to vector<448x32xbf16>
    %123 = arith.truncf %120 : vector<1x448xf32> to vector<1x448xbf16>
    %cst_96 = arith.constant dense<0.000000e+00> : vector<1x32xf32>
    %124 = tpu.matmul %123, %122, %cst_96 {dimension_numbers = #tpu.dot_dimension_numbers<[1], [0], [0], [1], [0, 0, 1, 1], [], []>} : vector<1x448xbf16>, vector<448x32xbf16>, vector<1x32xf32> -> vector<1x32xf32>
    %125 = arith.addf %119, %124 : vector<1x32xf32>
    %c0_97 = arith.constant 0 : index
    %c0_98 = arith.constant 0 : index
    %c0_99 = arith.constant 0 : index
    %126 = vector.load %arg18[%c0_97, %c0_98, %c0_99] : memref<1x1x32xf32, #tpu.memory_space<vmem>>, vector<1x1x32xf32>
    %127 = vector.shape_cast %126 : vector<1x1x32xf32> to vector<1x32xf32>
    %128 = vector.shape_cast %125 : vector<1x32xf32> to vector<1x1x32xf32>
    tpu.vector_store %arg18[%c0_97, %c0_98, %c0_99], %128 {strides = array<i32>} : memref<1x1x32xf32, #tpu.memory_space<vmem>>, vector<1x1x32xf32>,
    %129 = arith.truncf %125 : vector<1x32xf32> to vector<1x32xbf16>
    %c0_100 = arith.constant 0 : index
    %c0_101 = arith.constant 0 : index
    %c0_102 = arith.constant 0 : index
    %130 = vector.load %arg10[%c0_100, %c0_101, %c0_102] : memref<7x32x448xbf16, #tpu.memory_space<vmem>>, vector<1x32x448xbf16>
    %131 = vector.shape_cast %130 : vector<1x32x448xbf16> to vector<32x448xbf16>
    %cst_103 = arith.constant dense<0.000000e+00> : vector<1x448xf32>
    %132 = tpu.matmul %129, %131, %cst_103 {dimension_numbers = #tpu.dot_dimension_numbers<[1], [0], [0], [1], [0, 0, 1, 1], [], []>} : vector<1x32xbf16>, vector<32x448xbf16>, vector<1x448xf32> -> vector<1x448xf32>
    %c0_104 = arith.constant 0 : index
    %c0_105 = arith.constant 0 : index
    %c0_106 = arith.constant 0 : index
    %133 = vector.load %arg11[%c0_104, %c0_105, %c0_106] : memref<7x1x448xf32, #tpu.memory_space<vmem>>, vector<1x1x448xf32>
    %134 = vector.shape_cast %133 : vector<1x1x448xf32> to vector<1x448xf32>
    %135 = arith.addf %132, %134 : vector<1x448xf32>
    %c0_107 = arith.constant 0 : index
    %c0_108 = arith.constant 0 : index
    %136 = vector.load %arg20[%c0_107, %c0_108] : memref<7x448xf32, #tpu.memory_space<vmem>>, vector<1x448xf32>
    tpu.vector_store %arg20[%c0_107, %c0_108], %135 {strides = array<i32>} : memref<7x448xf32, #tpu.memory_space<vmem>>, vector<1x448xf32>,
    %c1_109 = arith.constant 1 : index
    %c0_110 = arith.constant 0 : index
    %c0_111 = arith.constant 0 : index
    %137 = vector.load %arg10[%c1_109, %c0_110, %c0_111] : memref<7x32x448xbf16, #tpu.memory_space<vmem>>, vector<1x32x448xbf16>
    %138 = vector.shape_cast %137 : vector<1x32x448xbf16> to vector<32x448xbf16>
    %cst_112 = arith.constant dense<0.000000e+00> : vector<1x448xf32>
    %139 = tpu.matmul %129, %138, %cst_112 {dimension_numbers = #tpu.dot_dimension_numbers<[1], [0], [0], [1], [0, 0, 1, 1], [], []>} : vector<1x32xbf16>, vector<32x448xbf16>, vector<1x448xf32> -> vector<1x448xf32>
    %c1_113 = arith.constant 1 : index
    %c0_114 = arith.constant 0 : index
    %c0_115 = arith.constant 0 : index
    %140 = vector.load %arg11[%c1_113, %c0_114, %c0_115] : memref<7x1x448xf32, #tpu.memory_space<vmem>>, vector<1x1x448xf32>
    %141 = vector.shape_cast %140 : vector<1x1x448xf32> to vector<1x448xf32>
    %142 = arith.addf %139, %141 : vector<1x448xf32>
    %c1_116 = arith.constant 1 : index
    %c0_117 = arith.constant 0 : index
    %143 = vector.load %arg20[%c1_116, %c0_117] : memref<7x448xf32, #tpu.memory_space<vmem>>, vector<1x448xf32>
    tpu.vector_store %arg20[%c1_116, %c0_117], %142 {strides = array<i32>} : memref<7x448xf32, #tpu.memory_space<vmem>>, vector<1x448xf32>,
    %c2_118 = arith.constant 2 : index
    %c0_119 = arith.constant 0 : index
    %c0_120 = arith.constant 0 : index
    %144 = vector.load %arg10[%c2_118, %c0_119, %c0_120] : memref<7x32x448xbf16, #tpu.memory_space<vmem>>, vector<1x32x448xbf16>
    %145 = vector.shape_cast %144 : vector<1x32x448xbf16> to vector<32x448xbf16>
    %cst_121 = arith.constant dense<0.000000e+00> : vector<1x448xf32>
    %146 = tpu.matmul %129, %145, %cst_121 {dimension_numbers = #tpu.dot_dimension_numbers<[1], [0], [0], [1], [0, 0, 1, 1], [], []>} : vector<1x32xbf16>, vector<32x448xbf16>, vector<1x448xf32> -> vector<1x448xf32>
    %c2_122 = arith.constant 2 : index
    %c0_123 = arith.constant 0 : index
    %c0_124 = arith.constant 0 : index
    %147 = vector.load %arg11[%c2_122, %c0_123, %c0_124] : memref<7x1x448xf32, #tpu.memory_space<vmem>>, vector<1x1x448xf32>
    %148 = vector.shape_cast %147 : vector<1x1x448xf32> to vector<1x448xf32>
    %149 = arith.addf %146, %148 : vector<1x448xf32>
    %c2_125 = arith.constant 2 : index
    %c0_126 = arith.constant 0 : index
    %150 = vector.load %arg20[%c2_125, %c0_126] : memref<7x448xf32, #tpu.memory_space<vmem>>, vector<1x448xf32>
    tpu.vector_store %arg20[%c2_125, %c0_126], %149 {strides = array<i32>} : memref<7x448xf32, #tpu.memory_space<vmem>>, vector<1x448xf32>,
    %c3_127 = arith.constant 3 : index
    %c0_128 = arith.constant 0 : index
    %c0_129 = arith.constant 0 : index
    %151 = vector.load %arg10[%c3_127, %c0_128, %c0_129] : memref<7x32x448xbf16, #tpu.memory_space<vmem>>, vector<1x32x448xbf16>
    %152 = vector.shape_cast %151 : vector<1x32x448xbf16> to vector<32x448xbf16>
    %cst_130 = arith.constant dense<0.000000e+00> : vector<1x448xf32>
    %153 = tpu.matmul %129, %152, %cst_130 {dimension_numbers = #tpu.dot_dimension_numbers<[1], [0], [0], [1], [0, 0, 1, 1], [], []>} : vector<1x32xbf16>, vector<32x448xbf16>, vector<1x448xf32> -> vector<1x448xf32>
    %c3_131 = arith.constant 3 : index
    %c0_132 = arith.constant 0 : index
    %c0_133 = arith.constant 0 : index
    %154 = vector.load %arg11[%c3_131, %c0_132, %c0_133] : memref<7x1x448xf32, #tpu.memory_space<vmem>>, vector<1x1x448xf32>
    %155 = vector.shape_cast %154 : vector<1x1x448xf32> to vector<1x448xf32>
    %156 = arith.addf %153, %155 : vector<1x448xf32>
    %c3_134 = arith.constant 3 : index
    %c0_135 = arith.constant 0 : index
    %157 = vector.load %arg20[%c3_134, %c0_135] : memref<7x448xf32, #tpu.memory_space<vmem>>, vector<1x448xf32>
    tpu.vector_store %arg20[%c3_134, %c0_135], %156 {strides = array<i32>} : memref<7x448xf32, #tpu.memory_space<vmem>>, vector<1x448xf32>,
    %c4_136 = arith.constant 4 : index
    %c0_137 = arith.constant 0 : index
    %c0_138 = arith.constant 0 : index
    %158 = vector.load %arg10[%c4_136, %c0_137, %c0_138] : memref<7x32x448xbf16, #tpu.memory_space<vmem>>, vector<1x32x448xbf16>
    %159 = vector.shape_cast %158 : vector<1x32x448xbf16> to vector<32x448xbf16>
    %cst_139 = arith.constant dense<0.000000e+00> : vector<1x448xf32>
    %160 = tpu.matmul %129, %159, %cst_139 {dimension_numbers = #tpu.dot_dimension_numbers<[1], [0], [0], [1], [0, 0, 1, 1], [], []>} : vector<1x32xbf16>, vector<32x448xbf16>, vector<1x448xf32> -> vector<1x448xf32>
    %c4_140 = arith.constant 4 : index
    %c0_141 = arith.constant 0 : index
    %c0_142 = arith.constant 0 : index
    %161 = vector.load %arg11[%c4_140, %c0_141, %c0_142] : memref<7x1x448xf32, #tpu.memory_space<vmem>>, vector<1x1x448xf32>
    %162 = vector.shape_cast %161 : vector<1x1x448xf32> to vector<1x448xf32>
    %163 = arith.addf %160, %162 : vector<1x448xf32>
    %c4_143 = arith.constant 4 : index
    %c0_144 = arith.constant 0 : index
    %164 = vector.load %arg20[%c4_143, %c0_144] : memref<7x448xf32, #tpu.memory_space<vmem>>, vector<1x448xf32>
    tpu.vector_store %arg20[%c4_143, %c0_144], %163 {strides = array<i32>} : memref<7x448xf32, #tpu.memory_space<vmem>>, vector<1x448xf32>,
    %c5_145 = arith.constant 5 : index
    %c0_146 = arith.constant 0 : index
    %c0_147 = arith.constant 0 : index
    %165 = vector.load %arg10[%c5_145, %c0_146, %c0_147] : memref<7x32x448xbf16, #tpu.memory_space<vmem>>, vector<1x32x448xbf16>
    %166 = vector.shape_cast %165 : vector<1x32x448xbf16> to vector<32x448xbf16>
    %cst_148 = arith.constant dense<0.000000e+00> : vector<1x448xf32>
    %167 = tpu.matmul %129, %166, %cst_148 {dimension_numbers = #tpu.dot_dimension_numbers<[1], [0], [0], [1], [0, 0, 1, 1], [], []>} : vector<1x32xbf16>, vector<32x448xbf16>, vector<1x448xf32> -> vector<1x448xf32>
    %c5_149 = arith.constant 5 : index
    %c0_150 = arith.constant 0 : index
    %c0_151 = arith.constant 0 : index
    %168 = vector.load %arg11[%c5_149, %c0_150, %c0_151] : memref<7x1x448xf32, #tpu.memory_space<vmem>>, vector<1x1x448xf32>
    %169 = vector.shape_cast %168 : vector<1x1x448xf32> to vector<1x448xf32>
    %170 = arith.addf %167, %169 : vector<1x448xf32>
    %c5_152 = arith.constant 5 : index
    %c0_153 = arith.constant 0 : index
    %171 = vector.load %arg20[%c5_152, %c0_153] : memref<7x448xf32, #tpu.memory_space<vmem>>, vector<1x448xf32>
    tpu.vector_store %arg20[%c5_152, %c0_153], %170 {strides = array<i32>} : memref<7x448xf32, #tpu.memory_space<vmem>>, vector<1x448xf32>,
    %c6_154 = arith.constant 6 : index
    %c0_155 = arith.constant 0 : index
    %c0_156 = arith.constant 0 : index
    %172 = vector.load %arg10[%c6_154, %c0_155, %c0_156] : memref<7x32x448xbf16, #tpu.memory_space<vmem>>, vector<1x32x448xbf16>
    %173 = vector.shape_cast %172 : vector<1x32x448xbf16> to vector<32x448xbf16>
    %cst_157 = arith.constant dense<0.000000e+00> : vector<1x448xf32>
    %174 = tpu.matmul %129, %173, %cst_157 {dimension_numbers = #tpu.dot_dimension_numbers<[1], [0], [0], [1], [0, 0, 1, 1], [], []>} : vector<1x32xbf16>, vector<32x448xbf16>, vector<1x448xf32> -> vector<1x448xf32>
    %c6_158 = arith.constant 6 : index
    %c0_159 = arith.constant 0 : index
    %c0_160 = arith.constant 0 : index
    %175 = vector.load %arg11[%c6_158, %c0_159, %c0_160] : memref<7x1x448xf32, #tpu.memory_space<vmem>>, vector<1x1x448xf32>
    %176 = vector.shape_cast %175 : vector<1x1x448xf32> to vector<1x448xf32>
    %177 = arith.addf %174, %176 : vector<1x448xf32>
    %c6_161 = arith.constant 6 : index
    %c0_162 = arith.constant 0 : index
    %178 = vector.load %arg20[%c6_161, %c0_162] : memref<7x448xf32, #tpu.memory_space<vmem>>, vector<1x448xf32>
    tpu.vector_store %arg20[%c6_161, %c0_162], %177 {strides = array<i32>} : memref<7x448xf32, #tpu.memory_space<vmem>>, vector<1x448xf32>,
    %c0_163 = arith.constant 0 : index
    %c0_164 = arith.constant 0 : index
    %179 = vector.load %arg20[%c0_163, %c0_164] : memref<7x448xf32, #tpu.memory_space<vmem>>, vector<7x448xf32>
    %cst_165 = arith.constant 0.000000e+00 : f32
    %180 = vector.broadcast %cst_165 : f32 to vector<7x448xf32>
    %181 = arith.maximumf %179, %180 : vector<7x448xf32>
    %cst_166 = arith.constant 0.000000e+00 : f32
    %182 = vector.broadcast %cst_166 : f32 to vector<14x448xf32>
    %c0_167 = arith.constant 0 : index
    %c0_168 = arith.constant 0 : index
    %c0_169 = arith.constant 0 : index
    %183 = vector.load %arg13[%c0_167, %c0_168, %c0_169] : memref<4x448x448xbf16, #tpu.memory_space<vmem>>, vector<1x448x448xbf16>
    %184 = vector.shape_cast %183 : vector<1x448x448xbf16> to vector<448x448xbf16>
    %185 = arith.truncf %181 : vector<7x448xf32> to vector<7x448xbf16>
    %cst_170 = arith.constant dense<0.000000e+00> : vector<7x448xf32>
    %186 = tpu.matmul %185, %184, %cst_170 {dimension_numbers = #tpu.dot_dimension_numbers<[1], [0], [0], [1], [0, 0, 1, 1], [], []>} : vector<7x448xbf16>, vector<448x448xbf16>, vector<7x448xf32> -> vector<7x448xf32>
    %c0_171 = arith.constant 0 : index
    %c0_172 = arith.constant 0 : index
    %c0_173 = arith.constant 0 : index
    %187 = vector.load %arg12[%c0_171, %c0_172, %c0_173] : memref<4x14x7xbf16, #tpu.memory_space<vmem>>, vector<1x14x7xbf16>
    %188 = vector.shape_cast %187 : vector<1x14x7xbf16> to vector<14x7xbf16>
    %189 = arith.truncf %186 : vector<7x448xf32> to vector<7x448xbf16>
    %cst_174 = arith.constant dense<0.000000e+00> : vector<14x448xf32>
    %190 = tpu.matmul %188, %189, %cst_174 {dimension_numbers = #tpu.dot_dimension_numbers<[1], [0], [0], [1], [0, 0, 1, 1], [], []>} : vector<14x7xbf16>, vector<7x448xbf16>, vector<14x448xf32> -> vector<14x448xf32>
    %191 = arith.addf %182, %190 : vector<14x448xf32>
    %c1_175 = arith.constant 1 : index
    %c0_176 = arith.constant 0 : index
    %c0_177 = arith.constant 0 : index
    %192 = vector.load %arg13[%c1_175, %c0_176, %c0_177] : memref<4x448x448xbf16, #tpu.memory_space<vmem>>, vector<1x448x448xbf16>
    %193 = vector.shape_cast %192 : vector<1x448x448xbf16> to vector<448x448xbf16>
    %194 = arith.truncf %181 : vector<7x448xf32> to vector<7x448xbf16>
    %cst_178 = arith.constant dense<0.000000e+00> : vector<7x448xf32>
    %195 = tpu.matmul %194, %193, %cst_178 {dimension_numbers = #tpu.dot_dimension_numbers<[1], [0], [0], [1], [0, 0, 1, 1], [], []>} : vector<7x448xbf16>, vector<448x448xbf16>, vector<7x448xf32> -> vector<7x448xf32>
    %c1_179 = arith.constant 1 : index
    %c0_180 = arith.constant 0 : index
    %c0_181 = arith.constant 0 : index
    %196 = vector.load %arg12[%c1_179, %c0_180, %c0_181] : memref<4x14x7xbf16, #tpu.memory_space<vmem>>, vector<1x14x7xbf16>
    %197 = vector.shape_cast %196 : vector<1x14x7xbf16> to vector<14x7xbf16>
    %198 = arith.truncf %195 : vector<7x448xf32> to vector<7x448xbf16>
    %cst_182 = arith.constant dense<0.000000e+00> : vector<14x448xf32>
    %199 = tpu.matmul %197, %198, %cst_182 {dimension_numbers = #tpu.dot_dimension_numbers<[1], [0], [0], [1], [0, 0, 1, 1], [], []>} : vector<14x7xbf16>, vector<7x448xbf16>, vector<14x448xf32> -> vector<14x448xf32>
    %200 = arith.addf %191, %199 : vector<14x448xf32>
    %c2_183 = arith.constant 2 : index
    %c0_184 = arith.constant 0 : index
    %c0_185 = arith.constant 0 : index
    %201 = vector.load %arg13[%c2_183, %c0_184, %c0_185] : memref<4x448x448xbf16, #tpu.memory_space<vmem>>, vector<1x448x448xbf16>
    %202 = vector.shape_cast %201 : vector<1x448x448xbf16> to vector<448x448xbf16>
    %203 = arith.truncf %181 : vector<7x448xf32> to vector<7x448xbf16>
    %cst_186 = arith.constant dense<0.000000e+00> : vector<7x448xf32>
    %204 = tpu.matmul %203, %202, %cst_186 {dimension_numbers = #tpu.dot_dimension_numbers<[1], [0], [0], [1], [0, 0, 1, 1], [], []>} : vector<7x448xbf16>, vector<448x448xbf16>, vector<7x448xf32> -> vector<7x448xf32>
    %c2_187 = arith.constant 2 : index
    %c0_188 = arith.constant 0 : index
    %c0_189 = arith.constant 0 : index
    %205 = vector.load %arg12[%c2_187, %c0_188, %c0_189] : memref<4x14x7xbf16, #tpu.memory_space<vmem>>, vector<1x14x7xbf16>
    %206 = vector.shape_cast %205 : vector<1x14x7xbf16> to vector<14x7xbf16>
    %207 = arith.truncf %204 : vector<7x448xf32> to vector<7x448xbf16>
    %cst_190 = arith.constant dense<0.000000e+00> : vector<14x448xf32>
    %208 = tpu.matmul %206, %207, %cst_190 {dimension_numbers = #tpu.dot_dimension_numbers<[1], [0], [0], [1], [0, 0, 1, 1], [], []>} : vector<14x7xbf16>, vector<7x448xbf16>, vector<14x448xf32> -> vector<14x448xf32>
    %209 = arith.addf %200, %208 : vector<14x448xf32>
    %c3_191 = arith.constant 3 : index
    %c0_192 = arith.constant 0 : index
    %c0_193 = arith.constant 0 : index
    %210 = vector.load %arg13[%c3_191, %c0_192, %c0_193] : memref<4x448x448xbf16, #tpu.memory_space<vmem>>, vector<1x448x448xbf16>
    %211 = vector.shape_cast %210 : vector<1x448x448xbf16> to vector<448x448xbf16>
    %212 = arith.truncf %181 : vector<7x448xf32> to vector<7x448xbf16>
    %cst_194 = arith.constant dense<0.000000e+00> : vector<7x448xf32>
    %213 = tpu.matmul %212, %211, %cst_194 {dimension_numbers = #tpu.dot_dimension_numbers<[1], [0], [0], [1], [0, 0, 1, 1], [], []>} : vector<7x448xbf16>, vector<448x448xbf16>, vector<7x448xf32> -> vector<7x448xf32>
    %c3_195 = arith.constant 3 : index
    %c0_196 = arith.constant 0 : index
    %c0_197 = arith.constant 0 : index
    %214 = vector.load %arg12[%c3_195, %c0_196, %c0_197] : memref<4x14x7xbf16, #tpu.memory_space<vmem>>, vector<1x14x7xbf16>
    %215 = vector.shape_cast %214 : vector<1x14x7xbf16> to vector<14x7xbf16>
    %216 = arith.truncf %213 : vector<7x448xf32> to vector<7x448xbf16>
    %cst_198 = arith.constant dense<0.000000e+00> : vector<14x448xf32>
    %217 = tpu.matmul %215, %216, %cst_198 {dimension_numbers = #tpu.dot_dimension_numbers<[1], [0], [0], [1], [0, 0, 1, 1], [], []>} : vector<14x7xbf16>, vector<7x448xbf16>, vector<14x448xf32> -> vector<14x448xf32>
    %218 = arith.addf %209, %217 : vector<14x448xf32>
    %c0_199 = arith.constant 0 : index
    %c0_200 = arith.constant 0 : index
    %219 = vector.load %arg14[%c0_199, %c0_200] : memref<1x448xf32, #tpu.memory_space<vmem>>, vector<1x448xf32>
    %220 = vector.broadcast %219 : vector<1x448xf32> to vector<14x448xf32>
    %221 = arith.addf %218, %220 : vector<14x448xf32>
    %cst_201 = arith.constant 0.000000e+00 : f32
    %222 = vector.broadcast %cst_201 : f32 to vector<14x448xf32>
    %223 = arith.maximumf %221, %222 : vector<14x448xf32>
    %cst_202 = arith.constant 0.000000e+00 : f32
    %224 = vector.broadcast %cst_202 : f32 to vector<28x28xf32>
    %c0_203 = arith.constant 0 : index
    %c0_204 = arith.constant 0 : index
    %c0_205 = arith.constant 0 : index
    %225 = vector.load %arg16[%c0_203, %c0_204, %c0_205] : memref<4x448x28xbf16, #tpu.memory_space<vmem>>, vector<1x448x28xbf16>
    %226 = vector.shape_cast %225 : vector<1x448x28xbf16> to vector<448x28xbf16>
    %227 = arith.truncf %223 : vector<14x448xf32> to vector<14x448xbf16>
    %cst_206 = arith.constant dense<0.000000e+00> : vector<14x28xf32>
    %228 = tpu.matmul %227, %226, %cst_206 {dimension_numbers = #tpu.dot_dimension_numbers<[1], [0], [0], [1], [0, 0, 1, 1], [], []>} : vector<14x448xbf16>, vector<448x28xbf16>, vector<14x28xf32> -> vector<14x28xf32>
    %c0_207 = arith.constant 0 : index
    %c0_208 = arith.constant 0 : index
    %c0_209 = arith.constant 0 : index
    %229 = vector.load %arg15[%c0_207, %c0_208, %c0_209] : memref<4x28x14xbf16, #tpu.memory_space<vmem>>, vector<1x28x14xbf16>
    %230 = vector.shape_cast %229 : vector<1x28x14xbf16> to vector<28x14xbf16>
    %231 = arith.truncf %228 : vector<14x28xf32> to vector<14x28xbf16>
    %cst_210 = arith.constant dense<0.000000e+00> : vector<28x28xf32>
    %232 = tpu.matmul %230, %231, %cst_210 {dimension_numbers = #tpu.dot_dimension_numbers<[1], [0], [0], [1], [0, 0, 1, 1], [], []>} : vector<28x14xbf16>, vector<14x28xbf16>, vector<28x28xf32> -> vector<28x28xf32>
    %233 = arith.addf %224, %232 : vector<28x28xf32>
    %c1_211 = arith.constant 1 : index
    %c0_212 = arith.constant 0 : index
    %c0_213 = arith.constant 0 : index
    %234 = vector.load %arg16[%c1_211, %c0_212, %c0_213] : memref<4x448x28xbf16, #tpu.memory_space<vmem>>, vector<1x448x28xbf16>
    %235 = vector.shape_cast %234 : vector<1x448x28xbf16> to vector<448x28xbf16>
    %236 = arith.truncf %223 : vector<14x448xf32> to vector<14x448xbf16>
    %cst_214 = arith.constant dense<0.000000e+00> : vector<14x28xf32>
    %237 = tpu.matmul %236, %235, %cst_214 {dimension_numbers = #tpu.dot_dimension_numbers<[1], [0], [0], [1], [0, 0, 1, 1], [], []>} : vector<14x448xbf16>, vector<448x28xbf16>, vector<14x28xf32> -> vector<14x28xf32>
    %c1_215 = arith.constant 1 : index
    %c0_216 = arith.constant 0 : index
    %c0_217 = arith.constant 0 : index
    %238 = vector.load %arg15[%c1_215, %c0_216, %c0_217] : memref<4x28x14xbf16, #tpu.memory_space<vmem>>, vector<1x28x14xbf16>
    %239 = vector.shape_cast %238 : vector<1x28x14xbf16> to vector<28x14xbf16>
    %240 = arith.truncf %237 : vector<14x28xf32> to vector<14x28xbf16>
    %cst_218 = arith.constant dense<0.000000e+00> : vector<28x28xf32>
    %241 = tpu.matmul %239, %240, %cst_218 {dimension_numbers = #tpu.dot_dimension_numbers<[1], [0], [0], [1], [0, 0, 1, 1], [], []>} : vector<28x14xbf16>, vector<14x28xbf16>, vector<28x28xf32> -> vector<28x28xf32>
    %242 = arith.addf %233, %241 : vector<28x28xf32>
    %c2_219 = arith.constant 2 : index
    %c0_220 = arith.constant 0 : index
    %c0_221 = arith.constant 0 : index
    %243 = vector.load %arg16[%c2_219, %c0_220, %c0_221] : memref<4x448x28xbf16, #tpu.memory_space<vmem>>, vector<1x448x28xbf16>
    %244 = vector.shape_cast %243 : vector<1x448x28xbf16> to vector<448x28xbf16>
    %245 = arith.truncf %223 : vector<14x448xf32> to vector<14x448xbf16>
    %cst_222 = arith.constant dense<0.000000e+00> : vector<14x28xf32>
    %246 = tpu.matmul %245, %244, %cst_222 {dimension_numbers = #tpu.dot_dimension_numbers<[1], [0], [0], [1], [0, 0, 1, 1], [], []>} : vector<14x448xbf16>, vector<448x28xbf16>, vector<14x28xf32> -> vector<14x28xf32>
    %c2_223 = arith.constant 2 : index
    %c0_224 = arith.constant 0 : index
    %c0_225 = arith.constant 0 : index
    %247 = vector.load %arg15[%c2_223, %c0_224, %c0_225] : memref<4x28x14xbf16, #tpu.memory_space<vmem>>, vector<1x28x14xbf16>
    %248 = vector.shape_cast %247 : vector<1x28x14xbf16> to vector<28x14xbf16>
    %249 = arith.truncf %246 : vector<14x28xf32> to vector<14x28xbf16>
    %cst_226 = arith.constant dense<0.000000e+00> : vector<28x28xf32>
    %250 = tpu.matmul %248, %249, %cst_226 {dimension_numbers = #tpu.dot_dimension_numbers<[1], [0], [0], [1], [0, 0, 1, 1], [], []>} : vector<28x14xbf16>, vector<14x28xbf16>, vector<28x28xf32> -> vector<28x28xf32>
    %251 = arith.addf %242, %250 : vector<28x28xf32>
    %c3_227 = arith.constant 3 : index
    %c0_228 = arith.constant 0 : index
    %c0_229 = arith.constant 0 : index
    %252 = vector.load %arg16[%c3_227, %c0_228, %c0_229] : memref<4x448x28xbf16, #tpu.memory_space<vmem>>, vector<1x448x28xbf16>
    %253 = vector.shape_cast %252 : vector<1x448x28xbf16> to vector<448x28xbf16>
    %254 = arith.truncf %223 : vector<14x448xf32> to vector<14x448xbf16>
    %cst_230 = arith.constant dense<0.000000e+00> : vector<14x28xf32>
    %255 = tpu.matmul %254, %253, %cst_230 {dimension_numbers = #tpu.dot_dimension_numbers<[1], [0], [0], [1], [0, 0, 1, 1], [], []>} : vector<14x448xbf16>, vector<448x28xbf16>, vector<14x28xf32> -> vector<14x28xf32>
    %c3_231 = arith.constant 3 : index
    %c0_232 = arith.constant 0 : index
    %c0_233 = arith.constant 0 : index
    %256 = vector.load %arg15[%c3_231, %c0_232, %c0_233] : memref<4x28x14xbf16, #tpu.memory_space<vmem>>, vector<1x28x14xbf16>
    %257 = vector.shape_cast %256 : vector<1x28x14xbf16> to vector<28x14xbf16>
    %258 = arith.truncf %255 : vector<14x28xf32> to vector<14x28xbf16>
    %cst_234 = arith.constant dense<0.000000e+00> : vector<28x28xf32>
    %259 = tpu.matmul %257, %258, %cst_234 {dimension_numbers = #tpu.dot_dimension_numbers<[1], [0], [0], [1], [0, 0, 1, 1], [], []>} : vector<28x14xbf16>, vector<14x28xbf16>, vector<28x28xf32> -> vector<28x28xf32>
    %260 = arith.addf %251, %259 : vector<28x28xf32>
    %c0_235 = arith.constant 0 : index
    %c0_236 = arith.constant 0 : index
    %261 = vector.load %arg17[%c0_235, %c0_236] : memref<1x28xf32, #tpu.memory_space<vmem>>, vector<1x28xf32>
    %262 = vector.broadcast %261 : vector<1x28xf32> to vector<28x28xf32>
    %263 = arith.addf %260, %262 : vector<28x28xf32>
    %264 = math.absf %263 : vector<28x28xf32>
    %cst_237 = arith.constant 0.000000e+00 : f32
    %265 = vector.broadcast %cst_237 : f32 to vector<28x28xf32>
    %266 = arith.subf %265, %264 : vector<28x28xf32>
    %267 = math.exp %266 : vector<28x28xf32>
    %cst_238 = arith.constant 0.000000e+00 : f32
    %268 = vector.broadcast %cst_238 : f32 to vector<28x28xf32>
    %269 = arith.cmpf oge, %263, %268 : vector<28x28xf32>
    %cst_239 = arith.constant 1.000000e+00 : f32
    %270 = vector.broadcast %cst_239 : f32 to vector<28x28xf32>
    %271 = arith.select %269, %270, %267 : vector<28x28xi1>, vector<28x28xf32>
    %cst_240 = arith.constant 1.000000e+00 : f32
    %272 = vector.broadcast %cst_240 : f32 to vector<28x28xf32>
    %273 = arith.addf %272, %267 : vector<28x28xf32>
    %274 = arith.divf %271, %273 : vector<28x28xf32>
    %c0_241 = arith.constant 0 : index
    %c0_242 = arith.constant 0 : index
    %c0_243 = arith.constant 0 : index
    %275 = vector.load %arg19[%c0_241, %c0_242, %c0_243] : memref<1x28x28xf32, #tpu.memory_space<vmem>>, vector<1x28x28xf32>
    %276 = vector.shape_cast %275 : vector<1x28x28xf32> to vector<28x28xf32>
    %277 = vector.shape_cast %274 : vector<28x28xf32> to vector<1x28x28xf32>
    tpu.vector_store %arg19[%c0_241, %c0_242, %c0_243], %277 {strides = array<i32>} : memref<1x28x28xf32, #tpu.memory_space<vmem>>, vector<1x28x28xf32>,
    return
  }
  func.func @transform_0(%arg0: i32) -> (i32, i32, i32) {
    %c0_i32 = arith.constant 0 : i32
    %c0_i32_0 = arith.constant 0 : i32
    %c0_i32_1 = arith.constant 0 : i32
    return %arg0, %c0_i32, %c0_i32_0 : i32, i32, i32
  }
  func.func @transform_1(%arg0: i32) -> (i32, i32, i32) {
    %c0_i32 = arith.constant 0 : i32
    %c0_i32_0 = arith.constant 0 : i32
    %c0_i32_1 = arith.constant 0 : i32
    %c0_i32_2 = arith.constant 0 : i32
    return %c0_i32, %c0_i32_0, %c0_i32_1 : i32, i32, i32
  }
  func.func @transform_2(%arg0: i32) -> (i32, i32, i32) {
    %c0_i32 = arith.constant 0 : i32
    %c0_i32_0 = arith.constant 0 : i32
    %c0_i32_1 = arith.constant 0 : i32
    %c0_i32_2 = arith.constant 0 : i32
    return %c0_i32, %c0_i32_0, %c0_i32_1 : i32, i32, i32
  }
  func.func @transform_3(%arg0: i32) -> (i32, i32) {
    %c0_i32 = arith.constant 0 : i32
    %c0_i32_0 = arith.constant 0 : i32
    %c0_i32_1 = arith.constant 0 : i32
    return %c0_i32, %c0_i32_0 : i32, i32
  }
  func.func @transform_4(%arg0: i32) -> (i32, i32, i32) {
    %c0_i32 = arith.constant 0 : i32
    %c0_i32_0 = arith.constant 0 : i32
    %c0_i32_1 = arith.constant 0 : i32
    %c0_i32_2 = arith.constant 0 : i32
    return %c0_i32, %c0_i32_0, %c0_i32_1 : i32, i32, i32
  }
  func.func @transform_5(%arg0: i32) -> (i32, i32, i32) {
    %c0_i32 = arith.constant 0 : i32
    %c0_i32_0 = arith.constant 0 : i32
    %c0_i32_1 = arith.constant 0 : i32
    %c0_i32_2 = arith.constant 0 : i32
    return %c0_i32, %c0_i32_0, %c0_i32_1 : i32, i32, i32
  }
  func.func @transform_6(%arg0: i32) -> (i32, i32) {
    %c0_i32 = arith.constant 0 : i32
    %c0_i32_0 = arith.constant 0 : i32
    %c0_i32_1 = arith.constant 0 : i32
    return %c0_i32, %c0_i32_0 : i32, i32
  }
  func.func @transform_7(%arg0: i32) -> (i32, i32, i32) {
    %c0_i32 = arith.constant 0 : i32
    %c0_i32_0 = arith.constant 0 : i32
    %c0_i32_1 = arith.constant 0 : i32
    %c0_i32_2 = arith.constant 0 : i32
    return %c0_i32, %c0_i32_0, %c0_i32_1 : i32, i32, i32
  }
  func.func @transform_8(%arg0: i32) -> (i32, i32) {
    %c0_i32 = arith.constant 0 : i32
    %c0_i32_0 = arith.constant 0 : i32
    %c0_i32_1 = arith.constant 0 : i32
    return %c0_i32, %c0_i32_0 : i32, i32
  }
  func.func @transform_9(%arg0: i32) -> (i32, i32, i32) {
    %c0_i32 = arith.constant 0 : i32
    %c0_i32_0 = arith.constant 0 : i32
    %c0_i32_1 = arith.constant 0 : i32
    %c0_i32_2 = arith.constant 0 : i32
    return %c0_i32, %c0_i32_0, %c0_i32_1 : i32, i32, i32
  }
  func.func @transform_10(%arg0: i32) -> (i32, i32, i32) {
    %c0_i32 = arith.constant 0 : i32
    %c0_i32_0 = arith.constant 0 : i32
    %c0_i32_1 = arith.constant 0 : i32
    %c0_i32_2 = arith.constant 0 : i32
    return %c0_i32, %c0_i32_0, %c0_i32_1 : i32, i32, i32
  }
  func.func @transform_11(%arg0: i32) -> (i32, i32, i32) {
    %c0_i32 = arith.constant 0 : i32
    %c0_i32_0 = arith.constant 0 : i32
    %c0_i32_1 = arith.constant 0 : i32
    %c0_i32_2 = arith.constant 0 : i32
    return %c0_i32, %c0_i32_0, %c0_i32_1 : i32, i32, i32
  }
  func.func @transform_12(%arg0: i32) -> (i32, i32, i32) {
    %c0_i32 = arith.constant 0 : i32
    %c0_i32_0 = arith.constant 0 : i32
    %c0_i32_1 = arith.constant 0 : i32
    %c0_i32_2 = arith.constant 0 : i32
    return %c0_i32, %c0_i32_0, %c0_i32_1 : i32, i32, i32
  }
  func.func @transform_13(%arg0: i32) -> (i32, i32) {
    %c0_i32 = arith.constant 0 : i32
    %c0_i32_0 = arith.constant 0 : i32
    %c0_i32_1 = arith.constant 0 : i32
    return %c0_i32, %c0_i32_0 : i32, i32
  }
  func.func @transform_14(%arg0: i32) -> (i32, i32, i32) {
    %c0_i32 = arith.constant 0 : i32
    %c0_i32_0 = arith.constant 0 : i32
    %c0_i32_1 = arith.constant 0 : i32
    %c0_i32_2 = arith.constant 0 : i32
    return %c0_i32, %c0_i32_0, %c0_i32_1 : i32, i32, i32
  }
  func.func @transform_15(%arg0: i32) -> (i32, i32, i32) {
    %c0_i32 = arith.constant 0 : i32
    %c0_i32_0 = arith.constant 0 : i32
    %c0_i32_1 = arith.constant 0 : i32
    %c0_i32_2 = arith.constant 0 : i32
    return %c0_i32, %c0_i32_0, %c0_i32_1 : i32, i32, i32
  }
  func.func @transform_16(%arg0: i32) -> (i32, i32) {
    %c0_i32 = arith.constant 0 : i32
    %c0_i32_0 = arith.constant 0 : i32
    %c0_i32_1 = arith.constant 0 : i32
    return %c0_i32, %c0_i32_0 : i32, i32
  }
  func.func @transform_17(%arg0: i32) -> (i32, i32, i32) {
    %c0_i32 = arith.constant 0 : i32
    %c0_i32_0 = arith.constant 0 : i32
    %c0_i32_1 = arith.constant 0 : i32
    return %arg0, %c0_i32, %c0_i32_0 : i32, i32, i32
  }
  func.func @transform_18(%arg0: i32) -> (i32, i32, i32) {
    %c0_i32 = arith.constant 0 : i32
    %c0_i32_0 = arith.constant 0 : i32
    %c0_i32_1 = arith.constant 0 : i32
    return %arg0, %c0_i32, %c0_i32_0 : i32, i32, i32
  }
}

</mosaic_0001>

<bundles_post_ra>
// kernel: fwd.1
= control target key start
LH: loop header
LB: loop body
LE: loop exit
PB: predicated region body
PF: predicated region fallthrough
CT: control target
= control target key end

     0   :  { %s22683_s0 = inlined_call_operand.vmem [shape: f32[2,28,28], index: 0, kind: input, shape index: {}]   ;;  %s22684_s1 = inlined_call_operand.vmem [shape: bf16[4,14,28], index: 1, kind: input, shape index: {}]   ;;  %s22685_s2 = inlined_call_operand.vmem [shape: bf16[4,28,448], index: 2, kind: input, shape index: {}]   ;;  %s22686_s3 = inlined_call_operand.vmem [shape: f32[1,448], index: 3, kind: input, shape index: {}]   ;;  %s22687_s4 = inlined_call_operand.vmem [shape: bf16[4,7,14], index: 4, kind: input, shape index: {}]   ;;  %s22688_s5 = inlined_call_operand.vmem [shape: bf16[4,448,448], index: 5, kind: input, shape index: {}]   ;;  %s22689_s6 = inlined_call_operand.vmem [shape: f32[1,448], index: 6, kind: input, shape index: {}]   ;;  %s22690_s7 = inlined_call_operand.vmem [shape: bf16[7,448,32], index: 7, kind: input, shape index: {}]   ;;  %s22691_s8 = inlined_call_operand.vmem [shape: f32[1,32], index: 8, kind: input, shape index: {}]   ;;  %s22692_s9 = inlined_call_operand.vmem [shape: bf16[7,32,448], index: 9, kind: input, shape index: {}]   ;;  %s22693_s10 = inlined_call_operand.vmem [shape: f32[7,1,448], index: 10, kind: input, shape index: {}]   ;;  %s22694_s11 = inlined_call_operand.vmem [shape: bf16[4,14,7], index: 11, kind: input, shape index: {}]   ;;  %s22695_s12 = inlined_call_operand.hbm [shape: bf16[4,448,448], index: 12, kind: input, shape index: {}]   ;;  %s22696_s13 = inlined_call_operand.vmem [shape: f32[1,448], index: 13, kind: input, shape index: {}]   ;;  %s22697_s14 = inlined_call_operand.vmem [shape: bf16[4,28,14], index: 14, kind: input, shape index: {}]   ;;  %s22698_s15 = inlined_call_operand.vmem [shape: bf16[4,448,28], index: 15, kind: input, shape index: {}]   ;;  %s22699_s16 = inlined_call_operand.vmem [shape: f32[1,28], index: 16, kind: input, shape index: {}]   ;;  %s22700_s17 = inlined_call_operand.hbm [shape: f32[2,1,32], index: 17, kind: output, shape index: {0}]   ;;  %s22701_s18 = inlined_call_operand.vmem [shape: f32[2,28,28], index: 18, kind: output, shape index: {1}]  }
   0x1   :  { %22716 = sst [smem:[#allocation15_spill]] %s22683_s0 }
   0x2   :  { %22717 = sst [smem:[#allocation16_spill]] %s22684_s1 }
   0x3   :  { %22718 = sst [smem:[#allocation17_spill]] %s22685_s2 }
   0x4   :  { %22719 = sst [smem:[#allocation18_spill]] %s22686_s3 }
   0x5   :  { %22720 = sst [smem:[#allocation19_spill]] %s22695_s12 }
   0x6   :  { %24 = vsyncpa [#allocation4], 0 }
   0x7   :  { %25 = vsyncpa [#allocation5], 0 }
   0x8   :  { %27 = vsyncpa [#allocation5 + $0x1], 0  ;;  %s19229_s27 = smov 0   ;;  %s19231_s28 = smov 0  }
   0x9   :  { %s19233_s29 = smov 0   ;;  %s19235_s30 = smov 0  }
   0xa LB: > { %22721 = sst [smem:[#allocation9_spill]] %s19111_s27  ;;  %s19250_s0 = sadd.s32 4294967295, %s19123_s30   ;;  %s19123_s30 = sphi %s19235_s30, %s22748_s30   ;;  %s19119_s29 = sphi %s19233_s29, %s22750_s29   ;;  %s19115_s28 = sphi %s19231_s28, %s22752_s28   ;;  %s19111_s27 = sphi %s19229_s27, %s22751_s27  }
   0xb   : > { %22722 = sst [smem:[#allocation10_spill]] %s19119_s29  ;;  %s14344_s19 = sadd.s32 4294967294, %s19123_s30  }
   0xc   : > { %22723 = sst [smem:[#allocation11_spill]] %s19123_s30  ;;  %s19254_s1 = sadd.s32 1, %s19123_s30  }
   0xd   : > { %22724 = sst [smem:[#allocation12_spill]] %s19254_s1  ;;  %s402_s20 = sadd.s32 1, %s19119_s29 }
   0xe   : > { %s399_s21 = ssub.s32 %s19123_s30, %s19254_s1  ;;  %p412_p0 = scmp.ne.s32.totalorder %s19119_s29, %s19115_s28 }
   0xf   : > { %p400_p1 = scmp.eq.s32.totalorder %s399_s21, 0  ;;  %p413_p2 = scmp.eq.s32.totalorder %s19250_s0, 1 }
  0x10   : > { %p418_p3 = scmp.ne.s32.totalorder %s19115_s28, %s19111_s27  ;;  %p419_p4 = scmp.eq.s32.totalorder %s14344_s19, 1 }
  0x11   : > { %s19265_s22 = scalar_select %p400_p1, %s19119_s29, %s402_s20  }
  0x12   : > { %p19267_p5 = por %p413_p2, %p412_p0  ;;  %p19271_p6 = por %p419_p4, %p418_p3 }
  0x13   : > { %22725 = sst [smem:[#allocation13_spill]] %s19265_s22  ;;  %p14345_p7 = scmp.ge.s32.totalorder %s19123_s30, 1 }
  0x14   : > { %s22726_s2 = scalar_select %p19267_p5, 1, 0 }
  0x15   : > { %s22727_s23 = scalar_select %p19271_p6, 1, 0 }
  0x16   : > { %p452_p8 = scmp.lt.s32.totalorder %s19123_s30, 3  ;;  %p22709_p9 = scmp.eq.s32.totalorder %s19250_s0, 0 }
  0x17   : > { %22728 = sst [smem:[#allocation14_spill]] %s22727_s23  ;;  %s19125_s25 = smov [#allocation3]  }
  0x18   : > { %p19278_p10 = pnand %p14345_p7, %p452_p8  ;;  %s497_s26 = sshll.u32 %s19125_s25, 4  ;;  %s498_s26 = int_to_ptr.vmem [resolvable:$true] %s497_s26 }
  0x19   : > { %s22731_s12 = sld [smem:[#allocation19_spill]] }
  0x1a   : > { %s22729_s24 = scalar_select %p19278_p10, 1, 0 }
  0x1b   : > { %p17162_p11 = pneg %p19278_p10 }
  0x1d   : > { %p19286_p12 = pnand %p22709_p9, %p17162_p11 }
  0x1f   : > { %s19029_s22 = scalar_lea.hbm %s22731_s12, 57344  ;;  %p19031_p0 = pneg %p19286_p12 }
  0x20   : > { %p19030_p13 = scmp.ne.s32.totalorder %s22731_s12, %s19029_s22  ;;  %p19036_p3 = scmp.lt.u32.totalorder %s19029_s22, %s22731_s12 }
  0x22   : > { %p19032_p1 = pnand %p19031_p0, %p19030_p13 }
  0x24   : > { %p19033_p2 = pneg %p19032_p1 }
  0x26   : > { %p19038_p4 = pnand %p19036_p3, %p19033_p2 }
  0x28   : > { %19041 = shalt.err (!%p19038_p4)
}
  0x29   : > { %s19042_s27 = scalar_lea.vmem %s498_s26, 57344  ;;  %p19050_p9 = scmp.lt.s32.totalorder %s498_s26, %s498_s26 }
  0x2a   : > { %p19043_p7 = scmp.ne.s32.totalorder %s498_s26, %s19042_s27  ;;  %p19051_p6 = scmp.lt.s32.totalorder %s19042_s27, %s19042_s27 }
  0x2c   : > { %p19045_p8 = pnand %p19043_p7, %p19031_p0  ;;  %p19052_p5 = por %p19051_p6, %p19050_p9 }
  0x2e   : > { %p19046_p11 = pneg %p19045_p8 }
  0x30   : > { %p19053_p10 = pnand %p19052_p5, %p19046_p11 }
  0x32   : > { %19056 = shalt.err (!%p19053_p10)
}
  0x33   : > { %s19126_s29 = smov 256   ;;  %s19127_s1 = smov 16  }
  0x34   : > { %17165 = dma.hbm_to_vmem [thread:$0]  (!%p19286_p12), %s22731_s12, 57344, %s498_s26, [#allocation4], %s19126_s29, %s19126_s29, %s19127_s1  }
  0x35   : > { %p22732_p13 = scmp.ne.s32.totalorder %s22729_s24, 0 }
  0x36   : > { %p22733_p1 = scmp.eq.s32.totalorder (!%p22732_p13), %s19250_s0, 0 }
  0x37   : > { %533 = sbr.rel (%p22732_p13) target bundleno = 5367 (0x14f7), region = 88 }
  0x3e   : > { %19102 = dma.done.wait (%p22733_p1), [#allocation4], 57344   ;;  %p22734_p0 = pmov %p22733_p1 }
  0x3f   : > { %p591_p5 = scmp.lt.s32.totalorder %s19250_s0, 1  ;;  %v19128_v0 = vmov 0.0   ;;  %vm19129_vm0 = vmmov 0   ;;  %s22735_s26 = sld [smem:[#allocation15_spill]]  ;;  %vm619_vm1 = vcmask 1045504   ;;  %vm615_vm2 = vcmask 228352  }
  0x40   : > { %19104 = vsyncadd (%p22734_p0), [#allocation4], 4294909952  ;;  %16972 = vmatprep.subr.bf16.mxu0 %v19128_v0  ;;  %16976 = vmatprep.mubr.msk.bf16.mxu0 %vm19129_vm0, %v19128_v0  ;;  %s22736_s1 = sld [smem:[#allocation16_spill]]  ;;  %s22737_s23 = sld [smem:[#allocation17_spill]]  ;;  %v19130_v17 = vmov 0   ;;  %vm1470_vm3 = vcmask 1046528  }
  0x41   : > { %s19317_s27 = scalar_select %p591_p5, %s19250_s0, 1  ;;  %998 = vmatprep.mubr.bf16.mxu1 %v19130_v17  ;;  %vm1466_vm4 = vcmask 113664   ;;  %vm2445_vm5 = vcmask 523264   ;;  %vm7460_vm6 = vcmask 253952   ;;  %vm7533_vm7 = vcmask 261120  }
  0x42   : > { %s22738_s3 = sld [smem:[#allocation18_spill]]  ;;  %s22714_s12 = sand.u32 1, %s19115_s28   ;;  %vm10480_vm9 = vcmask 1042432   ;;  %vm10481_vm10 = vcmask 1043456   ;;  %vm10476_vm11 = vcmask 56320  }
  0x43   : > { %s22712_s22 = sshll.u32 %s19317_s27, 5  ;;  %s21793_s25 = scalar_lea.vmem [#allocation6], %s22714_s12 }
  0x44   : > { %s14249_s29 = sshll.u32 %s21793_s25, 4  ;;  %s22741_s12 = sand.u32 1, %s19115_s28   ;;  %s14250_s29 = int_to_ptr.vmem [resolvable:$true] %s14249_s29 }
  0x45   : > { %s595_s19 = scalar_lea.vmem %s22735_s26, %s22712_s22  ;;  %s14232_s24 = scalar_lea.sflag [#allocation5], %s22741_s12 }
  0x46   : > { %v602_v1 = vld [vmem:[%s595_s19] sm:$0xff]  ;;  %v603_v2 = vld [vmem:[%s595_s19 + $0x8] sm:$0xff]  ;;  %v604_v3 = vld [vmem:[%s595_s19 + $0x10] sm:$0xff]  ;;  %s19057_s30 = scalar_lea.vmem %s14250_s29, 16  ;;  %p22742_p9 = scmp.ne.s32.totalorder %s22726_s2, 0 }
  0x47   : > { %v19325_v4 = vpack.c.bf16 %v603_v2, %v602_v1  ;;  %v605_v5 = vld [vmem:[%s595_s19 + $0x18] sm:$0xf]  ;;  %v17213_v8 = vld [vmem:[%s22736_s1] sm:$0x7f]   ;;  %v17215_v9 = vld [vmem:[%s22737_s23 + $0xc] ss:$16 sps:$4 sm:$0xff]   ;;  %p19058_p6 = scmp.ne.s32.totalorder %s14250_s29, %s19057_s30 }
  0x48   : > { %v607_v6 = vpack.c.bf16 %v605_v5, %v604_v3  ;;  %v17217_v10 = vld [vmem:[%s22737_s23 + $0x8] ss:$16 sps:$4 sm:$0xff]   ;;  %966 = vmatprep.subr.bf16.mxu1 %v17215_v9  ;;  %v17218_v12 = vld [vmem:[%s22737_s23 + $0x2c] ss:$16 sps:$4 sm:$0x3f]   ;;  %s16701_s19 = sshll.u32 %s19250_s0, 4 }
  0x49   : > { %16973 = vmatpush3.bf16.msra.mxu0 %v19325_v4  ;;  %967 = vmatpush1.bf16.msra.mxu1 %v17217_v10  ;;  %v17214_v11 = vld [vmem:[%s22736_s1 + $0x8] sm:$0x7f]   ;;  %v17221_v15 = vld [vmem:[%s22737_s23 + $0x40] ss:$16 sps:$4 sm:$0xff]   ;;  %v17223_v16 = vld [vmem:[%s22737_s23 + $0x44] ss:$16 sps:$4 sm:$0xff]   ;;  %s22634_s21 = scalar_lea.hbm %s22700_s17, %s16701_s19  ;;  %p19059_p10 = pnand %p19058_p6, %p22742_p9 }
  0x4a   : > { %16974 = vmatprep.subr.bf16.mxu0 %v19128_v0  ;;  %v19330_v7 = vsel %vm619_vm1, %v607_v6, 0  ;;  %v17220_v13 = vld [vmem:[%s22737_s23 + $0x28] ss:$16 sps:$4 sm:$0x3f]   ;;  %14390 = vmatprep.subr.msk.bf16.mxu1 %vm619_vm1, %v17218_v12  ;;  %v17229_v21 = vld [vmem:[%s22737_s23 + $0x4c] ss:$16 sps:$4 sm:$0xff]  }
  0x4b   : > { %v918_v14 = vsel %vm619_vm1, %v17220_v13, 0  ;;  %v17224_v18 = vld [vmem:[%s22737_s23 + $0x64] ss:$16 sps:$4 sm:$0x3f]   ;;  %v17227_v32 = vld [vmem:[%s22737_s23 + $0x48] ss:$16 sps:$4 sm:$0xff]   ;;  %v1425_v13 = vlaneseq  ;;  %p19060_p12 = pneg %p19059_p10 }
  0x4c   : > { %v17226_v19 = vld [vmem:[%s22737_s23 + $0x60] ss:$16 sps:$4 sm:$0x3f]   ;;  %v17232_v22 = vld [vmem:[%s22737_s23 + $0x68] ss:$16 sps:$4 sm:$0x3f]  }
  0x4d   : > { %16975 = vmatpush3.bf16.msra.mxu0 %v19330_v7  ;;  %969 = vmatpush1.bf16.msra.mxu1 %v918_v14  ;;  %v775_v20 = vsel %vm619_vm1, %v17226_v19, 0  ;;  %v17238_v23 = vld [vmem:[%s22737_s23 + $0x20] ss:$16 sps:$4 sm:$0x3f]   ;;  %v781_v24 = vsel %vm619_vm1, %v17232_v22, 0  ;;  %v19502_v14 = vshrl.u32 %v1425_v13, 7 }
  0x4e   : > { %16980 = vmatprep.subr.bf16.mxu0 %v19128_v0  ;;  %v912_v25 = vsel %vm619_vm1, %v17238_v23, 0  ;;  %v17230_v34 = vld [vmem:[%s22737_s23 + $0x6c] ss:$16 sps:$4 sm:$0x3f]   ;;  %v17235_v38 = vld [vmem:[%s22737_s23 + $0x4] ss:$16 sps:$4 sm:$0xff]  }
  0x4f   : > { %v17233_v39 = vld [vmem:[%s22737_s23] ss:$16 sps:$4 sm:$0xff]   ;;  %v17236_v40 = vld [vmem:[%s22737_s23 + $0x24] ss:$16 sps:$4 sm:$0x3f]   ;;  %v19514_v19 = vsub.s32 2, %v19502_v14 }
  0x50   : > { %16977 = vmatmul.mubr.msk.bf16.vlgmr.msra.gmra.mrb[0].mxu0 %vm615_vm2, %v17213_v8  ;;  %v17239_v41 = vld [vmem:[%s22736_s1 + $0x10] sm:$0x7f]   ;;  %v17243_v44 = vld [vmem:[%s22737_s23 + $0x88] ss:$16 sps:$4 sm:$0xff]   ;;  %v17245_v45 = vld [vmem:[%s22737_s23 + $0x8c] ss:$16 sps:$4 sm:$0xff]  }
  0x51   : > { %16981 = vmatpush3.bf16.msra.mxu0 %v19325_v4  ;;  %16984 = vmatprep.mubr.msk.bf16.mxu0 %vm19129_vm0, %v19128_v0  ;;  %v17240_v42 = vld [vmem:[%s22737_s23 + $0x80] ss:$16 sps:$4 sm:$0xff]   ;;  %v17242_v43 = vld [vmem:[%s22737_s23 + $0x84] ss:$16 sps:$4 sm:$0xff]   ;;  %v17258_v63 = vld [vmem:[%s22737_s23 + $0xcc] ss:$16 sps:$4 sm:$0xff]  }
  0x52   : > { %16982 = vmatprep.subr.bf16.mxu0 %v19128_v0  ;;  %1165 = vmatprep.subr.bf16.mxu1 %v17245_v45  ;;  %v17246_v46 = vld [vmem:[%s22737_s23 + $0xa4] ss:$16 sps:$4 sm:$0x3f]   ;;  %v17248_v47 = vld [vmem:[%s22737_s23 + $0xac] ss:$16 sps:$4 sm:$0x3f]  }
  0x53   : > { %v17250_v48 = vld [vmem:[%s22737_s23 + $0xa0] ss:$16 sps:$4 sm:$0x3f]   ;;  %v17251_v49 = vld [vmem:[%s22737_s23 + $0xa8] ss:$16 sps:$4 sm:$0x3f]  }
  0x54   : > { %v1111_v50 = vsel %vm619_vm1, %v17250_v48, 0  ;;  %v1117_v51 = vsel %vm619_vm1, %v17251_v49, 0  ;;  %v17255_v52 = vld [vmem:[%s22737_s23 + $0xc4] ss:$16 sps:$4 sm:$0xff]   ;;  %v17253_v59 = vld [vmem:[%s22737_s23 + $0xc0] ss:$16 sps:$4 sm:$0xff]  }
  0x55   : > { %16983 = vmatpush3.bf16.msra.mxu0 %v19330_v7  ;;  %v17252_v1 = vld [vmem:[%s22736_s1 + $0x18] sm:$0x7f]   ;;  %vm22002_vm8 = vcmp.lt.s32.totalorder %v1425_v13, 448  ;;  %s19133_s22 = smov [#allocation6]  }
  0x56   : > { %786 = vmatprep.subr.bf16.mxu0 %v17223_v16  ;;  %v17256_v2 = vld [vmem:[%s22737_s23 + $0xc8] ss:$16 sps:$4 sm:$0xff]   ;;  %v17261_v3 = vld [vmem:[%s22737_s23 + $0xec] ss:$16 sps:$4 sm:$0x3f]   ;;  %s19061_s26 = sshll.u32 %s19133_s22, 4  ;;  %s19062_s26 = int_to_ptr.vmem [resolvable:$false] %s19061_s26 }
  0x57   : > { %v17264_v5 = vld [vmem:[%s22737_s23 + $0xe8] ss:$16 sps:$4 sm:$0x3f]   ;;  %v1423_v16 = vld [vmem:[%s22738_s3] sm:$0xf]  ;;  %s19063_s3 = scalar_lea.vmem %s19062_s26, 32  ;;  %p19064_p2 = scmp.lt.s32.totalorder %s14250_s29, %s19062_s26 }
  0x58   : > { %16985 = vmatmul.mubr.msk.bf16.vlgmr.msra.gmra.mrb[4].mxu0 %vm615_vm2, %v17214_v11  ;;  %v1436_v23 = vrot.slane %v1423_v16, %v19514_v19  ;;  %p19065_p3 = scmp.lt.s32.totalorder %s19063_s3, %s19057_s30 }
  0x59   : > { %818 = vmatprep.mubr.bf16.mxu0 %v19130_v17  ;;  %787 = vmatpush1.bf16.msra.mxu0 %v17221_v15  ;;  %v19505_v15 = vsub.s32 0, %v19502_v14 }
  0x5a   : > { %14376 = vmatprep.subr.msk.bf16.mxu0 %vm619_vm1, %v17224_v18  ;;  %v19511_v18 = vsub.s32 1, %v19502_v14  ;;  %p19066_p4 = por %p19065_p3, %p19064_p2 }
  0x5c   : > { %v1432_v22 = vrot.slane %v1423_v16, %v19511_v18  ;;  %p19067_p7 = pnand %p19066_p4, %p19060_p12 }
  0x5d   : > { %789 = vmatpush1.bf16.msra.mxu0 %v775_v20  ;;  %v19517_v20 = vsub.s32 3, %v19502_v14 }
  0x5e   : > { %829 = vmatprep.subr.bf16.mxu0 %v17229_v21  ;;  %v1428_v21 = vrot.slane %v1423_v16, %v19505_v15 }
 0x123   : > { %v657_v26 = vpop.f32.mrb[0].mxu0 }
 0x124   : > { %v16978_v27 = vpop.f32.mrb[1].mxu0 }
 0x125   : > { %v660_v28 = vpop.f32.mrb[2].mxu0 }
 0x126   : > { %v672_v29 = vpack.c.bf16 %v660_v28, %v657_v26  ;;  %v16979_v30 = vpop.f32.mrb[3].mxu0  ;;  %v1440_v26 = vrot.slane %v1423_v16, %v19517_v20  ;;  %v17298_v16 = vld [vmem:[%s22688_s5 + $0x5e0] ss:$16 sps:$4 sm:$0xff]  }
 0x128   : > { %14391 = vmatmul.mubr.msk.bf16.vlgmr.msra.gmra.mrb[0].mxu1 %vm615_vm2, %v672_v29 }
 0x129   : > { %1197 = vmatprep.mubr.bf16.mxu1 %v19130_v17  ;;  %1166 = vmatpush1.bf16.msra.mxu1 %v17243_v44 }
 0x12a   : > { %14414 = vmatprep.subr.msk.bf16.mxu1 %vm619_vm1, %v17248_v47 }
 0x12b   : > { %v718_v31 = vpop.f32.mrb[4].mxu0 }
 0x12c   : > { %v16986_v33 = vpop.f32.mrb[5].mxu0 }
 0x12d   : > { %v721_v35 = vpop.f32.mrb[6].mxu0  ;;  %1168 = vmatpush1.bf16.msra.mxu1 %v1117_v51 }
 0x12e   : > { %v734_v36 = vpack.c.bf16 %v721_v35, %v718_v31  ;;  %v16987_v37 = vpop.f32.mrb[7].mxu0  ;;  %16996 = vmatprep.subr.bf16.mxu1 %v19128_v0 }
 0x130   : > { %14377 = vmatmul.mubr.msk.bf16.vlgmr.msra.gmra.mrb[8].mxu0 %vm615_vm2, %v734_v36 }
 0x131   : > { %830 = vmatpush1.bf16.msra.mxu0 %v17227_v32  ;;  %861 = vmatprep.mubr.bf16.mxu0 %v19130_v17 }
 0x132   : > { %14378 = vmatprep.subr.msk.bf16.mxu0 %vm619_vm1, %v17230_v34 }
 0x135   : > { %832 = vmatpush1.bf16.msra.mxu0 %v781_v24 }
 0x136   : > { %923 = vmatprep.subr.bf16.mxu0 %v17235_v38 }
 0x138   : > { %14379 = vmatmul.mubr.msk.bf16.vlgmr.msra.gmra.mrb[12].mxu0 %vm615_vm2, %v734_v36 }
 0x139   : > { %924 = vmatpush1.bf16.msra.mxu0 %v17233_v39  ;;  %955 = vmatprep.mubr.bf16.mxu0 %v19130_v17 }
 0x13a   : > { %14388 = vmatprep.subr.msk.bf16.mxu0 %vm619_vm1, %v17236_v40 }
 0x13d   : > { %926 = vmatpush1.bf16.msra.mxu0 %v912_v25 }
 0x13e   : > { %16988 = vmatprep.subr.bf16.mxu0 %v19128_v0 }
 0x140   : > { %14389 = vmatmul.mubr.msk.bf16.vlgmr.msra.gmra.mrb[8].mxu0 %vm615_vm2, %v672_v29 }
 0x141   : > { %16989 = vmatpush3.bf16.msra.mxu0 %v19325_v4  ;;  %16992 = vmatprep.mubr.msk.bf16.mxu0 %vm19129_vm0, %v19128_v0 }
 0x142   : > { %16990 = vmatprep.subr.bf16.mxu0 %v19128_v0 }
 0x145   : > { %16991 = vmatpush3.bf16.msra.mxu0 %v19330_v7 }
 0x146   : > { %1122 = vmatprep.subr.bf16.mxu0 %v17242_v43 }
 0x148   : > { %16993 = vmatmul.mubr.msk.bf16.vlgmr.msra.gmra.mrb[16].mxu0 %vm615_vm2, %v17239_v41 }
 0x149   : > { %1154 = vmatprep.mubr.bf16.mxu0 %v19130_v17  ;;  %1123 = vmatpush1.bf16.msra.mxu0 %v17240_v42 }
 0x14a   : > { %14412 = vmatprep.subr.msk.bf16.mxu0 %vm619_vm1, %v17246_v46 }
 0x14d   : > { %1125 = vmatpush1.bf16.msra.mxu0 %v1111_v50 }
 0x14e   : > { %1329 = vmatprep.subr.bf16.mxu0 %v17255_v52 }
 0x20b   : > { %v863_v53 = vpop.f32.mrb[12].mxu0 }
 0x20c   : > { %v865_v54 = vpop.f32.mrb[13].mxu0 }
 0x20d   : > { %v19455_v55 = vpop.f32.mrb[14].mxu0 }
 0x20e   : > { %v19457_v56 = vpop.f32.mrb[15].mxu0 }
 0x21b   : > { %v1054_v57 = vpop.f32.mrb[16].mxu0 }
 0x21c   : > { %v16994_v58 = vpop.f32.mrb[17].mxu0 }
 0x21d   : > { %v1057_v60 = vpop.f32.mrb[18].mxu0 }
 0x21e   : > { %v1070_v61 = vpack.c.bf16 %v1057_v60, %v1054_v57  ;;  %v16995_v62 = vpop.f32.mrb[19].mxu0  ;;  %v17267_v60 = vld [vmem:[%s22688_s5 + $0x384] ss:$16 sps:$4 sm:$0xff]  }
 0x21f   : > { %v14444_v62 = vld [vmem:[%s22687_s4 + $0x4] sm:$0xf] }
 0x220   : > { %14413 = vmatmul.mubr.msk.bf16.vlgmr.msra.gmra.mrb[8].mxu0 %vm615_vm2, %v1070_v61  ;;  %14415 = vmatmul.mubr.msk.bf16.vlgmr.msra.gmra.mrb[0].mxu1 %vm615_vm2, %v1070_v61  ;;  %v17282_v61 = vld [vmem:[%s22688_s5 + $0x584] ss:$16 sps:$4 sm:$0xff]  }
 0x221   : > { %16997 = vmatpush3.bf16.msra.mxu1 %v19325_v4  ;;  %17000 = vmatprep.mubr.msk.bf16.mxu1 %vm19129_vm0, %v19128_v0  ;;  %v17263_v4 = vld [vmem:[%s22737_s23 + $0xe0] ss:$16 sps:$4 sm:$0x3f]  }
 0x222   : > { %16998 = vmatprep.subr.bf16.mxu1 %v19128_v0  ;;  %1330 = vmatpush1.bf16.msra.mxu0 %v17253_v59  ;;  %v17259_v0 = vld [vmem:[%s22737_s23 + $0xe4] ss:$16 sps:$4 sm:$0x3f]   ;;  %v1318_v6 = vsel %vm619_vm1, %v17263_v4, 0  ;;  %v1461_v59 = vld [vmem:[%s22687_s4] sm:$0xf] }
 0x223   : > { %1361 = vmatprep.mubr.bf16.mxu0 %v19130_v17  ;;  %14436 = vmatprep.subr.msk.bf16.mxu0 %vm619_vm1, %v17259_v0  ;;  %v17288_v0 = vld [vmem:[%s22688_s5 + $0x5a4] ss:$16 sps:$4 sm:$0xff]  }
 0x224   : > { %v17273_v4 = vld [vmem:[%s22688_s5 + $0x3c4] ss:$16 sps:$4 sm:$0xff]  }
 0x225   : > { %16999 = vmatpush3.bf16.msra.mxu1 %v19330_v7  ;;  %v1324_v7 = vsel %vm619_vm1, %v17264_v5, 0  ;;  %v17286_v5 = vld [vmem:[%s22688_s5 + $0x5a0] ss:$16 sps:$4 sm:$0xff]  }
 0x226   : > { %1372 = vmatprep.subr.bf16.mxu1 %v17258_v63  ;;  %1332 = vmatpush1.bf16.msra.mxu0 %v1318_v6  ;;  %v17265_v63 = vld [vmem:[%s22688_s5 + $0x380] ss:$16 sps:$4 sm:$0xff]   ;;  %v17294_v6 = vld [vmem:[%s22688_s5 + $0x5c4] ss:$16 sps:$4 sm:$0xff]  }
 0x228   : > { %17001 = vmatmul.mubr.msk.bf16.vlgmr.msra.gmra.mrb[4].mxu1 %vm615_vm2, %v17252_v1  ;;  %v17270_v1 = vld [vmem:[%s22688_s5 + $0x3a4] ss:$16 sps:$4 sm:$0xff]  }
 0x229   : > { %1373 = vmatpush1.bf16.msra.mxu1 %v17256_v2  ;;  %1404 = vmatprep.mubr.bf16.mxu1 %v19130_v17  ;;  %v17280_v2 = vld [vmem:[%s22688_s5 + $0x580] ss:$16 sps:$4 sm:$0xff]  }
 0x22a   : > { %14438 = vmatprep.subr.msk.bf16.mxu1 %vm619_vm1, %v17261_v3  ;;  %v17268_v3 = vld [vmem:[%s22688_s5 + $0x3a0] ss:$16 sps:$4 sm:$0xff]  }
 0x22d   : > { %1375 = vmatpush1.bf16.msra.mxu1 %v1324_v7  ;;  %v17271_v7 = vld [vmem:[%s22688_s5 + $0x3c0] ss:$16 sps:$4 sm:$0xff]  }
 0x2fb   : > { %v1261_v8 = vpop.f32.mrb[4].mxu1 }
 0x2fc   : > { %v17002_v9 = vpop.f32.mrb[5].mxu1 }
 0x2fd   : > { %v1264_v10 = vpop.f32.mrb[6].mxu1  ;;  %v17292_v9 = vld [vmem:[%s22688_s5 + $0x5c0] ss:$16 sps:$4 sm:$0xff]  }
 0x2fe   : > { %v1277_v11 = vpack.c.bf16 %v1264_v10, %v1261_v8  ;;  %v17003_v12 = vpop.f32.mrb[7].mxu1  ;;  %v17276_v8 = vld [vmem:[%s22688_s5 + $0x3e4] ss:$16 sps:$4 sm:$0xff]  }
 0x2ff   : > { %v17300_v10 = vld [vmem:[%s22688_s5 + $0x5e4] ss:$16 sps:$4 sm:$0xff]  }
 0x300   : > { %14437 = vmatmul.mubr.msk.bf16.vlgmr.msra.gmra.mrb[8].mxu0 %vm615_vm2, %v1277_v11  ;;  %14439 = vmatmul.mubr.msk.bf16.vlgmr.msra.gmra.mrb[0].mxu1 %vm615_vm2, %v1277_v11  ;;  %v17274_v11 = vld [vmem:[%s22688_s5 + $0x3e0] ss:$16 sps:$4 sm:$0xff]   ;;  %v17279_v12 = vld [vmem:[%s22688_s5 + $0x404] ss:$16 sps:$4 sm:$0xff]  }
 0x301   : > { %1515 = vmatprep.mubr.bf16.mxu0 %v19130_v17  ;;  %1556 = vmatprep.mubr.bf16.mxu1 %v19130_v17 }
 0x3d3   : > { %v1363_v24 = vpop.f32.mrb[8].mxu0  ;;  %v1406_v25 = vpop.f32.mrb[0].mxu1 }
 0x3d4   : > { %v1445_v27 = vadd.f32 %v1428_v21, %v1363_v24  ;;  %v17028_v28 = vadd.f32 %v1406_v25, %v863_v53  ;;  %v1365_v29 = vpop.f32.mrb[9].mxu0  ;;  %v1408_v30 = vpop.f32.mrb[1].mxu1  ;;  %v17304_v24 = vld [vmem:[%s22688_s5 + $0x600] ss:$16 sps:$4 sm:$0xff]   ;;  %v17312_v25 = vld [vmem:[%s22688_s5 + $0x624] ss:$16 sps:$4 sm:$0xff]  }
 0x3d5   : > { %v1446_v31 = vadd.f32 %v1432_v22, %v1365_v29  ;;  %v17029_v32 = vadd.f32 %v1408_v30, %v865_v54  ;;  %v1367_v33 = vpop.f32.mrb[10].mxu0  ;;  %v1410_v34 = vpop.f32.mrb[2].mxu1  ;;  %v17318_v29 = vld [vmem:[%s22688_s5 + $0x644] ss:$16 sps:$4 sm:$0xff]   ;;  %v17289_v30 = vld [vmem:[%s22688_s5 + $0x440] ss:$16 sps:$4 sm:$0xff]  }
 0x3d6   : > { %v1447_v35 = vadd.f32 %v17028_v28, %v1436_v23  ;;  %v1449_v36 = vadd.f32 %v1428_v21, %v1367_v33  ;;  %v17030_v37 = vadd.f32 %v1410_v34, %v19455_v55  ;;  %v1369_v38 = vpop.f32.mrb[11].mxu0  ;;  %v1412_v39 = vpop.f32.mrb[3].mxu1  ;;  %v1453_v43 = vmax.f32 %v1445_v27, 0.0  ;;  %v17306_v21 = vld [vmem:[%s22688_s5 + $0x604] ss:$16 sps:$4 sm:$0xff]  }
 0x3d7   : > { %v1448_v40 = vadd.f32 %v17029_v32, %v1440_v26  ;;  %v1450_v41 = vadd.f32 %v1432_v22, %v1369_v38  ;;  %v17031_v42 = vadd.f32 %v1412_v39, %v19457_v56  ;;  %v1454_v46 = vmax.f32 %v1446_v31, 0.0  ;;  %v17277_v22 = vld [vmem:[%s22688_s5 + $0x400] ss:$16 sps:$4 sm:$0xff]   ;;  %v17291_v27 = vld [vmem:[%s22688_s5 + $0x444] ss:$16 sps:$4 sm:$0xff]  }
 0x3d8   : > { %v1457_v44 = vmax.f32 %v1449_v36, 0.0  ;;  %v1451_v45 = vadd.f32 %v17030_v37, %v1436_v23  ;;  %v1455_v49 = vmax.f32 %v1447_v35, 0.0  ;;  %v17285_v23 = vld [vmem:[%s22688_s5 + $0x424] ss:$16 sps:$4 sm:$0xff]   ;;  %v17310_v28 = vld [vmem:[%s22688_s5 + $0x620] ss:$16 sps:$4 sm:$0xff]  }
 0x3d9   : > { %v1458_v47 = vmax.f32 %v1450_v41, 0.0  ;;  %v1452_v48 = vadd.f32 %v17031_v42, %v1440_v26  ;;  %v1456_v52 = vmax.f32 %v1448_v40, 0.0  ;;  %v17283_v26 = vld [vmem:[%s22688_s5 + $0x420] ss:$16 sps:$4 sm:$0xff]   ;;  %v17297_v31 = vld [vmem:[%s22688_s5 + $0x464] ss:$16 sps:$4 sm:$0xff]  }
 0x3da   : > { %v1462_v50 = vpack.c.bf16 %v1457_v44, %v1453_v43  ;;  %v1459_v51 = vmax.f32 %v1451_v45, 0.0  ;;  %v17316_v32 = vld [vmem:[%s22688_s5 + $0x640] ss:$16 sps:$4 sm:$0xff]   ;;  %v17324_v33 = vld [vmem:[%s22688_s5 + $0x664] ss:$16 sps:$4 sm:$0xff]  }
 0x3db   : > { %v19525_v53 = vpack.c.bf16 %v1458_v47, %v1454_v46  ;;  %v1460_v54 = vmax.f32 %v1452_v48, 0.0  ;;  %v17295_v34 = vld [vmem:[%s22688_s5 + $0x460] ss:$16 sps:$4 sm:$0xff]   ;;  %v17303_v35 = vld [vmem:[%s22688_s5 + $0x484] ss:$16 sps:$4 sm:$0xff]  }
 0x3dc   : > { %v1464_v55 = vpack.c.bf16 %v1459_v51, %v1455_v49  ;;  %v19528_v57 = vsel %vm1470_vm3, %v1462_v50, 0  ;;  %v17322_v36 = vld [vmem:[%s22688_s5 + $0x660] ss:$16 sps:$4 sm:$0xff]   ;;  %v17330_v37 = vld [vmem:[%s22688_s5 + $0x684] ss:$16 sps:$4 sm:$0xff]  }
 0x3dd   : > { %v19530_v58 = vpack.c.bf16 %v1460_v54, %v1456_v52  ;;  %14440 = vmatprep.subr.msk.bf16.mxu0 %vm1470_vm3, %v19525_v53  ;;  %v17301_v38 = vld [vmem:[%s22688_s5 + $0x480] ss:$16 sps:$4 sm:$0xff]   ;;  %v17309_v39 = vld [vmem:[%s22688_s5 + $0x4a4] ss:$16 sps:$4 sm:$0xff]  }
 0x3de   : > { %1484 = vmatpush1.bf16.msra.mxu0 %v19528_v57  ;;  %v19536_v56 = vsel %vm1470_vm3, %v1464_v55, 0  ;;  %v17328_v40 = vld [vmem:[%s22688_s5 + $0x680] ss:$16 sps:$4 sm:$0xff]   ;;  %v17315_v42 = vld [vmem:[%s22688_s5 + $0x4c4] ss:$16 sps:$4 sm:$0xff]  }
 0x3df   : > { %14442 = vmatprep.subr.msk.bf16.mxu1 %vm1470_vm3, %v19530_v58  ;;  %14445 = vmatprep.subr.msk.bf16.mxu0 %vm1470_vm3, %v19525_v53  ;;  %v17307_v41 = vld [vmem:[%s22688_s5 + $0x4a0] ss:$16 sps:$4 sm:$0xff]   ;;  %v17321_v44 = vld [vmem:[%s22688_s5 + $0x4e4] ss:$16 sps:$4 sm:$0xff]  }
 0x3e0   : > { %1525 = vmatpush1.bf16.msra.mxu1 %v19536_v56  ;;  %v17313_v43 = vld [vmem:[%s22688_s5 + $0x4c0] ss:$16 sps:$4 sm:$0xff]   ;;  %v17327_v46 = vld [vmem:[%s22688_s5 + $0x504] ss:$16 sps:$4 sm:$0xff]  }
 0x3e1   : > { %14441 = vmatmul.mubr.msk.bf16.vlgmr.msra.gmra.mrb[20].mxu0 %vm1466_vm4, %v1461_v59  ;;  %14447 = vmatprep.subr.msk.bf16.mxu1 %vm1470_vm3, %v19530_v58  ;;  %v17319_v45 = vld [vmem:[%s22688_s5 + $0x4e0] ss:$16 sps:$4 sm:$0xff]   ;;  %v17333_v48 = vld [vmem:[%s22688_s5 + $0x524] ss:$16 sps:$4 sm:$0xff]  }
 0x3e2   : > { %1687 = vmatpush1.bf16.msra.mxu0 %v19528_v57  ;;  %1718 = vmatprep.mubr.bf16.mxu0 %v19130_v17  ;;  %v17325_v47 = vld [vmem:[%s22688_s5 + $0x500] ss:$16 sps:$4 sm:$0xff]   ;;  %v17336_v50 = vld [vmem:[%s22688_s5 + $0x6a4] ss:$16 sps:$4 sm:$0xff]  }
 0x3e3   : > { %14443 = vmatmul.mubr.msk.bf16.vlgmr.msra.gmra.mrb[8].mxu1 %vm1466_vm4, %v1461_v59  ;;  %2449 = vmatprep.subr.bf16.mxu0 %v17267_v60  ;;  %v17331_v49 = vld [vmem:[%s22688_s5 + $0x520] ss:$16 sps:$4 sm:$0xff]   ;;  %v17339_v52 = vld [vmem:[%s22688_s5 + $0x544] ss:$16 sps:$4 sm:$0xff]  }
 0x3e4   : > { %1728 = vmatpush1.bf16.msra.mxu1 %v19536_v56  ;;  %1759 = vmatprep.mubr.bf16.mxu1 %v19130_v17  ;;  %v17334_v51 = vld [vmem:[%s22688_s5 + $0x6a0] ss:$16 sps:$4 sm:$0xff]   ;;  %v17342_v55 = vld [vmem:[%s22688_s5 + $0x6c4] ss:$16 sps:$4 sm:$0xff]  }
 0x3e5   : > { %2490 = vmatprep.subr.bf16.mxu1 %v17282_v61  ;;  %v17337_v54 = vld [vmem:[%s22688_s5 + $0x540] ss:$16 sps:$4 sm:$0xff]   ;;  %v17345_v60 = vld [vmem:[%s22688_s5 + $0x564] ss:$16 sps:$4 sm:$0xff]  }
 0x3e6   : > { %v17340_v59 = vld [vmem:[%s22688_s5 + $0x6c0] ss:$16 sps:$4 sm:$0xff]  }
 0x3e7   : > { %v17343_v61 = vld [vmem:[%s22688_s5 + $0x560] ss:$16 sps:$4 sm:$0xff]  }
 0x3e9   : > { %14446 = vmatmul.mubr.msk.bf16.vlgmr.msra.gmra.mrb[24].mxu0 %vm1466_vm4, %v14444_v62 }
 0x3ea   : > { %2450 = vmatpush1.bf16.msra.mxu0 %v17265_v63  ;;  %v17346_v63 = vld [vmem:[%s22688_s5 + $0x6e0] ss:$16 sps:$4 sm:$0xff]  }
 0x3eb   : > { %14448 = vmatmul.mubr.msk.bf16.vlgmr.msra.gmra.mrb[12].mxu1 %vm1466_vm4, %v14444_v62  ;;  %2451 = vmatprep.subr.bf16.mxu0 %v17270_v1  ;;  %v17348_v62 = vld [vmem:[%s22688_s5 + $0x6e4] ss:$16 sps:$4 sm:$0xff]   ;;  %v17351_v1 = vld [vmem:[%s22688_s5 + $0x58c] ss:$16 sps:$4 sm:$0xff]  }
 0x3ec   : > { %2491 = vmatpush1.bf16.msra.mxu1 %v17280_v2  ;;  %v17354_v2 = vld [vmem:[%s22688_s5 + $0x38c] ss:$16 sps:$4 sm:$0xff]  }
 0x3ed   : > { %2492 = vmatprep.subr.bf16.mxu1 %v17288_v0 }
 0x3ee   : > { %2452 = vmatpush1.bf16.msra.mxu0 %v17268_v3 }
 0x3ef   : > { %2453 = vmatprep.subr.bf16.mxu0 %v17273_v4 }
 0x3f0   : > { %2493 = vmatpush1.bf16.msra.mxu1 %v17286_v5 }
 0x3f1   : > { %2494 = vmatprep.subr.bf16.mxu1 %v17294_v6 }
 0x3f2   : > { %2454 = vmatpush1.bf16.msra.mxu0 %v17271_v7 }
 0x3f3   : > { %2455 = vmatprep.subr.bf16.mxu0 %v17276_v8 }
 0x3f4   : > { %2495 = vmatpush1.bf16.msra.mxu1 %v17292_v9 }
 0x3f5   : > { %2496 = vmatprep.subr.bf16.mxu1 %v17300_v10 }
 0x3f6   : > { %2456 = vmatpush1.bf16.msra.mxu0 %v17274_v11 }
 0x3f7   : > { %2457 = vmatprep.subr.bf16.mxu0 %v17279_v12 }
 0x3f8   : > { %2497 = vmatpush1.bf16.msra.mxu1 %v17298_v16 }
 0x3f9   : > { %2498 = vmatprep.subr.bf16.mxu1 %v17306_v21 }
 0x3fa   : > { %2458 = vmatpush1.bf16.msra.mxu0 %v17277_v22  ;;  %v17349_v22 = vld [vmem:[%s22688_s5 + $0x588] ss:$16 sps:$4 sm:$0xff]  }
 0x3fb   : > { %2459 = vmatprep.subr.bf16.mxu0 %v17285_v23 }
 0x3fc   : > { %2499 = vmatpush1.bf16.msra.mxu1 %v17304_v24 }
 0x3fd   : > { %2500 = vmatprep.subr.bf16.mxu1 %v17312_v25 }
 0x3fe   : > { %2460 = vmatpush1.bf16.msra.mxu0 %v17283_v26 }
 0x3ff   : > { %2461 = vmatprep.subr.bf16.mxu0 %v17291_v27 }
 0x400   : > { %2501 = vmatpush1.bf16.msra.mxu1 %v17310_v28  ;;  %v17352_v28 = vld [vmem:[%s22688_s5 + $0x388] ss:$16 sps:$4 sm:$0xff]  }
 0x401   : > { %2502 = vmatprep.subr.bf16.mxu1 %v17318_v29  ;;  %v17357_v29 = vld [vmem:[%s22688_s5 + $0x5ac] ss:$16 sps:$4 sm:$0xff]  }
 0x402   : > { %2462 = vmatpush1.bf16.msra.mxu0 %v17289_v30 }
 0x403   : > { %2463 = vmatprep.subr.bf16.mxu0 %v17297_v31 }
 0x404   : > { %2503 = vmatpush1.bf16.msra.mxu1 %v17316_v32  ;;  %v17360_v32 = vld [vmem:[%s22688_s5 + $0x3ac] ss:$16 sps:$4 sm:$0xff]  }
 0x405   : > { %2504 = vmatprep.subr.bf16.mxu1 %v17324_v33  ;;  %v17355_v33 = vld [vmem:[%s22688_s5 + $0x5a8] ss:$16 sps:$4 sm:$0xff]  }
 0x406   : > { %2464 = vmatpush1.bf16.msra.mxu0 %v17295_v34  ;;  %v17363_v34 = vld [vmem:[%s22688_s5 + $0x5cc] ss:$16 sps:$4 sm:$0xff]  }
 0x407   : > { %2465 = vmatprep.subr.bf16.mxu0 %v17303_v35  ;;  %v17358_v35 = vld [vmem:[%s22688_s5 + $0x3a8] ss:$16 sps:$4 sm:$0xff]  }
 0x408   : > { %2505 = vmatpush1.bf16.msra.mxu1 %v17322_v36  ;;  %v17366_v36 = vld [vmem:[%s22688_s5 + $0x3cc] ss:$16 sps:$4 sm:$0xff]  }
 0x409   : > { %2506 = vmatprep.subr.bf16.mxu1 %v17330_v37  ;;  %v17361_v37 = vld [vmem:[%s22688_s5 + $0x5c8] ss:$16 sps:$4 sm:$0xff]  }
 0x40a   : > { %2466 = vmatpush1.bf16.msra.mxu0 %v17301_v38  ;;  %v17369_v38 = vld [vmem:[%s22688_s5 + $0x5ec] ss:$16 sps:$4 sm:$0xff]  }
 0x40b   : > { %2467 = vmatprep.subr.bf16.mxu0 %v17309_v39  ;;  %v17364_v39 = vld [vmem:[%s22688_s5 + $0x3c8] ss:$16 sps:$4 sm:$0xff]  }
 0x40c   : > { %2507 = vmatpush1.bf16.msra.mxu1 %v17328_v40  ;;  %v17372_v40 = vld [vmem:[%s22688_s5 + $0x3ec] ss:$16 sps:$4 sm:$0xff]  }
 0x40d   : > { %2508 = vmatprep.subr.bf16.mxu1 %v17336_v50  ;;  %v17387_v50 = vld [vmem:[%s22688_s5 + $0x64c] ss:$16 sps:$4 sm:$0xff]  }
 0x40e   : > { %2468 = vmatpush1.bf16.msra.mxu0 %v17307_v41  ;;  %v17367_v41 = vld [vmem:[%s22688_s5 + $0x5e8] ss:$16 sps:$4 sm:$0xff]  }
 0x40f   : > { %2469 = vmatprep.subr.bf16.mxu0 %v17315_v42  ;;  %v17375_v42 = vld [vmem:[%s22688_s5 + $0x60c] ss:$16 sps:$4 sm:$0xff]  }
 0x410   : > { %2509 = vmatpush1.bf16.msra.mxu1 %v17334_v51  ;;  %v17382_v51 = vld [vmem:[%s22688_s5 + $0x428] ss:$16 sps:$4 sm:$0xff]  }
 0x411   : > { %2510 = vmatprep.subr.bf16.mxu1 %v17342_v55  ;;  %v17393_v55 = vld [vmem:[%s22688_s5 + $0x66c] ss:$16 sps:$4 sm:$0xff]  }
 0x412   : > { %2470 = vmatpush1.bf16.msra.mxu0 %v17313_v43  ;;  %v17370_v43 = vld [vmem:[%s22688_s5 + $0x3e8] ss:$16 sps:$4 sm:$0xff]  }
 0x413   : > { %2471 = vmatprep.subr.bf16.mxu0 %v17321_v44  ;;  %v17378_v44 = vld [vmem:[%s22688_s5 + $0x40c] ss:$16 sps:$4 sm:$0xff]  }
 0x414   : > { %2511 = vmatpush1.bf16.msra.mxu1 %v17340_v59  ;;  %v17388_v59 = vld [vmem:[%s22688_s5 + $0x448] ss:$16 sps:$4 sm:$0xff]  }
 0x415   : > { %2512 = vmatprep.subr.bf16.mxu1 %v17348_v62  ;;  %v17399_v62 = vld [vmem:[%s22688_s5 + $0x68c] ss:$16 sps:$4 sm:$0xff]  }
 0x416   : > { %2472 = vmatpush1.bf16.msra.mxu0 %v17319_v45  ;;  %v17373_v45 = vld [vmem:[%s22688_s5 + $0x608] ss:$16 sps:$4 sm:$0xff]  }
 0x417   : > { %2473 = vmatprep.subr.bf16.mxu0 %v17327_v46  ;;  %v17381_v46 = vld [vmem:[%s22688_s5 + $0x62c] ss:$16 sps:$4 sm:$0xff]  }
 0x418   : > { %2513 = vmatpush1.bf16.msra.mxu1 %v17346_v63  ;;  %v17394_v63 = vld [vmem:[%s22688_s5 + $0x468] ss:$16 sps:$4 sm:$0xff]  }
 0x419   : > { %2531 = vmatprep.subr.bf16.mxu1 %v17354_v2  ;;  %v17397_v2 = vld [vmem:[%s22688_s5 + $0x688] ss:$16 sps:$4 sm:$0xff]  }
 0x41a   : > { %2474 = vmatpush1.bf16.msra.mxu0 %v17325_v47  ;;  %v17376_v47 = vld [vmem:[%s22688_s5 + $0x408] ss:$16 sps:$4 sm:$0xff]  }
 0x41b   : > { %2475 = vmatprep.subr.bf16.mxu0 %v17333_v48  ;;  %v17384_v48 = vld [vmem:[%s22688_s5 + $0x42c] ss:$16 sps:$4 sm:$0xff]  }
 0x41e   : > { %2476 = vmatpush1.bf16.msra.mxu0 %v17331_v49  ;;  %v17379_v49 = vld [vmem:[%s22688_s5 + $0x628] ss:$16 sps:$4 sm:$0xff]  }
 0x41f   : > { %2477 = vmatprep.subr.bf16.mxu0 %v17339_v52  ;;  %v17390_v52 = vld [vmem:[%s22688_s5 + $0x44c] ss:$16 sps:$4 sm:$0xff]  }
 0x422   : > { %2478 = vmatpush1.bf16.msra.mxu0 %v17337_v54  ;;  %v17385_v54 = vld [vmem:[%s22688_s5 + $0x648] ss:$16 sps:$4 sm:$0xff]  }
 0x423   : > { %2479 = vmatprep.subr.bf16.mxu0 %v17345_v60  ;;  %v17396_v60 = vld [vmem:[%s22688_s5 + $0x46c] ss:$16 sps:$4 sm:$0xff]  }
 0x426   : > { %2480 = vmatpush1.bf16.msra.mxu0 %v17343_v61  ;;  %v17391_v61 = vld [vmem:[%s22688_s5 + $0x668] ss:$16 sps:$4 sm:$0xff]  }
 0x427   : > { %2572 = vmatprep.subr.bf16.mxu0 %v17351_v1  ;;  %v17402_v1 = vld [vmem:[%s22688_s5 + $0x48c] ss:$16 sps:$4 sm:$0xff]  }
 0x4b4   : > { %v19733_v0 = vpop.f32.mrb[20].mxu0 }
 0x4b5   : > { %v19735_v3 = vpop.f32.mrb[21].mxu0 }
 0x4b6   : > { %v19737_v4 = vpop.f32.mrb[8].mxu1  ;;  %v1521_v5 = vpop.f32.mrb[22].mxu0 }
 0x4b7   : > { %v19739_v6 = vpop.f32.mrb[9].mxu1  ;;  %v1522_v7 = vpop.f32.mrb[23].mxu0  ;;  %v17405_v5 = vld [vmem:[%s22688_s5 + $0x6ac] ss:$16 sps:$4 sm:$0xff]  }
 0x4b8   : > { %v1562_v8 = vpop.f32.mrb[10].mxu1  ;;  %v17400_v7 = vld [vmem:[%s22688_s5 + $0x488] ss:$16 sps:$4 sm:$0xff]  }
 0x4b9   : > { %v1563_v9 = vpop.f32.mrb[11].mxu1  ;;  %v17408_v8 = vld [vmem:[%s22688_s5 + $0x4ac] ss:$16 sps:$4 sm:$0xff]  }
 0x4ba   : > { %v17403_v9 = vld [vmem:[%s22688_s5 + $0x6a8] ss:$16 sps:$4 sm:$0xff]  }
 0x4bc   : > { %v1720_v10 = vpop.f32.mrb[24].mxu0 }
 0x4bd   : > { %v19741_v11 = vpack.c.bf16 %v1720_v10, %v1720_v10  ;;  %v1722_v12 = vpop.f32.mrb[25].mxu0  ;;  %v17411_v10 = vld [vmem:[%s22688_s5 + $0x6cc] ss:$16 sps:$4 sm:$0xff]  }
 0x4be   : > { %v1882_v16 = vpack.c.bf16 %v1722_v12, %v1722_v12  ;;  %v1761_v21 = vpop.f32.mrb[12].mxu1  ;;  %v1724_v23 = vpop.f32.mrb[26].mxu0  ;;  %v17406_v12 = vld [vmem:[%s22688_s5 + $0x4a8] ss:$16 sps:$4 sm:$0xff]  }
 0x4bf   : > { %v1763_v24 = vpop.f32.mrb[13].mxu1  ;;  %v1725_v25 = vpop.f32.mrb[27].mxu0  ;;  %v19752_v30 = vpack.c.bf16 %v1761_v21, %v1761_v21  ;;  %v17409_v21 = vld [vmem:[%s22688_s5 + $0x6c8] ss:$16 sps:$4 sm:$0xff]  }
 0x4c0   : > { %v1884_v26 = vpack.c.bf16 %v1763_v24, %v1763_v24  ;;  %v1765_v27 = vpop.f32.mrb[14].mxu1  ;;  %2481 = vmatprep.mubr.bf16.mxu0 %v1882_v16  ;;  %v17412_v23 = vld [vmem:[%s22688_s5 + $0x4c8] ss:$16 sps:$4 sm:$0xff]   ;;  %v17420_v24 = vld [vmem:[%s22688_s5 + $0x4ec] ss:$16 sps:$4 sm:$0xff]  }
 0x4c1   : > { %v1766_v31 = vpop.f32.mrb[15].mxu1  ;;  %2482 = vmatmul.mubr.bf16.vlgmr.msra.gmra.mrb[28].mxu0 %v19741_v11  ;;  %v17415_v25 = vld [vmem:[%s22688_s5 + $0x6e8] ss:$16 sps:$4 sm:$0xff]  }
 0x4c2   : > { %2573 = vmatpush1.bf16.msra.mxu0 %v17349_v22  ;;  %14673 = vmatprep.mubr.msk.bf16.mxu1 %vm2445_vm5, %v1884_v26  ;;  %v17417_v22 = vld [vmem:[%s22688_s5 + $0x6ec] ss:$16 sps:$4 sm:$0xff]   ;;  %v17418_v27 = vld [vmem:[%s22688_s5 + $0x4e8] ss:$16 sps:$4 sm:$0xff]   ;;  %v17429_v31 = vld [vmem:[%s22688_s5 + $0x24] ss:$16 sps:$4 sm:$0xff]  }
 0x4c3   : > { %14674 = vmatprep.mubr.msk.bf16.mxu0 %vm2445_vm5, %v1884_v26  ;;  %2523 = vmatmul.mubr.bf16.vlgmr.msra.gmra.mrb[16].mxu1 %v19752_v30  ;;  %v17423_v26 = vld [vmem:[%s22688_s5 + $0x4] ss:$16 sps:$4 sm:$0xff]  }
 0x4c4   : > { %2532 = vmatpush1.bf16.msra.mxu1 %v17352_v28  ;;  %2574 = vmatprep.subr.bf16.mxu0 %v17357_v29  ;;  %v17426_v28 = vld [vmem:[%s22688_s5 + $0x50c] ss:$16 sps:$4 sm:$0xff]   ;;  %v17421_v29 = vld [vmem:[%s22688_s5] ss:$16 sps:$4 sm:$0xff]  }
 0x4c5   : > { %2533 = vmatprep.subr.bf16.mxu1 %v17360_v32  ;;  %2563 = vmatprep.mubr.bf16.mxu1 %v1882_v16  ;;  %v17414_v16 = vld [vmem:[%s22688_s5 + $0x4cc] ss:$16 sps:$4 sm:$0xff]   ;;  %v19901_v32 = vpack.c.bf16 %v19735_v3, %v19735_v3  ;;  %v17427_v3 = vld [vmem:[%s22688_s5 + $0x20] ss:$16 sps:$4 sm:$0xff]  }
 0x4c6   : > { %2575 = vmatpush1.bf16.msra.mxu0 %v17355_v33  ;;  %v17424_v33 = vld [vmem:[%s22688_s5 + $0x508] ss:$16 sps:$4 sm:$0xff]  }
 0x4c7   : > { %2576 = vmatprep.subr.bf16.mxu0 %v17363_v34  ;;  %v17432_v34 = vld [vmem:[%s22688_s5 + $0x52c] ss:$16 sps:$4 sm:$0xff]  }
 0x4c8   : > { %2534 = vmatpush1.bf16.msra.mxu1 %v17358_v35  ;;  %v17435_v35 = vld [vmem:[%s22688_s5 + $0x44] ss:$16 sps:$4 sm:$0xff]  }
 0x4c9   : > { %2535 = vmatprep.subr.bf16.mxu1 %v17366_v36  ;;  %v17438_v36 = vld [vmem:[%s22688_s5 + $0x54c] ss:$16 sps:$4 sm:$0xff]  }
 0x4ca   : > { %2577 = vmatpush1.bf16.msra.mxu0 %v17361_v37  ;;  %v17433_v37 = vld [vmem:[%s22688_s5 + $0x40] ss:$16 sps:$4 sm:$0xff]  }
 0x4cb   : > { %2578 = vmatprep.subr.bf16.mxu0 %v17369_v38  ;;  %v17441_v38 = vld [vmem:[%s22688_s5 + $0x64] ss:$16 sps:$4 sm:$0xff]  }
 0x4cc   : > { %2536 = vmatpush1.bf16.msra.mxu1 %v17364_v39  ;;  %v17436_v39 = vld [vmem:[%s22688_s5 + $0x548] ss:$16 sps:$4 sm:$0xff]  }
 0x4cd   : > { %2537 = vmatprep.subr.bf16.mxu1 %v17372_v40  ;;  %v17444_v40 = vld [vmem:[%s22688_s5 + $0x56c] ss:$16 sps:$4 sm:$0xff]  }
 0x4ce   : > { %2579 = vmatpush1.bf16.msra.mxu0 %v17367_v41  ;;  %v17439_v41 = vld [vmem:[%s22688_s5 + $0x60] ss:$16 sps:$4 sm:$0xff]  }
 0x4cf   : > { %2580 = vmatprep.subr.bf16.mxu0 %v17375_v42  ;;  %v17447_v42 = vld [vmem:[%s22688_s5 + $0x84] ss:$16 sps:$4 sm:$0xff]  }
 0x4d0   : > { %2538 = vmatpush1.bf16.msra.mxu1 %v17370_v43  ;;  %v17442_v43 = vld [vmem:[%s22688_s5 + $0x568] ss:$16 sps:$4 sm:$0xff]  }
 0x4d1   : > { %2539 = vmatprep.subr.bf16.mxu1 %v17378_v44  ;;  %v17450_v44 = vld [vmem:[%s22688_s5 + $0x204] ss:$16 sps:$4 sm:$0xff]  }
 0x4d2   : > { %2581 = vmatpush1.bf16.msra.mxu0 %v17373_v45  ;;  %v17445_v45 = vld [vmem:[%s22688_s5 + $0x80] ss:$16 sps:$4 sm:$0xff]  }
 0x4d3   : > { %2582 = vmatprep.subr.bf16.mxu0 %v17381_v46  ;;  %v17453_v46 = vld [vmem:[%s22688_s5 + $0xa4] ss:$16 sps:$4 sm:$0xff]  }
 0x4d4   : > { %2540 = vmatpush1.bf16.msra.mxu1 %v17376_v47  ;;  %v17448_v47 = vld [vmem:[%s22688_s5 + $0x200] ss:$16 sps:$4 sm:$0xff]  }
 0x4d5   : > { %2541 = vmatprep.subr.bf16.mxu1 %v17384_v48  ;;  %v17456_v48 = vld [vmem:[%s22688_s5 + $0x224] ss:$16 sps:$4 sm:$0xff]  }
 0x4d6   : > { %2583 = vmatpush1.bf16.msra.mxu0 %v17379_v49  ;;  %v19961_v49 = vpack.c.bf16 %v19739_v6, %v19739_v6  ;;  %v17454_v6 = vld [vmem:[%s22688_s5 + $0x220] ss:$16 sps:$4 sm:$0xff]  }
 0x4d7   : > { %2584 = vmatprep.subr.bf16.mxu0 %v17387_v50  ;;  %v17451_v50 = vld [vmem:[%s22688_s5 + $0xa0] ss:$16 sps:$4 sm:$0xff]  }
 0x4d8   : > { %2542 = vmatpush1.bf16.msra.mxu1 %v17382_v51  ;;  %v17459_v51 = vld [vmem:[%s22688_s5 + $0xc4] ss:$16 sps:$4 sm:$0xff]  }
 0x4d9   : > { %2543 = vmatprep.subr.bf16.mxu1 %v17390_v52  ;;  %v17462_v52 = vld [vmem:[%s22688_s5 + $0x244] ss:$16 sps:$4 sm:$0xff]  }
 0x4da   : > { %2585 = vmatpush1.bf16.msra.mxu0 %v17385_v54  ;;  %v17465_v54 = vld [vmem:[%s22688_s5 + $0xe4] ss:$16 sps:$4 sm:$0xff]  }
 0x4db   : > { %2586 = vmatprep.subr.bf16.mxu0 %v17393_v55  ;;  %v17460_v55 = vld [vmem:[%s22688_s5 + $0x240] ss:$16 sps:$4 sm:$0xff]  }
 0x4dc   : > { %2544 = vmatpush1.bf16.msra.mxu1 %v17388_v59  ;;  %v17468_v59 = vld [vmem:[%s22688_s5 + $0x264] ss:$16 sps:$4 sm:$0xff]  }
 0x4dd   : > { %2545 = vmatprep.subr.bf16.mxu1 %v17396_v60  ;;  %v17463_v60 = vld [vmem:[%s22688_s5 + $0xe0] ss:$16 sps:$4 sm:$0xff]  }
 0x4de   : > { %2587 = vmatpush1.bf16.msra.mxu0 %v17391_v61  ;;  %v17471_v61 = vld [vmem:[%s22688_s5 + $0x104] ss:$16 sps:$4 sm:$0xff]  }
 0x4df   : > { %2588 = vmatprep.subr.bf16.mxu0 %v17399_v62  ;;  %v17466_v62 = vld [vmem:[%s22688_s5 + $0x260] ss:$16 sps:$4 sm:$0xff]  }
 0x4e0   : > { %2546 = vmatpush1.bf16.msra.mxu1 %v17394_v63  ;;  %v17474_v63 = vld [vmem:[%s22688_s5 + $0x284] ss:$16 sps:$4 sm:$0xff]  }
 0x4e1   : > { %2547 = vmatprep.subr.bf16.mxu1 %v17402_v1  ;;  %v17469_v1 = vld [vmem:[%s22688_s5 + $0x100] ss:$16 sps:$4 sm:$0xff]  }
 0x4e2   : > { %2589 = vmatpush1.bf16.msra.mxu0 %v17397_v2  ;;  %v17477_v2 = vld [vmem:[%s22688_s5 + $0x124] ss:$16 sps:$4 sm:$0xff]  }
 0x4e3   : > { %2590 = vmatprep.subr.bf16.mxu0 %v17405_v5  ;;  %v17472_v5 = vld [vmem:[%s22688_s5 + $0x280] ss:$16 sps:$4 sm:$0xff]  }
 0x4e4   : > { %2548 = vmatpush1.bf16.msra.mxu1 %v17400_v7  ;;  %v17480_v7 = vld [vmem:[%s22688_s5 + $0x2a4] ss:$16 sps:$4 sm:$0xff]  }
 0x4e5   : > { %2549 = vmatprep.subr.bf16.mxu1 %v17408_v8  ;;  %v17475_v8 = vld [vmem:[%s22688_s5 + $0x120] ss:$16 sps:$4 sm:$0xff]  }
 0x4e6   : > { %2591 = vmatpush1.bf16.msra.mxu0 %v17403_v9  ;;  %v17483_v9 = vld [vmem:[%s22688_s5 + $0x144] ss:$16 sps:$4 sm:$0xff]  }
 0x4e7   : > { %2592 = vmatprep.subr.bf16.mxu0 %v17411_v10  ;;  %v17478_v10 = vld [vmem:[%s22688_s5 + $0x2a0] ss:$16 sps:$4 sm:$0xff]  }
 0x4e8   : > { %2550 = vmatpush1.bf16.msra.mxu1 %v17406_v12  ;;  %v17486_v12 = vld [vmem:[%s22688_s5 + $0x2c4] ss:$16 sps:$4 sm:$0xff]  }
 0x4e9   : > { %2551 = vmatprep.subr.bf16.mxu1 %v17414_v16  ;;  %v17481_v16 = vld [vmem:[%s22688_s5 + $0x140] ss:$16 sps:$4 sm:$0xff]  }
 0x4ea   : > { %2593 = vmatpush1.bf16.msra.mxu0 %v17409_v21  ;;  %v17489_v21 = vld [vmem:[%s22688_s5 + $0x164] ss:$16 sps:$4 sm:$0xff]  }
 0x4eb   : > { %2594 = vmatprep.subr.bf16.mxu0 %v17417_v22  ;;  %v17484_v22 = vld [vmem:[%s22688_s5 + $0x2c0] ss:$16 sps:$4 sm:$0xff]  }
 0x4ec   : > { %2552 = vmatpush1.bf16.msra.mxu1 %v17412_v23  ;;  %v17492_v23 = vld [vmem:[%s22688_s5 + $0x2e4] ss:$16 sps:$4 sm:$0xff]  }
 0x4ed   : > { %2553 = vmatprep.subr.bf16.mxu1 %v17420_v24  ;;  %v17487_v24 = vld [vmem:[%s22688_s5 + $0x160] ss:$16 sps:$4 sm:$0xff]  }
 0x4ee   : > { %2595 = vmatpush1.bf16.msra.mxu0 %v17415_v25  ;;  %v17495_v25 = vld [vmem:[%s22688_s5 + $0x184] ss:$16 sps:$4 sm:$0xff]  }
 0x4ef   : > { %3176 = vmatprep.subr.bf16.mxu0 %v17423_v26  ;;  %v17490_v26 = vld [vmem:[%s22688_s5 + $0x2e0] ss:$16 sps:$4 sm:$0xff]  }
 0x4f0   : > { %2554 = vmatpush1.bf16.msra.mxu1 %v17418_v27  ;;  %v17498_v27 = vld [vmem:[%s22688_s5 + $0x304] ss:$16 sps:$4 sm:$0xff]  }
 0x4f1   : > { %2605 = vmatmul.mubr.bf16.vlgmr.msra.gmra.mrb[32].mxu0 %v19752_v30  ;;  %2555 = vmatprep.subr.bf16.mxu1 %v17426_v28  ;;  %v17430_v30 = vld [vmem:[%s22688_s5 + $0x528] ss:$16 sps:$4 sm:$0xff]   ;;  %v17493_v28 = vld [vmem:[%s22688_s5 + $0x180] ss:$16 sps:$4 sm:$0xff]  }
 0x4f2   : > { %3177 = vmatpush1.bf16.msra.mxu0 %v17421_v29  ;;  %3208 = vmatprep.mubr.bf16.mxu0 %v19901_v32  ;;  %v17501_v29 = vld [vmem:[%s22688_s5 + $0x1a4] ss:$16 sps:$4 sm:$0xff]  }
 0x4f3   : > { %3178 = vmatprep.subr.bf16.mxu0 %v17429_v31  ;;  %v17496_v31 = vld [vmem:[%s22688_s5 + $0x300] ss:$16 sps:$4 sm:$0xff]  }
 0x4f4   : > { %2556 = vmatpush1.bf16.msra.mxu1 %v17424_v33  ;;  %v17504_v33 = vld [vmem:[%s22688_s5 + $0x324] ss:$16 sps:$4 sm:$0xff]  }
 0x4f5   : > { %2557 = vmatprep.subr.bf16.mxu1 %v17432_v34  ;;  %v17499_v34 = vld [vmem:[%s22688_s5 + $0x1a0] ss:$16 sps:$4 sm:$0xff]  }
 0x4f6   : > { %3179 = vmatpush1.bf16.msra.mxu0 %v17427_v3  ;;  %v17507_v3 = vld [vmem:[%s22688_s5 + $0x1c4] ss:$16 sps:$4 sm:$0xff]  }
 0x4f7   : > { %3180 = vmatprep.subr.bf16.mxu0 %v17435_v35  ;;  %v17502_v35 = vld [vmem:[%s22688_s5 + $0x320] ss:$16 sps:$4 sm:$0xff]  }
 0x4f8   : > { %2558 = vmatpush1.bf16.msra.mxu1 %v17430_v30  ;;  %v17510_v30 = vld [vmem:[%s22688_s5 + $0x344] ss:$16 sps:$4 sm:$0xff]  }
 0x4f9   : > { %2559 = vmatprep.subr.bf16.mxu1 %v17438_v36  ;;  %v17505_v36 = vld [vmem:[%s22688_s5 + $0x1c0] ss:$16 sps:$4 sm:$0xff]  }
 0x4fa   : > { %3181 = vmatpush1.bf16.msra.mxu0 %v17433_v37  ;;  %v17513_v37 = vld [vmem:[%s22688_s5 + $0x1e4] ss:$16 sps:$4 sm:$0xff]  }
 0x4fb   : > { %3182 = vmatprep.subr.bf16.mxu0 %v17441_v38  ;;  %v17508_v38 = vld [vmem:[%s22688_s5 + $0x340] ss:$16 sps:$4 sm:$0xff]  }
 0x4fc   : > { %2560 = vmatpush1.bf16.msra.mxu1 %v17436_v39  ;;  %v17516_v39 = vld [vmem:[%s22688_s5 + $0x364] ss:$16 sps:$4 sm:$0xff]  }
 0x4fd   : > { %2561 = vmatprep.subr.bf16.mxu1 %v17444_v40  ;;  %v17511_v40 = vld [vmem:[%s22688_s5 + $0x1e0] ss:$16 sps:$4 sm:$0xff]  }
 0x4fe   : > { %3183 = vmatpush1.bf16.msra.mxu0 %v17439_v41  ;;  %v17519_v41 = vld [vmem:[%s22688_s5 + $0x20c] ss:$16 sps:$4 sm:$0xff]  }
 0x4ff   : > { %3184 = vmatprep.subr.bf16.mxu0 %v17447_v42  ;;  %v17514_v42 = vld [vmem:[%s22688_s5 + $0x360] ss:$16 sps:$4 sm:$0xff]  }
 0x500   : > { %2562 = vmatpush1.bf16.msra.mxu1 %v17442_v43  ;;  %v17522_v43 = vld [vmem:[%s22688_s5 + $0xc] ss:$16 sps:$4 sm:$0xff]  }
 0x501   : > { %3217 = vmatprep.subr.bf16.mxu1 %v17450_v44  ;;  %v17517_v44 = vld [vmem:[%s22688_s5 + $0x208] ss:$16 sps:$4 sm:$0xff]  }
 0x502   : > { %3185 = vmatpush1.bf16.msra.mxu0 %v17445_v45  ;;  %v20103_v45 = vpack.c.bf16 %v19733_v0, %v19733_v0  ;;  %v17528_v0 = vld [vmem:[%s22688_s5 + $0x2c] ss:$16 sps:$4 sm:$0xff]  }
 0x503   : > { %2564 = vmatmul.mubr.bf16.vlgmr.msra.gmra.mrb[20].mxu1 %v19741_v11  ;;  %3186 = vmatprep.subr.bf16.mxu0 %v17453_v46  ;;  %v17457_v11 = vld [vmem:[%s22688_s5 + $0xc0] ss:$16 sps:$4 sm:$0xff]   ;;  %v17525_v46 = vld [vmem:[%s22688_s5 + $0x22c] ss:$16 sps:$4 sm:$0xff]  }
 0x504   : > { %3218 = vmatpush1.bf16.msra.mxu1 %v17448_v47  ;;  %14787 = vmatprep.mubr.msk.bf16.mxu1 %vm2445_vm5, %v19961_v49  ;;  %v17520_v47 = vld [vmem:[%s22688_s5 + $0x8] ss:$16 sps:$4 sm:$0xff]  }
 0x505   : > { %3219 = vmatprep.subr.bf16.mxu1 %v17456_v48  ;;  %v20113_v48 = vpack.c.bf16 %v19737_v4, %v19737_v4  ;;  %v17531_v4 = vld [vmem:[%s22688_s5 + $0x24c] ss:$16 sps:$4 sm:$0xff]  }
 0x506   : > { %3187 = vmatpush1.bf16.msra.mxu0 %v17451_v50  ;;  %v17523_v50 = vld [vmem:[%s22688_s5 + $0x228] ss:$16 sps:$4 sm:$0xff]  }
 0x507   : > { %3188 = vmatprep.subr.bf16.mxu0 %v17459_v51  ;;  %v17526_v51 = vld [vmem:[%s22688_s5 + $0x28] ss:$16 sps:$4 sm:$0xff]  }
 0x508   : > { %3220 = vmatpush1.bf16.msra.mxu1 %v17454_v6  ;;  %v17529_v6 = vld [vmem:[%s22688_s5 + $0x248] ss:$16 sps:$4 sm:$0xff]  }
 0x509   : > { %3221 = vmatprep.subr.bf16.mxu1 %v17462_v52  ;;  %v17537_v52 = vld [vmem:[%s22688_s5 + $0x26c] ss:$16 sps:$4 sm:$0xff]  }
 0x50a   : > { %3189 = vmatpush1.bf16.msra.mxu0 %v17457_v11  ;;  %v17540_v11 = vld [vmem:[%s22688_s5 + $0x6c] ss:$16 sps:$4 sm:$0xff]  }
 0x50b   : > { %3190 = vmatprep.subr.bf16.mxu0 %v17465_v54  ;;  %v17535_v54 = vld [vmem:[%s22688_s5 + $0x268] ss:$16 sps:$4 sm:$0xff]  }
 0x50c   : > { %3222 = vmatpush1.bf16.msra.mxu1 %v17460_v55  ;;  %v17543_v55 = vld [vmem:[%s22688_s5 + $0x28c] ss:$16 sps:$4 sm:$0xff]  }
 0x50d   : > { %3223 = vmatprep.subr.bf16.mxu1 %v17468_v59  ;;  %v17538_v59 = vld [vmem:[%s22688_s5 + $0x68] ss:$16 sps:$4 sm:$0xff]  }
 0x50e   : > { %3191 = vmatpush1.bf16.msra.mxu0 %v17463_v60  ;;  %v17546_v60 = vld [vmem:[%s22688_s5 + $0x8c] ss:$16 sps:$4 sm:$0xff]  }
 0x50f   : > { %3192 = vmatprep.subr.bf16.mxu0 %v17471_v61  ;;  %v17541_v61 = vld [vmem:[%s22688_s5 + $0x288] ss:$16 sps:$4 sm:$0xff]  }
 0x510   : > { %3224 = vmatpush1.bf16.msra.mxu1 %v17466_v62  ;;  %v17549_v62 = vld [vmem:[%s22688_s5 + $0x2ac] ss:$16 sps:$4 sm:$0xff]  }
 0x511   : > { %3225 = vmatprep.subr.bf16.mxu1 %v17474_v63  ;;  %v17544_v63 = vld [vmem:[%s22688_s5 + $0x88] ss:$16 sps:$4 sm:$0xff]  }
 0x512   : > { %3193 = vmatpush1.bf16.msra.mxu0 %v17469_v1  ;;  %v17552_v1 = vld [vmem:[%s22688_s5 + $0xac] ss:$16 sps:$4 sm:$0xff]  }
 0x513   : > { %3194 = vmatprep.subr.bf16.mxu0 %v17477_v2  ;;  %v17547_v2 = vld [vmem:[%s22688_s5 + $0x2a8] ss:$16 sps:$4 sm:$0xff]  }
 0x514   : > { %3226 = vmatpush1.bf16.msra.mxu1 %v17472_v5  ;;  %v17555_v5 = vld [vmem:[%s22688_s5 + $0x2cc] ss:$16 sps:$4 sm:$0xff]  }
 0x515   : > { %3227 = vmatprep.subr.bf16.mxu1 %v17480_v7  ;;  %v17550_v7 = vld [vmem:[%s22688_s5 + $0xa8] ss:$16 sps:$4 sm:$0xff]  }
 0x516   : > { %3195 = vmatpush1.bf16.msra.mxu0 %v17475_v8  ;;  %v17558_v8 = vld [vmem:[%s22688_s5 + $0xcc] ss:$16 sps:$4 sm:$0xff]  }
 0x517   : > { %3196 = vmatprep.subr.bf16.mxu0 %v17483_v9  ;;  %v17553_v9 = vld [vmem:[%s22688_s5 + $0x2c8] ss:$16 sps:$4 sm:$0xff]  }
 0x518   : > { %3228 = vmatpush1.bf16.msra.mxu1 %v17478_v10  ;;  %v17561_v10 = vld [vmem:[%s22688_s5 + $0x2ec] ss:$16 sps:$4 sm:$0xff]  }
 0x519   : > { %3229 = vmatprep.subr.bf16.mxu1 %v17486_v12  ;;  %v17556_v12 = vld [vmem:[%s22688_s5 + $0xc8] ss:$16 sps:$4 sm:$0xff]  }
 0x51a   : > { %3197 = vmatpush1.bf16.msra.mxu0 %v17481_v16  ;;  %v17564_v16 = vld [vmem:[%s22688_s5 + $0xec] ss:$16 sps:$4 sm:$0xff]  }
 0x51b   : > { %3198 = vmatprep.subr.bf16.mxu0 %v17489_v21  ;;  %v17559_v21 = vld [vmem:[%s22688_s5 + $0x2e8] ss:$16 sps:$4 sm:$0xff]  }
 0x51c   : > { %3230 = vmatpush1.bf16.msra.mxu1 %v17484_v22  ;;  %v17567_v22 = vld [vmem:[%s22688_s5 + $0x30c] ss:$16 sps:$4 sm:$0xff]  }
 0x51d   : > { %3231 = vmatprep.subr.bf16.mxu1 %v17492_v23  ;;  %v17562_v23 = vld [vmem:[%s22688_s5 + $0xe8] ss:$16 sps:$4 sm:$0xff]  }
 0x51e   : > { %3199 = vmatpush1.bf16.msra.mxu0 %v17487_v24  ;;  %v17570_v24 = vld [vmem:[%s22688_s5 + $0x10c] ss:$16 sps:$4 sm:$0xff]  }
 0x51f   : > { %3200 = vmatprep.subr.bf16.mxu0 %v17495_v25  ;;  %v17565_v25 = vld [vmem:[%s22688_s5 + $0x308] ss:$16 sps:$4 sm:$0xff]  }
 0x520   : > { %3232 = vmatpush1.bf16.msra.mxu1 %v17490_v26  ;;  %v17573_v26 = vld [vmem:[%s22688_s5 + $0x32c] ss:$16 sps:$4 sm:$0xff]  }
 0x521   : > { %3233 = vmatprep.subr.bf16.mxu1 %v17498_v27  ;;  %v17568_v27 = vld [vmem:[%s22688_s5 + $0x108] ss:$16 sps:$4 sm:$0xff]  }
 0x522   : > { %3201 = vmatpush1.bf16.msra.mxu0 %v17493_v28  ;;  %v17576_v28 = vld [vmem:[%s22688_s5 + $0x12c] ss:$16 sps:$4 sm:$0xff]  }
 0x523   : > { %3202 = vmatprep.subr.bf16.mxu0 %v17501_v29  ;;  %v17571_v29 = vld [vmem:[%s22688_s5 + $0x328] ss:$16 sps:$4 sm:$0xff]  }
 0x524   : > { %3234 = vmatpush1.bf16.msra.mxu1 %v17496_v31  ;;  %v17579_v31 = vld [vmem:[%s22688_s5 + $0x34c] ss:$16 sps:$4 sm:$0xff]  }
 0x525   : > { %3235 = vmatprep.subr.bf16.mxu1 %v17504_v33  ;;  %v17574_v33 = vld [vmem:[%s22688_s5 + $0x128] ss:$16 sps:$4 sm:$0xff]  }
 0x526   : > { %3203 = vmatpush1.bf16.msra.mxu0 %v17499_v34  ;;  %v17582_v34 = vld [vmem:[%s22688_s5 + $0x14c] ss:$16 sps:$4 sm:$0xff]  }
 0x527   : > { %3204 = vmatprep.subr.bf16.mxu0 %v17507_v3  ;;  %v17577_v3 = vld [vmem:[%s22688_s5 + $0x348] ss:$16 sps:$4 sm:$0xff]  }
 0x528   : > { %3236 = vmatpush1.bf16.msra.mxu1 %v17502_v35  ;;  %v17585_v35 = vld [vmem:[%s22688_s5 + $0x36c] ss:$16 sps:$4 sm:$0xff]  }
 0x529   : > { %3237 = vmatprep.subr.bf16.mxu1 %v17510_v30  ;;  %v17580_v30 = vld [vmem:[%s22688_s5 + $0x148] ss:$16 sps:$4 sm:$0xff]  }
 0x52a   : > { %3205 = vmatpush1.bf16.msra.mxu0 %v17505_v36  ;;  %v17588_v36 = vld [vmem:[%s22688_s5 + $0x16c] ss:$16 sps:$4 sm:$0xff]  }
 0x52b   : > { %3206 = vmatprep.subr.bf16.mxu0 %v17513_v37  ;;  %v17583_v37 = vld [vmem:[%s22688_s5 + $0x368] ss:$16 sps:$4 sm:$0xff]  }
 0x52c   : > { %3238 = vmatpush1.bf16.msra.mxu1 %v17508_v38  ;;  %v17586_v38 = vld [vmem:[%s22688_s5 + $0x168] ss:$16 sps:$4 sm:$0xff]  }
 0x52d   : > { %3239 = vmatprep.subr.bf16.mxu1 %v17516_v39  ;;  %v17591_v39 = vld [vmem:[%s22688_s5 + $0x18c] ss:$16 sps:$4 sm:$0xff]  }
 0x52e   : > { %3207 = vmatpush1.bf16.msra.mxu0 %v17511_v40  ;;  %v17603_v40 = vld [vmem:[%s22688_s5 + $0x704] ss:$16 sps:$4 sm:$0xff]  }
 0x52f   : > { %3299 = vmatprep.subr.bf16.mxu0 %v17519_v41  ;;  %v17589_v41 = vld [vmem:[%s22688_s5 + $0x188] ss:$16 sps:$4 sm:$0xff]  }
 0x530   : > { %3240 = vmatpush1.bf16.msra.mxu1 %v17514_v42  ;;  %v17594_v42 = vld [vmem:[%s22688_s5 + $0x1ac] ss:$16 sps:$4 sm:$0xff]  }
 0x531   : > { %3209 = vmatmul.mubr.bf16.vlgmr.msra.gmra.mrb[36].mxu0 %v20103_v45  ;;  %3258 = vmatprep.subr.bf16.mxu1 %v17522_v43  ;;  %v17592_v43 = vld [vmem:[%s22688_s5 + $0x1a8] ss:$16 sps:$4 sm:$0xff]  }
 0x532   : > { %3300 = vmatpush1.bf16.msra.mxu0 %v17517_v44  ;;  %14788 = vmatprep.mubr.msk.bf16.mxu0 %vm2445_vm5, %v19961_v49  ;;  %v17534_v49 = vld [vmem:[%s22688_s5 + $0x4c] ss:$16 sps:$4 sm:$0xff]  }
 0x533   : > { %3250 = vmatmul.mubr.bf16.vlgmr.msra.gmra.mrb[24].mxu1 %v20113_v48  ;;  %3301 = vmatprep.subr.bf16.mxu0 %v17525_v46  ;;  %v17597_v44 = vld [vmem:[%s22688_s5 + $0x1cc] ss:$16 sps:$4 sm:$0xff]   ;;  %v14789_v46 = vld [vmem:[%s22687_s4 + $0x8] sm:$0xf] }
 0x534   : > { %3259 = vmatpush1.bf16.msra.mxu1 %v17520_v47  ;;  %3290 = vmatprep.mubr.bf16.mxu1 %v19901_v32  ;;  %v17532_v32 = vld [vmem:[%s22688_s5 + $0x48] ss:$16 sps:$4 sm:$0xff]   ;;  %v17601_v47 = vld [vmem:[%s22688_s5 + $0x700] ss:$16 sps:$4 sm:$0xff]  }
 0x535   : > { %3260 = vmatprep.subr.bf16.mxu1 %v17528_v0  ;;  %v17600_v0 = vld [vmem:[%s22688_s5 + $0x1ec] ss:$16 sps:$4 sm:$0xff]  }
 0x536   : > { %3302 = vmatpush1.bf16.msra.mxu0 %v17523_v50  ;;  %v17598_v50 = vld [vmem:[%s22688_s5 + $0x1e8] ss:$16 sps:$4 sm:$0xff]  }
 0x537   : > { %3303 = vmatprep.subr.bf16.mxu0 %v17531_v4  ;;  %v17606_v4 = vld [vmem:[%s22688_s5 + $0x724] ss:$16 sps:$4 sm:$0xff]  }
 0x538   : > { %3261 = vmatpush1.bf16.msra.mxu1 %v17526_v51  ;;  %v17604_v51 = vld [vmem:[%s22688_s5 + $0x720] ss:$16 sps:$4 sm:$0xff]  }
 0x539   : > { %3262 = vmatprep.subr.bf16.mxu1 %v17534_v49  ;;  %v17607_v49 = vld [vmem:[%s22688_s5 + $0x740] ss:$16 sps:$4 sm:$0xff]  }
 0x53a   : > { %3304 = vmatpush1.bf16.msra.mxu0 %v17529_v6  ;;  %v17610_v6 = vld [vmem:[%s22688_s5 + $0x760] ss:$16 sps:$4 sm:$0xff]  }
 0x53b   : > { %3305 = vmatprep.subr.bf16.mxu0 %v17537_v52  ;;  %v17612_v52 = vld [vmem:[%s22688_s5 + $0x764] ss:$16 sps:$4 sm:$0xff]  }
 0x53c   : > { %3263 = vmatpush1.bf16.msra.mxu1 %v17532_v32  ;;  %v17615_v32 = vld [vmem:[%s22688_s5 + $0x784] ss:$16 sps:$4 sm:$0xff]  }
 0x53d   : > { %3264 = vmatprep.subr.bf16.mxu1 %v17540_v11  ;;  %v17613_v11 = vld [vmem:[%s22688_s5 + $0x780] ss:$16 sps:$4 sm:$0xff]  }
 0x53e   : > { %3306 = vmatpush1.bf16.msra.mxu0 %v17535_v54  ;;  %v17628_v54 = vld [vmem:[%s22688_s5 + $0x900] ss:$16 sps:$4 sm:$0xff]  }
 0x53f   : > { %3307 = vmatprep.subr.bf16.mxu0 %v17543_v55  ;;  %v17630_v55 = vld [vmem:[%s22688_s5 + $0x904] ss:$16 sps:$4 sm:$0xff]  }
 0x540   : > { %3265 = vmatpush1.bf16.msra.mxu1 %v17538_v59  ;;  %v17618_v59 = vld [vmem:[%s22688_s5 + $0x7a4] ss:$16 sps:$4 sm:$0xff]  }
 0x541   : > { %3266 = vmatprep.subr.bf16.mxu1 %v17546_v60  ;;  %v17636_v60 = vld [vmem:[%s22688_s5 + $0x924] ss:$16 sps:$4 sm:$0xff]  }
 0x542   : > { %3308 = vmatpush1.bf16.msra.mxu0 %v17541_v61  ;;  %v17634_v61 = vld [vmem:[%s22688_s5 + $0x920] ss:$16 sps:$4 sm:$0xff]  }
 0x543   : > { %3309 = vmatprep.subr.bf16.mxu0 %v17549_v62  ;;  %v17616_v62 = vld [vmem:[%s22688_s5 + $0x7a0] ss:$16 sps:$4 sm:$0xff]  }
 0x544   : > { %3267 = vmatpush1.bf16.msra.mxu1 %v17544_v63  ;;  %v17642_v63 = vld [vmem:[%s22688_s5 + $0x944] ss:$16 sps:$4 sm:$0xff]  }
 0x545   : > { %3268 = vmatprep.subr.bf16.mxu1 %v17552_v1  ;;  %v17621_v1 = vld [vmem:[%s22688_s5 + $0x7c4] ss:$16 sps:$4 sm:$0xff]  }
 0x546   : > { %3310 = vmatpush1.bf16.msra.mxu0 %v17547_v2 }
 0x547   : > { %3311 = vmatprep.subr.bf16.mxu0 %v17555_v5  ;;  %v17640_v5 = vld [vmem:[%s22688_s5 + $0x940] ss:$16 sps:$4 sm:$0xff]  }
 0x548   : > { %3269 = vmatpush1.bf16.msra.mxu1 %v17550_v7 }
 0x549   : > { %3270 = vmatprep.subr.bf16.mxu1 %v17558_v8  ;;  %v17619_v8 = vld [vmem:[%s22688_s5 + $0x7c0] ss:$16 sps:$4 sm:$0xff]  }
 0x54a   : > { %3312 = vmatpush1.bf16.msra.mxu0 %v17553_v9  ;;  %v17648_v9 = vld [vmem:[%s22688_s5 + $0x964] ss:$16 sps:$4 sm:$0xff]  }
 0x54b   : > { %3313 = vmatprep.subr.bf16.mxu0 %v17561_v10 }
 0x54c   : > { %3271 = vmatpush1.bf16.msra.mxu1 %v17556_v12 }
 0x54d   : > { %3272 = vmatprep.subr.bf16.mxu1 %v17564_v16  ;;  %v17624_v16 = vld [vmem:[%s22688_s5 + $0x7e4] ss:$16 sps:$4 sm:$0xff]  }
 0x54e   : > { %3314 = vmatpush1.bf16.msra.mxu0 %v17559_v21 }
 0x54f   : > { %3315 = vmatprep.subr.bf16.mxu0 %v17567_v22 }
 0x550   : > { %3273 = vmatpush1.bf16.msra.mxu1 %v17562_v23 }
 0x551   : > { %3274 = vmatprep.subr.bf16.mxu1 %v17570_v24 }
 0x552   : > { %3316 = vmatpush1.bf16.msra.mxu0 %v17565_v25 }
 0x553   : > { %3317 = vmatprep.subr.bf16.mxu0 %v17573_v26  ;;  %v17646_v26 = vld [vmem:[%s22688_s5 + $0x960] ss:$16 sps:$4 sm:$0xff]  }
 0x554   : > { %3275 = vmatpush1.bf16.msra.mxu1 %v17568_v27 }
 0x555   : > { %3276 = vmatprep.subr.bf16.mxu1 %v17576_v28  ;;  %v17622_v28 = vld [vmem:[%s22688_s5 + $0x7e0] ss:$16 sps:$4 sm:$0xff]  }
 0x556   : > { %3318 = vmatpush1.bf16.msra.mxu0 %v17571_v29  ;;  %v17654_v29 = vld [vmem:[%s22688_s5 + $0x984] ss:$16 sps:$4 sm:$0xff]  }
 0x557   : > { %3319 = vmatprep.subr.bf16.mxu0 %v17579_v31  ;;  %v17627_v31 = vld [vmem:[%s22688_s5 + $0x804] ss:$16 sps:$4 sm:$0xff]  }
 0x558   : > { %3277 = vmatpush1.bf16.msra.mxu1 %v17574_v33  ;;  %v17652_v33 = vld [vmem:[%s22688_s5 + $0x980] ss:$16 sps:$4 sm:$0xff]  }
 0x559   : > { %3278 = vmatprep.subr.bf16.mxu1 %v17582_v34  ;;  %v17625_v34 = vld [vmem:[%s22688_s5 + $0x800] ss:$16 sps:$4 sm:$0xff]  }
 0x55a   : > { %3320 = vmatpush1.bf16.msra.mxu0 %v17577_v3  ;;  %v17633_v3 = vld [vmem:[%s22688_s5 + $0x824] ss:$16 sps:$4 sm:$0xff]  }
 0x55b   : > { %3321 = vmatprep.subr.bf16.mxu0 %v17585_v35  ;;  %v17631_v35 = vld [vmem:[%s22688_s5 + $0x820] ss:$16 sps:$4 sm:$0xff]  }
 0x55c   : > { %3279 = vmatpush1.bf16.msra.mxu1 %v17580_v30  ;;  %v17639_v30 = vld [vmem:[%s22688_s5 + $0x844] ss:$16 sps:$4 sm:$0xff]  }
 0x55d   : > { %3280 = vmatprep.subr.bf16.mxu1 %v17588_v36  ;;  %v17637_v36 = vld [vmem:[%s22688_s5 + $0x840] ss:$16 sps:$4 sm:$0xff]  }
 0x55e   : > { %3322 = vmatpush1.bf16.msra.mxu0 %v17583_v37  ;;  %v17645_v37 = vld [vmem:[%s22688_s5 + $0x864] ss:$16 sps:$4 sm:$0xff]  }
 0x55f   : > { %14790 = vmatprep.subr.msk.bf16.mxu0 %vm1470_vm3, %v19525_v53 }
 0x560   : > { %3281 = vmatpush1.bf16.msra.mxu1 %v17586_v38  ;;  %v17643_v38 = vld [vmem:[%s22688_s5 + $0x860] ss:$16 sps:$4 sm:$0xff]  }
 0x561   : > { %3332 = vmatmul.mubr.bf16.vlgmr.msra.gmra.mrb[40].mxu0 %v20113_v48  ;;  %3282 = vmatprep.subr.bf16.mxu1 %v17591_v39  ;;  %v17595_v48 = vld [vmem:[%s22688_s5 + $0x1c8] ss:$16 sps:$4 sm:$0xff]   ;;  %v17651_v39 = vld [vmem:[%s22688_s5 + $0x884] ss:$16 sps:$4 sm:$0xff]  }
 0x562   : > { %3346 = vmatpush1.bf16.msra.mxu0 %v19528_v57  ;;  %3377 = vmatprep.mubr.bf16.mxu0 %v19130_v17 }
 0x563   : > { %4107 = vmatprep.subr.bf16.mxu0 %v17603_v40  ;;  %v17649_v40 = vld [vmem:[%s22688_s5 + $0x880] ss:$16 sps:$4 sm:$0xff]  }
 0x564   : > { %3283 = vmatpush1.bf16.msra.mxu1 %v17589_v41  ;;  %v17657_v41 = vld [vmem:[%s22688_s5 + $0x8a4] ss:$16 sps:$4 sm:$0xff]  }
 0x565   : > { %3284 = vmatprep.subr.bf16.mxu1 %v17594_v42  ;;  %v17655_v42 = vld [vmem:[%s22688_s5 + $0x8a0] ss:$16 sps:$4 sm:$0xff]  }
 0x568   : > { %3285 = vmatpush1.bf16.msra.mxu1 %v17592_v43  ;;  %v17660_v43 = vld [vmem:[%s22688_s5 + $0x9a4] ss:$16 sps:$4 sm:$0xff]  }
 0x569   : > { %14791 = vmatmul.mubr.msk.bf16.vlgmr.msra.gmra.mrb[44].mxu0 %vm1466_vm4, %v14789_v46  ;;  %3286 = vmatprep.subr.bf16.mxu1 %v17597_v44  ;;  %v17658_v44 = vld [vmem:[%s22688_s5 + $0x9a0] ss:$16 sps:$4 sm:$0xff]  }
 0x56a   : > { %4108 = vmatpush1.bf16.msra.mxu0 %v17601_v47  ;;  %v17661_v47 = vld [vmem:[%s22688_s5 + $0x8c0] ss:$16 sps:$4 sm:$0xff]  }
 0x56b   : > { %4109 = vmatprep.subr.bf16.mxu0 %v17606_v4  ;;  %v17667_v4 = vld [vmem:[%s22688_s5 + $0x8e0] ss:$16 sps:$4 sm:$0xff]  }
 0x56c   : > { %3287 = vmatpush1.bf16.msra.mxu1 %v17595_v48  ;;  %v17664_v48 = vld [vmem:[%s22688_s5 + $0x9c0] ss:$16 sps:$4 sm:$0xff]  }
 0x56d   : > { %3288 = vmatprep.subr.bf16.mxu1 %v17600_v0  ;;  %v17666_v0 = vld [vmem:[%s22688_s5 + $0x9c4] ss:$16 sps:$4 sm:$0xff]  }
 0x56e   : > { %4110 = vmatpush1.bf16.msra.mxu0 %v17604_v51  ;;  %v17672_v51 = vld [vmem:[%s22688_s5 + $0x9e4] ss:$16 sps:$4 sm:$0xff]  }
 0x570   : > { %3289 = vmatpush1.bf16.msra.mxu1 %v17598_v50  ;;  %v17669_v50 = vld [vmem:[%s22688_s5 + $0x8e4] ss:$16 sps:$4 sm:$0xff]  }
 0x571   : > { %14792 = vmatprep.subr.msk.bf16.mxu1 %vm1470_vm3, %v19530_v58 }
 0x573   : > { %3291 = vmatmul.mubr.bf16.vlgmr.msra.gmra.mrb[28].mxu1 %v20103_v45  ;;  %v17609_v45 = vld [vmem:[%s22688_s5 + $0x744] ss:$16 sps:$4 sm:$0xff]  }
 0x574   : > { %3387 = vmatpush1.bf16.msra.mxu1 %v19536_v56  ;;  %3418 = vmatprep.mubr.bf16.mxu1 %v19130_v17 }
 0x575   : > { %4111 = vmatprep.subr.bf16.mxu0 %v17609_v45  ;;  %4148 = vmatprep.subr.bf16.mxu1 %v17630_v55  ;;  %v17670_v45 = vld [vmem:[%s22688_s5 + $0x9e0] ss:$16 sps:$4 sm:$0xff]  }
 0x576   : > { %4112 = vmatpush1.bf16.msra.mxu0 %v17607_v49  ;;  %v17675_v49 = vld [vmem:[%s22688_s5 + $0x90c] ss:$16 sps:$4 sm:$0xff]  }
 0x577   : > { %4113 = vmatprep.subr.bf16.mxu0 %v17612_v52  ;;  %v17676_v52 = vld [vmem:[%s22688_s5 + $0xa00] ss:$16 sps:$4 sm:$0xff]  }
 0x57a   : > { %4114 = vmatpush1.bf16.msra.mxu0 %v17610_v6  ;;  %v17678_v6 = vld [vmem:[%s22688_s5 + $0xa04] ss:$16 sps:$4 sm:$0xff]  }
 0x57b   : > { %14793 = vmatmul.mubr.msk.bf16.vlgmr.msra.gmra.mrb[32].mxu1 %vm1466_vm4, %v14789_v46  ;;  %4115 = vmatprep.subr.bf16.mxu0 %v17615_v32  ;;  %v17663_v46 = vld [vmem:[%s22688_s5 + $0x8c4] ss:$16 sps:$4 sm:$0xff]  }
 0x57c   : > { %4149 = vmatpush1.bf16.msra.mxu1 %v17628_v54  ;;  %v17684_v54 = vld [vmem:[%s22688_s5 + $0xa24] ss:$16 sps:$4 sm:$0xff]  }
 0x57d   : > { %4150 = vmatprep.subr.bf16.mxu1 %v17636_v60 }
 0x57e   : > { %4116 = vmatpush1.bf16.msra.mxu0 %v17613_v11 }
 0x57f   : > { %4117 = vmatprep.subr.bf16.mxu0 %v17618_v59  ;;  %v17682_v59 = vld [vmem:[%s22688_s5 + $0xa20] ss:$16 sps:$4 sm:$0xff]  }
 0x580   : > { %4151 = vmatpush1.bf16.msra.mxu1 %v17634_v61  ;;  %v17690_v61 = vld [vmem:[%s22688_s5 + $0xa44] ss:$16 sps:$4 sm:$0xff]  }
 0x581   : > { %4152 = vmatprep.subr.bf16.mxu1 %v17642_v63  ;;  %v17696_v63 = vld [vmem:[%s22688_s5 + $0xa64] ss:$16 sps:$4 sm:$0xff]  }
 0x582   : > { %4118 = vmatpush1.bf16.msra.mxu0 %v17616_v62  ;;  %v17688_v62 = vld [vmem:[%s22688_s5 + $0xa40] ss:$16 sps:$4 sm:$0xff]  }
 0x583   : > { %4119 = vmatprep.subr.bf16.mxu0 %v17621_v1  ;;  %v17694_v1 = vld [vmem:[%s22688_s5 + $0xa60] ss:$16 sps:$4 sm:$0xff]  }
 0x584   : > { %4153 = vmatpush1.bf16.msra.mxu1 %v17640_v5 }
 0x585   : > { %4154 = vmatprep.subr.bf16.mxu1 %v17648_v9 }
 0x586   : > { %4120 = vmatpush1.bf16.msra.mxu0 %v17619_v8 }
 0x587   : > { %4121 = vmatprep.subr.bf16.mxu0 %v17624_v16 }
 0x588   : > { %4155 = vmatpush1.bf16.msra.mxu1 %v17646_v26 }
 0x589   : > { %4156 = vmatprep.subr.bf16.mxu1 %v17654_v29 }
 0x58a   : > { %4122 = vmatpush1.bf16.msra.mxu0 %v17622_v28 }
 0x58b   : > { %4123 = vmatprep.subr.bf16.mxu0 %v17627_v31 }
 0x58c   : > { %4157 = vmatpush1.bf16.msra.mxu1 %v17652_v33 }
 0x58d   : > { %4158 = vmatprep.subr.bf16.mxu1 %v17660_v43 }
 0x58e   : > { %4124 = vmatpush1.bf16.msra.mxu0 %v17625_v34 }
 0x58f   : > { %4125 = vmatprep.subr.bf16.mxu0 %v17633_v3 }
 0x590   : > { %4159 = vmatpush1.bf16.msra.mxu1 %v17658_v44  ;;  %v17679_v44 = vld [vmem:[%s22688_s5 + $0x928] ss:$16 sps:$4 sm:$0xff]  }
 0x591   : > { %4160 = vmatprep.subr.bf16.mxu1 %v17666_v0 }
 0x592   : > { %4126 = vmatpush1.bf16.msra.mxu0 %v17631_v35 }
 0x593   : > { %4127 = vmatprep.subr.bf16.mxu0 %v17639_v30 }
 0x594   : > { %v2483_v2 = vpop.f32.mrb[28].mxu0  ;;  %4161 = vmatpush1.bf16.msra.mxu1 %v17664_v48  ;;  %v17685_v48 = vld [vmem:[%s22688_s5 + $0x948] ss:$16 sps:$4 sm:$0xff]  }
 0x595   : > { %v2485_v7 = vpop.f32.mrb[29].mxu0  ;;  %4162 = vmatprep.subr.bf16.mxu1 %v17672_v51 }
 0x596   : > { %v2524_v10 = vpop.f32.mrb[16].mxu1  ;;  %v2487_v12 = vpop.f32.mrb[30].mxu0  ;;  %4128 = vmatpush1.bf16.msra.mxu0 %v17637_v36 }
 0x597   : > { %v20354_v21 = vadd.f32 %v2524_v10, %v2483_v2  ;;  %v2526_v22 = vpop.f32.mrb[17].mxu1  ;;  %v2488_v23 = vpop.f32.mrb[31].mxu0  ;;  %4129 = vmatprep.subr.bf16.mxu0 %v17645_v37  ;;  %v17702_v2 = vld [vmem:[%s22688_s5 + $0x70c] ss:$16 sps:$4 sm:$0xff]  }
 0x598   : > { %v20356_v24 = vadd.f32 %v2526_v22, %v2485_v7  ;;  %v2528_v25 = vpop.f32.mrb[18].mxu1  ;;  %4163 = vmatpush1.bf16.msra.mxu1 %v17670_v45 }
 0x599   : > { %v2529_v27 = vpop.f32.mrb[19].mxu1  ;;  %4164 = vmatprep.subr.bf16.mxu1 %v17678_v6 }
 0x59a   : > { %4130 = vmatpush1.bf16.msra.mxu0 %v17643_v38 }
 0x59b   : > { %4131 = vmatprep.subr.bf16.mxu0 %v17651_v39 }
 0x59c   : > { %4165 = vmatpush1.bf16.msra.mxu1 %v17676_v52 }
 0x59d   : > { %4166 = vmatprep.subr.bf16.mxu1 %v17684_v54 }
 0x59e   : > { %4132 = vmatpush1.bf16.msra.mxu0 %v17649_v40 }
 0x59f   : > { %4133 = vmatprep.subr.bf16.mxu0 %v17657_v41 }
 0x5a0   : > { %4167 = vmatpush1.bf16.msra.mxu1 %v17682_v59 }
 0x5a1   : > { %4168 = vmatprep.subr.bf16.mxu1 %v17690_v61 }
 0x5a2   : > { %4134 = vmatpush1.bf16.msra.mxu0 %v17655_v42  ;;  %v17681_v42 = vld [vmem:[%s22688_s5 + $0x92c] ss:$16 sps:$4 sm:$0xff]  }
 0x5a3   : > { %4135 = vmatprep.subr.bf16.mxu0 %v17663_v46  ;;  %v17687_v46 = vld [vmem:[%s22688_s5 + $0x94c] ss:$16 sps:$4 sm:$0xff]  }
 0x5a4   : > { %4169 = vmatpush1.bf16.msra.mxu1 %v17688_v62  ;;  %v17700_v62 = vld [vmem:[%s22688_s5 + $0x708] ss:$16 sps:$4 sm:$0xff]  }
 0x5a5   : > { %4170 = vmatprep.subr.bf16.mxu1 %v17696_v63  ;;  %v17705_v63 = vld [vmem:[%s22688_s5 + $0x9ac] ss:$16 sps:$4 sm:$0xff]  }
 0x5a6   : > { %4136 = vmatpush1.bf16.msra.mxu0 %v17661_v47 }
 0x5a7   : > { %4137 = vmatprep.subr.bf16.mxu0 %v17669_v50 }
 0x5a8   : > { %4171 = vmatpush1.bf16.msra.mxu1 %v17694_v1 }
 0x5a9   : > { %4189 = vmatprep.subr.bf16.mxu1 %v17702_v2 }
 0x5aa   : > { %4138 = vmatpush1.bf16.msra.mxu0 %v17667_v4  ;;  %v17693_v4 = vld [vmem:[%s22688_s5 + $0x96c] ss:$16 sps:$4 sm:$0xff]  }
 0x5ab   : > { %4230 = vmatprep.subr.bf16.mxu0 %v17675_v49 }
 0x5c4   : > { %v2606_v32 = vpop.f32.mrb[32].mxu0 }
 0x5c5   : > { %v2608_v11 = vpop.f32.mrb[33].mxu0 }
 0x5c6   : > { %v2610_v55 = vpop.f32.mrb[34].mxu0 }
 0x5c7   : > { %v2611_v60 = vpop.f32.mrb[35].mxu0  ;;  %v17697_v55 = vld [vmem:[%s22688_s5 + $0x988] ss:$16 sps:$4 sm:$0xff]  }
 0x5d6   : > { %v2565_v5 = vpop.f32.mrb[20].mxu1 }
 0x5d7   : > { %v2607_v7 = vadd.f32 %v2606_v32, %v2565_v5  ;;  %v2567_v8 = vpop.f32.mrb[21].mxu1  ;;  %v17691_v32 = vld [vmem:[%s22688_s5 + $0x968] ss:$16 sps:$4 sm:$0xff]   ;;  %v17708_v5 = vld [vmem:[%s22688_s5 + $0x72c] ss:$16 sps:$4 sm:$0xff]  }
 0x5d8   : > { %v2609_v9 = vadd.f32 %v2608_v11, %v2567_v8  ;;  %v2569_v10 = vpop.f32.mrb[22].mxu1  ;;  %v17699_v11 = vld [vmem:[%s22688_s5 + $0x98c] ss:$16 sps:$4 sm:$0xff]  }
 0x5d9   : > { %v2570_v12 = vpop.f32.mrb[23].mxu1  ;;  %v17711_v8 = vld [vmem:[%s22688_s5 + $0x9cc] ss:$16 sps:$4 sm:$0xff]  }
 0x5da   : > { %v17714_v10 = vld [vmem:[%s22688_s5 + $0x74c] ss:$16 sps:$4 sm:$0xff]   ;;  %v17709_v12 = vld [vmem:[%s22688_s5 + $0x9c8] ss:$16 sps:$4 sm:$0xff]  }
 0x604   : > { %v3210_v16 = vpop.f32.mrb[36].mxu0 }
 0x605   : > { %v3211_v22 = vadd.f32 %v3210_v16, %v20354_v21  ;;  %v3212_v23 = vpop.f32.mrb[37].mxu0  ;;  %v17717_v16 = vld [vmem:[%s22688_s5 + $0x9ec] ss:$16 sps:$4 sm:$0xff]  }
 0x606   : > { %v3213_v25 = vadd.f32 %v3212_v23, %v20356_v24  ;;  %v3214_v26 = vpop.f32.mrb[38].mxu0  ;;  %v3251_v27 = vpop.f32.mrb[24].mxu1  ;;  %v17673_v24 = vld [vmem:[%s22688_s5 + $0x908] ss:$16 sps:$4 sm:$0xff]   ;;  %v17720_v23 = vld [vmem:[%s22688_s5 + $0x76c] ss:$16 sps:$4 sm:$0xff]  }
 0x607   : > { %v20468_v28 = vadd.f32 %v3251_v27, %v3211_v22  ;;  %v3215_v29 = vpop.f32.mrb[39].mxu0  ;;  %v3253_v31 = vpop.f32.mrb[25].mxu1  ;;  %v17712_v22 = vld [vmem:[%s22688_s5 + $0x748] ss:$16 sps:$4 sm:$0xff]   ;;  %v17723_v26 = vld [vmem:[%s22688_s5 + $0xa0c] ss:$16 sps:$4 sm:$0xff]  }
 0x608   : > { %v20470_v33 = vadd.f32 %v3253_v31, %v3213_v25  ;;  %v3255_v34 = vpop.f32.mrb[26].mxu1  ;;  %v17715_v25 = vld [vmem:[%s22688_s5 + $0x9e8] ss:$16 sps:$4 sm:$0xff]   ;;  %v17726_v29 = vld [vmem:[%s22688_s5 + $0x78c] ss:$16 sps:$4 sm:$0xff]  }
 0x609   : > { %v3256_v3 = vpop.f32.mrb[27].mxu1  ;;  %v17718_v27 = vld [vmem:[%s22688_s5 + $0x768] ss:$16 sps:$4 sm:$0xff]   ;;  %v17729_v34 = vld [vmem:[%s22688_s5 + $0xa2c] ss:$16 sps:$4 sm:$0xff]  }
 0x60a   : > { %v17721_v31 = vld [vmem:[%s22688_s5 + $0xa08] ss:$16 sps:$4 sm:$0xff]  }
 0x60b   : > { %v17724_v3 = vld [vmem:[%s22688_s5 + $0x788] ss:$16 sps:$4 sm:$0xff]  }
 0x634   : > { %v3333_v35 = vpop.f32.mrb[40].mxu0 }
 0x635   : > { %v3335_v30 = vpop.f32.mrb[41].mxu0 }
 0x636   : > { %v3337_v36 = vpop.f32.mrb[42].mxu0 }
 0x637   : > { %v3338_v37 = vpop.f32.mrb[43].mxu0  ;;  %v17735_v36 = vld [vmem:[%s22688_s5 + $0xa4c] ss:$16 sps:$4 sm:$0xff]  }
 0x638   : > { %v17730_v37 = vld [vmem:[%s22688_s5 + $0x7a8] ss:$16 sps:$4 sm:$0xff]  }
 0x63c   : > { %v3379_v38 = vpop.f32.mrb[44].mxu0 }
 0x63d   : > { %v20472_v39 = vpack.c.bf16 %v3379_v38, %v3379_v38  ;;  %v3381_v21 = vpop.f32.mrb[45].mxu0  ;;  %v17738_v38 = vld [vmem:[%s22688_s5 + $0x7cc] ss:$16 sps:$4 sm:$0xff]  }
 0x63e   : > { %v3541_v40 = vpack.c.bf16 %v3381_v21, %v3381_v21  ;;  %v3383_v41 = vpop.f32.mrb[46].mxu0  ;;  %v17733_v21 = vld [vmem:[%s22688_s5 + $0xa48] ss:$16 sps:$4 sm:$0xff]  }
 0x63f   : > { %v3384_v43 = vpop.f32.mrb[47].mxu0  ;;  %v17744_v41 = vld [vmem:[%s22688_s5 + $0x7ec] ss:$16 sps:$4 sm:$0xff]  }
 0x640   : > { %4139 = vmatprep.mubr.bf16.mxu0 %v3541_v40  ;;  %v17742_v43 = vld [vmem:[%s22688_s5 + $0x7e8] ss:$16 sps:$4 sm:$0xff]  }
 0x641   : > { %4140 = vmatmul.mubr.bf16.vlgmr.msra.gmra.mrb[48].mxu0 %v20472_v39 }
 0x642   : > { %4231 = vmatpush1.bf16.msra.mxu0 %v17673_v24  ;;  %v17736_v24 = vld [vmem:[%s22688_s5 + $0x7c8] ss:$16 sps:$4 sm:$0xff]  }
 0x643   : > { %4232 = vmatprep.subr.bf16.mxu0 %v17681_v42  ;;  %v17739_v42 = vld [vmem:[%s22688_s5 + $0xa68] ss:$16 sps:$4 sm:$0xff]  }
 0x646   : > { %4233 = vmatpush1.bf16.msra.mxu0 %v17679_v44  ;;  %v3292_v47 = vpop.f32.mrb[28].mxu1  ;;  %v17747_v44 = vld [vmem:[%s22688_s5 + $0x80c] ss:$16 sps:$4 sm:$0xff]  }
 0x647   : > { %v3293_v0 = vadd.f32 %v3292_v47, %v2607_v7  ;;  %v3294_v50 = vpop.f32.mrb[29].mxu1  ;;  %4234 = vmatprep.subr.bf16.mxu0 %v17687_v46  ;;  %v17703_v7 = vld [vmem:[%s22688_s5 + $0x9a8] ss:$16 sps:$4 sm:$0xff]   ;;  %v17771_v46 = vld [vmem:[%s22688_s5 + $0xa84] ss:$16 sps:$4 sm:$0xff]  }
 0x648   : > { %v3295_v51 = vadd.f32 %v3294_v50, %v2609_v9  ;;  %v3296_v45 = vpop.f32.mrb[30].mxu1  ;;  %v17706_v9 = vld [vmem:[%s22688_s5 + $0x728] ss:$16 sps:$4 sm:$0xff]   ;;  %v15020_v50 = vld [vmem:[%s22687_s4 + $0xc] sm:$0xf] }
 0x649   : > { %v20493_v49 = vadd.f32 %v3333_v35, %v3293_v0  ;;  %v3297_v6 = vpop.f32.mrb[31].mxu1  ;;  %v17732_v35 = vld [vmem:[%s22688_s5 + $0x7ac] ss:$16 sps:$4 sm:$0xff]   ;;  %v17745_v47 = vld [vmem:[%s22688_s5 + $0x808] ss:$16 sps:$4 sm:$0xff]  }
 0x64a   : > { %v20495_v52 = vadd.f32 %v3335_v30, %v3295_v51  ;;  %4235 = vmatpush1.bf16.msra.mxu0 %v17685_v48  ;;  %v17727_v30 = vld [vmem:[%s22688_s5 + $0xa28] ss:$16 sps:$4 sm:$0xff]   ;;  %v17750_v48 = vld [vmem:[%s22688_s5 + $0x82c] ss:$16 sps:$4 sm:$0xff]   ;;  %v17772_v6 = vld [vmem:[%s22688_s5 + $0xaa0] ss:$16 sps:$4 sm:$0xff]  }
 0x64b   : > { %4236 = vmatprep.subr.bf16.mxu0 %v17693_v4  ;;  %v17753_v0 = vld [vmem:[%s22688_s5 + $0x84c] ss:$16 sps:$4 sm:$0xff]   ;;  %v17774_v4 = vld [vmem:[%s22688_s5 + $0xaa4] ss:$16 sps:$4 sm:$0xff]   ;;  %v17751_v51 = vld [vmem:[%s22688_s5 + $0x848] ss:$16 sps:$4 sm:$0xff]  }
 0x64c   : > { %v17756_v45 = vld [vmem:[%s22688_s5 + $0x86c] ss:$16 sps:$4 sm:$0xff]  }
 0x64e   : > { %4237 = vmatpush1.bf16.msra.mxu0 %v17691_v32  ;;  %v3420_v54 = vpop.f32.mrb[32].mxu1  ;;  %v17777_v32 = vld [vmem:[%s22688_s5 + $0xac4] ss:$16 sps:$4 sm:$0xff]  }
 0x64f   : > { %v3422_v59 = vpop.f32.mrb[33].mxu1  ;;  %4238 = vmatprep.subr.bf16.mxu0 %v17699_v11  ;;  %v20512_v1 = vpack.c.bf16 %v3420_v54, %v3420_v54  ;;  %v17754_v11 = vld [vmem:[%s22688_s5 + $0x868] ss:$16 sps:$4 sm:$0xff]   ;;  %v17759_v54 = vld [vmem:[%s22688_s5 + $0x88c] ss:$16 sps:$4 sm:$0xff]  }
 0x650   : > { %v3543_v60 = vpack.c.bf16 %v3422_v59, %v3422_v59  ;;  %v3424_v61 = vpop.f32.mrb[34].mxu1  ;;  %v17780_v59 = vld [vmem:[%s22688_s5 + $0xae4] ss:$16 sps:$4 sm:$0xff]  }
 0x651   : > { %v3425_v2 = vpop.f32.mrb[35].mxu1  ;;  %v17762_v61 = vld [vmem:[%s22688_s5 + $0x8ac] ss:$16 sps:$4 sm:$0xff]  }
 0x652   : > { %4239 = vmatpush1.bf16.msra.mxu0 %v17697_v55  ;;  %15018 = vmatprep.mubr.msk.bf16.mxu1 %vm2445_vm5, %v3543_v60  ;;  %v17775_v55 = vld [vmem:[%s22688_s5 + $0xac0] ss:$16 sps:$4 sm:$0xff]   ;;  %v17765_v2 = vld [vmem:[%s22688_s5 + $0x8cc] ss:$16 sps:$4 sm:$0xff]  }
 0x653   : > { %15019 = vmatprep.mubr.msk.bf16.mxu0 %vm2445_vm5, %v3543_v60  ;;  %4181 = vmatmul.mubr.bf16.vlgmr.msra.gmra.mrb[36].mxu1 %v20512_v1  ;;  %v17757_v60 = vld [vmem:[%s22688_s5 + $0x888] ss:$16 sps:$4 sm:$0xff]  }
 0x654   : > { %4190 = vmatpush1.bf16.msra.mxu1 %v17700_v62  ;;  %4240 = vmatprep.subr.bf16.mxu0 %v17705_v63  ;;  %v17778_v62 = vld [vmem:[%s22688_s5 + $0xae0] ss:$16 sps:$4 sm:$0xff]   ;;  %v17783_v63 = vld [vmem:[%s22688_s5 + $0xb04] ss:$16 sps:$4 sm:$0xff]  }
 0x655   : > { %4191 = vmatprep.subr.bf16.mxu1 %v17708_v5  ;;  %4221 = vmatprep.mubr.bf16.mxu1 %v3541_v40  ;;  %v17741_v40 = vld [vmem:[%s22688_s5 + $0xa6c] ss:$16 sps:$4 sm:$0xff]   ;;  %v17781_v5 = vld [vmem:[%s22688_s5 + $0xb00] ss:$16 sps:$4 sm:$0xff]  }
 0x656   : > { %4241 = vmatpush1.bf16.msra.mxu0 %v17703_v7  ;;  %v17786_v7 = vld [vmem:[%s22688_s5 + $0xb24] ss:$16 sps:$4 sm:$0xff]  }
 0x657   : > { %4242 = vmatprep.subr.bf16.mxu0 %v17711_v8  ;;  %v17763_v8 = vld [vmem:[%s22688_s5 + $0x8c8] ss:$16 sps:$4 sm:$0xff]  }
 0x658   : > { %4192 = vmatpush1.bf16.msra.mxu1 %v17706_v9  ;;  %v17768_v9 = vld [vmem:[%s22688_s5 + $0x8ec] ss:$16 sps:$4 sm:$0xff]  }
 0x659   : > { %4193 = vmatprep.subr.bf16.mxu1 %v17714_v10  ;;  %v17784_v10 = vld [vmem:[%s22688_s5 + $0xb20] ss:$16 sps:$4 sm:$0xff]  }
 0x65a   : > { %4243 = vmatpush1.bf16.msra.mxu0 %v17709_v12  ;;  %v17766_v12 = vld [vmem:[%s22688_s5 + $0x8e8] ss:$16 sps:$4 sm:$0xff]  }
 0x65b   : > { %4244 = vmatprep.subr.bf16.mxu0 %v17717_v16  ;;  %v17789_v16 = vld [vmem:[%s22688_s5 + $0xb44] ss:$16 sps:$4 sm:$0xff]  }
 0x65c   : > { %4194 = vmatpush1.bf16.msra.mxu1 %v17712_v22  ;;  %v17787_v22 = vld [vmem:[%s22688_s5 + $0xb40] ss:$16 sps:$4 sm:$0xff]  }
 0x65d   : > { %4195 = vmatprep.subr.bf16.mxu1 %v17720_v23  ;;  %v17793_v23 = vld [vmem:[%s22688_s5 + $0xb80] ss:$16 sps:$4 sm:$0xff]  }
 0x65e   : > { %4245 = vmatpush1.bf16.msra.mxu0 %v17715_v25  ;;  %v17798_v25 = vld [vmem:[%s22688_s5 + $0xba4] ss:$16 sps:$4 sm:$0xff]  }
 0x65f   : > { %4246 = vmatprep.subr.bf16.mxu0 %v17723_v26  ;;  %v17808_v26 = vld [vmem:[%s22688_s5 + $0xc80] ss:$16 sps:$4 sm:$0xff]  }
 0x660   : > { %4196 = vmatpush1.bf16.msra.mxu1 %v17718_v27  ;;  %v17810_v27 = vld [vmem:[%s22688_s5 + $0xc84] ss:$16 sps:$4 sm:$0xff]  }
 0x661   : > { %4197 = vmatprep.subr.bf16.mxu1 %v17726_v29  ;;  %v17796_v29 = vld [vmem:[%s22688_s5 + $0xba0] ss:$16 sps:$4 sm:$0xff]  }
 0x662   : > { %4247 = vmatpush1.bf16.msra.mxu0 %v17721_v31  ;;  %v17801_v31 = vld [vmem:[%s22688_s5 + $0xbc4] ss:$16 sps:$4 sm:$0xff]  }
 0x663   : > { %4248 = vmatprep.subr.bf16.mxu0 %v17729_v34  ;;  %v17799_v34 = vld [vmem:[%s22688_s5 + $0xbc0] ss:$16 sps:$4 sm:$0xff]  }
 0x664   : > { %4198 = vmatpush1.bf16.msra.mxu1 %v17724_v3  ;;  %v17804_v3 = vld [vmem:[%s22688_s5 + $0xbe4] ss:$16 sps:$4 sm:$0xff]  }
 0x665   : > { %4199 = vmatprep.subr.bf16.mxu1 %v17732_v35  ;;  %v17802_v35 = vld [vmem:[%s22688_s5 + $0xbe0] ss:$16 sps:$4 sm:$0xff]  }
 0x666   : > { %4249 = vmatpush1.bf16.msra.mxu0 %v17727_v30  ;;  %v17807_v30 = vld [vmem:[%s22688_s5 + $0xc04] ss:$16 sps:$4 sm:$0xff]  }
 0x667   : > { %4250 = vmatprep.subr.bf16.mxu0 %v17735_v36  ;;  %v17805_v36 = vld [vmem:[%s22688_s5 + $0xc00] ss:$16 sps:$4 sm:$0xff]  }
 0x668   : > { %4200 = vmatpush1.bf16.msra.mxu1 %v17730_v37  ;;  %v17813_v37 = vld [vmem:[%s22688_s5 + $0xc24] ss:$16 sps:$4 sm:$0xff]  }
 0x669   : > { %4201 = vmatprep.subr.bf16.mxu1 %v17738_v38  ;;  %v17811_v38 = vld [vmem:[%s22688_s5 + $0xc20] ss:$16 sps:$4 sm:$0xff]  }
 0x66a   : > { %4251 = vmatpush1.bf16.msra.mxu0 %v17733_v21  ;;  %v17816_v21 = vld [vmem:[%s22688_s5 + $0xca4] ss:$16 sps:$4 sm:$0xff]  }
 0x66b   : > { %4252 = vmatprep.subr.bf16.mxu0 %v17741_v40  ;;  %v17814_v40 = vld [vmem:[%s22688_s5 + $0xca0] ss:$16 sps:$4 sm:$0xff]  }
 0x66c   : > { %4202 = vmatpush1.bf16.msra.mxu1 %v17736_v24  ;;  %v17819_v24 = vld [vmem:[%s22688_s5 + $0xc44] ss:$16 sps:$4 sm:$0xff]  }
 0x66d   : > { %4203 = vmatprep.subr.bf16.mxu1 %v17744_v41  ;;  %v17817_v41 = vld [vmem:[%s22688_s5 + $0xc40] ss:$16 sps:$4 sm:$0xff]  }
 0x66e   : > { %4253 = vmatpush1.bf16.msra.mxu0 %v17739_v42  ;;  %v17820_v42 = vld [vmem:[%s22688_s5 + $0xcc0] ss:$16 sps:$4 sm:$0xff]  }
 0x66f   : > { %15021 = vmatprep.subr.msk.bf16.mxu0 %vm1470_vm3, %v19525_v53  ;;  %v17748_v53 = vld [vmem:[%s22688_s5 + $0x828] ss:$16 sps:$4 sm:$0xff]  }
 0x670   : > { %4204 = vmatpush1.bf16.msra.mxu1 %v17742_v43  ;;  %v17822_v43 = vld [vmem:[%s22688_s5 + $0xcc4] ss:$16 sps:$4 sm:$0xff]  }
 0x671   : > { %4263 = vmatmul.mubr.bf16.vlgmr.msra.gmra.mrb[52].mxu0 %v20512_v1  ;;  %4205 = vmatprep.subr.bf16.mxu1 %v17747_v44  ;;  %v17760_v1 = vld [vmem:[%s22688_s5 + $0x8a8] ss:$16 sps:$4 sm:$0xff]   ;;  %v17825_v44 = vld [vmem:[%s22688_s5 + $0xc64] ss:$16 sps:$4 sm:$0xff]  }
 0x672   : > { %4281 = vmatpush1.bf16.msra.mxu0 %v19528_v57  ;;  %4312 = vmatprep.mubr.bf16.mxu0 %v19130_v17  ;;  %v17769_v57 = vld [vmem:[%s22688_s5 + $0xa80] ss:$16 sps:$4 sm:$0xff]  }
 0x673   : > { %5042 = vmatprep.subr.bf16.mxu0 %v17771_v46  ;;  %v17823_v46 = vld [vmem:[%s22688_s5 + $0xc60] ss:$16 sps:$4 sm:$0xff]  }
 0x674   : > { %4206 = vmatpush1.bf16.msra.mxu1 %v17745_v47  ;;  %v17828_v47 = vld [vmem:[%s22688_s5 + $0xce4] ss:$16 sps:$4 sm:$0xff]  }
 0x675   : > { %4207 = vmatprep.subr.bf16.mxu1 %v17750_v48  ;;  %v17826_v48 = vld [vmem:[%s22688_s5 + $0xce0] ss:$16 sps:$4 sm:$0xff]  }
 0x678   : > { %4208 = vmatpush1.bf16.msra.mxu1 %v17748_v53  ;;  %v17831_v53 = vld [vmem:[%s22688_s5 + $0xc8c] ss:$16 sps:$4 sm:$0xff]  }
 0x679   : > { %15022 = vmatmul.mubr.msk.bf16.vlgmr.msra.gmra.mrb[56].mxu0 %vm1466_vm4, %v15020_v50  ;;  %4209 = vmatprep.subr.bf16.mxu1 %v17753_v0  ;;  %v17834_v0 = vld [vmem:[%s22688_s5 + $0xd04] ss:$16 sps:$4 sm:$0xff]  }
 0x67a   : > { %5043 = vmatpush1.bf16.msra.mxu0 %v17769_v57  ;;  %v17840_v57 = vld [vmem:[%s22688_s5 + $0xd24] ss:$16 sps:$4 sm:$0xff]  }
 0x67b   : > { %5044 = vmatprep.subr.bf16.mxu0 %v17774_v4  ;;  %v17838_v4 = vld [vmem:[%s22688_s5 + $0xd20] ss:$16 sps:$4 sm:$0xff]  }
 0x67c   : > { %4210 = vmatpush1.bf16.msra.mxu1 %v17751_v51  ;;  %v17846_v51 = vld [vmem:[%s22688_s5 + $0xd44] ss:$16 sps:$4 sm:$0xff]  }
 0x67d   : > { %4211 = vmatprep.subr.bf16.mxu1 %v17756_v45  ;;  %v17844_v45 = vld [vmem:[%s22688_s5 + $0xd40] ss:$16 sps:$4 sm:$0xff]  }
 0x67e   : > { %5045 = vmatpush1.bf16.msra.mxu0 %v17772_v6  ;;  %v17852_v6 = vld [vmem:[%s22688_s5 + $0xd64] ss:$16 sps:$4 sm:$0xff]  }
 0x67f   : > { %5046 = vmatprep.subr.bf16.mxu0 %v17777_v32  ;;  %v17850_v32 = vld [vmem:[%s22688_s5 + $0xd60] ss:$16 sps:$4 sm:$0xff]  }
 0x680   : > { %4212 = vmatpush1.bf16.msra.mxu1 %v17754_v11  ;;  %v17858_v11 = vld [vmem:[%s22688_s5 + $0xd84] ss:$16 sps:$4 sm:$0xff]  }
 0x681   : > { %4213 = vmatprep.subr.bf16.mxu1 %v17759_v54  ;;  %v17856_v54 = vld [vmem:[%s22688_s5 + $0xd80] ss:$16 sps:$4 sm:$0xff]  }
 0x682   : > { %5047 = vmatpush1.bf16.msra.mxu0 %v17775_v55  ;;  %v17864_v55 = vld [vmem:[%s22688_s5 + $0xda4] ss:$16 sps:$4 sm:$0xff]  }
 0x683   : > { %5048 = vmatprep.subr.bf16.mxu0 %v17780_v59  ;;  %v17862_v59 = vld [vmem:[%s22688_s5 + $0xda0] ss:$16 sps:$4 sm:$0xff]  }
 0x684   : > { %4214 = vmatpush1.bf16.msra.mxu1 %v17757_v60  ;;  %v17870_v60 = vld [vmem:[%s22688_s5 + $0xdc4] ss:$16 sps:$4 sm:$0xff]  }
 0x685   : > { %4215 = vmatprep.subr.bf16.mxu1 %v17762_v61  ;;  %v17868_v61 = vld [vmem:[%s22688_s5 + $0xdc0] ss:$16 sps:$4 sm:$0xff]  }
 0x686   : > { %5049 = vmatpush1.bf16.msra.mxu0 %v17778_v62  ;;  %v17876_v62 = vld [vmem:[%s22688_s5 + $0xde4] ss:$16 sps:$4 sm:$0xff]  }
 0x687   : > { %5050 = vmatprep.subr.bf16.mxu0 %v17783_v63  ;;  %v17874_v63 = vld [vmem:[%s22688_s5 + $0xde0] ss:$16 sps:$4 sm:$0xff]  }
 0x688   : > { %4216 = vmatpush1.bf16.msra.mxu1 %v17760_v1  ;;  %v17882_v1 = vld [vmem:[%s22688_s5 + $0xa8c] ss:$16 sps:$4 sm:$0xff]  }
 0x689   : > { %4217 = vmatprep.subr.bf16.mxu1 %v17765_v2 }
 0x68a   : > { %5051 = vmatpush1.bf16.msra.mxu0 %v17781_v5 }
 0x68b   : > { %5052 = vmatprep.subr.bf16.mxu0 %v17786_v7 }
 0x68c   : > { %4218 = vmatpush1.bf16.msra.mxu1 %v17763_v8 }
 0x68d   : > { %4219 = vmatprep.subr.bf16.mxu1 %v17768_v9 }
 0x68e   : > { %5053 = vmatpush1.bf16.msra.mxu0 %v17784_v10 }
 0x68f   : > { %5054 = vmatprep.subr.bf16.mxu0 %v17789_v16 }
 0x690   : > { %4220 = vmatpush1.bf16.msra.mxu1 %v17766_v12 }
 0x691   : > { %15023 = vmatprep.subr.msk.bf16.mxu1 %vm1470_vm3, %v19530_v58  ;;  %v17790_v58 = vld [vmem:[%s22688_s5 + $0xb60] ss:$16 sps:$4 sm:$0xff]  }
 0x692   : > { %5055 = vmatpush1.bf16.msra.mxu0 %v17787_v22 }
 0x693   : > { %4222 = vmatmul.mubr.bf16.vlgmr.msra.gmra.mrb[40].mxu1 %v20472_v39  ;;  %v17795_v39 = vld [vmem:[%s22688_s5 + $0xb84] ss:$16 sps:$4 sm:$0xff]  }
 0x694   : > { %4322 = vmatpush1.bf16.msra.mxu1 %v19536_v56  ;;  %4353 = vmatprep.mubr.bf16.mxu1 %v19130_v17  ;;  %v17792_v56 = vld [vmem:[%s22688_s5 + $0xb64] ss:$16 sps:$4 sm:$0xff]  }
 0x695   : > { %5056 = vmatprep.subr.bf16.mxu0 %v17792_v56  ;;  %5083 = vmatprep.subr.bf16.mxu1 %v17810_v27 }
 0x696   : > { %5057 = vmatpush1.bf16.msra.mxu0 %v17790_v58 }
 0x697   : > { %5058 = vmatprep.subr.bf16.mxu0 %v17795_v39 }
 0x69a   : > { %5059 = vmatpush1.bf16.msra.mxu0 %v17793_v23 }
 0x69b   : > { %15024 = vmatmul.mubr.msk.bf16.vlgmr.msra.gmra.mrb[44].mxu1 %vm1466_vm4, %v15020_v50  ;;  %5060 = vmatprep.subr.bf16.mxu0 %v17798_v25  ;;  %v17832_v50 = vld [vmem:[%s22688_s5 + $0xd00] ss:$16 sps:$4 sm:$0xff]  }
 0x69c   : > { %5084 = vmatpush1.bf16.msra.mxu1 %v17808_v26 }
 0x69d   : > { %5085 = vmatprep.subr.bf16.mxu1 %v17816_v21  ;;  %v17849_v21 = vld [vmem:[%s22688_s5 + $0xcec] ss:$16 sps:$4 sm:$0xff]  }
 0x69e   : > { %5061 = vmatpush1.bf16.msra.mxu0 %v17796_v29 }
 0x69f   : > { %5062 = vmatprep.subr.bf16.mxu0 %v17801_v31 }
 0x6a0   : > { %5086 = vmatpush1.bf16.msra.mxu1 %v17814_v40  ;;  %v17847_v40 = vld [vmem:[%s22688_s5 + $0xce8] ss:$16 sps:$4 sm:$0xff]  }
 0x6a1   : > { %5087 = vmatprep.subr.bf16.mxu1 %v17822_v43  ;;  %v17859_v43 = vld [vmem:[%s22688_s5 + $0xd28] ss:$16 sps:$4 sm:$0xff]  }
 0x6a2   : > { %5063 = vmatpush1.bf16.msra.mxu0 %v17799_v34 }
 0x6a3   : > { %5064 = vmatprep.subr.bf16.mxu0 %v17804_v3 }
 0x6a4   : > { %5088 = vmatpush1.bf16.msra.mxu1 %v17820_v42  ;;  %v17861_v42 = vld [vmem:[%s22688_s5 + $0xd2c] ss:$16 sps:$4 sm:$0xff]  }
 0x6a5   : > { %5089 = vmatprep.subr.bf16.mxu1 %v17828_v47  ;;  %v17865_v47 = vld [vmem:[%s22688_s5 + $0xd48] ss:$16 sps:$4 sm:$0xff]  }
 0x6a6   : > { %5065 = vmatpush1.bf16.msra.mxu0 %v17802_v35  ;;  %v17829_v35 = vld [vmem:[%s22688_s5 + $0xc88] ss:$16 sps:$4 sm:$0xff]  }
 0x6a7   : > { %5066 = vmatprep.subr.bf16.mxu0 %v17807_v30 }
 0x6a8   : > { %5090 = vmatpush1.bf16.msra.mxu1 %v17826_v48 }
 0x6a9   : > { %5091 = vmatprep.subr.bf16.mxu1 %v17834_v0  ;;  %v17873_v0 = vld [vmem:[%s22688_s5 + $0xd6c] ss:$16 sps:$4 sm:$0xff]  }
 0x6aa   : > { %5067 = vmatpush1.bf16.msra.mxu0 %v17805_v36  ;;  %v17835_v36 = vld [vmem:[%s22688_s5 + $0xca8] ss:$16 sps:$4 sm:$0xff]  }
 0x6ab   : > { %5068 = vmatprep.subr.bf16.mxu0 %v17813_v37  ;;  %v17843_v37 = vld [vmem:[%s22688_s5 + $0xccc] ss:$16 sps:$4 sm:$0xff]  }
 0x6ac   : > { %5092 = vmatpush1.bf16.msra.mxu1 %v17832_v50 }
 0x6ad   : > { %5093 = vmatprep.subr.bf16.mxu1 %v17840_v57 }
 0x6ae   : > { %5069 = vmatpush1.bf16.msra.mxu0 %v17811_v38  ;;  %v17841_v38 = vld [vmem:[%s22688_s5 + $0xcc8] ss:$16 sps:$4 sm:$0xff]  }
 0x6af   : > { %5070 = vmatprep.subr.bf16.mxu0 %v17819_v24  ;;  %v17855_v24 = vld [vmem:[%s22688_s5 + $0xd0c] ss:$16 sps:$4 sm:$0xff]  }
 0x6b0   : > { %5094 = vmatpush1.bf16.msra.mxu1 %v17838_v4 }
 0x6b1   : > { %5095 = vmatprep.subr.bf16.mxu1 %v17846_v51 }
 0x6b2   : > { %5071 = vmatpush1.bf16.msra.mxu0 %v17817_v41  ;;  %v17853_v41 = vld [vmem:[%s22688_s5 + $0xd08] ss:$16 sps:$4 sm:$0xff]  }
 0x6b3   : > { %5072 = vmatprep.subr.bf16.mxu0 %v17825_v44  ;;  %v17867_v44 = vld [vmem:[%s22688_s5 + $0xd4c] ss:$16 sps:$4 sm:$0xff]  }
 0x6b4   : > { %5096 = vmatpush1.bf16.msra.mxu1 %v17844_v45 }
 0x6b5   : > { %5097 = vmatprep.subr.bf16.mxu1 %v17852_v6  ;;  %v17871_v6 = vld [vmem:[%s22688_s5 + $0xd68] ss:$16 sps:$4 sm:$0xff]  }
 0x6b6   : > { %5073 = vmatpush1.bf16.msra.mxu0 %v17823_v46 }
 0x6b7   : > { %5165 = vmatprep.subr.bf16.mxu0 %v17831_v53 }
 0x6b8   : > { %5098 = vmatpush1.bf16.msra.mxu1 %v17850_v32  ;;  %v17879_v32 = vld [vmem:[%s22688_s5 + $0xd8c] ss:$16 sps:$4 sm:$0xff]  }
 0x6b9   : > { %5099 = vmatprep.subr.bf16.mxu1 %v17858_v11 }
 0x6bc   : > { %5100 = vmatpush1.bf16.msra.mxu1 %v17856_v54 }
 0x6bd   : > { %5101 = vmatprep.subr.bf16.mxu1 %v17864_v55 }
 0x6c0   : > { %5102 = vmatpush1.bf16.msra.mxu1 %v17862_v59  ;;  %v17880_v59 = vld [vmem:[%s22688_s5 + $0xa88] ss:$16 sps:$4 sm:$0xff]  }
 0x6c1   : > { %5103 = vmatprep.subr.bf16.mxu1 %v17870_v60  ;;  %v17885_v60 = vld [vmem:[%s22688_s5 + $0xdac] ss:$16 sps:$4 sm:$0xff]  }
 0x6c4   : > { %5104 = vmatpush1.bf16.msra.mxu1 %v17868_v61 }
 0x6c5   : > { %5105 = vmatprep.subr.bf16.mxu1 %v17876_v62 }
 0x6c8   : > { %5106 = vmatpush1.bf16.msra.mxu1 %v17874_v63  ;;  %v17888_v63 = vld [vmem:[%s22688_s5 + $0xaac] ss:$16 sps:$4 sm:$0xff]  }
 0x6c9   : > { %5124 = vmatprep.subr.bf16.mxu1 %v17882_v1  ;;  %v17883_v1 = vld [vmem:[%s22688_s5 + $0xda8] ss:$16 sps:$4 sm:$0xff]  }
 0x714   : > { %v4141_v2 = vpop.f32.mrb[48].mxu0 }
 0x715   : > { %v4143_v5 = vpop.f32.mrb[49].mxu0 }
 0x716   : > { %v4145_v7 = vpop.f32.mrb[50].mxu0 }
 0x717   : > { %v4146_v8 = vpop.f32.mrb[51].mxu0  ;;  %v17894_v7 = vld [vmem:[%s22688_s5 + $0xacc] ss:$16 sps:$4 sm:$0xff]  }
 0x718   : > { %v17889_v8 = vld [vmem:[%s22688_s5 + $0xdc8] ss:$16 sps:$4 sm:$0xff]  }
 0x726   : > { %v4182_v9 = vpop.f32.mrb[36].mxu1 }
 0x727   : > { %v4183_v10 = vadd.f32 %v4182_v9, %v4141_v2  ;;  %v4184_v12 = vpop.f32.mrb[37].mxu1  ;;  %v17891_v2 = vld [vmem:[%s22688_s5 + $0xdcc] ss:$16 sps:$4 sm:$0xff]  }
 0x728   : > { %v4185_v16 = vadd.f32 %v4184_v12, %v4143_v5  ;;  %v4186_v22 = vpop.f32.mrb[38].mxu1  ;;  %v17886_v5 = vld [vmem:[%s22688_s5 + $0xaa8] ss:$16 sps:$4 sm:$0xff]   ;;  %v17897_v9 = vld [vmem:[%s22688_s5 + $0xdec] ss:$16 sps:$4 sm:$0xff]  }
 0x729   : > { %v20836_v58 = vadd.f32 %v4183_v10, %v20468_v28  ;;  %v4187_v56 = vpop.f32.mrb[39].mxu1  ;;  %v17892_v10 = vld [vmem:[%s22688_s5 + $0xac8] ss:$16 sps:$4 sm:$0xff]   ;;  %v17900_v12 = vld [vmem:[%s22688_s5 + $0xaec] ss:$16 sps:$4 sm:$0xff]   ;;  %v17937_v22 = vld [vmem:[%s22690_s7 + $0x40] sm:$0xff]  }
 0x72a   : > { %v20839_v39 = vadd.f32 %v4185_v16, %v20470_v33  ;;  %v17837_v33 = vld [vmem:[%s22688_s5 + $0xcac] ss:$16 sps:$4 sm:$0xff]   ;;  %v17895_v16 = vld [vmem:[%s22688_s5 + $0xde8] ss:$16 sps:$4 sm:$0xff]  }
 0x72b   : > { %v17898_v56 = vld [vmem:[%s22688_s5 + $0xae8] ss:$16 sps:$4 sm:$0xff]  }
 0x744   : > { %v4264_v23 = vpop.f32.mrb[52].mxu0 }
 0x745   : > { %v4266_v25 = vpop.f32.mrb[53].mxu0 }
 0x746   : > { %v4268_v26 = vpop.f32.mrb[54].mxu0 }
 0x747   : > { %v4269_v27 = vpop.f32.mrb[55].mxu0  ;;  %v17939_v26 = vld [vmem:[%s22690_s7 + $0x48] sm:$0xff]  }
 0x748   : > { %v17901_v27 = vld [vmem:[%s22688_s5 + $0xb08] ss:$16 sps:$4 sm:$0xff]  }
 0x74c   : > { %v4314_v29 = vpop.f32.mrb[56].mxu0 }
 0x74d   : > { %v20841_v31 = vpack.c.bf16 %v4314_v29, %v4314_v29  ;;  %v4316_v34 = vpop.f32.mrb[57].mxu0  ;;  %v17906_v29 = vld [vmem:[%s22688_s5 + $0xb2c] ss:$16 sps:$4 sm:$0xff]  }
 0x74e   : > { %v20843_v3 = vpack.c.bf16 %v4316_v34, %v4316_v34  ;;  %v4318_v28 = vpop.f32.mrb[58].mxu0  ;;  %v17940_v34 = vld [vmem:[%s22690_s7 + $0x8] sm:$0xff]  }
 0x74f   : > { %v4319_v30 = vpop.f32.mrb[59].mxu0  ;;  %v17909_v28 = vld [vmem:[%s22688_s5 + $0xb4c] ss:$16 sps:$4 sm:$0xff]  }
 0x750   : > { %5074 = vmatprep.mubr.bf16.mxu0 %v20843_v3  ;;  %v17943_v30 = vld [vmem:[%s22690_s7 + $0x58] sm:$0xff]  }
 0x751   : > { %5075 = vmatmul.mubr.bf16.vlgmr.msra.gmra.mrb[60].mxu0 %v20841_v31 }
 0x752   : > { %5166 = vmatpush1.bf16.msra.mxu0 %v17829_v35  ;;  %v17904_v35 = vld [vmem:[%s22688_s5 + $0xb28] ss:$16 sps:$4 sm:$0xff]  }
 0x753   : > { %5167 = vmatprep.subr.bf16.mxu0 %v17837_v33  ;;  %v17942_v33 = vld [vmem:[%s22690_s7 + $0x10] sm:$0xff]  }
 0x756   : > { %5168 = vmatpush1.bf16.msra.mxu0 %v17835_v36  ;;  %v17907_v36 = vld [vmem:[%s22688_s5 + $0xb48] ss:$16 sps:$4 sm:$0xff]  }
 0x757   : > { %5169 = vmatprep.subr.bf16.mxu0 %v17843_v37  ;;  %v17912_v37 = vld [vmem:[%s22688_s5 + $0xb6c] ss:$16 sps:$4 sm:$0xff]  }
 0x75a   : > { %5170 = vmatpush1.bf16.msra.mxu0 %v17841_v38  ;;  %v17944_v38 = vld [vmem:[%s22690_s7 + $0x18] sm:$0xff]  }
 0x75b   : > { %5171 = vmatprep.subr.bf16.mxu0 %v17849_v21  ;;  %v17945_v21 = vld [vmem:[%s22690_s7 + $0x60] sm:$0xff]  }
 0x75e   : > { %5172 = vmatpush1.bf16.msra.mxu0 %v17847_v40  ;;  %v17910_v40 = vld [vmem:[%s22688_s5 + $0xb68] ss:$16 sps:$4 sm:$0xff]  }
 0x75f   : > { %5173 = vmatprep.subr.bf16.mxu0 %v17855_v24  ;;  %v17915_v24 = vld [vmem:[%s22688_s5 + $0xb8c] ss:$16 sps:$4 sm:$0xff]  }
 0x762   : > { %5174 = vmatpush1.bf16.msra.mxu0 %v17853_v41  ;;  %v17946_v41 = vld [vmem:[%s22690_s7 + $0x20] sm:$0xff]  }
 0x763   : > { %5175 = vmatprep.subr.bf16.mxu0 %v17861_v42  ;;  %v17913_v42 = vld [vmem:[%s22688_s5 + $0xb88] ss:$16 sps:$4 sm:$0xff]  }
 0x766   : > { %5176 = vmatpush1.bf16.msra.mxu0 %v17859_v43  ;;  %v4223_v46 = vpop.f32.mrb[40].mxu1  ;;  %v17918_v43 = vld [vmem:[%s22688_s5 + $0xbac] ss:$16 sps:$4 sm:$0xff]  }
 0x767   : > { %v4265_v48 = vadd.f32 %v4264_v23, %v4223_v46  ;;  %v4225_v53 = vpop.f32.mrb[41].mxu1  ;;  %5177 = vmatprep.subr.bf16.mxu0 %v17867_v44  ;;  %v17903_v23 = vld [vmem:[%s22688_s5 + $0xb0c] ss:$16 sps:$4 sm:$0xff]   ;;  %v17916_v44 = vld [vmem:[%s22688_s5 + $0xba8] ss:$16 sps:$4 sm:$0xff]  }
 0x768   : > { %v4267_v50 = vadd.f32 %v4266_v25, %v4225_v53  ;;  %v4227_v57 = vpop.f32.mrb[42].mxu1  ;;  %v17938_v25 = vld [vmem:[%s22690_s7] sm:$0xff]   ;;  %v17921_v46 = vld [vmem:[%s22688_s5 + $0xbcc] ss:$16 sps:$4 sm:$0xff]   ;;  %v17922_v53 = vld [vmem:[%s22688_s5 + $0xbe8] ss:$16 sps:$4 sm:$0xff]  }
 0x769   : > { %v20890_v4 = vadd.f32 %v4265_v48, %v20493_v49  ;;  %v4228_v51 = vpop.f32.mrb[43].mxu1  ;;  %v17877_v49 = vld [vmem:[%s22688_s5 + $0xd88] ss:$16 sps:$4 sm:$0xff]   ;;  %v17924_v48 = vld [vmem:[%s22688_s5 + $0xbec] ss:$16 sps:$4 sm:$0xff]  }
 0x76a   : > { %v20893_v45 = vadd.f32 %v4267_v50, %v20495_v52  ;;  %5178 = vmatpush1.bf16.msra.mxu0 %v17865_v47  ;;  %v17919_v47 = vld [vmem:[%s22688_s5 + $0xbc8] ss:$16 sps:$4 sm:$0xff]   ;;  %v17930_v57 = vld [vmem:[%s22688_s5 + $0xc2c] ss:$16 sps:$4 sm:$0xff]  }
 0x76b   : > { %5179 = vmatprep.subr.bf16.mxu0 %v17873_v0  ;;  %v17927_v0 = vld [vmem:[%s22688_s5 + $0xc0c] ss:$16 sps:$4 sm:$0xff]   ;;  %v17925_v50 = vld [vmem:[%s22688_s5 + $0xc08] ss:$16 sps:$4 sm:$0xff]  }
 0x76c   : > { %v17928_v51 = vld [vmem:[%s22688_s5 + $0xc28] ss:$16 sps:$4 sm:$0xff]  }
 0x76e   : > { %5180 = vmatpush1.bf16.msra.mxu0 %v17871_v6  ;;  %v4355_v11 = vpop.f32.mrb[44].mxu1  ;;  %v17933_v6 = vld [vmem:[%s22688_s5 + $0xc4c] ss:$16 sps:$4 sm:$0xff]  }
 0x76f   : > { %v4357_v54 = vpop.f32.mrb[45].mxu1  ;;  %5181 = vmatprep.subr.bf16.mxu0 %v17879_v32  ;;  %v4477_v61 = vpack.c.bf16 %v4355_v11, %v4355_v11  ;;  %v17931_v32 = vld [vmem:[%s22688_s5 + $0xc48] ss:$16 sps:$4 sm:$0xff]   ;;  %v17936_v11 = vld [vmem:[%s22688_s5 + $0xc6c] ss:$16 sps:$4 sm:$0xff]  }
 0x770   : > { %v4478_v52 = vpack.c.bf16 %v4357_v54, %v4357_v54  ;;  %v4359_v55 = vpop.f32.mrb[46].mxu1  ;;  %v17947_v54 = vld [vmem:[%s22690_s7 + $0x68] sm:$0xff]  }
 0x771   : > { %v4360_v62 = vpop.f32.mrb[47].mxu1  ;;  %v17949_v55 = vld [vmem:[%s22690_s7 + $0x70] sm:$0xff]  }
 0x772   : > { %5182 = vmatpush1.bf16.msra.mxu0 %v17877_v49  ;;  %15249 = vmatprep.mubr.msk.bf16.mxu1 %vm2445_vm5, %v4478_v52  ;;  %v17934_v49 = vld [vmem:[%s22688_s5 + $0xc68] ss:$16 sps:$4 sm:$0xff]   ;;  %v17961_v62 = vld [vmem:[%s22690_s7 + $0x80] sm:$0xff]  }
 0x773   : > { %15250 = vmatprep.mubr.msk.bf16.mxu0 %vm2445_vm5, %v4478_v52  ;;  %5116 = vmatmul.mubr.bf16.vlgmr.msra.gmra.mrb[48].mxu1 %v4477_v61  ;;  %v17948_v52 = vld [vmem:[%s22690_s7 + $0x28] sm:$0xff]  }
 0x774   : > { %5125 = vmatpush1.bf16.msra.mxu1 %v17880_v59  ;;  %5183 = vmatprep.subr.bf16.mxu0 %v17885_v60  ;;  %v17950_v59 = vld [vmem:[%s22690_s7 + $0x30] sm:$0xff]   ;;  %v17952_v60 = vld [vmem:[%s22690_s7 + $0x38] sm:$0xff]  }
 0x775   : > { %5126 = vmatprep.subr.bf16.mxu1 %v17888_v63  ;;  %5156 = vmatprep.mubr.bf16.mxu1 %v20843_v3  ;;  %v17941_v3 = vld [vmem:[%s22690_s7 + $0x50] sm:$0xff]   ;;  %v17964_v63 = vld [vmem:[%s22690_s7 + $0x88] sm:$0xff]  }
 0x776   : > { %5184 = vmatpush1.bf16.msra.mxu0 %v17883_v1  ;;  %v17967_v1 = vld [vmem:[%s22690_s7 + $0x90] sm:$0xff]  }
 0x777   : > { %5185 = vmatprep.subr.bf16.mxu0 %v17891_v2  ;;  %v17970_v2 = vld [vmem:[%s22690_s7 + $0x98] sm:$0xff]  }
 0x778   : > { %5127 = vmatpush1.bf16.msra.mxu1 %v17886_v5  ;;  %v17973_v5 = vld [vmem:[%s22690_s7 + $0xa0] sm:$0xff]  }
 0x779   : > { %5128 = vmatprep.subr.bf16.mxu1 %v17894_v7  ;;  %v17976_v7 = vld [vmem:[%s22690_s7 + $0xa8] sm:$0xff]  }
 0x77a   : > { %5186 = vmatpush1.bf16.msra.mxu0 %v17889_v8  ;;  %v17979_v8 = vld [vmem:[%s22690_s7 + $0xb0] sm:$0xff]  }
 0x77b   : > { %5187 = vmatprep.subr.bf16.mxu0 %v17897_v9  ;;  %v17982_v9 = vld [vmem:[%s22690_s7 + $0xb8] sm:$0xff]  }
 0x77c   : > { %5129 = vmatpush1.bf16.msra.mxu1 %v17892_v10  ;;  %v17985_v10 = vld [vmem:[%s22690_s7 + $0xc0] sm:$0xff]  }
 0x77d   : > { %5130 = vmatprep.subr.bf16.mxu1 %v17900_v12  ;;  %v17988_v12 = vld [vmem:[%s22690_s7 + $0xc8] sm:$0xff]  }
 0x77e   : > { %5188 = vmatpush1.bf16.msra.mxu0 %v17895_v16  ;;  %v17991_v16 = vld [vmem:[%s22690_s7 + $0xd0] sm:$0xff]  }
 0x77f   : > { %16718 = vmatprep.subr.bf16.mxu0 %v17937_v22  ;;  %v17994_v22 = vld [vmem:[%s22690_s7 + $0xd8] sm:$0xff]  }
 0x780   : > { %5131 = vmatpush1.bf16.msra.mxu1 %v17898_v56 }
 0x781   : > { %5198 = vmatmul.mubr.bf16.vlgmr.msra.gmra.mrb[64].mxu0 %v4477_v61  ;;  %5132 = vmatprep.subr.bf16.mxu1 %v17903_v23  ;;  %v17953_v61 = vld [vmem:[%s22690_s7 + $0x120] sm:$0xff]  }
 0x782   : > { %16719 = vmatpush3.bf16.msra.mxu0 %v17938_v25 }
 0x783   : > { %16720 = vmatprep.subr.bf16.mxu0 %v17939_v26 }
 0x784   : > { %5133 = vmatpush1.bf16.msra.mxu1 %v17901_v27  ;;  %v21122_v27 = vld [vmem:[%s22689_s6] sm:$0xf] }
 0x785   : > { %5134 = vmatprep.subr.bf16.mxu1 %v17906_v29 }
 0x786   : > { %16721 = vmatpush3.bf16.msra.mxu0 %v17940_v34 }
 0x787   : > { %16722 = vmatprep.subr.bf16.mxu0 %v17941_v3  ;;  %v5215_v3 = vrot.slane %v21122_v27, %v19505_v15 }
 0x788   : > { %5135 = vmatpush1.bf16.msra.mxu1 %v17904_v35 }
 0x789   : > { %5136 = vmatprep.subr.bf16.mxu1 %v17909_v28 }
 0x78a   : > { %16723 = vmatpush3.bf16.msra.mxu0 %v17942_v33  ;;  %v5219_v33 = vrot.slane %v21122_v27, %v19511_v18 }
 0x78b   : > { %16724 = vmatprep.subr.bf16.mxu0 %v17943_v30 }
 0x78c   : > { %5137 = vmatpush1.bf16.msra.mxu1 %v17907_v36 }
 0x78d   : > { %5138 = vmatprep.subr.bf16.mxu1 %v17912_v37 }
 0x78e   : > { %16725 = vmatpush3.bf16.msra.mxu0 %v17944_v38 }
 0x78f   : > { %16726 = vmatprep.subr.bf16.mxu0 %v17945_v21 }
 0x790   : > { %5139 = vmatpush1.bf16.msra.mxu1 %v17910_v40 }
 0x791   : > { %5140 = vmatprep.subr.bf16.mxu1 %v17915_v24 }
 0x792   : > { %16727 = vmatpush3.bf16.msra.mxu0 %v17946_v41 }
 0x793   : > { %16728 = vmatprep.subr.bf16.mxu0 %v17947_v54  ;;  %v17966_v54 = vld [vmem:[%s22690_s7 + $0x108] sm:$0xff]  }
 0x794   : > { %5141 = vmatpush1.bf16.msra.mxu1 %v17913_v42 }
 0x795   : > { %5142 = vmatprep.subr.bf16.mxu1 %v17918_v43  ;;  %v17954_v43 = vld [vmem:[%s22690_s7 + $0xe0] sm:$0xff]  }
 0x796   : > { %16729 = vmatpush3.bf16.msra.mxu0 %v17948_v52  ;;  %v17968_v52 = vld [vmem:[%s22690_s7 + $0x150] sm:$0xff]  }
 0x797   : > { %16730 = vmatprep.subr.bf16.mxu0 %v17949_v55  ;;  %v17969_v55 = vld [vmem:[%s22690_s7 + $0x110] sm:$0xff]  }
 0x798   : > { %5143 = vmatpush1.bf16.msra.mxu1 %v17916_v44 }
 0x799   : > { %5144 = vmatprep.subr.bf16.mxu1 %v17921_v46  ;;  %v17955_v46 = vld [vmem:[%s22690_s7 + $0x128] sm:$0xff]  }
 0x79a   : > { %16731 = vmatpush3.bf16.msra.mxu0 %v17950_v59  ;;  %v17971_v59 = vld [vmem:[%s22690_s7 + $0x158] sm:$0xff]  }
 0x79c   : > { %5145 = vmatpush1.bf16.msra.mxu1 %v17919_v47  ;;  %v17956_v47 = vld [vmem:[%s22690_s7 + $0xe8] sm:$0xff]  }
 0x79d   : > { %5146 = vmatprep.subr.bf16.mxu1 %v17924_v48 }
 0x7a0   : > { %5147 = vmatpush1.bf16.msra.mxu1 %v17922_v53  ;;  %v17957_v53 = vld [vmem:[%s22690_s7 + $0x130] sm:$0xff]  }
 0x7a1   : > { %5148 = vmatprep.subr.bf16.mxu1 %v17927_v0 }
 0x7a4   : > { %5149 = vmatpush1.bf16.msra.mxu1 %v17925_v50 }
 0x7a5   : > { %5150 = vmatprep.subr.bf16.mxu1 %v17930_v57  ;;  %v17958_v57 = vld [vmem:[%s22690_s7 + $0xf0] sm:$0xff]  }
 0x7a8   : > { %5151 = vmatpush1.bf16.msra.mxu1 %v17928_v51  ;;  %v17959_v51 = vld [vmem:[%s22690_s7 + $0x138] sm:$0xff]  }
 0x7a9   : > { %5152 = vmatprep.subr.bf16.mxu1 %v17933_v6  ;;  %v17960_v6 = vld [vmem:[%s22690_s7 + $0xf8] sm:$0xff]  }
 0x7ac   : > { %5153 = vmatpush1.bf16.msra.mxu1 %v17931_v32  ;;  %v17962_v32 = vld [vmem:[%s22690_s7 + $0x140] sm:$0xff]  }
 0x7ad   : > { %5154 = vmatprep.subr.bf16.mxu1 %v17936_v11  ;;  %v17963_v11 = vld [vmem:[%s22690_s7 + $0x100] sm:$0xff]  }
 0x7b0   : > { %5155 = vmatpush1.bf16.msra.mxu1 %v17934_v49  ;;  %v17965_v49 = vld [vmem:[%s22690_s7 + $0x148] sm:$0xff]  }
 0x7b1   : > { %5512 = vmatprep.subr.bf16.mxu1 %v19130_v17 }
 0x7b3   : > { %5157 = vmatmul.mubr.bf16.vlgmr.msra.gmra.mrb[52].mxu1 %v20841_v31  ;;  %v17951_v31 = vld [vmem:[%s22690_s7 + $0x78] sm:$0xff]  }
 0x7b4   : > { %16732 = vmatprep.subr.bf16.mxu0 %v17951_v31  ;;  %5513 = vmatpush1.bf16.msra.mxu1 %v17961_v62  ;;  %v17972_v31 = vld [vmem:[%s22690_s7 + $0x118] sm:$0xff]  }
 0x7b5   : > { %16733 = vmatpush3.bf16.msra.mxu0 %v17952_v60  ;;  %5514 = vmatprep.subr.bf16.mxu1 %v19130_v17  ;;  %v17974_v60 = vld [vmem:[%s22690_s7 + $0x200] sm:$0xff]  }
 0x7b6   : > { %16740 = vmatprep.subr.bf16.mxu0 %v17953_v61  ;;  %v17975_v61 = vld [vmem:[%s22690_s7 + $0x1c0] sm:$0xff]  }
 0x7b8   : > { %5515 = vmatpush1.bf16.msra.mxu1 %v17964_v63  ;;  %v17977_v63 = vld [vmem:[%s22690_s7 + $0x208] sm:$0xff]  }
 0x7b9   : > { %5516 = vmatprep.subr.bf16.mxu1 %v19130_v17 }
 0x7bc   : > { %5517 = vmatpush1.bf16.msra.mxu1 %v17967_v1 }
 0x7bd   : > { %5518 = vmatprep.subr.bf16.mxu1 %v19130_v17 }
 0x7c0   : > { %5519 = vmatpush1.bf16.msra.mxu1 %v17970_v2  ;;  %v17978_v2 = vld [vmem:[%s22690_s7 + $0x1c8] sm:$0xff]  }
 0x7c1   : > { %5520 = vmatprep.subr.bf16.mxu1 %v19130_v17 }
 0x7c4   : > { %5521 = vmatpush1.bf16.msra.mxu1 %v17973_v5  ;;  %v17980_v5 = vld [vmem:[%s22690_s7 + $0x210] sm:$0xff]  }
 0x7c5   : > { %5522 = vmatprep.subr.bf16.mxu1 %v19130_v17 }
 0x7c8   : > { %5523 = vmatpush1.bf16.msra.mxu1 %v17976_v7  ;;  %v17981_v7 = vld [vmem:[%s22690_s7 + $0x1d0] sm:$0xff]  }
 0x7c9   : > { %5524 = vmatprep.subr.bf16.mxu1 %v19130_v17 }
 0x7cc   : > { %5525 = vmatpush1.bf16.msra.mxu1 %v17979_v8  ;;  %v17983_v8 = vld [vmem:[%s22690_s7 + $0x218] sm:$0xff]  }
 0x7cd   : > { %5526 = vmatprep.subr.bf16.mxu1 %v19130_v17 }
 0x7d0   : > { %5527 = vmatpush1.bf16.msra.mxu1 %v17982_v9  ;;  %v17984_v9 = vld [vmem:[%s22690_s7 + $0x1d8] sm:$0xff]  }
 0x7d1   : > { %5528 = vmatprep.subr.bf16.mxu1 %v19130_v17 }
 0x7d4   : > { %5529 = vmatpush1.bf16.msra.mxu1 %v17985_v10  ;;  %v17986_v10 = vld [vmem:[%s22690_s7 + $0x220] sm:$0xff]  }
 0x7d5   : > { %5530 = vmatprep.subr.bf16.mxu1 %v19130_v17 }
 0x7d8   : > { %5531 = vmatpush1.bf16.msra.mxu1 %v17988_v12  ;;  %v17987_v12 = vld [vmem:[%s22690_s7 + $0x1e0] sm:$0xff]  }
 0x7d9   : > { %5532 = vmatprep.subr.bf16.mxu1 %v19130_v17 }
 0x7dc   : > { %5533 = vmatpush1.bf16.msra.mxu1 %v17991_v16  ;;  %v17989_v16 = vld [vmem:[%s22690_s7 + $0x228] sm:$0xff]  }
 0x7dd   : > { %5534 = vmatprep.subr.bf16.mxu1 %v19130_v17 }
 0x7e0   : > { %5535 = vmatpush1.bf16.msra.mxu1 %v17994_v22  ;;  %v17990_v22 = vld [vmem:[%s22690_s7 + $0x1e8] sm:$0xff]  }
 0x7e1   : > { %5835 = vmatprep.subr.bf16.mxu1 %v19130_v17 }
 0x824   : > { %v5076_v56 = vpop.f32.mrb[60].mxu0 }
 0x825   : > { %v5078_v23 = vpop.f32.mrb[61].mxu0 }
 0x826   : > { %v5080_v25 = vpop.f32.mrb[62].mxu0 }
 0x827   : > { %v5081_v26 = vpop.f32.mrb[63].mxu0 }
 0x828   : > { %v5223_v26 = vrot.slane %v21122_v27, %v19514_v19 }
 0x846   : > { %v5117_v29 = vpop.f32.mrb[48].mxu1 }
 0x847   : > { %v5118_v34 = vadd.f32 %v5117_v29, %v5076_v56  ;;  %v5119_v35 = vpop.f32.mrb[49].mxu1  ;;  %v17992_v56 = vld [vmem:[%s22690_s7 + $0x230] sm:$0xff]  }
 0x848   : > { %v5120_v28 = vadd.f32 %v5119_v35, %v5078_v23  ;;  %v5121_v30 = vpop.f32.mrb[50].mxu1 }
 0x849   : > { %v5206_v36 = vadd.f32 %v5118_v34, %v20836_v58  ;;  %v5122_v37 = vpop.f32.mrb[51].mxu1 }
 0x84a   : > { %v5207_v38 = vadd.f32 %v5120_v28, %v20839_v39  ;;  %v17993_v28 = vld [vmem:[%s22690_s7 + $0x1f0] sm:$0xff]  }
 0x84b   : > { %v5232_v21 = vadd.f32 %v5215_v3, %v5206_v36  ;;  %v5227_v3 = vrot.slane %v21122_v27, %v19517_v20  ;;  %v17995_v36 = vld [vmem:[%s22690_s7 + $0x238] sm:$0xff]  }
 0x84c   : > { %v5233_v40 = vadd.f32 %v5219_v33, %v5207_v38  ;;  %v17996_v27 = vld [vmem:[%s22690_s7 + $0x1f8] sm:$0xff]  }
 0x84d   : > { %v5236_v24 = vmax.f32 %v5232_v21, 0.0 }
 0x84e   : > { %v5237_v41 = vmax.f32 %v5233_v40, 0.0 }
 0x84f   : > { %v21135_v44 = vpack.c.bf16 %v5236_v24, %v5236_v24 }
 0x850   : > { %v21130_v42 = vpack.c.bf16 %v5237_v41, %v5237_v41 }
 0x851   : > { %v21192_v62 = vshrl.u32 %v21135_v44, 16 }
 0x852   : > { %5504 = vmatprep.mubr.bf16.mxu0 %v21130_v42  ;;  %v21142_v58 = vshrl.u32 %v21130_v42, 16  ;;  %v5938_v1 = vrot.slane %v21130_v42, 1 }
 0x853   : > { %5505 = vmatmul.mubr.bf16.vlgmr.msra.gmra.mrb[68].mxu0 %v21135_v44 }
 0x854   : > { %v5199_v39 = vpop.f32.mrb[64].mxu0  ;;  %16741 = vmatpush3.bf16.msra.mxu0 %v17954_v43  ;;  %5827 = vmatprep.mubr.bf16.mxu0 %v21142_v58 }
 0x855   : > { %v5201_v48 = vpop.f32.mrb[65].mxu0  ;;  %16742 = vmatprep.subr.bf16.mxu0 %v17955_v46  ;;  %v5937_v46 = vrot.slane %v21135_v44, 1 }
 0x856   : > { %v5203_v0 = vpop.f32.mrb[66].mxu0 }
 0x857   : > { %v5204_v50 = vpop.f32.mrb[67].mxu0  ;;  %v18000_v0 = vld [vmem:[%s22690_s7 + $0x168] sm:$0xff]  }
 0x858   : > { %16743 = vmatpush3.bf16.msra.mxu0 %v17956_v47  ;;  %v18002_v50 = vld [vmem:[%s22690_s7 + $0x2a8] sm:$0xff]  }
 0x859   : > { %16744 = vmatprep.subr.bf16.mxu0 %v17957_v53  ;;  %v6254_v53 = vrot.slane %v21142_v58, 1 }
 0x85c   : > { %16745 = vmatpush3.bf16.msra.mxu0 %v17958_v57  ;;  %v18004_v57 = vld [vmem:[%s22690_s7 + $0x2f0] sm:$0xff]  }
 0x85d   : > { %16746 = vmatprep.subr.bf16.mxu0 %v17959_v51  ;;  %v18003_v51 = vld [vmem:[%s22690_s7 + $0x170] sm:$0xff]  }
 0x860   : > { %16747 = vmatpush3.bf16.msra.mxu0 %v17960_v6  ;;  %v18005_v6 = vld [vmem:[%s22690_s7 + $0x2b0] sm:$0xff]  }
 0x861   : > { %16748 = vmatprep.subr.bf16.mxu0 %v17962_v32  ;;  %v18007_v32 = vld [vmem:[%s22690_s7 + $0x2f8] sm:$0xff]  }
 0x864   : > { %16749 = vmatpush3.bf16.msra.mxu0 %v17963_v11  ;;  %v18006_v11 = vld [vmem:[%s22690_s7 + $0x178] sm:$0xff]  }
 0x865   : > { %16750 = vmatprep.subr.bf16.mxu0 %v17965_v49  ;;  %v18008_v49 = vld [vmem:[%s22690_s7 + $0x2b8] sm:$0xff]  }
 0x868   : > { %16751 = vmatpush3.bf16.msra.mxu0 %v17966_v54  ;;  %v18010_v54 = vld [vmem:[%s22690_s7 + $0x300] sm:$0xff]  }
 0x869   : > { %16752 = vmatprep.subr.bf16.mxu0 %v17968_v52  ;;  %v18009_v52 = vld [vmem:[%s22690_s7 + $0x180] sm:$0xff]  }
 0x86c   : > { %16753 = vmatpush3.bf16.msra.mxu0 %v17969_v55  ;;  %v18011_v55 = vld [vmem:[%s22690_s7 + $0x2c0] sm:$0xff]  }
 0x86d   : > { %16754 = vmatprep.subr.bf16.mxu0 %v17971_v59  ;;  %v18013_v59 = vld [vmem:[%s22690_s7 + $0x308] sm:$0xff]  }
 0x870   : > { %16755 = vmatpush3.bf16.msra.mxu0 %v17972_v31  ;;  %v18012_v31 = vld [vmem:[%s22690_s7 + $0x188] sm:$0xff]  }
 0x871   : > { %16762 = vmatprep.subr.bf16.mxu0 %v17974_v60  ;;  %v18014_v60 = vld [vmem:[%s22690_s7 + $0x2c8] sm:$0xff]  }
 0x873   : > { %5828 = vmatmul.mubr.bf16.vlgmr.msra.gmra.mrb[72].mxu0 %v21192_v62 }
 0x874   : > { %16763 = vmatpush3.bf16.msra.mxu0 %v17975_v61  ;;  %6147 = vmatprep.mubr.bf16.mxu0 %v5938_v1  ;;  %v18016_v61 = vld [vmem:[%s22690_s7 + $0x310] sm:$0xff]  }
 0x875   : > { %16764 = vmatprep.subr.bf16.mxu0 %v17977_v63  ;;  %v18015_v63 = vld [vmem:[%s22690_s7 + $0x190] sm:$0xff]  }
 0x876   : > { %v18017_v1 = vld [vmem:[%s22690_s7 + $0x2d0] sm:$0xff]  }
 0x878   : > { %16765 = vmatpush3.bf16.msra.mxu0 %v17978_v2  ;;  %v18019_v2 = vld [vmem:[%s22690_s7 + $0x318] sm:$0xff]  }
 0x879   : > { %16766 = vmatprep.subr.bf16.mxu0 %v17980_v5  ;;  %v18018_v5 = vld [vmem:[%s22690_s7 + $0x198] sm:$0xff]  }
 0x87c   : > { %16767 = vmatpush3.bf16.msra.mxu0 %v17981_v7  ;;  %v18020_v7 = vld [vmem:[%s22690_s7 + $0x2d8] sm:$0xff]  }
 0x87d   : > { %16768 = vmatprep.subr.bf16.mxu0 %v17983_v8  ;;  %v18022_v8 = vld [vmem:[%s22690_s7 + $0x3c0] sm:$0xff]  }
 0x880   : > { %16769 = vmatpush3.bf16.msra.mxu0 %v17984_v9  ;;  %v18021_v9 = vld [vmem:[%s22690_s7 + $0x1a0] sm:$0xff]  }
 0x881   : > { %16770 = vmatprep.subr.bf16.mxu0 %v17986_v10  ;;  %v18023_v10 = vld [vmem:[%s22690_s7 + $0x380] sm:$0xff]  }
 0x884   : > { %16771 = vmatpush3.bf16.msra.mxu0 %v17987_v12  ;;  %v6253_v12 = vrot.slane %v21192_v62, 1 }
 0x885   : > { %16772 = vmatprep.subr.bf16.mxu0 %v17989_v16  ;;  %v18025_v16 = vld [vmem:[%s22690_s7 + $0x3c8] sm:$0xff]  }
 0x886   : > { %v5158_v23 = vpop.f32.mrb[52].mxu1 }
 0x887   : > { %v5200_v25 = vadd.f32 %v5199_v39, %v5158_v23  ;;  %v5160_v29 = vpop.f32.mrb[53].mxu1  ;;  %v17999_v39 = vld [vmem:[%s22690_s7 + $0x2a0] sm:$0xff]   ;;  %v18026_v23 = vld [vmem:[%s22690_s7 + $0x388] sm:$0xff]  }
 0x888   : > { %v5202_v34 = vadd.f32 %v5201_v48, %v5160_v29  ;;  %v5162_v35 = vpop.f32.mrb[54].mxu1  ;;  %16773 = vmatpush3.bf16.msra.mxu0 %v17990_v22  ;;  %v18001_v48 = vld [vmem:[%s22690_s7 + $0x2e8] sm:$0xff]   ;;  %v6570_v22 = vrot.slane %v21130_v42, 2  ;;  %v18029_v29 = vld [vmem:[%s22690_s7 + $0x390] sm:$0xff]  }
 0x889   : > { %v5208_v33 = vadd.f32 %v5200_v25, %v20890_v4  ;;  %v5163_v30 = vpop.f32.mrb[55].mxu1  ;;  %16774 = vmatprep.subr.bf16.mxu0 %v17992_v56  ;;  %v17998_v4 = vld [vmem:[%s22690_s7 + $0x2e0] sm:$0xff]   ;;  %v18024_v56 = vld [vmem:[%s22690_s7 + $0x1a8] sm:$0xff]   ;;  %v18028_v25 = vld [vmem:[%s22690_s7 + $0x3d0] sm:$0xff]  }
 0x88a   : > { %v5209_v37 = vadd.f32 %v5202_v34, %v20893_v45  ;;  %v17997_v45 = vld [vmem:[%s22690_s7 + $0x160] sm:$0xff]   ;;  %v18031_v34 = vld [vmem:[%s22690_s7 + $0x3d8] sm:$0xff]  }
 0x88b   : > { %v5234_v38 = vadd.f32 %v5223_v26, %v5208_v33  ;;  %v18027_v26 = vld [vmem:[%s22690_s7 + $0x1b0] sm:$0xff]   ;;  %v18032_v35 = vld [vmem:[%s22690_s7 + $0x398] sm:$0xff]   ;;  %v18033_v33 = vld [vmem:[%s22690_s7 + $0x240] sm:$0xff]  }
 0x88c   : > { %v5235_v21 = vadd.f32 %v5227_v3, %v5209_v37  ;;  %16775 = vmatpush3.bf16.msra.mxu0 %v17993_v28  ;;  %v18030_v3 = vld [vmem:[%s22690_s7 + $0x1b8] sm:$0xff]   ;;  %v18034_v28 = vld [vmem:[%s22690_s7 + $0x3e0] sm:$0xff]  }
 0x88d   : > { %v5238_v40 = vmax.f32 %v5234_v38, 0.0  ;;  %16776 = vmatprep.subr.bf16.mxu0 %v17995_v36  ;;  %v18035_v36 = vld [vmem:[%s22690_s7 + $0x3a0] sm:$0xff]   ;;  %v18037_v38 = vld [vmem:[%s22690_s7 + $0x3e8] sm:$0xff]  }
 0x88e   : > { %v5239_v24 = vmax.f32 %v5235_v21, 0.0  ;;  %v18036_v21 = vld [vmem:[%s22690_s7 + $0x248] sm:$0xff]  }
 0x88f   : > { %v21252_v43 = vpack.c.bf16 %v5238_v40, %v5238_v40  ;;  %v18040_v40 = vld [vmem:[%s22690_s7 + $0x3f0] sm:$0xff]  }
 0x890   : > { %v21247_v41 = vpack.c.bf16 %v5239_v24, %v5239_v24  ;;  %16777 = vmatpush3.bf16.msra.mxu0 %v17996_v27  ;;  %v18038_v27 = vld [vmem:[%s22690_s7 + $0x3a8] sm:$0xff]   ;;  %v18041_v24 = vld [vmem:[%s22690_s7 + $0x3b0] sm:$0xff]  }
 0x891   : > { %16784 = vmatprep.subr.bf16.mxu0 %v17998_v4  ;;  %v21386_v30 = vshrl.u32 %v21252_v43, 16  ;;  %v18039_v4 = vld [vmem:[%s22690_s7 + $0x250] sm:$0xff]  }
 0x892   : > { %15279 = vmatprep.mubr.msk.bf16.mxu1 %vm2445_vm5, %v21247_v41  ;;  %v21261_v47 = vshrl.u32 %v21247_v41, 16  ;;  %v5940_v37 = vrot.slane %v21247_v41, 1 }
 0x893   : > { %5545 = vmatmul.mubr.bf16.vlgmr.msra.gmra.mrb[56].mxu1 %v21252_v43  ;;  %6148 = vmatmul.mubr.bf16.vlgmr.msra.gmra.mrb[76].mxu0 %v5937_v46  ;;  %v18042_v46 = vld [vmem:[%s22690_s7 + $0x258] sm:$0xff]  }
 0x894   : > { %5836 = vmatpush1.bf16.msra.mxu1 %v17997_v45  ;;  %15364 = vmatprep.mubr.msk.bf16.mxu1 %vm2445_vm5, %v21261_v47  ;;  %v18043_v45 = vld [vmem:[%s22690_s7 + $0x3f8] sm:$0xff]  }
 0x895   : > { %16785 = vmatpush3.bf16.msra.mxu0 %v17999_v39  ;;  %6463 = vmatprep.mubr.bf16.mxu0 %v6254_v53  ;;  %v18044_v39 = vld [vmem:[%s22690_s7 + $0x3b8] sm:$0xff]   ;;  %v18045_v53 = vld [vmem:[%s22690_s7 + $0x260] sm:$0xff]  }
 0x896   : > { %5837 = vmatprep.subr.bf16.mxu1 %v19130_v17  ;;  %16786 = vmatprep.subr.bf16.mxu0 %v18001_v48  ;;  %v18046_v48 = vld [vmem:[%s22690_s7 + $0x4a0] sm:$0xff]  }
 0x898   : > { %5838 = vmatpush1.bf16.msra.mxu1 %v18000_v0  ;;  %v18047_v0 = vld [vmem:[%s22690_s7 + $0x460] sm:$0xff]  }
 0x899   : > { %16787 = vmatpush3.bf16.msra.mxu0 %v18002_v50  ;;  %5839 = vmatprep.subr.bf16.mxu1 %v19130_v17  ;;  %v6569_v50 = vrot.slane %v21135_v44, 2 }
 0x89a   : > { %16788 = vmatprep.subr.bf16.mxu0 %v18004_v57  ;;  %v18049_v57 = vld [vmem:[%s22690_s7 + $0x4a8] sm:$0xff]  }
 0x89c   : > { %5840 = vmatpush1.bf16.msra.mxu1 %v18003_v51  ;;  %v6886_v51 = vrot.slane %v21142_v58, 2  ;;  %v18051_v58 = vld [vmem:[%s22690_s7 + $0x270] sm:$0xff]  }
 0x89d   : > { %16789 = vmatpush3.bf16.msra.mxu0 %v18005_v6  ;;  %5841 = vmatprep.subr.bf16.mxu1 %v19130_v17  ;;  %v18048_v6 = vld [vmem:[%s22690_s7 + $0x268] sm:$0xff]  }
 0x89e   : > { %16790 = vmatprep.subr.bf16.mxu0 %v18007_v32  ;;  %v18050_v32 = vld [vmem:[%s22690_s7 + $0x468] sm:$0xff]  }
 0x8a0   : > { %5842 = vmatpush1.bf16.msra.mxu1 %v18006_v11  ;;  %v18052_v11 = vld [vmem:[%s22690_s7 + $0x4b0] sm:$0xff]  }
 0x8a1   : > { %16791 = vmatpush3.bf16.msra.mxu0 %v18008_v49  ;;  %5843 = vmatprep.subr.bf16.mxu1 %v19130_v17  ;;  %v18053_v49 = vld [vmem:[%s22690_s7 + $0x470] sm:$0xff]  }
 0x8a2   : > { %16792 = vmatprep.subr.bf16.mxu0 %v18010_v54  ;;  %v18055_v54 = vld [vmem:[%s22690_s7 + $0x4b8] sm:$0xff]  }
 0x8a4   : > { %5844 = vmatpush1.bf16.msra.mxu1 %v18009_v52  ;;  %v18054_v52 = vld [vmem:[%s22690_s7 + $0x278] sm:$0xff]  }
 0x8a5   : > { %16793 = vmatpush3.bf16.msra.mxu0 %v18011_v55  ;;  %5845 = vmatprep.subr.bf16.mxu1 %v19130_v17  ;;  %v18056_v55 = vld [vmem:[%s22690_s7 + $0x478] sm:$0xff]  }
 0x8a6   : > { %16794 = vmatprep.subr.bf16.mxu0 %v18013_v59  ;;  %v18058_v59 = vld [vmem:[%s22690_s7 + $0x4c0] sm:$0xff]  }
 0x8a8   : > { %5846 = vmatpush1.bf16.msra.mxu1 %v18012_v31  ;;  %v18057_v31 = vld [vmem:[%s22690_s7 + $0x280] sm:$0xff]  }
 0x8a9   : > { %16795 = vmatpush3.bf16.msra.mxu0 %v18014_v60  ;;  %5847 = vmatprep.subr.bf16.mxu1 %v19130_v17  ;;  %v18059_v60 = vld [vmem:[%s22690_s7 + $0x480] sm:$0xff]  }
 0x8aa   : > { %16796 = vmatprep.subr.bf16.mxu0 %v18016_v61  ;;  %v18061_v61 = vld [vmem:[%s22690_s7 + $0x4c8] sm:$0xff]  }
 0x8ac   : > { %5848 = vmatpush1.bf16.msra.mxu1 %v18015_v63  ;;  %v18060_v63 = vld [vmem:[%s22690_s7 + $0x288] sm:$0xff]  }
 0x8ad   : > { %16797 = vmatpush3.bf16.msra.mxu0 %v18017_v1  ;;  %5849 = vmatprep.subr.bf16.mxu1 %v19130_v17  ;;  %v18062_v1 = vld [vmem:[%s22690_s7 + $0x488] sm:$0xff]  }
 0x8ae   : > { %16798 = vmatprep.subr.bf16.mxu0 %v18019_v2  ;;  %v18064_v2 = vld [vmem:[%s22690_s7 + $0x4d0] sm:$0xff]  }
 0x8b0   : > { %5850 = vmatpush1.bf16.msra.mxu1 %v18018_v5  ;;  %v18063_v5 = vld [vmem:[%s22690_s7 + $0x290] sm:$0xff]  }
 0x8b1   : > { %16799 = vmatpush3.bf16.msra.mxu0 %v18020_v7  ;;  %5851 = vmatprep.subr.bf16.mxu1 %v19130_v17  ;;  %v18065_v7 = vld [vmem:[%s22690_s7 + $0x490] sm:$0xff]  }
 0x8b2   : > { %16806 = vmatprep.subr.bf16.mxu0 %v18022_v8  ;;  %v18067_v8 = vld [vmem:[%s22690_s7 + $0x4d8] sm:$0xff]  }
 0x8b4   : > { %5852 = vmatpush1.bf16.msra.mxu1 %v18021_v9  ;;  %6464 = vmatmul.mubr.bf16.vlgmr.msra.gmra.mrb[80].mxu0 %v6253_v12  ;;  %v18066_v9 = vld [vmem:[%s22690_s7 + $0x298] sm:$0xff]   ;;  %v18070_v12 = vld [vmem:[%s22690_s7 + $0x580] sm:$0xff]  }
 0x8b5   : > { %16807 = vmatpush3.bf16.msra.mxu0 %v18023_v10  ;;  %6779 = vmatprep.mubr.bf16.mxu0 %v6570_v22  ;;  %v18068_v10 = vld [vmem:[%s22690_s7 + $0x498] sm:$0xff]   ;;  %v5939_v22 = vrot.slane %v21252_v43, 1 }
 0x8b6   : > { %5853 = vmatprep.subr.bf16.mxu1 %v19130_v17  ;;  %16808 = vmatprep.subr.bf16.mxu0 %v18025_v16  ;;  %v18069_v16 = vld [vmem:[%s22690_s7 + $0x320] sm:$0xff]  }
 0x8b8   : > { %5854 = vmatpush1.bf16.msra.mxu1 %v18024_v56  ;;  %v6256_v56 = vrot.slane %v21261_v47, 1 }
 0x8b9   : > { %16809 = vmatpush3.bf16.msra.mxu0 %v18026_v23  ;;  %5855 = vmatprep.subr.bf16.mxu1 %v19130_v17  ;;  %v18071_v23 = vld [vmem:[%s22690_s7 + $0x540] sm:$0xff]  }
 0x8ba   : > { %16810 = vmatprep.subr.bf16.mxu0 %v18028_v25  ;;  %v6885_v25 = vrot.slane %v21192_v62, 2  ;;  %v18074_v62 = vld [vmem:[%s22690_s7 + $0x548] sm:$0xff]  }
 0x8bc   : > { %5856 = vmatpush1.bf16.msra.mxu1 %v18027_v26  ;;  %v18073_v26 = vld [vmem:[%s22690_s7 + $0x588] sm:$0xff]  }
 0x8bd   : > { %16811 = vmatpush3.bf16.msra.mxu0 %v18029_v29  ;;  %5857 = vmatprep.subr.bf16.mxu1 %v19130_v17  ;;  %v7202_v29 = vrot.slane %v21130_v42, 3  ;;  %v18075_v42 = vld [vmem:[%s22690_s7 + $0x330] sm:$0xff]  }
 0x8be   : > { %16812 = vmatprep.subr.bf16.mxu0 %v18031_v34  ;;  %v18072_v34 = vld [vmem:[%s22690_s7 + $0x328] sm:$0xff]  }
 0x8c0   : > { %5858 = vmatpush1.bf16.msra.mxu1 %v18030_v3  ;;  %v18076_v3 = vld [vmem:[%s22690_s7 + $0x590] sm:$0xff]  }
 0x8c1   : > { %16813 = vmatpush3.bf16.msra.mxu0 %v18032_v35  ;;  %6155 = vmatprep.subr.bf16.mxu1 %v19130_v17  ;;  %v18077_v35 = vld [vmem:[%s22690_s7 + $0x550] sm:$0xff]  }
 0x8c2   : > { %16814 = vmatprep.subr.bf16.mxu0 %v18034_v28  ;;  %v18079_v28 = vld [vmem:[%s22690_s7 + $0x598] sm:$0xff]  }
 0x8c3   : > { %5868 = vmatmul.mubr.bf16.vlgmr.msra.gmra.mrb[56].mxu1 %v21386_v30 }
 0x8c4   : > { %6156 = vmatpush1.bf16.msra.mxu1 %v18033_v33  ;;  %15449 = vmatprep.mubr.msk.bf16.mxu1 %vm2445_vm5, %v5940_v37  ;;  %v18078_v33 = vld [vmem:[%s22690_s7 + $0x338] sm:$0xff]   ;;  %v18082_v37 = vld [vmem:[%s22690_s7 + $0x5a0] sm:$0xff]  }
 0x8c5   : > { %16815 = vmatpush3.bf16.msra.mxu0 %v18035_v36  ;;  %6157 = vmatprep.subr.bf16.mxu1 %v19130_v17  ;;  %v18080_v36 = vld [vmem:[%s22690_s7 + $0x558] sm:$0xff]  }
 0x8c6   : > { %16816 = vmatprep.subr.bf16.mxu0 %v18037_v38  ;;  %v18081_v38 = vld [vmem:[%s22690_s7 + $0x340] sm:$0xff]  }
 0x8c8   : > { %6158 = vmatpush1.bf16.msra.mxu1 %v18036_v21  ;;  %v18083_v21 = vld [vmem:[%s22690_s7 + $0x560] sm:$0xff]  }
 0x8c9   : > { %16817 = vmatpush3.bf16.msra.mxu0 %v18038_v27  ;;  %6159 = vmatprep.subr.bf16.mxu1 %v19130_v17  ;;  %v18085_v27 = vld [vmem:[%s22690_s7 + $0x5a8] sm:$0xff]  }
 0x8ca   : > { %16818 = vmatprep.subr.bf16.mxu0 %v18040_v40  ;;  %v18084_v40 = vld [vmem:[%s22690_s7 + $0x348] sm:$0xff]  }
 0x8cc   : > { %6160 = vmatpush1.bf16.msra.mxu1 %v18039_v4  ;;  %v18086_v4 = vld [vmem:[%s22690_s7 + $0x568] sm:$0xff]  }
 0x8cd   : > { %16819 = vmatpush3.bf16.msra.mxu0 %v18041_v24  ;;  %6161 = vmatprep.subr.bf16.mxu1 %v19130_v17  ;;  %v18088_v24 = vld [vmem:[%s22690_s7 + $0x5b0] sm:$0xff]  }
 0x8ce   : > { %16820 = vmatprep.subr.bf16.mxu0 %v18043_v45  ;;  %v18087_v45 = vld [vmem:[%s22690_s7 + $0x350] sm:$0xff]  }
 0x8d0   : > { %6162 = vmatpush1.bf16.msra.mxu1 %v18042_v46  ;;  %v18089_v46 = vld [vmem:[%s22690_s7 + $0x570] sm:$0xff]  }
 0x8d1   : > { %16821 = vmatpush3.bf16.msra.mxu0 %v18044_v39  ;;  %6163 = vmatprep.subr.bf16.mxu1 %v19130_v17  ;;  %v18091_v39 = vld [vmem:[%s22690_s7 + $0x5b8] sm:$0xff]  }
 0x8d2   : > { %16828 = vmatprep.subr.bf16.mxu0 %v18046_v48  ;;  %v18090_v48 = vld [vmem:[%s22690_s7 + $0x358] sm:$0xff]  }
 0x8d4   : > { %6164 = vmatpush1.bf16.msra.mxu1 %v18045_v53  ;;  %6780 = vmatmul.mubr.bf16.vlgmr.msra.gmra.mrb[84].mxu0 %v6569_v50  ;;  %v18092_v53 = vld [vmem:[%s22690_s7 + $0x578] sm:$0xff]   ;;  %v7201_v50 = vrot.slane %v21135_v44, 3 }
 0x8d5   : > { %16829 = vmatpush3.bf16.msra.mxu0 %v18047_v0  ;;  %7095 = vmatprep.mubr.bf16.mxu0 %v6886_v51  ;;  %v18093_v0 = vld [vmem:[%s22690_s7 + $0x360] sm:$0xff]   ;;  %v18095_v51 = vld [vmem:[%s22690_s7 + $0x370] sm:$0xff]   ;;  %v18096_v44 = vld [vmem:[%s22690_s7 + $0x378] sm:$0xff]  }
 0x8d6   : > { %6165 = vmatprep.subr.bf16.mxu1 %v19130_v17  ;;  %16830 = vmatprep.subr.bf16.mxu0 %v18049_v57  ;;  %v18094_v57 = vld [vmem:[%s22690_s7 + $0x368] sm:$0xff]  }
 0x8d8   : > { %6166 = vmatpush1.bf16.msra.mxu1 %v18048_v6  ;;  %v18097_v6 = vld [vmem:[%s22690_s7 + $0x400] sm:$0xff]  }
 0x8d9   : > { %16831 = vmatpush3.bf16.msra.mxu0 %v18050_v32  ;;  %6167 = vmatprep.subr.bf16.mxu1 %v19130_v17  ;;  %v6255_v32 = vrot.slane %v21386_v30, 1 }
 0x8da   : > { %16832 = vmatprep.subr.bf16.mxu0 %v18052_v11  ;;  %v6572_v11 = vrot.slane %v21247_v41, 2 }
 0x8dc   : > { %6168 = vmatpush1.bf16.msra.mxu1 %v18051_v58  ;;  %v18098_v58 = vld [vmem:[%s22690_s7 + $0x408] sm:$0xff]  }
 0x8dd   : > { %16833 = vmatpush3.bf16.msra.mxu0 %v18053_v49  ;;  %6169 = vmatprep.subr.bf16.mxu1 %v19130_v17 }
 0x8de   : > { %16834 = vmatprep.subr.bf16.mxu0 %v18055_v54 }
 0x8e0   : > { %6170 = vmatpush1.bf16.msra.mxu1 %v18054_v52 }
 0x8e1   : > { %16835 = vmatpush3.bf16.msra.mxu0 %v18056_v55  ;;  %6171 = vmatprep.subr.bf16.mxu1 %v19130_v17 }
 0x8e2   : > { %16836 = vmatprep.subr.bf16.mxu0 %v18058_v59  ;;  %v18099_v59 = vld [vmem:[%s22690_s7 + $0x410] sm:$0xff]  }
 0x8e4   : > { %6172 = vmatpush1.bf16.msra.mxu1 %v18057_v31 }
 0x8e5   : > { %16837 = vmatpush3.bf16.msra.mxu0 %v18059_v60  ;;  %6173 = vmatprep.subr.bf16.mxu1 %v19130_v17  ;;  %v18100_v60 = vld [vmem:[%s22690_s7 + $0x418] sm:$0xff]  }
 0x8e6   : > { %16838 = vmatprep.subr.bf16.mxu0 %v18061_v61  ;;  %v18101_v61 = vld [vmem:[%s22690_s7 + $0x420] sm:$0xff]  }
 0x8e8   : > { %6174 = vmatpush1.bf16.msra.mxu1 %v18060_v63  ;;  %v18102_v63 = vld [vmem:[%s22690_s7 + $0x428] sm:$0xff]  }
 0x8e9   : > { %16839 = vmatpush3.bf16.msra.mxu0 %v18062_v1  ;;  %6175 = vmatprep.subr.bf16.mxu1 %v19130_v17  ;;  %v18103_v1 = vld [vmem:[%s22690_s7 + $0x430] sm:$0xff]  }
 0x8ea   : > { %16840 = vmatprep.subr.bf16.mxu0 %v18064_v2  ;;  %v18104_v2 = vld [vmem:[%s22690_s7 + $0x438] sm:$0xff]  }
 0x8ec   : > { %6176 = vmatpush1.bf16.msra.mxu1 %v18063_v5  ;;  %v18105_v5 = vld [vmem:[%s22690_s7 + $0x440] sm:$0xff]  }
 0x8ed   : > { %16841 = vmatpush3.bf16.msra.mxu0 %v18065_v7  ;;  %6177 = vmatprep.subr.bf16.mxu1 %v19130_v17  ;;  %v18106_v7 = vld [vmem:[%s22690_s7 + $0x448] sm:$0xff]  }
 0x8ee   : > { %16842 = vmatprep.subr.bf16.mxu0 %v18067_v8  ;;  %v5240_v8 = vld [vmem:[%s22691_s8] sm:$0x1] }
 0x8f0   : > { %6178 = vmatpush1.bf16.msra.mxu1 %v18066_v9 }
 0x8f1   : > { %16843 = vmatpush3.bf16.msra.mxu0 %v18068_v10  ;;  %6471 = vmatprep.subr.bf16.mxu1 %v19130_v17 }
 0x8f2   : > { %16850 = vmatprep.subr.bf16.mxu0 %v18070_v12 }
 0x8f3   : > { %6188 = vmatmul.mubr.bf16.vlgmr.msra.gmra.mrb[56].mxu1 %v5939_v22 }
 0x8f4   : > { %6472 = vmatpush1.bf16.msra.mxu1 %v18069_v16  ;;  %15534 = vmatprep.mubr.msk.bf16.mxu1 %vm2445_vm5, %v6256_v56  ;;  %v18107_v56 = vld [vmem:[%s22690_s7 + $0x450] sm:$0xff]  }
 0x8f5   : > { %7096 = vmatmul.mubr.bf16.vlgmr.msra.gmra.mrb[88].mxu0 %v6885_v25  ;;  %6473 = vmatprep.subr.bf16.mxu1 %v19130_v17 }
 0x8f6   : > { %16851 = vmatpush3.bf16.msra.mxu0 %v18071_v23  ;;  %7411 = vmatprep.mubr.bf16.mxu0 %v7202_v29  ;;  %v18109_v29 = vld [vmem:[%s22690_s7 + $0x4e0] sm:$0xff]  }
 0x8f7   : > { %16852 = vmatprep.subr.bf16.mxu0 %v18073_v26  ;;  %v18108_v26 = vld [vmem:[%s22690_s7 + $0x458] sm:$0xff]  }
 0x8f8   : > { %6474 = vmatpush1.bf16.msra.mxu1 %v18072_v34  ;;  %v6571_v34 = vrot.slane %v21252_v43, 2 }
 0x8f9   : > { %6475 = vmatprep.subr.bf16.mxu1 %v19130_v17 }
 0x8fa   : > { %16853 = vmatpush3.bf16.msra.mxu0 %v18074_v62  ;;  %v6888_v62 = vrot.slane %v21261_v47, 2  ;;  %v18112_v47 = vld [vmem:[%s22690_s7 + $0x4f8] sm:$0xff]  }
 0x8fb   : > { %16854 = vmatprep.subr.bf16.mxu0 %v18076_v3  ;;  %v18110_v3 = vld [vmem:[%s22690_s7 + $0x4e8] sm:$0xff]  }
 0x8fc   : > { %6476 = vmatpush1.bf16.msra.mxu1 %v18075_v42  ;;  %v18111_v42 = vld [vmem:[%s22690_s7 + $0x4f0] sm:$0xff]  }
 0x8fd   : > { %6477 = vmatprep.subr.bf16.mxu1 %v19130_v17 }
 0x8fe   : > { %16855 = vmatpush3.bf16.msra.mxu0 %v18077_v35  ;;  %v18113_v35 = vld [vmem:[%s22690_s7 + $0x500] sm:$0xff]  }
 0x8ff   : > { %16856 = vmatprep.subr.bf16.mxu0 %v18079_v28  ;;  %v18114_v28 = vld [vmem:[%s22690_s7 + $0x508] sm:$0xff]  }
 0x900   : > { %6478 = vmatpush1.bf16.msra.mxu1 %v18078_v33 }
 0x901   : > { %6479 = vmatprep.subr.bf16.mxu1 %v19130_v17 }
 0x902   : > { %16857 = vmatpush3.bf16.msra.mxu0 %v18080_v36 }
 0x903   : > { %16858 = vmatprep.subr.bf16.mxu0 %v18082_v37 }
 0x904   : > { %6480 = vmatpush1.bf16.msra.mxu1 %v18081_v38 }
 0x905   : > { %6481 = vmatprep.subr.bf16.mxu1 %v19130_v17 }
 0x906   : > { %16859 = vmatpush3.bf16.msra.mxu0 %v18083_v21  ;;  %v18115_v21 = vld [vmem:[%s22690_s7 + $0x510] sm:$0xff]  }
 0x907   : > { %16860 = vmatprep.subr.bf16.mxu0 %v18085_v27 }
 0x908   : > { %6482 = vmatpush1.bf16.msra.mxu1 %v18084_v40 }
 0x909   : > { %6483 = vmatprep.subr.bf16.mxu1 %v19130_v17 }
 0x90a   : > { %16861 = vmatpush3.bf16.msra.mxu0 %v18086_v4  ;;  %v18133_v4 = vld [vmem:[%s22692_s9] ss:$16 sps:$4 sm:$0xff]  }
 0x90b   : > { %16862 = vmatprep.subr.bf16.mxu0 %v18088_v24  ;;  %v18135_v24 = vld [vmem:[%s22692_s9 + $0x4] ss:$16 sps:$4 sm:$0xff]  }
 0x90c   : > { %6484 = vmatpush1.bf16.msra.mxu1 %v18087_v45  ;;  %v18116_v45 = vld [vmem:[%s22690_s7 + $0x518] sm:$0xff]  }
 0x90d   : > { %6485 = vmatprep.subr.bf16.mxu1 %v19130_v17 }
 0x90e   : > { %16863 = vmatpush3.bf16.msra.mxu0 %v18089_v46  ;;  %v18117_v46 = vld [vmem:[%s22690_s7 + $0x520] sm:$0xff]  }
 0x90f   : > { %16864 = vmatprep.subr.bf16.mxu0 %v18091_v39  ;;  %v18118_v39 = vld [vmem:[%s22690_s7 + $0x528] sm:$0xff]  }
 0x910   : > { %6486 = vmatpush1.bf16.msra.mxu1 %v18090_v48  ;;  %v18119_v48 = vld [vmem:[%s22690_s7 + $0x530] sm:$0xff]  }
 0x911   : > { %6487 = vmatprep.subr.bf16.mxu1 %v19130_v17 }
 0x912   : > { %16865 = vmatpush3.bf16.msra.mxu0 %v18092_v53  ;;  %v18120_v53 = vld [vmem:[%s22690_s7 + $0x538] sm:$0xff]  }
 0x913   : > { %7537 = vmatprep.subr.bf16.mxu0 %v18135_v24  ;;  %v18147_v24 = vld [vmem:[%s22692_s9 + $0x44] ss:$16 sps:$4 sm:$0xff]  }
 0x914   : > { %6488 = vmatpush1.bf16.msra.mxu1 %v18093_v0  ;;  %v18121_v0 = vld [vmem:[%s22690_s7 + $0x5c0] sm:$0xff]  }
 0x915   : > { %7412 = vmatmul.mubr.bf16.vlgmr.msra.gmra.mrb[92].mxu0 %v7201_v50  ;;  %6489 = vmatprep.subr.bf16.mxu1 %v19130_v17  ;;  %v6887_v50 = vrot.slane %v21386_v30, 2  ;;  %v18123_v30 = vld [vmem:[%s22690_s7 + $0x5d0] sm:$0xff]  }
 0x916   : > { %7569 = vmatprep.mubr.bf16.mxu0 %v19130_v17  ;;  %7538 = vmatpush1.bf16.msra.mxu0 %v18133_v4  ;;  %v18142_v4 = vld [vmem:[%s22692_s9 + $0x28] ss:$16 sps:$4 sm:$0xff]  }
 0x918   : > { %6490 = vmatpush1.bf16.msra.mxu1 %v18094_v57  ;;  %v7204_v57 = vrot.slane %v21247_v41, 3 }
 0x919   : > { %6491 = vmatprep.subr.bf16.mxu1 %v19130_v17 }
 0x91c   : > { %6492 = vmatpush1.bf16.msra.mxu1 %v18095_v51  ;;  %v18122_v51 = vld [vmem:[%s22690_s7 + $0x5c8] sm:$0xff]  }
 0x91d   : > { %6493 = vmatprep.subr.bf16.mxu1 %v19130_v17 }
 0x920   : > { %6494 = vmatpush1.bf16.msra.mxu1 %v18096_v44 }
 0x921   : > { %6787 = vmatprep.subr.bf16.mxu1 %v19130_v17 }
 0x923   : > { %6504 = vmatmul.mubr.bf16.vlgmr.msra.gmra.mrb[56].mxu1 %v6255_v32 }
 0x924   : > { %6788 = vmatpush1.bf16.msra.mxu1 %v18097_v6  ;;  %15619 = vmatprep.mubr.msk.bf16.mxu1 %vm2445_vm5, %v6572_v11 }
 0x925   : > { %6789 = vmatprep.subr.bf16.mxu1 %v19130_v17 }
 0x926   : > { %v16734_v49 = vpop.f32.mrb[68].mxu0 }
 0x927   : > { %v16735_v54 = vpop.f32.mrb[69].mxu0 }
 0x928   : > { %6790 = vmatpush1.bf16.msra.mxu1 %v18098_v58  ;;  %v16736_v52 = vadd.f32 %v16735_v54, %v16734_v49  ;;  %v16737_v55 = vpop.f32.mrb[70].mxu0  ;;  %v18124_v49 = vld [vmem:[%s22690_s7 + $0x5d8] sm:$0xff]   ;;  %v18125_v54 = vld [vmem:[%s22690_s7 + $0x5e0] sm:$0xff]  }
 0x929   : > { %v16738_v31 = vpop.f32.mrb[71].mxu0  ;;  %6791 = vmatprep.subr.bf16.mxu1 %v19130_v17  ;;  %v18127_v55 = vld [vmem:[%s22690_s7 + $0x5f0] sm:$0xff]  }
 0x92a   : > { %v17032_v12 = vadd.f32 %v16736_v52, %v5240_v8  ;;  %v18126_v52 = vld [vmem:[%s22690_s7 + $0x5e8] sm:$0xff]   ;;  %v18129_v31 = vld [vmem:[%s22690_s7 + $0x600] sm:$0xff]  }
 0x92c   : > { %6792 = vmatpush1.bf16.msra.mxu1 %v18099_v59  ;;  %v18128_v59 = vld [vmem:[%s22690_s7 + $0x5f8] sm:$0xff]  }
 0x92d   : > { %6793 = vmatprep.subr.bf16.mxu1 %v19130_v17 }
 0x930   : > { %6794 = vmatpush1.bf16.msra.mxu1 %v18100_v60  ;;  %v18130_v60 = vld [vmem:[%s22690_s7 + $0x608] sm:$0xff]  }
 0x931   : > { %6795 = vmatprep.subr.bf16.mxu1 %v19130_v17 }
 0x934   : > { %6796 = vmatpush1.bf16.msra.mxu1 %v18101_v61 }
 0x935   : > { %6797 = vmatprep.subr.bf16.mxu1 %v19130_v17 }
 0x938   : > { %6798 = vmatpush1.bf16.msra.mxu1 %v18102_v63 }
 0x939   : > { %6799 = vmatprep.subr.bf16.mxu1 %v19130_v17 }
 0x93c   : > { %6800 = vmatpush1.bf16.msra.mxu1 %v18103_v1  ;;  %v18131_v1 = vld [vmem:[%s22690_s7 + $0x610] sm:$0xff]  }
 0x93d   : > { %6801 = vmatprep.subr.bf16.mxu1 %v19130_v17 }
 0x940   : > { %6802 = vmatpush1.bf16.msra.mxu1 %v18104_v2 }
 0x941   : > { %6803 = vmatprep.subr.bf16.mxu1 %v19130_v17 }
 0x944   : > { %6804 = vmatpush1.bf16.msra.mxu1 %v18105_v5 }
 0x945   : > { %6805 = vmatprep.subr.bf16.mxu1 %v19130_v17 }
 0x946   : > { %v16756_v9 = vpop.f32.mrb[72].mxu0 }
 0x947   : > { %v16757_v10 = vpop.f32.mrb[73].mxu0 }
 0x948   : > { %v16758_v16 = vadd.f32 %v16757_v10, %v16756_v9  ;;  %6806 = vmatpush1.bf16.msra.mxu1 %v18106_v7  ;;  %v16759_v22 = vpop.f32.mrb[74].mxu0  ;;  %v18132_v9 = vld [vmem:[%s22690_s7 + $0x618] sm:$0xff]   ;;  %v7203_v10 = vrot.slane %v21252_v43, 3  ;;  %v18136_v43 = vld [vmem:[%s22692_s9 + $0x20] ss:$16 sps:$4 sm:$0xff]  }
 0x949   : > { %v16760_v23 = vpop.f32.mrb[75].mxu0  ;;  %6807 = vmatprep.subr.bf16.mxu1 %v19130_v17 }
 0x94a   : > { %v17033_v25 = vadd.f32 %v17032_v12, %v16758_v16 }
 0x94c   : > { %6808 = vmatpush1.bf16.msra.mxu1 %v18107_v56 }
 0x94d   : > { %6809 = vmatprep.subr.bf16.mxu1 %v19130_v17 }
 0x950   : > { %6810 = vmatpush1.bf16.msra.mxu1 %v18108_v26 }
 0x951   : > { %7103 = vmatprep.subr.bf16.mxu1 %v19130_v17 }
 0x953   : > { %6820 = vmatmul.mubr.bf16.vlgmr.msra.gmra.mrb[56].mxu1 %v6571_v34 }
 0x954   : > { %7104 = vmatpush1.bf16.msra.mxu1 %v18109_v29  ;;  %15704 = vmatprep.mubr.msk.bf16.mxu1 %vm2445_vm5, %v6888_v62 }
 0x955   : > { %7105 = vmatprep.subr.bf16.mxu1 %v19130_v17 }
 0x958   : > { %7106 = vmatpush1.bf16.msra.mxu1 %v18110_v3 }
 0x959   : > { %7107 = vmatprep.subr.bf16.mxu1 %v19130_v17 }
 0x95c   : > { %7108 = vmatpush1.bf16.msra.mxu1 %v18111_v42 }
 0x95d   : > { %7109 = vmatprep.subr.bf16.mxu1 %v19130_v17 }
 0x960   : > { %7110 = vmatpush1.bf16.msra.mxu1 %v18112_v47  ;;  %v18138_v47 = vld [vmem:[%s22692_s9 + $0x24] ss:$16 sps:$4 sm:$0xff]  }
 0x961   : > { %7111 = vmatprep.subr.bf16.mxu1 %v19130_v17  ;;  %7539 = vmatprep.subr.bf16.mxu0 %v18138_v47  ;;  %v18211_v47 = vld [vmem:[%s22692_s9 + $0x188] ss:$16 sps:$4 sm:$0xff]  }
 0x962   : > { %7540 = vmatpush1.bf16.msra.mxu0 %v18136_v43  ;;  %v18216_v43 = vld [vmem:[%s22692_s9 + $0x1ac] ss:$16 sps:$4 sm:$0xff]  }
 0x964   : > { %7112 = vmatpush1.bf16.msra.mxu1 %v18113_v35  ;;  %v18141_v35 = vld [vmem:[%s22692_s9 + $0xc] ss:$16 sps:$4 sm:$0xff]  }
 0x965   : > { %7113 = vmatprep.subr.bf16.mxu1 %v19130_v17  ;;  %7578 = vmatprep.subr.bf16.mxu0 %v18141_v35  ;;  %v18214_v35 = vld [vmem:[%s22692_s9 + $0x1a8] ss:$16 sps:$4 sm:$0xff]  }
 0x966   : > { %v16778_v33 = vpop.f32.mrb[76].mxu0 }
 0x967   : > { %v16779_v36 = vpop.f32.mrb[77].mxu0 }
 0x968   : > { %v16780_v37 = vadd.f32 %v16779_v36, %v16778_v33  ;;  %7114 = vmatpush1.bf16.msra.mxu1 %v18114_v28  ;;  %v16781_v38 = vpop.f32.mrb[78].mxu0 }
 0x969   : > { %v16782_v27 = vpop.f32.mrb[79].mxu0  ;;  %7115 = vmatprep.subr.bf16.mxu1 %v19130_v17  ;;  %v18139_v38 = vld [vmem:[%s22692_s9 + $0x8] ss:$16 sps:$4 sm:$0xff]  }
 0x96a   : > { %v17034_v40 = vadd.f32 %v17033_v25, %v16780_v37 }
 0x96c   : > { %7116 = vmatpush1.bf16.msra.mxu1 %v18115_v21 }
 0x96d   : > { %7117 = vmatprep.subr.bf16.mxu1 %v19130_v17 }
 0x970   : > { %7118 = vmatpush1.bf16.msra.mxu1 %v18116_v45  ;;  %v18145_v45 = vld [vmem:[%s22692_s9 + $0x40] ss:$16 sps:$4 sm:$0xff]  }
 0x971   : > { %7119 = vmatprep.subr.bf16.mxu1 %v19130_v17 }
 0x974   : > { %7120 = vmatpush1.bf16.msra.mxu1 %v18117_v46  ;;  %v18150_v46 = vld [vmem:[%s22692_s9 + $0x64] ss:$16 sps:$4 sm:$0xff]  }
 0x975   : > { %7121 = vmatprep.subr.bf16.mxu1 %v19130_v17 }
 0x978   : > { %7122 = vmatpush1.bf16.msra.mxu1 %v18118_v39  ;;  %v18148_v39 = vld [vmem:[%s22692_s9 + $0x60] ss:$16 sps:$4 sm:$0xff]  }
 0x979   : > { %7123 = vmatprep.subr.bf16.mxu1 %v19130_v17 }
 0x97c   : > { %7124 = vmatpush1.bf16.msra.mxu1 %v18119_v48  ;;  %v18153_v48 = vld [vmem:[%s22692_s9 + $0x4c] ss:$16 sps:$4 sm:$0xff]  }
 0x97d   : > { %7125 = vmatprep.subr.bf16.mxu1 %v19130_v17 }
 0x980   : > { %7126 = vmatpush1.bf16.msra.mxu1 %v18120_v53  ;;  %v18151_v53 = vld [vmem:[%s22692_s9 + $0x48] ss:$16 sps:$4 sm:$0xff]  }
 0x981   : > { %7419 = vmatprep.subr.bf16.mxu1 %v19130_v17 }
 0x983   : > { %7136 = vmatmul.mubr.bf16.vlgmr.msra.gmra.mrb[56].mxu1 %v6887_v50  ;;  %v18154_v50 = vld [vmem:[%s22692_s9 + $0x68] ss:$16 sps:$4 sm:$0xff]  }
 0x984   : > { %7420 = vmatpush1.bf16.msra.mxu1 %v18121_v0  ;;  %15789 = vmatprep.mubr.msk.bf16.mxu1 %vm2445_vm5, %v7204_v57  ;;  %v18156_v0 = vld [vmem:[%s22692_s9 + $0x6c] ss:$16 sps:$4 sm:$0xff]   ;;  %v18159_v57 = vld [vmem:[%s22692_s9 + $0x84] ss:$16 sps:$4 sm:$0xff]  }
 0x985   : > { %7421 = vmatprep.subr.bf16.mxu1 %v19130_v17 }
 0x987   : > { %v16800_v44 = vpop.f32.mrb[80].mxu0 }
 0x988   : > { %v16801_v6 = vpop.f32.mrb[81].mxu0  ;;  %7422 = vmatpush1.bf16.msra.mxu1 %v18122_v51  ;;  %v18157_v51 = vld [vmem:[%s22692_s9 + $0x80] ss:$16 sps:$4 sm:$0xff]  }
 0x989   : > { %v16802_v32 = vadd.f32 %v16801_v6, %v16800_v44  ;;  %v16803_v11 = vpop.f32.mrb[82].mxu0  ;;  %7423 = vmatprep.subr.bf16.mxu1 %v19130_v17  ;;  %v18162_v44 = vld [vmem:[%s22692_s9 + $0xa4] ss:$16 sps:$4 sm:$0xff]   ;;  %v18160_v6 = vld [vmem:[%s22692_s9 + $0xa0] ss:$16 sps:$4 sm:$0xff]  }
 0x98a   : > { %v16804_v41 = vpop.f32.mrb[83].mxu0  ;;  %v18168_v11 = vld [vmem:[%s22692_s9 + $0xac] ss:$16 sps:$4 sm:$0xff]  }
 0x98b   : > { %v17035_v58 = vadd.f32 %v17034_v40, %v16802_v32  ;;  %v18144_v40 = vld [vmem:[%s22692_s9 + $0x2c] ss:$16 sps:$4 sm:$0xff]   ;;  %v18163_v32 = vld [vmem:[%s22692_s9 + $0x88] ss:$16 sps:$4 sm:$0xff]  }
 0x98c   : > { %7424 = vmatpush1.bf16.msra.mxu1 %v18123_v30  ;;  %v18165_v30 = vld [vmem:[%s22692_s9 + $0x8c] ss:$16 sps:$4 sm:$0xff]   ;;  %v18166_v41 = vld [vmem:[%s22692_s9 + $0xa8] ss:$16 sps:$4 sm:$0xff]  }
 0x98d   : > { %7425 = vmatprep.subr.bf16.mxu1 %v19130_v17 }
 0x990   : > { %7426 = vmatpush1.bf16.msra.mxu1 %v18124_v49  ;;  %v18169_v49 = vld [vmem:[%s22692_s9 + $0xc0] ss:$16 sps:$4 sm:$0xff]  }
 0x991   : > { %7427 = vmatprep.subr.bf16.mxu1 %v19130_v17 }
 0x994   : > { %7428 = vmatpush1.bf16.msra.mxu1 %v18125_v54  ;;  %v18174_v54 = vld [vmem:[%s22692_s9 + $0xe4] ss:$16 sps:$4 sm:$0xff]  }
 0x995   : > { %7429 = vmatprep.subr.bf16.mxu1 %v19130_v17 }
 0x998   : > { %7430 = vmatpush1.bf16.msra.mxu1 %v18126_v52  ;;  %v18172_v52 = vld [vmem:[%s22692_s9 + $0xe0] ss:$16 sps:$4 sm:$0xff]  }
 0x999   : > { %7431 = vmatprep.subr.bf16.mxu1 %v19130_v17 }
 0x99c   : > { %7432 = vmatpush1.bf16.msra.mxu1 %v18127_v55  ;;  %v18177_v55 = vld [vmem:[%s22692_s9 + $0xcc] ss:$16 sps:$4 sm:$0xff]  }
 0x99d   : > { %7433 = vmatprep.subr.bf16.mxu1 %v19130_v17 }
 0x9a0   : > { %7434 = vmatpush1.bf16.msra.mxu1 %v18128_v59  ;;  %v18175_v59 = vld [vmem:[%s22692_s9 + $0xc8] ss:$16 sps:$4 sm:$0xff]  }
 0x9a1   : > { %7435 = vmatprep.subr.bf16.mxu1 %v19130_v17 }
 0x9a4   : > { %7436 = vmatpush1.bf16.msra.mxu1 %v18129_v31  ;;  %v18180_v31 = vld [vmem:[%s22692_s9 + $0xec] ss:$16 sps:$4 sm:$0xff]  }
 0x9a5   : > { %7437 = vmatprep.subr.bf16.mxu1 %v19130_v17 }
 0x9a7   : > { %v16822_v61 = vpop.f32.mrb[84].mxu0 }
 0x9a8   : > { %v16823_v63 = vpop.f32.mrb[85].mxu0  ;;  %7438 = vmatpush1.bf16.msra.mxu1 %v18130_v60  ;;  %v18178_v60 = vld [vmem:[%s22692_s9 + $0xe8] ss:$16 sps:$4 sm:$0xff]  }
 0x9a9   : > { %v16824_v2 = vadd.f32 %v16823_v63, %v16822_v61  ;;  %v16825_v5 = vpop.f32.mrb[86].mxu0  ;;  %7439 = vmatprep.subr.bf16.mxu1 %v19130_v17  ;;  %v18183_v61 = vld [vmem:[%s22692_s9 + $0x104] ss:$16 sps:$4 sm:$0xff]   ;;  %v18181_v63 = vld [vmem:[%s22692_s9 + $0x100] ss:$16 sps:$4 sm:$0xff]  }
 0x9aa   : > { %v16826_v7 = vpop.f32.mrb[87].mxu0  ;;  %v18189_v5 = vld [vmem:[%s22692_s9 + $0x10c] ss:$16 sps:$4 sm:$0xff]  }
 0x9ab   : > { %v17036_v8 = vadd.f32 %v17035_v58, %v16824_v2  ;;  %v18171_v58 = vld [vmem:[%s22692_s9 + $0xc4] ss:$16 sps:$4 sm:$0xff]   ;;  %v18184_v2 = vld [vmem:[%s22692_s9 + $0x120] ss:$16 sps:$4 sm:$0xff]   ;;  %v18187_v7 = vld [vmem:[%s22692_s9 + $0x108] ss:$16 sps:$4 sm:$0xff]  }
 0x9ac   : > { %7440 = vmatpush1.bf16.msra.mxu1 %v18131_v1  ;;  %v18186_v1 = vld [vmem:[%s22692_s9 + $0x124] ss:$16 sps:$4 sm:$0xff]  }
 0x9ad   : > { %7441 = vmatprep.subr.bf16.mxu1 %v19130_v17 }
 0x9b0   : > { %7442 = vmatpush1.bf16.msra.mxu1 %v18132_v9  ;;  %v18190_v9 = vld [vmem:[%s22692_s9 + $0x128] ss:$16 sps:$4 sm:$0xff]  }
 0x9b3   : > { %7452 = vmatmul.mubr.bf16.vlgmr.msra.gmra.mrb[56].mxu1 %v7203_v10  ;;  %v18195_v10 = vld [vmem:[%s22692_s9 + $0x144] ss:$16 sps:$4 sm:$0xff]  }
 0x9c8   : > { %v16844_v12 = vpop.f32.mrb[88].mxu0 }
 0x9c9   : > { %v16845_v16 = vpop.f32.mrb[89].mxu0 }
 0x9ca   : > { %v16846_v22 = vadd.f32 %v16845_v16, %v16844_v12  ;;  %v16847_v56 = vpop.f32.mrb[90].mxu0  ;;  %v18193_v12 = vld [vmem:[%s22692_s9 + $0x140] ss:$16 sps:$4 sm:$0xff]   ;;  %v18198_v16 = vld [vmem:[%s22692_s9 + $0x164] ss:$16 sps:$4 sm:$0xff]  }
 0x9cb   : > { %v16848_v23 = vpop.f32.mrb[91].mxu0  ;;  %v18201_v56 = vld [vmem:[%s22692_s9 + $0x14c] ss:$16 sps:$4 sm:$0xff]  }
 0x9cc   : > { %v17037_v25 = vadd.f32 %v17036_v8, %v16846_v22  ;;  %v18192_v8 = vld [vmem:[%s22692_s9 + $0x12c] ss:$16 sps:$4 sm:$0xff]   ;;  %v18196_v22 = vld [vmem:[%s22692_s9 + $0x160] ss:$16 sps:$4 sm:$0xff]   ;;  %v18199_v23 = vld [vmem:[%s22692_s9 + $0x148] ss:$16 sps:$4 sm:$0xff]  }
 0x9e8   : > { %v16866_v26 = vpop.f32.mrb[92].mxu0 }
 0x9e9   : > { %v16867_v29 = vpop.f32.mrb[93].mxu0 }
 0x9ea   : > { %v16868_v34 = vadd.f32 %v16867_v29, %v16866_v26  ;;  %v16869_v62 = vpop.f32.mrb[94].mxu0  ;;  %v18202_v26 = vld [vmem:[%s22692_s9 + $0x168] ss:$16 sps:$4 sm:$0xff]   ;;  %v18207_v29 = vld [vmem:[%s22692_s9 + $0x184] ss:$16 sps:$4 sm:$0xff]  }
 0x9eb   : > { %v16870_v3 = vpop.f32.mrb[95].mxu0  ;;  %v18210_v62 = vld [vmem:[%s22692_s9 + $0x1a4] ss:$16 sps:$4 sm:$0xff]  }
 0x9ec   : > { %v17038_v42 = vadd.f32 %v17037_v25, %v16868_v34  ;;  %v18204_v25 = vld [vmem:[%s22692_s9 + $0x16c] ss:$16 sps:$4 sm:$0xff]   ;;  %v18205_v34 = vld [vmem:[%s22692_s9 + $0x180] ss:$16 sps:$4 sm:$0xff]  }
 0x9ed   : > { %v18208_v3 = vld [vmem:[%s22692_s9 + $0x1a0] ss:$16 sps:$4 sm:$0xff]  }
 0xa86   : > { %v7453_v28 = vpop.f32.mrb[56].mxu1 }
 0xa87   : > { %v17039_v33 = vadd.f32 %v17038_v42, %v7453_v28  ;;  %v7455_v36 = vpop.f32.mrb[57].mxu1  ;;  %v18213_v42 = vld [vmem:[%s22692_s9 + $0x18c] ss:$16 sps:$4 sm:$0xff]   ;;  %v18219_v28 = vld [vmem:[#allocation3 + $0x4] ss:$16 sps:$4 sm:$0xff]  }
 0xa88   : > { %v7456_v37 = vpop.f32.mrb[58].mxu1  ;;  %v18217_v36 = vld [vmem:[#allocation3] ss:$16 sps:$4 sm:$0xff]  }
 0xa89   : > { %v21786_v21 = vpack.c.bf16 %v17039_v33, %v17039_v33  ;;  %v7457_v27 = vpop.f32.mrb[59].mxu1  ;;  %7461 = vst.msk [vmem:[%s21793_s25] sm:$0x1] %vm7460_vm6, %v17039_v33  ;;  %v18222_v33 = vld [vmem:[#allocation3 + $0xc] ss:$16 sps:$4 sm:$0xff]  }
 0xa8a   : > { %v18220_v37 = vld [vmem:[#allocation3 + $0x8] ss:$16 sps:$4 sm:$0xff]   ;;  %9539 = vmatprep.subr.bf16.mxu1 %v18222_v33  ;;  %v18228_v27 = vld [vmem:[#allocation3 + $0x2c] ss:$16 sps:$4 sm:$0xff]   ;;  %v18301_v33 = vld [vmem:[#allocation3 + $0x1c0] ss:$16 sps:$4 sm:$0xff]  }
 0xa8b   : > { %15798 = vmatmul.mubr.msk.bf16.vlgmr.msra.gmra.mrb[96].mxu0 %vm7533_vm7, %v21786_v21  ;;  %9540 = vmatpush1.bf16.msra.mxu1 %v18220_v37  ;;  %v18309_v37 = vld [vmem:[#allocation3 + $0x1e4] ss:$16 sps:$4 sm:$0xff]  }
 0xa8c   : > { %7579 = vmatpush1.bf16.msra.mxu0 %v18139_v38  ;;  %7610 = vmatprep.mubr.bf16.mxu0 %v19130_v17  ;;  %v18225_v38 = vld [vmem:[#allocation3 + $0x24] ss:$16 sps:$4 sm:$0xff]  }
 0xa8d   : > { %7580 = vmatprep.subr.bf16.mxu0 %v18144_v40  ;;  %v18223_v40 = vld [vmem:[#allocation3 + $0x20] ss:$16 sps:$4 sm:$0xff]   ;;  %9541 = vmatprep.subr.bf16.mxu1 %v18228_v27 }
 0xa8e   : > { %v7471_v27 = vld [vmem:[%s22693_s10] sm:$0xf] }
 0xa90   : > { %7581 = vmatpush1.bf16.msra.mxu0 %v18142_v4  ;;  %v18226_v4 = vld [vmem:[#allocation3 + $0x28] ss:$16 sps:$4 sm:$0xff]  }
 0xa91   : > { %7726 = vmatprep.subr.bf16.mxu0 %v18147_v24  ;;  %9542 = vmatpush1.bf16.msra.mxu1 %v18226_v4  ;;  %v18231_v24 = vld [vmem:[#allocation3 + $0x44] ss:$16 sps:$4 sm:$0xff]   ;;  %v18310_v4 = vld [vmem:[#allocation3 + $0x1e8] ss:$16 sps:$4 sm:$0xff]  }
 0xa93   : > { %15799 = vmatmul.mubr.msk.bf16.vlgmr.msra.gmra.mrb[100].mxu0 %vm7533_vm7, %v21786_v21 }
 0xa94   : > { %7727 = vmatpush1.bf16.msra.mxu0 %v18145_v45  ;;  %7758 = vmatprep.mubr.bf16.mxu0 %v19130_v17  ;;  %v18234_v45 = vld [vmem:[#allocation3 + $0x4c] ss:$16 sps:$4 sm:$0xff]  }
 0xa95   : > { %7728 = vmatprep.subr.bf16.mxu0 %v18150_v46  ;;  %v18229_v46 = vld [vmem:[#allocation3 + $0x40] ss:$16 sps:$4 sm:$0xff]   ;;  %9543 = vmatprep.subr.bf16.mxu1 %v18234_v45  ;;  %v7520_v45 = vrot.slane %v7471_v27, %v19511_v18 }
 0xa98   : > { %7729 = vmatpush1.bf16.msra.mxu0 %v18148_v39  ;;  %v18237_v39 = vld [vmem:[#allocation3 + $0x64] ss:$16 sps:$4 sm:$0xff]  }
 0xa99   : > { %7767 = vmatprep.subr.bf16.mxu0 %v18153_v48  ;;  %v18240_v48 = vld [vmem:[#allocation3 + $0x6c] ss:$16 sps:$4 sm:$0xff]  }
 0xa9b   : > { %15817 = vmatmul.mubr.msk.bf16.vlgmr.msra.gmra.mrb[104].mxu0 %vm7533_vm7, %v21786_v21 }
 0xa9c   : > { %7768 = vmatpush1.bf16.msra.mxu0 %v18151_v53  ;;  %7799 = vmatprep.mubr.bf16.mxu0 %v19130_v17  ;;  %v18235_v53 = vld [vmem:[#allocation3 + $0x60] ss:$16 sps:$4 sm:$0xff]  }
 0xa9d   : > { %7769 = vmatprep.subr.bf16.mxu0 %v18156_v0  ;;  %v18238_v0 = vld [vmem:[#allocation3 + $0x68] ss:$16 sps:$4 sm:$0xff]  }
 0xaa0   : > { %7770 = vmatpush1.bf16.msra.mxu0 %v18154_v50  ;;  %v18243_v50 = vld [vmem:[#allocation3 + $0x84] ss:$16 sps:$4 sm:$0xff]  }
 0xaa1   : > { %7912 = vmatprep.subr.bf16.mxu0 %v18159_v57  ;;  %v18246_v57 = vld [vmem:[#allocation3 + $0x8c] ss:$16 sps:$4 sm:$0xff]  }
 0xaa3   : > { %15818 = vmatmul.mubr.msk.bf16.vlgmr.msra.gmra.mrb[108].mxu0 %vm7533_vm7, %v21786_v21 }
 0xaa4   : > { %7913 = vmatpush1.bf16.msra.mxu0 %v18157_v51  ;;  %7944 = vmatprep.mubr.bf16.mxu0 %v19130_v17  ;;  %v18241_v51 = vld [vmem:[#allocation3 + $0x80] ss:$16 sps:$4 sm:$0xff]  }
 0xaa5   : > { %7914 = vmatprep.subr.bf16.mxu0 %v18162_v44  ;;  %v18244_v44 = vld [vmem:[#allocation3 + $0x88] ss:$16 sps:$4 sm:$0xff]  }
 0xaa8   : > { %7915 = vmatpush1.bf16.msra.mxu0 %v18160_v6  ;;  %v18249_v6 = vld [vmem:[#allocation3 + $0xa4] ss:$16 sps:$4 sm:$0xff]  }
 0xaa9   : > { %7953 = vmatprep.subr.bf16.mxu0 %v18165_v30  ;;  %v18252_v30 = vld [vmem:[#allocation3 + $0xac] ss:$16 sps:$4 sm:$0xff]  }
 0xaab   : > { %15836 = vmatmul.mubr.msk.bf16.vlgmr.msra.gmra.mrb[112].mxu0 %vm7533_vm7, %v21786_v21 }
 0xaac   : > { %7954 = vmatpush1.bf16.msra.mxu0 %v18163_v32  ;;  %7985 = vmatprep.mubr.bf16.mxu0 %v19130_v17  ;;  %v18247_v32 = vld [vmem:[#allocation3 + $0xa0] ss:$16 sps:$4 sm:$0xff]  }
 0xaad   : > { %7955 = vmatprep.subr.bf16.mxu0 %v18168_v11  ;;  %v18250_v11 = vld [vmem:[#allocation3 + $0xa8] ss:$16 sps:$4 sm:$0xff]  }
 0xab0   : > { %7956 = vmatpush1.bf16.msra.mxu0 %v18166_v41  ;;  %v18255_v41 = vld [vmem:[#allocation3 + $0xc4] ss:$16 sps:$4 sm:$0xff]  }
 0xab1   : > { %8098 = vmatprep.subr.bf16.mxu0 %v18171_v58  ;;  %v18258_v58 = vld [vmem:[#allocation3 + $0xcc] ss:$16 sps:$4 sm:$0xff]  }
 0xab3   : > { %15837 = vmatmul.mubr.msk.bf16.vlgmr.msra.gmra.mrb[116].mxu0 %vm7533_vm7, %v21786_v21 }
 0xab4   : > { %8099 = vmatpush1.bf16.msra.mxu0 %v18169_v49  ;;  %8130 = vmatprep.mubr.bf16.mxu0 %v19130_v17  ;;  %v18253_v49 = vld [vmem:[#allocation3 + $0xc0] ss:$16 sps:$4 sm:$0xff]  }
 0xab5   : > { %8100 = vmatprep.subr.bf16.mxu0 %v18174_v54  ;;  %v18256_v54 = vld [vmem:[#allocation3 + $0xc8] ss:$16 sps:$4 sm:$0xff]  }
 0xab8   : > { %8101 = vmatpush1.bf16.msra.mxu0 %v18172_v52  ;;  %v18261_v52 = vld [vmem:[#allocation3 + $0xe4] ss:$16 sps:$4 sm:$0xff]  }
 0xab9   : > { %8139 = vmatprep.subr.bf16.mxu0 %v18177_v55  ;;  %v18264_v55 = vld [vmem:[#allocation3 + $0xec] ss:$16 sps:$4 sm:$0xff]  }
 0xabb   : > { %15855 = vmatmul.mubr.msk.bf16.vlgmr.msra.gmra.mrb[120].mxu0 %vm7533_vm7, %v21786_v21 }
 0xabc   : > { %8140 = vmatpush1.bf16.msra.mxu0 %v18175_v59  ;;  %8171 = vmatprep.mubr.bf16.mxu0 %v19130_v17  ;;  %v18259_v59 = vld [vmem:[#allocation3 + $0xe0] ss:$16 sps:$4 sm:$0xff]  }
 0xabd   : > { %8141 = vmatprep.subr.bf16.mxu0 %v18180_v31  ;;  %v18262_v31 = vld [vmem:[#allocation3 + $0xe8] ss:$16 sps:$4 sm:$0xff]  }
 0xac0   : > { %8142 = vmatpush1.bf16.msra.mxu0 %v18178_v60  ;;  %v18267_v60 = vld [vmem:[#allocation3 + $0x104] ss:$16 sps:$4 sm:$0xff]  }
 0xac1   : > { %8284 = vmatprep.subr.bf16.mxu0 %v18183_v61  ;;  %v18270_v61 = vld [vmem:[#allocation3 + $0x10c] ss:$16 sps:$4 sm:$0xff]  }
 0xac3   : > { %15856 = vmatmul.mubr.msk.bf16.vlgmr.msra.gmra.mrb[124].mxu0 %vm7533_vm7, %v21786_v21 }
 0xac4   : > { %8285 = vmatpush1.bf16.msra.mxu0 %v18181_v63  ;;  %8316 = vmatprep.mubr.bf16.mxu0 %v19130_v17  ;;  %v18265_v63 = vld [vmem:[#allocation3 + $0x100] ss:$16 sps:$4 sm:$0xff]  }
 0xac5   : > { %8286 = vmatprep.subr.bf16.mxu0 %v18186_v1  ;;  %v18268_v1 = vld [vmem:[#allocation3 + $0x108] ss:$16 sps:$4 sm:$0xff]  }
 0xac8   : > { %8287 = vmatpush1.bf16.msra.mxu0 %v18184_v2  ;;  %v18273_v2 = vld [vmem:[#allocation3 + $0x124] ss:$16 sps:$4 sm:$0xff]  }
 0xac9   : > { %8325 = vmatprep.subr.bf16.mxu0 %v18189_v5  ;;  %v18276_v5 = vld [vmem:[#allocation3 + $0x12c] ss:$16 sps:$4 sm:$0xff]  }
 0xacb   : > { %15874 = vmatmul.mubr.msk.bf16.vlgmr.msra.gmra.mrb[128].mxu0 %vm7533_vm7, %v21786_v21 }
 0xacc   : > { %8326 = vmatpush1.bf16.msra.mxu0 %v18187_v7  ;;  %8357 = vmatprep.mubr.bf16.mxu0 %v19130_v17  ;;  %v18271_v7 = vld [vmem:[#allocation3 + $0x120] ss:$16 sps:$4 sm:$0xff]  }
 0xacd   : > { %8327 = vmatprep.subr.bf16.mxu0 %v18192_v8  ;;  %v18274_v8 = vld [vmem:[#allocation3 + $0x128] ss:$16 sps:$4 sm:$0xff]  }
 0xad0   : > { %8328 = vmatpush1.bf16.msra.mxu0 %v18190_v9  ;;  %v18279_v9 = vld [vmem:[#allocation3 + $0x144] ss:$16 sps:$4 sm:$0xff]  }
 0xad1   : > { %8470 = vmatprep.subr.bf16.mxu0 %v18195_v10  ;;  %v18282_v10 = vld [vmem:[#allocation3 + $0x14c] ss:$16 sps:$4 sm:$0xff]  }
 0xad3   : > { %15875 = vmatmul.mubr.msk.bf16.vlgmr.msra.gmra.mrb[132].mxu0 %vm7533_vm7, %v21786_v21 }
 0xad4   : > { %8471 = vmatpush1.bf16.msra.mxu0 %v18193_v12  ;;  %8502 = vmatprep.mubr.bf16.mxu0 %v19130_v17  ;;  %v18277_v12 = vld [vmem:[#allocation3 + $0x140] ss:$16 sps:$4 sm:$0xff]  }
 0xad5   : > { %8472 = vmatprep.subr.bf16.mxu0 %v18198_v16  ;;  %v18280_v16 = vld [vmem:[#allocation3 + $0x148] ss:$16 sps:$4 sm:$0xff]  }
 0xad8   : > { %8473 = vmatpush1.bf16.msra.mxu0 %v18196_v22  ;;  %v18285_v22 = vld [vmem:[#allocation3 + $0x164] ss:$16 sps:$4 sm:$0xff]  }
 0xad9   : > { %8511 = vmatprep.subr.bf16.mxu0 %v18201_v56  ;;  %v18288_v56 = vld [vmem:[#allocation3 + $0x16c] ss:$16 sps:$4 sm:$0xff]  }
 0xadb   : > { %15893 = vmatmul.mubr.msk.bf16.vlgmr.msra.gmra.mrb[136].mxu0 %vm7533_vm7, %v21786_v21 }
 0xadc   : > { %8512 = vmatpush1.bf16.msra.mxu0 %v18199_v23  ;;  %8543 = vmatprep.mubr.bf16.mxu0 %v19130_v17  ;;  %v18283_v23 = vld [vmem:[#allocation3 + $0x160] ss:$16 sps:$4 sm:$0xff]  }
 0xadd   : > { %8513 = vmatprep.subr.bf16.mxu0 %v18204_v25  ;;  %v18286_v25 = vld [vmem:[#allocation3 + $0x168] ss:$16 sps:$4 sm:$0xff]  }
 0xae0   : > { %8514 = vmatpush1.bf16.msra.mxu0 %v18202_v26  ;;  %v18291_v26 = vld [vmem:[#allocation3 + $0x184] ss:$16 sps:$4 sm:$0xff]  }
 0xae1   : > { %8656 = vmatprep.subr.bf16.mxu0 %v18207_v29  ;;  %v18294_v29 = vld [vmem:[#allocation3 + $0x18c] ss:$16 sps:$4 sm:$0xff]  }
 0xae3   : > { %15894 = vmatmul.mubr.msk.bf16.vlgmr.msra.gmra.mrb[140].mxu0 %vm7533_vm7, %v21786_v21 }
 0xae4   : > { %8657 = vmatpush1.bf16.msra.mxu0 %v18205_v34  ;;  %8688 = vmatprep.mubr.bf16.mxu0 %v19130_v17  ;;  %v18289_v34 = vld [vmem:[#allocation3 + $0x180] ss:$16 sps:$4 sm:$0xff]  }
 0xae5   : > { %8658 = vmatprep.subr.bf16.mxu0 %v18210_v62  ;;  %v18292_v62 = vld [vmem:[#allocation3 + $0x188] ss:$16 sps:$4 sm:$0xff]  }
 0xae8   : > { %8659 = vmatpush1.bf16.msra.mxu0 %v18208_v3  ;;  %v18297_v3 = vld [vmem:[#allocation3 + $0x1a4] ss:$16 sps:$4 sm:$0xff]  }
 0xae9   : > { %8697 = vmatprep.subr.bf16.mxu0 %v18213_v42  ;;  %v18300_v42 = vld [vmem:[#allocation3 + $0x1ac] ss:$16 sps:$4 sm:$0xff]  }
 0xaeb   : > { %15912 = vmatmul.mubr.msk.bf16.vlgmr.msra.gmra.mrb[144].mxu0 %vm7533_vm7, %v21786_v21 }
 0xaec   : > { %8698 = vmatpush1.bf16.msra.mxu0 %v18211_v47  ;;  %8729 = vmatprep.mubr.bf16.mxu0 %v19130_v17  ;;  %v18295_v47 = vld [vmem:[#allocation3 + $0x1a0] ss:$16 sps:$4 sm:$0xff]  }
 0xaed   : > { %8699 = vmatprep.subr.bf16.mxu0 %v18216_v43  ;;  %v18298_v43 = vld [vmem:[#allocation3 + $0x1a8] ss:$16 sps:$4 sm:$0xff]  }
 0xaf0   : > { %8700 = vmatpush1.bf16.msra.mxu0 %v18214_v35  ;;  %v18303_v35 = vld [vmem:[#allocation3 + $0x1c4] ss:$16 sps:$4 sm:$0xff]  }
 0xaf1   : > { %9457 = vmatprep.subr.bf16.mxu0 %v18219_v28  ;;  %v18306_v28 = vld [vmem:[#allocation3 + $0x1cc] ss:$16 sps:$4 sm:$0xff]  }
 0xaf3   : > { %15913 = vmatmul.mubr.msk.bf16.vlgmr.msra.gmra.mrb[148].mxu0 %vm7533_vm7, %v21786_v21  ;;  %v18232_v21 = vld [vmem:[#allocation3 + $0x48] ss:$16 sps:$4 sm:$0xff]  }
 0xaf4   : > { %9458 = vmatpush1.bf16.msra.mxu0 %v18217_v36  ;;  %9544 = vmatpush1.bf16.msra.mxu1 %v18232_v21  ;;  %v18304_v36 = vld [vmem:[#allocation3 + $0x1c8] ss:$16 sps:$4 sm:$0xff]   ;;  %v18318_v21 = vld [vmem:[#allocation3 + $0x20c] ss:$16 sps:$4 sm:$0xff]  }
 0xaf5   : > { %9459 = vmatprep.subr.bf16.mxu0 %v18225_v38  ;;  %9545 = vmatprep.subr.bf16.mxu1 %v18240_v48  ;;  %v18312_v38 = vld [vmem:[#allocation3 + $0x1ec] ss:$16 sps:$4 sm:$0xff]  }
 0xaf8   : > { %9460 = vmatpush1.bf16.msra.mxu0 %v18223_v40  ;;  %9546 = vmatpush1.bf16.msra.mxu1 %v18238_v0  ;;  %v18307_v40 = vld [vmem:[#allocation3 + $0x1e0] ss:$16 sps:$4 sm:$0xff]   ;;  %v19131_v0 = vmov 1966171168  }
 0xaf9   : > { %9461 = vmatprep.subr.bf16.mxu0 %v18231_v24  ;;  %9547 = vmatprep.subr.bf16.mxu1 %v18246_v57  ;;  %v7516_v24 = vrot.slane %v7471_v27, %v19505_v15 }
 0xafc   : > { %9462 = vmatpush1.bf16.msra.mxu0 %v18229_v46  ;;  %9548 = vmatpush1.bf16.msra.mxu1 %v18244_v44  ;;  %v18315_v46 = vld [vmem:[#allocation3 + $0x204] ss:$16 sps:$4 sm:$0xff]  }
 0xafd   : > { %9463 = vmatprep.subr.bf16.mxu0 %v18237_v39  ;;  %9549 = vmatprep.subr.bf16.mxu1 %v18252_v30  ;;  %v7524_v30 = vrot.slane %v7471_v27, %v19514_v19 }
 0xb00   : > { %9464 = vmatpush1.bf16.msra.mxu0 %v18235_v53  ;;  %9550 = vmatpush1.bf16.msra.mxu1 %v18250_v11  ;;  %v7528_v11 = vrot.slane %v7471_v27, %v19517_v20 }
 0xb01   : > { %9465 = vmatprep.subr.bf16.mxu0 %v18243_v50  ;;  %9551 = vmatprep.subr.bf16.mxu1 %v18258_v58  ;;  %v7626_v50 = vunpack.c.l.s4 %v19131_v0 }
 0xb04   : > { %9466 = vmatpush1.bf16.msra.mxu0 %v18241_v51  ;;  %9552 = vmatpush1.bf16.msra.mxu1 %v18256_v54 }
 0xb05   : > { %9467 = vmatprep.subr.bf16.mxu0 %v18249_v6  ;;  %9553 = vmatprep.subr.bf16.mxu1 %v18264_v55 }
 0xb08   : > { %9468 = vmatpush1.bf16.msra.mxu0 %v18247_v32  ;;  %9554 = vmatpush1.bf16.msra.mxu1 %v18262_v31  ;;  %v7627_v32 = vunpack.c.0.s8 %v7626_v50 }
 0xb09   : > { %9469 = vmatprep.subr.bf16.mxu0 %v18255_v41  ;;  %9555 = vmatprep.subr.bf16.mxu1 %v18270_v61 }
 0xb0a   : > { %v21992_v54 = vsub.s32 %v7627_v32, %v19502_v14 }
 0xb0c   : > { %9470 = vmatpush1.bf16.msra.mxu0 %v18253_v49  ;;  %9556 = vmatpush1.bf16.msra.mxu1 %v18268_v1 }
 0xb0d   : > { %9471 = vmatprep.subr.bf16.mxu0 %v18261_v52  ;;  %9557 = vmatprep.subr.bf16.mxu1 %v18276_v5 }
 0xb10   : > { %9472 = vmatpush1.bf16.msra.mxu0 %v18259_v59  ;;  %9558 = vmatpush1.bf16.msra.mxu1 %v18274_v8  ;;  %v15808_v59 = vld [vmem:[%s22693_s10 + $0x4] sm:$0xf] }
 0xb11   : > { %9473 = vmatprep.subr.bf16.mxu0 %v18267_v60  ;;  %9559 = vmatprep.subr.bf16.mxu1 %v18282_v10  ;;  %v7709_v61 = vrot.slane %v15808_v59, %v19505_v15 }
 0xb14   : > { %9474 = vmatpush1.bf16.msra.mxu0 %v18265_v63  ;;  %9560 = vmatpush1.bf16.msra.mxu1 %v18280_v16 }
 0xb15   : > { %9475 = vmatprep.subr.bf16.mxu0 %v18273_v2  ;;  %9561 = vmatprep.subr.bf16.mxu1 %v18288_v56  ;;  %v7713_v2 = vrot.slane %v15808_v59, %v19511_v18 }
 0xb18   : > { %9476 = vmatpush1.bf16.msra.mxu0 %v18271_v7  ;;  %9562 = vmatpush1.bf16.msra.mxu1 %v18286_v25  ;;  %v7721_v25 = vrot.slane %v15808_v59, %v19517_v20 }
 0xb19   : > { %9477 = vmatprep.subr.bf16.mxu0 %v18279_v9  ;;  %9563 = vmatprep.subr.bf16.mxu1 %v18294_v29 }
 0xb1c   : > { %9478 = vmatpush1.bf16.msra.mxu0 %v18277_v12  ;;  %9564 = vmatpush1.bf16.msra.mxu1 %v18292_v62 }
 0xb1d   : > { %9479 = vmatprep.subr.bf16.mxu0 %v18285_v22  ;;  %9565 = vmatprep.subr.bf16.mxu1 %v18300_v42 }
 0xb20   : > { %9480 = vmatpush1.bf16.msra.mxu0 %v18283_v23  ;;  %9566 = vmatpush1.bf16.msra.mxu1 %v18298_v43  ;;  %v7717_v23 = vrot.slane %v15808_v59, %v19514_v19 }
 0xb21   : > { %9481 = vmatprep.subr.bf16.mxu0 %v18291_v26  ;;  %9567 = vmatprep.subr.bf16.mxu1 %v18306_v28 }
 0xb24   : > { %9482 = vmatpush1.bf16.msra.mxu0 %v18289_v34  ;;  %9568 = vmatpush1.bf16.msra.mxu1 %v18304_v36 }
 0xb25   : > { %9483 = vmatprep.subr.bf16.mxu0 %v18297_v3  ;;  %9569 = vmatprep.subr.bf16.mxu1 %v18312_v38  ;;  %v15827_v3 = vld [vmem:[%s22693_s10 + $0x8] sm:$0xf] }
 0xb26   : > { %v7895_v43 = vrot.slane %v15827_v3, %v19505_v15 }
 0xb28   : > { %9484 = vmatpush1.bf16.msra.mxu0 %v18295_v47  ;;  %9570 = vmatpush1.bf16.msra.mxu1 %v18310_v4 }
 0xb29   : > { %9485 = vmatprep.subr.bf16.mxu0 %v18303_v35  ;;  %9580 = vmatprep.subr.bf16.mxu1 %v18318_v21  ;;  %v7903_v21 = vrot.slane %v15827_v3, %v19514_v19 }
 0xb2c   : > { %9486 = vmatpush1.bf16.msra.mxu0 %v18301_v33  ;;  %v7899_v33 = vrot.slane %v15827_v3, %v19511_v18 }
 0xb2d   : > { %9487 = vmatprep.subr.bf16.mxu0 %v18309_v37 }
 0xb30   : > { %9488 = vmatpush1.bf16.msra.mxu0 %v18307_v40 }
 0xb31   : > { %9498 = vmatprep.subr.bf16.mxu0 %v18315_v46 }
 0xb5e   : > { %v7571_v39 = vpop.f32.mrb[96].mxu0 }
 0xb5f   : > { %v7572_v48 = vadd.f32 %v7571_v39, %v7516_v24  ;;  %v7573_v53 = vpop.f32.mrb[97].mxu0  ;;  %v7907_v39 = vrot.slane %v15827_v3, %v19517_v20 }
 0xb60   : > { %v7574_v57 = vadd.f32 %v7573_v53, %v7520_v45  ;;  %v7575_v51 = vpop.f32.mrb[98].mxu0 }
 0xb61   : > { %v7576_v44 = vpop.f32.mrb[99].mxu0  ;;  %v15846_v51 = vld [vmem:[%s22693_s10 + $0xc] sm:$0xf] }
 0xb62   : > { %v7623_v6 = vcombine.low %v7572_v48, %v7574_v57 }
 0xb64   : > { %v7631_v63 = vrot.slane %v7623_v6, %v21992_v54 }
 0xb66   : > { %v7612_v41 = vpop.f32.mrb[100].mxu0 }
 0xb67   : > { %v7613_v58 = vadd.f32 %v7612_v41, %v7524_v30  ;;  %v7614_v49 = vpop.f32.mrb[101].mxu0  ;;  %v8081_v30 = vrot.slane %v15846_v51, %v19505_v15  ;;  %v8085_v41 = vrot.slane %v15846_v51, %v19511_v18 }
 0xb68   : > { %v7615_v52 = vadd.f32 %v7614_v49, %v7528_v11  ;;  %v7616_v55 = vpop.f32.mrb[102].mxu0 }
 0xb69   : > { %v7617_v31 = vpop.f32.mrb[103].mxu0 }
 0xb6a   : > { %v7624_v60 = vcombine.low %v7613_v58, %v7615_v52 }
 0xb6c   : > { %v7638_v1 = vrot.slane %v7624_v60, %v21992_v54 }
 0xb6e   : > { %v7639_v5 = vcombine.low %v7631_v63, %v7638_v1  ;;  %v7760_v7 = vpop.f32.mrb[104].mxu0  ;;  %v8089_v1 = vrot.slane %v15846_v51, %v19514_v19 }
 0xb6f   : > { %v7761_v8 = vadd.f32 %v7760_v7, %v7709_v61  ;;  %v7762_v9 = vpop.f32.mrb[105].mxu0 }
 0xb70   : > { %v7646_v10 = vrot.slane %v7639_v5, %v21992_v54  ;;  %v7763_v12 = vadd.f32 %v7762_v9, %v7713_v2  ;;  %v7764_v16 = vpop.f32.mrb[106].mxu0  ;;  %v8093_v2 = vrot.slane %v15846_v51, %v19517_v20 }
 0xb71   : > { %v7765_v22 = vpop.f32.mrb[107].mxu0 }
 0xb72   : > { %7652 = vst.msk [vmem:[#allocation2] ss:$8 sm:$0xf] %vm22002_vm8, %v7646_v10  ;;  %v7812_v56 = vcombine.low %v7761_v8, %v7763_v12  ;;  %v15865_v12 = vld [vmem:[%s22693_s10 + $0x10] sm:$0xf] }
 0xb74   : > { %v7820_v35 = vrot.slane %v7812_v56, %v21992_v54  ;;  %v8267_v56 = vrot.slane %v15865_v12, %v19505_v15 }
 0xb76   : > { %v7801_v26 = vpop.f32.mrb[108].mxu0 }
 0xb77   : > { %v7802_v13 = vadd.f32 %v7801_v26, %v7717_v23  ;;  %v7803_v29 = vpop.f32.mrb[109].mxu0  ;;  %v8271_v26 = vrot.slane %v15865_v12, %v19511_v18 }
 0xb78   : > { %v7804_v34 = vadd.f32 %v7803_v29, %v7721_v25  ;;  %v7805_v62 = vpop.f32.mrb[110].mxu0 }
 0xb79   : > { %v7806_v42 = vpop.f32.mrb[111].mxu0 }
 0xb7a   : > { %v7813_v47 = vcombine.low %v7802_v13, %v7804_v34 }
 0xb7c   : > { %v7827_v28 = vrot.slane %v7813_v47, %v21992_v54 }
 0xb7e   : > { %v7828_v36 = vcombine.low %v7820_v35, %v7827_v28  ;;  %v7946_v37 = vpop.f32.mrb[112].mxu0  ;;  %v8275_v28 = vrot.slane %v15865_v12, %v19514_v19 }
 0xb7f   : > { %v7947_v38 = vadd.f32 %v7946_v37, %v7895_v43  ;;  %v7948_v27 = vpop.f32.mrb[113].mxu0 }
 0xb80   : > { %v7835_v40 = vrot.slane %v7828_v36, %v21992_v54  ;;  %v7949_v4 = vadd.f32 %v7948_v27, %v7899_v33  ;;  %v7950_v24 = vpop.f32.mrb[114].mxu0  ;;  %v8279_v33 = vrot.slane %v15865_v12, %v19517_v20 }
 0xb81   : > { %v7951_v45 = vpop.f32.mrb[115].mxu0 }
 0xb82   : > { %7838 = vst.msk [vmem:[#allocation2 + $0x1] ss:$8 sm:$0xf] %vm22002_vm8, %v7835_v40  ;;  %v7998_v46 = vcombine.low %v7947_v38, %v7949_v4  ;;  %v15884_v4 = vld [vmem:[%s22693_s10 + $0x14] sm:$0xf] }
 0xb84   : > { %v8006_v32 = vrot.slane %v7998_v46, %v21992_v54  ;;  %v8453_v46 = vrot.slane %v15884_v4, %v19505_v15 }
 0xb86   : > { %v7987_v48 = vpop.f32.mrb[116].mxu0 }
 0xb87   : > { %v7988_v53 = vadd.f32 %v7987_v48, %v7903_v21  ;;  %v7989_v0 = vpop.f32.mrb[117].mxu0  ;;  %v8457_v48 = vrot.slane %v15884_v4, %v19511_v18 }
 0xb88   : > { %v7990_v50 = vadd.f32 %v7989_v0, %v7907_v39  ;;  %v7991_v57 = vpop.f32.mrb[118].mxu0 }
 0xb89   : > { %v7992_v44 = vpop.f32.mrb[119].mxu0 }
 0xb8a   : > { %v7999_v6 = vcombine.low %v7988_v53, %v7990_v50 }
 0xb8c   : > { %v8013_v11 = vrot.slane %v7999_v6, %v21992_v54 }
 0xb8e   : > { %v8014_v58 = vcombine.low %v8006_v32, %v8013_v11  ;;  %v8132_v49 = vpop.f32.mrb[120].mxu0  ;;  %v8461_v11 = vrot.slane %v15884_v4, %v19514_v19 }
 0xb8f   : > { %v8133_v52 = vadd.f32 %v8132_v49, %v8081_v30  ;;  %v8134_v55 = vpop.f32.mrb[121].mxu0 }
 0xb90   : > { %v8021_v59 = vrot.slane %v8014_v58, %v21992_v54  ;;  %v8135_v31 = vadd.f32 %v8134_v55, %v8085_v41  ;;  %v8136_v60 = vpop.f32.mrb[122].mxu0  ;;  %v8465_v41 = vrot.slane %v15884_v4, %v19517_v20 }
 0xb91   : > { %v8137_v61 = vpop.f32.mrb[123].mxu0 }
 0xb92   : > { %8024 = vst.msk [vmem:[#allocation2 + $0x2] ss:$8 sm:$0xf] %vm22002_vm8, %v8021_v59  ;;  %v8184_v63 = vcombine.low %v8133_v52, %v8135_v31  ;;  %v15903_v31 = vld [vmem:[%s22693_s10 + $0x18] sm:$0xf] }
 0xb94   : > { %v8192_v23 = vrot.slane %v8184_v63, %v21992_v54  ;;  %v8639_v63 = vrot.slane %v15903_v31, %v19505_v15 }
 0xb96   : > { %v8173_v5 = vpop.f32.mrb[124].mxu0 }
 0xb97   : > { %v8174_v7 = vadd.f32 %v8173_v5, %v8089_v1  ;;  %v8175_v8 = vpop.f32.mrb[125].mxu0  ;;  %v8643_v5 = vrot.slane %v15903_v31, %v19511_v18 }
 0xb98   : > { %v8176_v9 = vadd.f32 %v8175_v8, %v8093_v2  ;;  %v8177_v10 = vpop.f32.mrb[126].mxu0 }
 0xb99   : > { %v8178_v16 = vpop.f32.mrb[127].mxu0 }
 0xb9a   : > { %v8185_v22 = vcombine.low %v8174_v7, %v8176_v9 }
 0xb9c   : > { %v8199_v25 = vrot.slane %v8185_v22, %v21992_v54 }
 0xb9e   : > { %v8200_v13 = vcombine.low %v8192_v23, %v8199_v25  ;;  %v8318_v29 = vpop.f32.mrb[128].mxu0  ;;  %v8647_v25 = vrot.slane %v15903_v31, %v19514_v19 }
 0xb9f   : > { %v8319_v34 = vadd.f32 %v8318_v29, %v8267_v56  ;;  %v8320_v62 = vpop.f32.mrb[129].mxu0 }
 0xba0   : > { %v8207_v3 = vrot.slane %v8200_v13, %v21992_v54  ;;  %v8321_v42 = vadd.f32 %v8320_v62, %v8271_v26  ;;  %v8322_v47 = vpop.f32.mrb[130].mxu0  ;;  %v8651_v26 = vrot.slane %v15903_v31, %v19517_v20  ;;  %v18346_v31 = vld [vmem:[#allocation3 + $0x2a8] ss:$16 sps:$4 sm:$0xff]  }
 0xba1   : > { %v8323_v43 = vpop.f32.mrb[131].mxu0 }
 0xba2   : > { %8210 = vst.msk [vmem:[#allocation2 + $0x3] ss:$8 sm:$0xf] %vm22002_vm8, %v8207_v3  ;;  %v8370_v35 = vcombine.low %v8319_v34, %v8321_v42 }
 0xba4   : > { %v8378_v21 = vrot.slane %v8370_v35, %v21992_v54 }
 0xba6   : > { %v8359_v36 = vpop.f32.mrb[132].mxu0 }
 0xba7   : > { %v8360_v37 = vadd.f32 %v8359_v36, %v8275_v28  ;;  %v8361_v38 = vpop.f32.mrb[133].mxu0 }
 0xba8   : > { %v8362_v27 = vadd.f32 %v8361_v38, %v8279_v33  ;;  %v8363_v40 = vpop.f32.mrb[134].mxu0 }
 0xba9   : > { %v8364_v24 = vpop.f32.mrb[135].mxu0 }
 0xbaa   : > { %v8371_v45 = vcombine.low %v8360_v37, %v8362_v27 }
 0xbac   : > { %v8385_v39 = vrot.slane %v8371_v45, %v21992_v54  ;;  %v18313_v45 = vld [vmem:[#allocation3 + $0x200] ss:$16 sps:$4 sm:$0xff]  }
 0xbae   : > { %v8386_v53 = vcombine.low %v8378_v21, %v8385_v39  ;;  %v8504_v0 = vpop.f32.mrb[136].mxu0  ;;  %v18324_v39 = vld [vmem:[#allocation3 + $0x22c] ss:$16 sps:$4 sm:$0xff]  }
 0xbaf   : > { %v8505_v50 = vadd.f32 %v8504_v0, %v8453_v46  ;;  %v8506_v57 = vpop.f32.mrb[137].mxu0  ;;  %v18316_v46 = vld [vmem:[#allocation3 + $0x208] ss:$16 sps:$4 sm:$0xff]   ;;  %v18327_v0 = vld [vmem:[#allocation3 + $0x244] ss:$16 sps:$4 sm:$0xff]  }
 0xbb0   : > { %v8393_v51 = vrot.slane %v8386_v53, %v21992_v54  ;;  %v8507_v44 = vadd.f32 %v8506_v57, %v8457_v48  ;;  %v8508_v6 = vpop.f32.mrb[138].mxu0  ;;  %v18319_v48 = vld [vmem:[#allocation3 + $0x220] ss:$16 sps:$4 sm:$0xff]   ;;  %v18322_v53 = vld [vmem:[#allocation3 + $0x228] ss:$16 sps:$4 sm:$0xff]  }
 0xbb1   : > { %v8509_v30 = vpop.f32.mrb[139].mxu0  ;;  %v18325_v57 = vld [vmem:[#allocation3 + $0x240] ss:$16 sps:$4 sm:$0xff]   ;;  %v18336_v6 = vld [vmem:[#allocation3 + $0x26c] ss:$16 sps:$4 sm:$0xff]  }
 0xbb2   : > { %8396 = vst.msk [vmem:[#allocation2 + $0x4] ss:$8 sm:$0xf] %vm22002_vm8, %v8393_v51  ;;  %v8556_v32 = vcombine.low %v8505_v50, %v8507_v44  ;;  %v18330_v50 = vld [vmem:[#allocation3 + $0x24c] ss:$16 sps:$4 sm:$0xff]  }
 0xbb3   : > { %v18328_v51 = vld [vmem:[#allocation3 + $0x248] ss:$16 sps:$4 sm:$0xff]   ;;  %v18333_v44 = vld [vmem:[#allocation3 + $0x264] ss:$16 sps:$4 sm:$0xff]   ;;  %v18331_v30 = vld [vmem:[#allocation3 + $0x260] ss:$16 sps:$4 sm:$0xff]  }
 0xbb4   : > { %v8564_v1 = vrot.slane %v8556_v32, %v21992_v54  ;;  %v18334_v32 = vld [vmem:[#allocation3 + $0x268] ss:$16 sps:$4 sm:$0xff]  }
 0xbb6   : > { %v8545_v58 = vpop.f32.mrb[140].mxu0 }
 0xbb7   : > { %v8546_v49 = vadd.f32 %v8545_v58, %v8461_v11  ;;  %v8547_v52 = vpop.f32.mrb[141].mxu0  ;;  %v18339_v11 = vld [vmem:[#allocation3 + $0x284] ss:$16 sps:$4 sm:$0xff]   ;;  %v18337_v58 = vld [vmem:[#allocation3 + $0x280] ss:$16 sps:$4 sm:$0xff]  }
 0xbb8   : > { %v8548_v55 = vadd.f32 %v8547_v52, %v8465_v41  ;;  %v8549_v59 = vpop.f32.mrb[142].mxu0  ;;  %v18342_v41 = vld [vmem:[#allocation3 + $0x28c] ss:$16 sps:$4 sm:$0xff]   ;;  %v18345_v52 = vld [vmem:[#allocation3 + $0x2a4] ss:$16 sps:$4 sm:$0xff]  }
 0xbb9   : > { %v8550_v60 = vpop.f32.mrb[143].mxu0  ;;  %v18343_v59 = vld [vmem:[#allocation3 + $0x2a0] ss:$16 sps:$4 sm:$0xff]  }
 0xbba   : > { %v8557_v61 = vcombine.low %v8546_v49, %v8548_v55  ;;  %v18340_v49 = vld [vmem:[#allocation3 + $0x288] ss:$16 sps:$4 sm:$0xff]   ;;  %v18348_v55 = vld [vmem:[#allocation3 + $0x2ac] ss:$16 sps:$4 sm:$0xff]   ;;  %v18351_v60 = vld [vmem:[#allocation3 + $0x2c4] ss:$16 sps:$4 sm:$0xff]  }
 0xbbc   : > { %v8571_v2 = vrot.slane %v8557_v61, %v21992_v54  ;;  %v18354_v61 = vld [vmem:[#allocation3 + $0x2cc] ss:$16 sps:$4 sm:$0xff]  }
 0xbbe   : > { %v8572_v7 = vcombine.low %v8564_v1, %v8571_v2  ;;  %v8690_v8 = vpop.f32.mrb[144].mxu0  ;;  %v18352_v1 = vld [vmem:[#allocation3 + $0x2c8] ss:$16 sps:$4 sm:$0xff]   ;;  %v18357_v2 = vld [vmem:[#allocation3 + $0x2e4] ss:$16 sps:$4 sm:$0xff]  }
 0xbbf   : > { %v8691_v9 = vadd.f32 %v8690_v8, %v8639_v63  ;;  %v8692_v10 = vpop.f32.mrb[145].mxu0  ;;  %v18349_v63 = vld [vmem:[#allocation3 + $0x2c0] ss:$16 sps:$4 sm:$0xff]   ;;  %v18358_v8 = vld [vmem:[#allocation3 + $0x2e8] ss:$16 sps:$4 sm:$0xff]  }
 0xbc0   : > { %v8579_v12 = vrot.slane %v8572_v7, %v21992_v54  ;;  %v8693_v16 = vadd.f32 %v8692_v10, %v8643_v5  ;;  %v8694_v22 = vpop.f32.mrb[146].mxu0  ;;  %v18360_v5 = vld [vmem:[#allocation3 + $0x2ec] ss:$16 sps:$4 sm:$0xff]   ;;  %v18355_v7 = vld [vmem:[#allocation3 + $0x2e0] ss:$16 sps:$4 sm:$0xff]  }
 0xbc1   : > { %v8695_v56 = vpop.f32.mrb[147].mxu0  ;;  %v18366_v10 = vld [vmem:[#allocation3 + $0x30c] ss:$16 sps:$4 sm:$0xff]   ;;  %v18369_v22 = vld [vmem:[#allocation3 + $0x324] ss:$16 sps:$4 sm:$0xff]  }
 0xbc2   : > { %8582 = vst.msk [vmem:[#allocation2 + $0x5] ss:$8 sm:$0xf] %vm22002_vm8, %v8579_v12  ;;  %v8742_v23 = vcombine.low %v8691_v9, %v8693_v16  ;;  %v18363_v9 = vld [vmem:[#allocation3 + $0x304] ss:$16 sps:$4 sm:$0xff]  }
 0xbc3   : > { %v18361_v12 = vld [vmem:[#allocation3 + $0x300] ss:$16 sps:$4 sm:$0xff]   ;;  %v18364_v16 = vld [vmem:[#allocation3 + $0x308] ss:$16 sps:$4 sm:$0xff]   ;;  %v18372_v56 = vld [vmem:[#allocation3 + $0x32c] ss:$16 sps:$4 sm:$0xff]  }
 0xbc4   : > { %v8750_v43 = vrot.slane %v8742_v23, %v21992_v54  ;;  %v18367_v23 = vld [vmem:[#allocation3 + $0x320] ss:$16 sps:$4 sm:$0xff]  }
 0xbc6   : > { %v8731_v13 = vpop.f32.mrb[148].mxu0 }
 0xbc7   : > { %v8732_v29 = vadd.f32 %v8731_v13, %v8647_v25  ;;  %v8733_v34 = vpop.f32.mrb[149].mxu0  ;;  %v18370_v25 = vld [vmem:[#allocation3 + $0x328] ss:$16 sps:$4 sm:$0xff]   ;;  %v18378_v13 = vld [vmem:[#allocation3 + $0x34c] ss:$16 sps:$4 sm:$0xff]  }
 0xbc8   : > { %v8734_v62 = vadd.f32 %v8733_v34, %v8651_v26  ;;  %v8735_v3 = vpop.f32.mrb[150].mxu0  ;;  %v18375_v26 = vld [vmem:[#allocation3 + $0x344] ss:$16 sps:$4 sm:$0xff]   ;;  %v18376_v34 = vld [vmem:[#allocation3 + $0x348] ss:$16 sps:$4 sm:$0xff]  }
 0xbc9   : > { %v8736_v42 = vpop.f32.mrb[151].mxu0  ;;  %v18384_v3 = vld [vmem:[#allocation3 + $0x36c] ss:$16 sps:$4 sm:$0xff]  }
 0xbca   : > { %v8743_v47 = vcombine.low %v8732_v29, %v8734_v62  ;;  %v18373_v29 = vld [vmem:[#allocation3 + $0x340] ss:$16 sps:$4 sm:$0xff]   ;;  %v18381_v62 = vld [vmem:[#allocation3 + $0x364] ss:$16 sps:$4 sm:$0xff]  }
 0xbcc   : > { %v8757_v35 = vrot.slane %v8743_v47, %v21992_v54  ;;  %v18379_v47 = vld [vmem:[#allocation3 + $0x360] ss:$16 sps:$4 sm:$0xff]  }
 0xbce   : > { %v8758_v28 = vcombine.low %v8750_v43, %v8757_v35  ;;  %v18382_v43 = vld [vmem:[#allocation3 + $0x368] ss:$16 sps:$4 sm:$0xff]  }
 0xbd0   : > { %v8765_v33 = vrot.slane %v8758_v28, %v21992_v54  ;;  %v18321_v54 = vld [vmem:[#allocation3 + $0x224] ss:$16 sps:$4 sm:$0xff]  }
 0xbd1   : > { %v18387_v28 = vld [vmem:[#allocation3 + $0x384] ss:$16 sps:$4 sm:$0xff]  }
 0xbd2   : > { %8768 = vst.msk [vmem:[#allocation2 + $0x6] ss:$8 sm:$0xf] %vm22002_vm8, %v8765_v33  ;;  %v18390_v33 = vld [vmem:[#allocation3 + $0x38c] ss:$16 sps:$4 sm:$0xff]  }
 0xbd9   : > { %v8771_v36 = vld [vmem:[#allocation2 + $0x8] sm:$0x7f]  ;;  %v8770_v37 = vld [vmem:[#allocation2] sm:$0x7f]  ;;  %v8773_v38 = vld [vmem:[#allocation2 + $0x18] sm:$0x7f] }
 0xbda   : > { %v8775_v27 = vmax.f32 %v8771_v36, 0.0  ;;  %v8774_v40 = vmax.f32 %v8770_v37, 0.0  ;;  %v8777_v4 = vmax.f32 %v8773_v38, 0.0  ;;  %v8772_v42 = vld [vmem:[#allocation2 + $0x10] sm:$0x7f] }
 0xbdb   : > { %v8776_v35 = vmax.f32 %v8772_v42, 0.0  ;;  %v18385_v36 = vld [vmem:[#allocation3 + $0x380] ss:$16 sps:$4 sm:$0xff]   ;;  %v18388_v38 = vld [vmem:[#allocation3 + $0x388] ss:$16 sps:$4 sm:$0xff]  }
 0xbdc   : > { %v22076_v24 = vpack.c.bf16 %v8775_v27, %v8775_v27  ;;  %v22078_v21 = vpack.c.bf16 %v8774_v40, %v8774_v40  ;;  %v22084_v14 = vpack.c.bf16 %v8777_v4, %v8777_v4  ;;  %v18393_v27 = vld [vmem:[#allocation3 + $0x3a4] ss:$16 sps:$4 sm:$0xff]   ;;  %v18396_v40 = vld [vmem:[#allocation3 + $0x3ac] ss:$16 sps:$4 sm:$0xff]   ;;  %v18391_v4 = vld [vmem:[#allocation3 + $0x3a0] ss:$16 sps:$4 sm:$0xff]  }
 0xbdd   : > { %v22090_v37 = vpack.c.bf16 %v8776_v35, %v8776_v35  ;;  %v18460_v42 = vld [vmem:[#allocation3 + $0x508] ss:$16 sps:$4 sm:$0xff]   ;;  %v18463_v35 = vld [vmem:[#allocation3 + $0x520] ss:$16 sps:$4 sm:$0xff]  }
 0xbde   : > { %9489 = vmatprep.mubr.bf16.mxu0 %v22076_v24  ;;  %9571 = vmatprep.mubr.bf16.mxu1 %v22076_v24 }
 0xbdf   : > { %9490 = vmatmul.mubr.bf16.vlgmr.msra.gmra.mrb[152].mxu0 %v22078_v21  ;;  %9572 = vmatmul.mubr.bf16.vlgmr.msra.gmra.mrb[60].mxu1 %v22078_v21 }
 0xbe0   : > { %9499 = vmatpush1.bf16.msra.mxu0 %v18313_v45  ;;  %9581 = vmatpush1.bf16.msra.mxu1 %v18316_v46  ;;  %v18394_v45 = vld [vmem:[#allocation3 + $0x3a8] ss:$16 sps:$4 sm:$0xff]   ;;  %v18399_v46 = vld [vmem:[#allocation3 + $0x3c4] ss:$16 sps:$4 sm:$0xff]  }
 0xbe1   : > { %16026 = vmatprep.mubr.msk.bf16.mxu0 %vm2445_vm5, %v22084_v14  ;;  %16027 = vmatprep.mubr.msk.bf16.mxu1 %vm2445_vm5, %v22084_v14 }
 0xbe2   : > { %9500 = vmatprep.subr.bf16.mxu0 %v18321_v54  ;;  %9582 = vmatprep.subr.bf16.mxu1 %v18324_v39  ;;  %v18402_v54 = vld [vmem:[#allocation3 + $0x3cc] ss:$16 sps:$4 sm:$0xff]   ;;  %v18397_v39 = vld [vmem:[#allocation3 + $0x3c0] ss:$16 sps:$4 sm:$0xff]  }
 0xbe4   : > { %9501 = vmatpush1.bf16.msra.mxu0 %v18319_v48  ;;  %9583 = vmatpush1.bf16.msra.mxu1 %v18322_v53  ;;  %v18400_v48 = vld [vmem:[#allocation3 + $0x3c8] ss:$16 sps:$4 sm:$0xff]   ;;  %v18405_v53 = vld [vmem:[#allocation3 + $0x3e4] ss:$16 sps:$4 sm:$0xff]  }
 0xbe5   : > { %9502 = vmatprep.subr.bf16.mxu0 %v18327_v0  ;;  %9584 = vmatprep.subr.bf16.mxu1 %v18330_v50  ;;  %v18408_v0 = vld [vmem:[#allocation3 + $0x3ec] ss:$16 sps:$4 sm:$0xff]   ;;  %v18403_v50 = vld [vmem:[#allocation3 + $0x3e0] ss:$16 sps:$4 sm:$0xff]  }
 0xbe8   : > { %9503 = vmatpush1.bf16.msra.mxu0 %v18325_v57  ;;  %9585 = vmatpush1.bf16.msra.mxu1 %v18328_v51  ;;  %v18406_v57 = vld [vmem:[#allocation3 + $0x3e8] ss:$16 sps:$4 sm:$0xff]   ;;  %v18411_v51 = vld [vmem:[#allocation3 + $0x404] ss:$16 sps:$4 sm:$0xff]  }
 0xbe9   : > { %9504 = vmatprep.subr.bf16.mxu0 %v18333_v44  ;;  %9586 = vmatprep.subr.bf16.mxu1 %v18336_v6  ;;  %v18414_v44 = vld [vmem:[#allocation3 + $0x40c] ss:$16 sps:$4 sm:$0xff]   ;;  %v18409_v6 = vld [vmem:[#allocation3 + $0x400] ss:$16 sps:$4 sm:$0xff]  }
 0xbec   : > { %9505 = vmatpush1.bf16.msra.mxu0 %v18331_v30  ;;  %9587 = vmatpush1.bf16.msra.mxu1 %v18334_v32  ;;  %v18412_v30 = vld [vmem:[#allocation3 + $0x408] ss:$16 sps:$4 sm:$0xff]   ;;  %v18417_v32 = vld [vmem:[#allocation3 + $0x424] ss:$16 sps:$4 sm:$0xff]  }
 0xbed   : > { %9506 = vmatprep.subr.bf16.mxu0 %v18339_v11  ;;  %9588 = vmatprep.subr.bf16.mxu1 %v18342_v41  ;;  %v18420_v11 = vld [vmem:[#allocation3 + $0x42c] ss:$16 sps:$4 sm:$0xff]   ;;  %v18415_v41 = vld [vmem:[#allocation3 + $0x420] ss:$16 sps:$4 sm:$0xff]  }
 0xbf0   : > { %9507 = vmatpush1.bf16.msra.mxu0 %v18337_v58  ;;  %9589 = vmatpush1.bf16.msra.mxu1 %v18340_v49  ;;  %v18418_v58 = vld [vmem:[#allocation3 + $0x428] ss:$16 sps:$4 sm:$0xff]   ;;  %v18423_v49 = vld [vmem:[#allocation3 + $0x444] ss:$16 sps:$4 sm:$0xff]  }
 0xbf1   : > { %9508 = vmatprep.subr.bf16.mxu0 %v18345_v52  ;;  %9590 = vmatprep.subr.bf16.mxu1 %v18348_v55  ;;  %v18426_v52 = vld [vmem:[#allocation3 + $0x44c] ss:$16 sps:$4 sm:$0xff]   ;;  %v18421_v55 = vld [vmem:[#allocation3 + $0x440] ss:$16 sps:$4 sm:$0xff]  }
 0xbf4   : > { %9509 = vmatpush1.bf16.msra.mxu0 %v18343_v59  ;;  %9591 = vmatpush1.bf16.msra.mxu1 %v18346_v31  ;;  %v18424_v59 = vld [vmem:[#allocation3 + $0x448] ss:$16 sps:$4 sm:$0xff]   ;;  %v18429_v31 = vld [vmem:[#allocation3 + $0x464] ss:$16 sps:$4 sm:$0xff]  }
 0xbf5   : > { %9510 = vmatprep.subr.bf16.mxu0 %v18351_v60  ;;  %9592 = vmatprep.subr.bf16.mxu1 %v18354_v61  ;;  %v18432_v60 = vld [vmem:[#allocation3 + $0x46c] ss:$16 sps:$4 sm:$0xff]   ;;  %v18427_v61 = vld [vmem:[#allocation3 + $0x460] ss:$16 sps:$4 sm:$0xff]  }
 0xbf8   : > { %9511 = vmatpush1.bf16.msra.mxu0 %v18349_v63  ;;  %9593 = vmatpush1.bf16.msra.mxu1 %v18352_v1  ;;  %v18430_v63 = vld [vmem:[#allocation3 + $0x468] ss:$16 sps:$4 sm:$0xff]   ;;  %v18435_v1 = vld [vmem:[#allocation3 + $0x484] ss:$16 sps:$4 sm:$0xff]  }
 0xbf9   : > { %9512 = vmatprep.subr.bf16.mxu0 %v18357_v2  ;;  %9594 = vmatprep.subr.bf16.mxu1 %v18360_v5  ;;  %v18438_v2 = vld [vmem:[#allocation3 + $0x48c] ss:$16 sps:$4 sm:$0xff]   ;;  %v18433_v5 = vld [vmem:[#allocation3 + $0x480] ss:$16 sps:$4 sm:$0xff]  }
 0xbfc   : > { %9513 = vmatpush1.bf16.msra.mxu0 %v18355_v7  ;;  %9595 = vmatpush1.bf16.msra.mxu1 %v18358_v8  ;;  %v18436_v7 = vld [vmem:[#allocation3 + $0x488] ss:$16 sps:$4 sm:$0xff]   ;;  %v18441_v8 = vld [vmem:[#allocation3 + $0x4a4] ss:$16 sps:$4 sm:$0xff]  }
 0xbfd   : > { %9514 = vmatprep.subr.bf16.mxu0 %v18363_v9  ;;  %9596 = vmatprep.subr.bf16.mxu1 %v18366_v10  ;;  %v18444_v9 = vld [vmem:[#allocation3 + $0x4ac] ss:$16 sps:$4 sm:$0xff]   ;;  %v18439_v10 = vld [vmem:[#allocation3 + $0x4a0] ss:$16 sps:$4 sm:$0xff]  }
 0xc00   : > { %9515 = vmatpush1.bf16.msra.mxu0 %v18361_v12  ;;  %9597 = vmatpush1.bf16.msra.mxu1 %v18364_v16  ;;  %v18442_v12 = vld [vmem:[#allocation3 + $0x4a8] ss:$16 sps:$4 sm:$0xff]   ;;  %v18447_v16 = vld [vmem:[#allocation3 + $0x4c4] ss:$16 sps:$4 sm:$0xff]  }
 0xc01   : > { %9516 = vmatprep.subr.bf16.mxu0 %v18369_v22  ;;  %9598 = vmatprep.subr.bf16.mxu1 %v18372_v56  ;;  %v18450_v22 = vld [vmem:[#allocation3 + $0x4cc] ss:$16 sps:$4 sm:$0xff]   ;;  %v18445_v56 = vld [vmem:[#allocation3 + $0x4c0] ss:$16 sps:$4 sm:$0xff]  }
 0xc04   : > { %9517 = vmatpush1.bf16.msra.mxu0 %v18367_v23  ;;  %9599 = vmatpush1.bf16.msra.mxu1 %v18370_v25  ;;  %v18448_v23 = vld [vmem:[#allocation3 + $0x4c8] ss:$16 sps:$4 sm:$0xff]   ;;  %v18453_v25 = vld [vmem:[#allocation3 + $0x4e4] ss:$16 sps:$4 sm:$0xff]  }
 0xc05   : > { %9518 = vmatprep.subr.bf16.mxu0 %v18375_v26  ;;  %9600 = vmatprep.subr.bf16.mxu1 %v18378_v13  ;;  %v18456_v26 = vld [vmem:[#allocation3 + $0x4ec] ss:$16 sps:$4 sm:$0xff]   ;;  %v18451_v13 = vld [vmem:[#allocation3 + $0x4e0] ss:$16 sps:$4 sm:$0xff]  }
 0xc08   : > { %9519 = vmatpush1.bf16.msra.mxu0 %v18373_v29  ;;  %9601 = vmatpush1.bf16.msra.mxu1 %v18376_v34  ;;  %v18454_v29 = vld [vmem:[#allocation3 + $0x4e8] ss:$16 sps:$4 sm:$0xff]   ;;  %v18459_v34 = vld [vmem:[#allocation3 + $0x504] ss:$16 sps:$4 sm:$0xff]  }
 0xc09   : > { %9520 = vmatprep.subr.bf16.mxu0 %v18381_v62  ;;  %9602 = vmatprep.subr.bf16.mxu1 %v18384_v3  ;;  %v18462_v62 = vld [vmem:[#allocation3 + $0x50c] ss:$16 sps:$4 sm:$0xff]   ;;  %v18457_v3 = vld [vmem:[#allocation3 + $0x500] ss:$16 sps:$4 sm:$0xff]  }
 0xc0c   : > { %9521 = vmatpush1.bf16.msra.mxu0 %v18379_v47  ;;  %9603 = vmatpush1.bf16.msra.mxu1 %v18382_v43  ;;  %v18465_v47 = vld [vmem:[#allocation3 + $0x524] ss:$16 sps:$4 sm:$0xff]   ;;  %v18468_v43 = vld [vmem:[#allocation3 + $0x52c] ss:$16 sps:$4 sm:$0xff]  }
 0xc0d   : > { %10300 = vmatprep.subr.bf16.mxu0 %v18387_v28  ;;  %10382 = vmatprep.subr.bf16.mxu1 %v18390_v33  ;;  %v18466_v28 = vld [vmem:[#allocation3 + $0x528] ss:$16 sps:$4 sm:$0xff]   ;;  %v18471_v33 = vld [vmem:[#allocation3 + $0x544] ss:$16 sps:$4 sm:$0xff]  }
 0xc0f   : > { %9531 = vmatmul.mubr.bf16.vlgmr.msra.gmra.mrb[152].mxu0 %v22090_v37  ;;  %9613 = vmatmul.mubr.bf16.vlgmr.msra.gmra.mrb[60].mxu1 %v22090_v37 }
 0xc10   : > { %10301 = vmatpush1.bf16.msra.mxu0 %v18385_v36  ;;  %10332 = vmatprep.mubr.bf16.mxu0 %v22076_v24  ;;  %v18474_v36 = vld [vmem:[#allocation3 + $0x54c] ss:$16 sps:$4 sm:$0xff]  }
 0xc11   : > { %10383 = vmatpush1.bf16.msra.mxu1 %v18388_v38  ;;  %10414 = vmatprep.mubr.bf16.mxu1 %v22076_v24  ;;  %v18469_v38 = vld [vmem:[#allocation3 + $0x540] ss:$16 sps:$4 sm:$0xff]  }
 0xc12   : > { %10302 = vmatprep.subr.bf16.mxu0 %v18393_v27  ;;  %10384 = vmatprep.subr.bf16.mxu1 %v18396_v40  ;;  %v18472_v27 = vld [vmem:[#allocation3 + $0x548] ss:$16 sps:$4 sm:$0xff]   ;;  %v18477_v40 = vld [vmem:[#allocation3 + $0x564] ss:$16 sps:$4 sm:$0xff]  }
 0xc14   : > { %10303 = vmatpush1.bf16.msra.mxu0 %v18391_v4  ;;  %v18480_v4 = vld [vmem:[#allocation3 + $0x56c] ss:$16 sps:$4 sm:$0xff]  }
 0xc15   : > { %10385 = vmatpush1.bf16.msra.mxu1 %v18394_v45  ;;  %10304 = vmatprep.subr.bf16.mxu0 %v18399_v46  ;;  %v18475_v45 = vld [vmem:[#allocation3 + $0x560] ss:$16 sps:$4 sm:$0xff]   ;;  %v18478_v46 = vld [vmem:[#allocation3 + $0x568] ss:$16 sps:$4 sm:$0xff]  }
 0xc16   : > { %10386 = vmatprep.subr.bf16.mxu1 %v18402_v54  ;;  %v18483_v54 = vld [vmem:[#allocation3 + $0x584] ss:$16 sps:$4 sm:$0xff]  }
 0xc18   : > { %10305 = vmatpush1.bf16.msra.mxu0 %v18397_v39  ;;  %v18486_v39 = vld [vmem:[#allocation3 + $0x58c] ss:$16 sps:$4 sm:$0xff]  }
 0xc19   : > { %10387 = vmatpush1.bf16.msra.mxu1 %v18400_v48  ;;  %10306 = vmatprep.subr.bf16.mxu0 %v18405_v53  ;;  %v18481_v48 = vld [vmem:[#allocation3 + $0x580] ss:$16 sps:$4 sm:$0xff]   ;;  %v18484_v53 = vld [vmem:[#allocation3 + $0x588] ss:$16 sps:$4 sm:$0xff]  }
 0xc1a   : > { %10388 = vmatprep.subr.bf16.mxu1 %v18408_v0  ;;  %v18489_v0 = vld [vmem:[#allocation3 + $0x5a4] ss:$16 sps:$4 sm:$0xff]  }
 0xc1c   : > { %10307 = vmatpush1.bf16.msra.mxu0 %v18403_v50  ;;  %v18492_v50 = vld [vmem:[#allocation3 + $0x5ac] ss:$16 sps:$4 sm:$0xff]  }
 0xc1d   : > { %10389 = vmatpush1.bf16.msra.mxu1 %v18406_v57  ;;  %10308 = vmatprep.subr.bf16.mxu0 %v18411_v51  ;;  %v18487_v57 = vld [vmem:[#allocation3 + $0x5a0] ss:$16 sps:$4 sm:$0xff]   ;;  %v18490_v51 = vld [vmem:[#allocation3 + $0x5a8] ss:$16 sps:$4 sm:$0xff]  }
 0xc1e   : > { %10390 = vmatprep.subr.bf16.mxu1 %v18414_v44  ;;  %v18495_v44 = vld [vmem:[#allocation3 + $0x5c4] ss:$16 sps:$4 sm:$0xff]  }
 0xc20   : > { %10309 = vmatpush1.bf16.msra.mxu0 %v18409_v6  ;;  %v18498_v6 = vld [vmem:[#allocation3 + $0x5cc] ss:$16 sps:$4 sm:$0xff]  }
 0xc21   : > { %10391 = vmatpush1.bf16.msra.mxu1 %v18412_v30  ;;  %10310 = vmatprep.subr.bf16.mxu0 %v18417_v32  ;;  %v18493_v30 = vld [vmem:[#allocation3 + $0x5c0] ss:$16 sps:$4 sm:$0xff]   ;;  %v18496_v32 = vld [vmem:[#allocation3 + $0x5c8] ss:$16 sps:$4 sm:$0xff]  }
 0xc22   : > { %10392 = vmatprep.subr.bf16.mxu1 %v18420_v11  ;;  %v18501_v11 = vld [vmem:[#allocation3 + $0x5e4] ss:$16 sps:$4 sm:$0xff]  }
 0xc24   : > { %10311 = vmatpush1.bf16.msra.mxu0 %v18415_v41  ;;  %v18504_v41 = vld [vmem:[#allocation3 + $0x5ec] ss:$16 sps:$4 sm:$0xff]  }
 0xc25   : > { %10393 = vmatpush1.bf16.msra.mxu1 %v18418_v58  ;;  %10312 = vmatprep.subr.bf16.mxu0 %v18423_v49  ;;  %v18499_v58 = vld [vmem:[#allocation3 + $0x5e0] ss:$16 sps:$4 sm:$0xff]   ;;  %v18502_v49 = vld [vmem:[#allocation3 + $0x5e8] ss:$16 sps:$4 sm:$0xff]  }
 0xc26   : > { %10394 = vmatprep.subr.bf16.mxu1 %v18426_v52  ;;  %v18507_v52 = vld [vmem:[#allocation3 + $0x604] ss:$16 sps:$4 sm:$0xff]  }
 0xc28   : > { %10313 = vmatpush1.bf16.msra.mxu0 %v18421_v55  ;;  %v18510_v55 = vld [vmem:[#allocation3 + $0x60c] ss:$16 sps:$4 sm:$0xff]  }
 0xc29   : > { %10395 = vmatpush1.bf16.msra.mxu1 %v18424_v59  ;;  %10314 = vmatprep.subr.bf16.mxu0 %v18429_v31  ;;  %v18505_v59 = vld [vmem:[#allocation3 + $0x600] ss:$16 sps:$4 sm:$0xff]   ;;  %v18508_v31 = vld [vmem:[#allocation3 + $0x608] ss:$16 sps:$4 sm:$0xff]  }
 0xc2a   : > { %10396 = vmatprep.subr.bf16.mxu1 %v18432_v60  ;;  %v18513_v60 = vld [vmem:[#allocation3 + $0x624] ss:$16 sps:$4 sm:$0xff]  }
 0xc2c   : > { %10315 = vmatpush1.bf16.msra.mxu0 %v18427_v61  ;;  %v18516_v61 = vld [vmem:[#allocation3 + $0x62c] ss:$16 sps:$4 sm:$0xff]  }
 0xc2d   : > { %10397 = vmatpush1.bf16.msra.mxu1 %v18430_v63  ;;  %10316 = vmatprep.subr.bf16.mxu0 %v18435_v1  ;;  %v18511_v63 = vld [vmem:[#allocation3 + $0x620] ss:$16 sps:$4 sm:$0xff]   ;;  %v18514_v1 = vld [vmem:[#allocation3 + $0x628] ss:$16 sps:$4 sm:$0xff]  }
 0xc2e   : > { %10398 = vmatprep.subr.bf16.mxu1 %v18438_v2  ;;  %v18519_v2 = vld [vmem:[#allocation3 + $0x644] ss:$16 sps:$4 sm:$0xff]  }
 0xc30   : > { %10317 = vmatpush1.bf16.msra.mxu0 %v18433_v5  ;;  %v18522_v5 = vld [vmem:[#allocation3 + $0x64c] ss:$16 sps:$4 sm:$0xff]  }
 0xc31   : > { %10399 = vmatpush1.bf16.msra.mxu1 %v18436_v7  ;;  %10318 = vmatprep.subr.bf16.mxu0 %v18441_v8  ;;  %v18517_v7 = vld [vmem:[#allocation3 + $0x640] ss:$16 sps:$4 sm:$0xff]   ;;  %v18520_v8 = vld [vmem:[#allocation3 + $0x648] ss:$16 sps:$4 sm:$0xff]  }
 0xc32   : > { %10400 = vmatprep.subr.bf16.mxu1 %v18444_v9  ;;  %v18525_v9 = vld [vmem:[#allocation3 + $0x664] ss:$16 sps:$4 sm:$0xff]  }
 0xc34   : > { %10319 = vmatpush1.bf16.msra.mxu0 %v18439_v10  ;;  %v18528_v10 = vld [vmem:[#allocation3 + $0x66c] ss:$16 sps:$4 sm:$0xff]  }
 0xc35   : > { %10401 = vmatpush1.bf16.msra.mxu1 %v18442_v12  ;;  %10320 = vmatprep.subr.bf16.mxu0 %v18447_v16  ;;  %v18523_v12 = vld [vmem:[#allocation3 + $0x660] ss:$16 sps:$4 sm:$0xff]   ;;  %v18526_v16 = vld [vmem:[#allocation3 + $0x668] ss:$16 sps:$4 sm:$0xff]  }
 0xc36   : > { %10402 = vmatprep.subr.bf16.mxu1 %v18450_v22  ;;  %v18531_v22 = vld [vmem:[#allocation3 + $0x684] ss:$16 sps:$4 sm:$0xff]  }
 0xc38   : > { %10321 = vmatpush1.bf16.msra.mxu0 %v18445_v56  ;;  %v18534_v56 = vld [vmem:[#allocation3 + $0x68c] ss:$16 sps:$4 sm:$0xff]  }
 0xc39   : > { %10403 = vmatpush1.bf16.msra.mxu1 %v18448_v23  ;;  %10322 = vmatprep.subr.bf16.mxu0 %v18453_v25  ;;  %v18529_v23 = vld [vmem:[#allocation3 + $0x680] ss:$16 sps:$4 sm:$0xff]   ;;  %v18532_v25 = vld [vmem:[#allocation3 + $0x688] ss:$16 sps:$4 sm:$0xff]  }
 0xc3a   : > { %10404 = vmatprep.subr.bf16.mxu1 %v18456_v26  ;;  %v18537_v26 = vld [vmem:[#allocation3 + $0x6a4] ss:$16 sps:$4 sm:$0xff]  }
 0xc3c   : > { %10323 = vmatpush1.bf16.msra.mxu0 %v18451_v13  ;;  %v18540_v13 = vld [vmem:[#allocation3 + $0x6ac] ss:$16 sps:$4 sm:$0xff]  }
 0xc3d   : > { %10405 = vmatpush1.bf16.msra.mxu1 %v18454_v29  ;;  %10324 = vmatprep.subr.bf16.mxu0 %v18459_v34  ;;  %v18535_v29 = vld [vmem:[#allocation3 + $0x6a0] ss:$16 sps:$4 sm:$0xff]   ;;  %v18538_v34 = vld [vmem:[#allocation3 + $0x6a8] ss:$16 sps:$4 sm:$0xff]  }
 0xc3e   : > { %10406 = vmatprep.subr.bf16.mxu1 %v18462_v62  ;;  %v18543_v62 = vld [vmem:[#allocation3 + $0x6c4] ss:$16 sps:$4 sm:$0xff]  }
 0xc40   : > { %10325 = vmatpush1.bf16.msra.mxu0 %v18457_v3  ;;  %v18546_v3 = vld [vmem:[#allocation3 + $0x6cc] ss:$16 sps:$4 sm:$0xff]  }
 0xc41   : > { %10407 = vmatpush1.bf16.msra.mxu1 %v18460_v42  ;;  %10326 = vmatprep.subr.bf16.mxu0 %v18465_v47  ;;  %v18541_v42 = vld [vmem:[#allocation3 + $0x6c0] ss:$16 sps:$4 sm:$0xff]   ;;  %v18544_v47 = vld [vmem:[#allocation3 + $0x6c8] ss:$16 sps:$4 sm:$0xff]  }
 0xc42   : > { %10408 = vmatprep.subr.bf16.mxu1 %v18468_v43  ;;  %v18549_v43 = vld [vmem:[#allocation3 + $0x6e4] ss:$16 sps:$4 sm:$0xff]  }
 0xc44   : > { %10327 = vmatpush1.bf16.msra.mxu0 %v18463_v35  ;;  %v18552_v35 = vld [vmem:[#allocation3 + $0x6ec] ss:$16 sps:$4 sm:$0xff]  }
 0xc45   : > { %10409 = vmatpush1.bf16.msra.mxu1 %v18466_v28  ;;  %10328 = vmatprep.subr.bf16.mxu0 %v18471_v33  ;;  %v18547_v28 = vld [vmem:[#allocation3 + $0x6e0] ss:$16 sps:$4 sm:$0xff]   ;;  %v18550_v33 = vld [vmem:[#allocation3 + $0x6e8] ss:$16 sps:$4 sm:$0xff]  }
 0xc46   : > { %10410 = vmatprep.subr.bf16.mxu1 %v18474_v36 }
 0xc48   : > { %10329 = vmatpush1.bf16.msra.mxu0 %v18469_v38 }
 0xc49   : > { %10411 = vmatpush1.bf16.msra.mxu1 %v18472_v27  ;;  %10330 = vmatprep.subr.bf16.mxu0 %v18477_v40 }
 0xc4a   : > { %10412 = vmatprep.subr.bf16.mxu1 %v18480_v4 }
 0xc4c   : > { %10331 = vmatpush1.bf16.msra.mxu0 %v18475_v45 }
 0xc4d   : > { %10413 = vmatpush1.bf16.msra.mxu1 %v18478_v46  ;;  %10341 = vmatprep.subr.bf16.mxu0 %v18483_v54 }
 0xc4e   : > { %10423 = vmatprep.subr.bf16.mxu1 %v18486_v39  ;;  %v19132_v39 = vmov 65535  }
 0xc4f   : > { %10333 = vmatmul.mubr.bf16.vlgmr.msra.gmra.mrb[156].mxu0 %v22078_v21 }
 0xc50   : > { %10415 = vmatmul.mubr.bf16.vlgmr.msra.gmra.mrb[64].mxu1 %v22078_v21  ;;  %10342 = vmatpush1.bf16.msra.mxu0 %v18481_v48  ;;  %v10482_v48 = vsel %vm10480_vm9, 4294967295, %v19132_v39  ;;  %v18591_v39 = vld [vmem:[#allocation3 + $0x7c0] ss:$16 sps:$4 sm:$0xff]  }
 0xc51   : > { %16140 = vmatprep.mubr.msk.bf16.mxu0 %vm2445_vm5, %v22084_v14  ;;  %10424 = vmatpush1.bf16.msra.mxu1 %v18484_v53 }
 0xc52   : > { %16141 = vmatprep.mubr.msk.bf16.mxu1 %vm2445_vm5, %v22084_v14  ;;  %10343 = vmatprep.subr.bf16.mxu0 %v18489_v0 }
 0xc53   : > { %10425 = vmatprep.subr.bf16.mxu1 %v18492_v50 }
 0xc54   : > { %10344 = vmatpush1.bf16.msra.mxu0 %v18487_v57 }
 0xc55   : > { %10426 = vmatpush1.bf16.msra.mxu1 %v18490_v51  ;;  %10345 = vmatprep.subr.bf16.mxu0 %v18495_v44 }
 0xc56   : > { %10427 = vmatprep.subr.bf16.mxu1 %v18498_v6 }
 0xc58   : > { %10346 = vmatpush1.bf16.msra.mxu0 %v18493_v30 }
 0xc59   : > { %10428 = vmatpush1.bf16.msra.mxu1 %v18496_v32  ;;  %10347 = vmatprep.subr.bf16.mxu0 %v18501_v11  ;;  %v22106_v11 = vsel %vm10481_vm10, %v10482_v48, 0  ;;  %v18594_v48 = vld [vmem:[#allocation3 + $0x7c8] ss:$16 sps:$4 sm:$0xff]  }
 0xc5a   : > { %10429 = vmatprep.subr.bf16.mxu1 %v18504_v41 }
 0xc5c   : > { %10348 = vmatpush1.bf16.msra.mxu0 %v18499_v58 }
 0xc5d   : > { %10430 = vmatpush1.bf16.msra.mxu1 %v18502_v49  ;;  %10349 = vmatprep.subr.bf16.mxu0 %v18507_v52 }
 0xc5e   : > { %10431 = vmatprep.subr.bf16.mxu1 %v18510_v55 }
 0xc60   : > { %10350 = vmatpush1.bf16.msra.mxu0 %v18505_v59 }
 0xc61   : > { %10432 = vmatpush1.bf16.msra.mxu1 %v18508_v31  ;;  %10351 = vmatprep.subr.bf16.mxu0 %v18513_v60 }
 0xc62   : > { %10433 = vmatprep.subr.bf16.mxu1 %v18516_v61 }
 0xc64   : > { %10352 = vmatpush1.bf16.msra.mxu0 %v18511_v63 }
 0xc65   : > { %10434 = vmatpush1.bf16.msra.mxu1 %v18514_v1  ;;  %10353 = vmatprep.subr.bf16.mxu0 %v18519_v2 }
 0xc66   : > { %10435 = vmatprep.subr.bf16.mxu1 %v18522_v5  ;;  %v18553_v5 = vld [vmem:[%s22694_s11 + $0x8] sm:$0x7f]  }
 0xc68   : > { %10354 = vmatpush1.bf16.msra.mxu0 %v18517_v7 }
 0xc69   : > { %10436 = vmatpush1.bf16.msra.mxu1 %v18520_v8  ;;  %10355 = vmatprep.subr.bf16.mxu0 %v18525_v9  ;;  %v18556_v9 = vld [vmem:[#allocation3 + $0x704] ss:$16 sps:$4 sm:$0xff]  }
 0xc6a   : > { %10437 = vmatprep.subr.bf16.mxu1 %v18528_v10 }
 0xc6c   : > { %10356 = vmatpush1.bf16.msra.mxu0 %v18523_v12  ;;  %v18559_v12 = vld [vmem:[#allocation3 + $0x70c] ss:$16 sps:$4 sm:$0xff]  }
 0xc6d   : > { %10438 = vmatpush1.bf16.msra.mxu1 %v18526_v16  ;;  %10357 = vmatprep.subr.bf16.mxu0 %v18531_v22  ;;  %v18560_v16 = vld [vmem:[%s22694_s11] sm:$0x7f]  }
 0xc6e   : > { %10439 = vmatprep.subr.bf16.mxu1 %v18534_v56  ;;  %v18554_v22 = vld [vmem:[#allocation3 + $0x700] ss:$16 sps:$4 sm:$0xff]   ;;  %v18557_v56 = vld [vmem:[#allocation3 + $0x708] ss:$16 sps:$4 sm:$0xff]  }
 0xc70   : > { %10358 = vmatpush1.bf16.msra.mxu0 %v18529_v23  ;;  %v18563_v23 = vld [vmem:[#allocation3 + $0x724] ss:$16 sps:$4 sm:$0xff]  }
 0xc71   : > { %10440 = vmatpush1.bf16.msra.mxu1 %v18532_v25  ;;  %10359 = vmatprep.subr.bf16.mxu0 %v18537_v26  ;;  %v18566_v25 = vld [vmem:[#allocation3 + $0x72c] ss:$16 sps:$4 sm:$0xff]   ;;  %v18561_v26 = vld [vmem:[#allocation3 + $0x720] ss:$16 sps:$4 sm:$0xff]  }
 0xc72   : > { %10441 = vmatprep.subr.bf16.mxu1 %v18540_v13  ;;  %v18564_v13 = vld [vmem:[#allocation3 + $0x728] ss:$16 sps:$4 sm:$0xff]  }
 0xc74   : > { %10360 = vmatpush1.bf16.msra.mxu0 %v18535_v29  ;;  %v18569_v29 = vld [vmem:[#allocation3 + $0x744] ss:$16 sps:$4 sm:$0xff]  }
 0xc75   : > { %10442 = vmatpush1.bf16.msra.mxu1 %v18538_v34  ;;  %10361 = vmatprep.subr.bf16.mxu0 %v18543_v62  ;;  %v18572_v34 = vld [vmem:[#allocation3 + $0x74c] ss:$16 sps:$4 sm:$0xff]   ;;  %v18567_v62 = vld [vmem:[#allocation3 + $0x740] ss:$16 sps:$4 sm:$0xff]  }
 0xc76   : > { %10443 = vmatprep.subr.bf16.mxu1 %v18546_v3  ;;  %v18570_v3 = vld [vmem:[#allocation3 + $0x748] ss:$16 sps:$4 sm:$0xff]  }
 0xc78   : > { %10362 = vmatpush1.bf16.msra.mxu0 %v18541_v42  ;;  %v18575_v42 = vld [vmem:[#allocation3 + $0x764] ss:$16 sps:$4 sm:$0xff]  }
 0xc79   : > { %10444 = vmatpush1.bf16.msra.mxu1 %v18544_v47  ;;  %10363 = vmatprep.subr.bf16.mxu0 %v18549_v43  ;;  %v18578_v47 = vld [vmem:[#allocation3 + $0x76c] ss:$16 sps:$4 sm:$0xff]   ;;  %v18573_v43 = vld [vmem:[#allocation3 + $0x760] ss:$16 sps:$4 sm:$0xff]  }
 0xc7a   : > { %10445 = vmatprep.subr.bf16.mxu1 %v18552_v35  ;;  %v18576_v35 = vld [vmem:[#allocation3 + $0x768] ss:$16 sps:$4 sm:$0xff]  }
 0xc7c   : > { %10364 = vmatpush1.bf16.msra.mxu0 %v18547_v28  ;;  %v18581_v28 = vld [vmem:[#allocation3 + $0x784] ss:$16 sps:$4 sm:$0xff]  }
 0xc7d   : > { %10446 = vmatpush1.bf16.msra.mxu1 %v18550_v33  ;;  %v18584_v33 = vld [vmem:[#allocation3 + $0x78c] ss:$16 sps:$4 sm:$0xff]  }
 0xc7f   : > { %10374 = vmatmul.mubr.bf16.vlgmr.msra.gmra.mrb[156].mxu0 %v22090_v37 }
 0xc80   : > { %10456 = vmatmul.mubr.bf16.vlgmr.msra.gmra.mrb[64].mxu1 %v22090_v37  ;;  %10528 = vmatprep.mubr.bf16.mxu0 %v19130_v17 }
 0xc81   : > { %10571 = vmatprep.mubr.bf16.mxu1 %v19130_v17 }
 0xce2   : > { %v9532_v36 = vpop.f32.mrb[152].mxu0  ;;  %v9614_v38 = vpop.f32.mrb[60].mxu1 }
 0xce3   : > { %v9534_v27 = vpop.f32.mrb[153].mxu0  ;;  %v9616_v40 = vpop.f32.mrb[61].mxu1  ;;  %v9623_v31 = vpack.c.bf16 %v9532_v36, %v9532_v36  ;;  %v9625_v63 = vpack.c.bf16 %v9614_v38, %v9614_v38  ;;  %v18579_v36 = vld [vmem:[#allocation3 + $0x780] ss:$16 sps:$4 sm:$0xff]   ;;  %v18582_v38 = vld [vmem:[#allocation3 + $0x788] ss:$16 sps:$4 sm:$0xff]  }
 0xce4   : > { %v9536_v4 = vpop.f32.mrb[154].mxu0  ;;  %v9618_v45 = vpop.f32.mrb[62].mxu1  ;;  %v9624_v51 = vpack.c.bf16 %v9534_v27, %v9534_v27  ;;  %v9626_v41 = vpack.c.bf16 %v9616_v40, %v9616_v40  ;;  %v18587_v27 = vld [vmem:[#allocation3 + $0x7a4] ss:$16 sps:$4 sm:$0xff]   ;;  %v18590_v40 = vld [vmem:[#allocation3 + $0x7ac] ss:$16 sps:$4 sm:$0xff]  }
 0xce5   : > { %v9537_v46 = vpop.f32.mrb[155].mxu0  ;;  %v9619_v54 = vpop.f32.mrb[63].mxu1  ;;  %v10591_v8 = vand.u32 %v22106_v11, %v9623_v31  ;;  %v10597_v10 = vand.u32 %v22106_v11, %v9625_v63  ;;  %v18585_v4 = vld [vmem:[#allocation3 + $0x7a0] ss:$16 sps:$4 sm:$0xff]   ;;  %v18588_v45 = vld [vmem:[#allocation3 + $0x7a8] ss:$16 sps:$4 sm:$0xff]  }
 0xce6   : > { %v10594_v1 = vand.u32 %v22106_v11, %v9624_v51  ;;  %v10600_v7 = vand.u32 %v22106_v11, %v9626_v41  ;;  %v18593_v46 = vld [vmem:[#allocation3 + $0x7c4] ss:$16 sps:$4 sm:$0xff]   ;;  %v18596_v54 = vld [vmem:[#allocation3 + $0x7cc] ss:$16 sps:$4 sm:$0xff]   ;;  %v18618_v31 = vld [vmem:[#allocation3 + $0x848] ss:$16 sps:$4 sm:$0xff]  }
 0xce7   : > { %v18605_v51 = vld [vmem:[#allocation3 + $0x804] ss:$16 sps:$4 sm:$0xff]   ;;  %v18614_v41 = vld [vmem:[#allocation3 + $0x82c] ss:$16 sps:$4 sm:$0xff]   ;;  %v18621_v63 = vld [vmem:[#allocation3 + $0x860] ss:$16 sps:$4 sm:$0xff]  }
 0xd52   : > { %v10375_v53 = vpop.f32.mrb[156].mxu0 }
 0xd53   : > { %v10467_v0 = vpack.c.bf16 %v10375_v53, %v10375_v53  ;;  %v10457_v50 = vpop.f32.mrb[64].mxu1  ;;  %v10377_v57 = vpop.f32.mrb[157].mxu0  ;;  %v18599_v53 = vld [vmem:[#allocation3 + $0x7e4] ss:$16 sps:$4 sm:$0xff]  }
 0xd54   : > { %v10469_v44 = vpack.c.bf16 %v10457_v50, %v10457_v50  ;;  %v10468_v6 = vpack.c.bf16 %v10377_v57, %v10377_v57  ;;  %v10459_v30 = vpop.f32.mrb[65].mxu1  ;;  %v10379_v32 = vpop.f32.mrb[158].mxu0  ;;  %v18597_v50 = vld [vmem:[#allocation3 + $0x7e0] ss:$16 sps:$4 sm:$0xff]   ;;  %v18600_v57 = vld [vmem:[#allocation3 + $0x7e8] ss:$16 sps:$4 sm:$0xff]  }
 0xd55   : > { %v10470_v58 = vpack.c.bf16 %v10459_v30, %v10459_v30  ;;  %v10461_v49 = vpop.f32.mrb[66].mxu1  ;;  %v10380_v52 = vpop.f32.mrb[159].mxu0  ;;  %v10485_v60 = vand.u32 %v22106_v11, %v10467_v0  ;;  %v18602_v0 = vld [vmem:[#allocation3 + $0x7ec] ss:$16 sps:$4 sm:$0xff]   ;;  %v18606_v30 = vld [vmem:[#allocation3 + $0x808] ss:$16 sps:$4 sm:$0xff]  }
 0xd56   : > { %v10488_v55 = vand.u32 %v22106_v11, %v10468_v6  ;;  %v10462_v59 = vpop.f32.mrb[67].mxu1  ;;  %v10491_v2 = vand.u32 %v22106_v11, %v10469_v44  ;;  %v18608_v44 = vld [vmem:[#allocation3 + $0x80c] ss:$16 sps:$4 sm:$0xff]   ;;  %v18603_v6 = vld [vmem:[#allocation3 + $0x800] ss:$16 sps:$4 sm:$0xff]  }
 0xd57   : > { %v10494_v61 = vand.u32 %v22106_v11, %v10470_v58  ;;  %v18611_v32 = vld [vmem:[#allocation3 + $0x824] ss:$16 sps:$4 sm:$0xff]   ;;  %v18609_v58 = vld [vmem:[#allocation3 + $0x820] ss:$16 sps:$4 sm:$0xff]   ;;  %v18612_v49 = vld [vmem:[#allocation3 + $0x828] ss:$16 sps:$4 sm:$0xff]  }
 0xd58   : > { %10496 = vmatprep.subr.bf16.mxu0 %v10488_v55  ;;  %v18617_v52 = vld [vmem:[#allocation3 + $0x844] ss:$16 sps:$4 sm:$0xff]   ;;  %v18620_v55 = vld [vmem:[#allocation3 + $0x84c] ss:$16 sps:$4 sm:$0xff]   ;;  %v18615_v59 = vld [vmem:[#allocation3 + $0x840] ss:$16 sps:$4 sm:$0xff]  }
 0xd59   : > { %10539 = vmatprep.subr.bf16.mxu1 %v10494_v61  ;;  %10497 = vmatpush1.bf16.msra.mxu0 %v10485_v60  ;;  %v18623_v60 = vld [vmem:[#allocation3 + $0x864] ss:$16 sps:$4 sm:$0xff]   ;;  %v18626_v61 = vld [vmem:[#allocation3 + $0x86c] ss:$16 sps:$4 sm:$0xff]  }
 0xd5a   : > { %10540 = vmatpush1.bf16.msra.mxu1 %v10491_v2  ;;  %10602 = vmatprep.subr.bf16.mxu0 %v10594_v1  ;;  %v18624_v1 = vld [vmem:[#allocation3 + $0x868] ss:$16 sps:$4 sm:$0xff]   ;;  %v18629_v2 = vld [vmem:[#allocation3 + $0x884] ss:$16 sps:$4 sm:$0xff]  }
 0xd5b   : > { %10645 = vmatprep.subr.bf16.mxu1 %v10600_v7  ;;  %v18627_v7 = vld [vmem:[#allocation3 + $0x880] ss:$16 sps:$4 sm:$0xff]  }
 0xd5c   : > { %16145 = vmatmul.mubr.msk.bf16.vlgmr.msra.gmra.mrb[160].mxu0 %vm10476_vm11, %v18553_v5 }
 0xd5d   : > { %16146 = vmatmul.mubr.msk.bf16.vlgmr.msra.gmra.mrb[68].mxu1 %vm10476_vm11, %v18553_v5  ;;  %10603 = vmatpush1.bf16.msra.mxu0 %v10591_v8  ;;  %v18632_v5 = vld [vmem:[#allocation3 + $0x88c] ss:$16 sps:$4 sm:$0xff]   ;;  %v18630_v8 = vld [vmem:[#allocation3 + $0x888] ss:$16 sps:$4 sm:$0xff]  }
 0xd5e   : > { %10646 = vmatpush1.bf16.msra.mxu1 %v10597_v10  ;;  %10634 = vmatprep.mubr.bf16.mxu0 %v19130_v17  ;;  %v18638_v10 = vld [vmem:[#allocation3 + $0x8ac] ss:$16 sps:$4 sm:$0xff]  }
 0xd5f   : > { %10677 = vmatprep.mubr.bf16.mxu1 %v19130_v17  ;;  %11361 = vmatprep.subr.bf16.mxu0 %v18556_v9  ;;  %v18635_v9 = vld [vmem:[#allocation3 + $0x8a4] ss:$16 sps:$4 sm:$0xff]  }
 0xd60   : > { %11443 = vmatprep.subr.bf16.mxu1 %v18559_v12  ;;  %v18633_v12 = vld [vmem:[#allocation3 + $0x8a0] ss:$16 sps:$4 sm:$0xff]  }
 0xd68   : > { %16148 = vmatmul.mubr.msk.bf16.vlgmr.msra.gmra.mrb[160].mxu0 %vm10476_vm11, %v18560_v16 }
 0xd69   : > { %16149 = vmatmul.mubr.msk.bf16.vlgmr.msra.gmra.mrb[68].mxu1 %vm10476_vm11, %v18560_v16  ;;  %11362 = vmatpush1.bf16.msra.mxu0 %v18554_v22  ;;  %v18636_v16 = vld [vmem:[#allocation3 + $0x8a8] ss:$16 sps:$4 sm:$0xff]   ;;  %v18641_v22 = vld [vmem:[#allocation3 + $0x8c4] ss:$16 sps:$4 sm:$0xff]  }
 0xd6a   : > { %11444 = vmatpush1.bf16.msra.mxu1 %v18557_v56  ;;  %11393 = vmatprep.mubr.bf16.mxu0 %v22076_v24  ;;  %v18644_v56 = vld [vmem:[#allocation3 + $0x8cc] ss:$16 sps:$4 sm:$0xff]  }
 0xd6b   : > { %11475 = vmatprep.mubr.bf16.mxu1 %v22076_v24  ;;  %11363 = vmatprep.subr.bf16.mxu0 %v18563_v23  ;;  %v18639_v23 = vld [vmem:[#allocation3 + $0x8c0] ss:$16 sps:$4 sm:$0xff]  }
 0xd6c   : > { %11445 = vmatprep.subr.bf16.mxu1 %v18566_v25  ;;  %v18642_v25 = vld [vmem:[#allocation3 + $0x8c8] ss:$16 sps:$4 sm:$0xff]  }
 0xd6d   : > { %11364 = vmatpush1.bf16.msra.mxu0 %v18561_v26  ;;  %v18647_v26 = vld [vmem:[#allocation3 + $0x8e4] ss:$16 sps:$4 sm:$0xff]  }
 0xd6e   : > { %11446 = vmatpush1.bf16.msra.mxu1 %v18564_v13  ;;  %11365 = vmatprep.subr.bf16.mxu0 %v18569_v29  ;;  %v18650_v13 = vld [vmem:[#allocation3 + $0x8ec] ss:$16 sps:$4 sm:$0xff]   ;;  %v18645_v29 = vld [vmem:[#allocation3 + $0x8e0] ss:$16 sps:$4 sm:$0xff]  }
 0xd6f   : > { %11447 = vmatprep.subr.bf16.mxu1 %v18572_v34  ;;  %v18648_v34 = vld [vmem:[#allocation3 + $0x8e8] ss:$16 sps:$4 sm:$0xff]  }
 0xd71   : > { %11366 = vmatpush1.bf16.msra.mxu0 %v18567_v62  ;;  %v18653_v62 = vld [vmem:[#allocation3 + $0x904] ss:$16 sps:$4 sm:$0xff]  }
 0xd72   : > { %11448 = vmatpush1.bf16.msra.mxu1 %v18570_v3  ;;  %11367 = vmatprep.subr.bf16.mxu0 %v18575_v42  ;;  %v18656_v3 = vld [vmem:[#allocation3 + $0x90c] ss:$16 sps:$4 sm:$0xff]   ;;  %v18651_v42 = vld [vmem:[#allocation3 + $0x900] ss:$16 sps:$4 sm:$0xff]  }
 0xd73   : > { %11449 = vmatprep.subr.bf16.mxu1 %v18578_v47  ;;  %v18654_v47 = vld [vmem:[#allocation3 + $0x908] ss:$16 sps:$4 sm:$0xff]  }
 0xd75   : > { %11368 = vmatpush1.bf16.msra.mxu0 %v18573_v43  ;;  %v18659_v43 = vld [vmem:[#allocation3 + $0x924] ss:$16 sps:$4 sm:$0xff]  }
 0xd76   : > { %11450 = vmatpush1.bf16.msra.mxu1 %v18576_v35  ;;  %11369 = vmatprep.subr.bf16.mxu0 %v18581_v28  ;;  %v18662_v35 = vld [vmem:[#allocation3 + $0x92c] ss:$16 sps:$4 sm:$0xff]   ;;  %v18657_v28 = vld [vmem:[#allocation3 + $0x920] ss:$16 sps:$4 sm:$0xff]  }
 0xd77   : > { %11451 = vmatprep.subr.bf16.mxu1 %v18584_v33  ;;  %v18660_v33 = vld [vmem:[#allocation3 + $0x928] ss:$16 sps:$4 sm:$0xff]  }
 0xd79   : > { %11370 = vmatpush1.bf16.msra.mxu0 %v18579_v36  ;;  %v18665_v36 = vld [vmem:[#allocation3 + $0x944] ss:$16 sps:$4 sm:$0xff]  }
 0xd7a   : > { %11452 = vmatpush1.bf16.msra.mxu1 %v18582_v38  ;;  %11371 = vmatprep.subr.bf16.mxu0 %v18587_v27  ;;  %v18668_v38 = vld [vmem:[#allocation3 + $0x94c] ss:$16 sps:$4 sm:$0xff]   ;;  %v18663_v27 = vld [vmem:[#allocation3 + $0x940] ss:$16 sps:$4 sm:$0xff]  }
 0xd7b   : > { %11453 = vmatprep.subr.bf16.mxu1 %v18590_v40  ;;  %v18666_v40 = vld [vmem:[#allocation3 + $0x948] ss:$16 sps:$4 sm:$0xff]  }
 0xd7d   : > { %11372 = vmatpush1.bf16.msra.mxu0 %v18585_v4  ;;  %v18671_v4 = vld [vmem:[#allocation3 + $0x964] ss:$16 sps:$4 sm:$0xff]  }
 0xd7e   : > { %11454 = vmatpush1.bf16.msra.mxu1 %v18588_v45  ;;  %11373 = vmatprep.subr.bf16.mxu0 %v18593_v46  ;;  %v18674_v45 = vld [vmem:[#allocation3 + $0x96c] ss:$16 sps:$4 sm:$0xff]   ;;  %v18669_v46 = vld [vmem:[#allocation3 + $0x960] ss:$16 sps:$4 sm:$0xff]  }
 0xd7f   : > { %11455 = vmatprep.subr.bf16.mxu1 %v18596_v54  ;;  %v18672_v54 = vld [vmem:[#allocation3 + $0x968] ss:$16 sps:$4 sm:$0xff]  }
 0xd81   : > { %11374 = vmatpush1.bf16.msra.mxu0 %v18591_v39  ;;  %v18677_v39 = vld [vmem:[#allocation3 + $0x984] ss:$16 sps:$4 sm:$0xff]  }
 0xd82   : > { %11456 = vmatpush1.bf16.msra.mxu1 %v18594_v48  ;;  %11375 = vmatprep.subr.bf16.mxu0 %v18599_v53  ;;  %v18680_v48 = vld [vmem:[#allocation3 + $0x98c] ss:$16 sps:$4 sm:$0xff]   ;;  %v18675_v53 = vld [vmem:[#allocation3 + $0x980] ss:$16 sps:$4 sm:$0xff]  }
 0xd83   : > { %11457 = vmatprep.subr.bf16.mxu1 %v18602_v0  ;;  %v18678_v0 = vld [vmem:[#allocation3 + $0x988] ss:$16 sps:$4 sm:$0xff]  }
 0xd85   : > { %11376 = vmatpush1.bf16.msra.mxu0 %v18597_v50  ;;  %v18683_v50 = vld [vmem:[#allocation3 + $0x9a4] ss:$16 sps:$4 sm:$0xff]  }
 0xd86   : > { %11458 = vmatpush1.bf16.msra.mxu1 %v18600_v57  ;;  %11377 = vmatprep.subr.bf16.mxu0 %v18605_v51  ;;  %v18686_v57 = vld [vmem:[#allocation3 + $0x9ac] ss:$16 sps:$4 sm:$0xff]   ;;  %v18681_v51 = vld [vmem:[#allocation3 + $0x9a0] ss:$16 sps:$4 sm:$0xff]  }
 0xd87   : > { %11459 = vmatprep.subr.bf16.mxu1 %v18608_v44  ;;  %v18684_v44 = vld [vmem:[#allocation3 + $0x9a8] ss:$16 sps:$4 sm:$0xff]  }
 0xd89   : > { %11378 = vmatpush1.bf16.msra.mxu0 %v18603_v6  ;;  %v18689_v6 = vld [vmem:[#allocation3 + $0x9c4] ss:$16 sps:$4 sm:$0xff]  }
 0xd8a   : > { %11460 = vmatpush1.bf16.msra.mxu1 %v18606_v30  ;;  %11379 = vmatprep.subr.bf16.mxu0 %v18611_v32  ;;  %v18692_v30 = vld [vmem:[#allocation3 + $0x9cc] ss:$16 sps:$4 sm:$0xff]   ;;  %v18687_v32 = vld [vmem:[#allocation3 + $0x9c0] ss:$16 sps:$4 sm:$0xff]  }
 0xd8b   : > { %11461 = vmatprep.subr.bf16.mxu1 %v18614_v41  ;;  %v18690_v41 = vld [vmem:[#allocation3 + $0x9c8] ss:$16 sps:$4 sm:$0xff]  }
 0xd8d   : > { %11380 = vmatpush1.bf16.msra.mxu0 %v18609_v58  ;;  %v18695_v58 = vld [vmem:[#allocation3 + $0x9e4] ss:$16 sps:$4 sm:$0xff]  }
 0xd8e   : > { %11462 = vmatpush1.bf16.msra.mxu1 %v18612_v49  ;;  %11381 = vmatprep.subr.bf16.mxu0 %v18617_v52  ;;  %v18698_v49 = vld [vmem:[#allocation3 + $0x9ec] ss:$16 sps:$4 sm:$0xff]   ;;  %v18693_v52 = vld [vmem:[#allocation3 + $0x9e0] ss:$16 sps:$4 sm:$0xff]  }
 0xd8f   : > { %11463 = vmatprep.subr.bf16.mxu1 %v18620_v55  ;;  %v18696_v55 = vld [vmem:[#allocation3 + $0x9e8] ss:$16 sps:$4 sm:$0xff]  }
 0xd91   : > { %11382 = vmatpush1.bf16.msra.mxu0 %v18615_v59  ;;  %v18701_v59 = vld [vmem:[#allocation3 + $0xa04] ss:$16 sps:$4 sm:$0xff]  }
 0xd92   : > { %11464 = vmatpush1.bf16.msra.mxu1 %v18618_v31  ;;  %11383 = vmatprep.subr.bf16.mxu0 %v18623_v60  ;;  %v18704_v31 = vld [vmem:[#allocation3 + $0xa0c] ss:$16 sps:$4 sm:$0xff]   ;;  %v18699_v60 = vld [vmem:[#allocation3 + $0xa00] ss:$16 sps:$4 sm:$0xff]  }
 0xd93   : > { %11465 = vmatprep.subr.bf16.mxu1 %v18626_v61  ;;  %v18702_v61 = vld [vmem:[#allocation3 + $0xa08] ss:$16 sps:$4 sm:$0xff]  }
 0xd95   : > { %11384 = vmatpush1.bf16.msra.mxu0 %v18621_v63  ;;  %v18707_v63 = vld [vmem:[#allocation3 + $0xa24] ss:$16 sps:$4 sm:$0xff]  }
 0xd96   : > { %11466 = vmatpush1.bf16.msra.mxu1 %v18624_v1  ;;  %11385 = vmatprep.subr.bf16.mxu0 %v18629_v2  ;;  %v18710_v1 = vld [vmem:[#allocation3 + $0xa2c] ss:$16 sps:$4 sm:$0xff]   ;;  %v18705_v2 = vld [vmem:[#allocation3 + $0xa20] ss:$16 sps:$4 sm:$0xff]  }
 0xd97   : > { %11467 = vmatprep.subr.bf16.mxu1 %v18632_v5  ;;  %v18708_v5 = vld [vmem:[#allocation3 + $0xa28] ss:$16 sps:$4 sm:$0xff]  }
 0xd99   : > { %11386 = vmatpush1.bf16.msra.mxu0 %v18627_v7  ;;  %v18713_v7 = vld [vmem:[#allocation3 + $0xa44] ss:$16 sps:$4 sm:$0xff]  }
 0xd9a   : > { %11468 = vmatpush1.bf16.msra.mxu1 %v18630_v8  ;;  %11387 = vmatprep.subr.bf16.mxu0 %v18635_v9  ;;  %v18716_v8 = vld [vmem:[#allocation3 + $0xa4c] ss:$16 sps:$4 sm:$0xff]   ;;  %v18711_v9 = vld [vmem:[#allocation3 + $0xa40] ss:$16 sps:$4 sm:$0xff]  }
 0xd9b   : > { %11469 = vmatprep.subr.bf16.mxu1 %v18638_v10  ;;  %v18714_v10 = vld [vmem:[#allocation3 + $0xa48] ss:$16 sps:$4 sm:$0xff]  }
 0xd9d   : > { %11388 = vmatpush1.bf16.msra.mxu0 %v18633_v12  ;;  %v18719_v12 = vld [vmem:[#allocation3 + $0xa64] ss:$16 sps:$4 sm:$0xff]  }
 0xd9e   : > { %11470 = vmatpush1.bf16.msra.mxu1 %v18636_v16  ;;  %11389 = vmatprep.subr.bf16.mxu0 %v18641_v22  ;;  %v18722_v16 = vld [vmem:[#allocation3 + $0xa6c] ss:$16 sps:$4 sm:$0xff]   ;;  %v18717_v22 = vld [vmem:[#allocation3 + $0xa60] ss:$16 sps:$4 sm:$0xff]  }
 0xd9f   : > { %11471 = vmatprep.subr.bf16.mxu1 %v18644_v56  ;;  %v18720_v56 = vld [vmem:[#allocation3 + $0xa68] ss:$16 sps:$4 sm:$0xff]  }
 0xda1   : > { %11390 = vmatpush1.bf16.msra.mxu0 %v18639_v23 }
 0xda2   : > { %11472 = vmatpush1.bf16.msra.mxu1 %v18642_v25  ;;  %11391 = vmatprep.subr.bf16.mxu0 %v18647_v26 }
 0xda3   : > { %11473 = vmatprep.subr.bf16.mxu1 %v18650_v13 }
 0xda5   : > { %11392 = vmatpush1.bf16.msra.mxu0 %v18645_v29 }
 0xda6   : > { %11474 = vmatpush1.bf16.msra.mxu1 %v18648_v34  ;;  %11402 = vmatprep.subr.bf16.mxu0 %v18653_v62 }
 0xda7   : > { %11484 = vmatprep.subr.bf16.mxu1 %v18656_v3 }
 0xda8   : > { %11394 = vmatmul.mubr.bf16.vlgmr.msra.gmra.mrb[164].mxu0 %v22078_v21 }
 0xda9   : > { %11476 = vmatmul.mubr.bf16.vlgmr.msra.gmra.mrb[72].mxu1 %v22078_v21  ;;  %11403 = vmatpush1.bf16.msra.mxu0 %v18651_v42 }
 0xdaa   : > { %16262 = vmatprep.mubr.msk.bf16.mxu0 %vm2445_vm5, %v22084_v14  ;;  %11485 = vmatpush1.bf16.msra.mxu1 %v18654_v47 }
 0xdab   : > { %16263 = vmatprep.mubr.msk.bf16.mxu1 %vm2445_vm5, %v22084_v14  ;;  %11404 = vmatprep.subr.bf16.mxu0 %v18659_v43 }
 0xdac   : > { %11486 = vmatprep.subr.bf16.mxu1 %v18662_v35 }
 0xdad   : > { %11405 = vmatpush1.bf16.msra.mxu0 %v18657_v28 }
 0xdae   : > { %11487 = vmatpush1.bf16.msra.mxu1 %v18660_v33  ;;  %11406 = vmatprep.subr.bf16.mxu0 %v18665_v36  ;;  %v18726_v33 = vld [vmem:[#allocation3 + $0xa84] ss:$16 sps:$4 sm:$0xff]  }
 0xdaf   : > { %11488 = vmatprep.subr.bf16.mxu1 %v18668_v38 }
 0xdb1   : > { %11407 = vmatpush1.bf16.msra.mxu0 %v18663_v27  ;;  %v18729_v27 = vld [vmem:[#allocation3 + $0xa8c] ss:$16 sps:$4 sm:$0xff]  }
 0xdb2   : > { %11489 = vmatpush1.bf16.msra.mxu1 %v18666_v40  ;;  %11408 = vmatprep.subr.bf16.mxu0 %v18671_v4  ;;  %v18723_v4 = vld [vmem:[%s22694_s11 + $0x10] sm:$0x7f]  }
 0xdb3   : > { %11490 = vmatprep.subr.bf16.mxu1 %v18674_v45  ;;  %v18724_v45 = vld [vmem:[#allocation3 + $0xa80] ss:$16 sps:$4 sm:$0xff]  }
 0xdb5   : > { %11409 = vmatpush1.bf16.msra.mxu0 %v18669_v46  ;;  %v18727_v46 = vld [vmem:[#allocation3 + $0xa88] ss:$16 sps:$4 sm:$0xff]  }
 0xdb6   : > { %11491 = vmatpush1.bf16.msra.mxu1 %v18672_v54  ;;  %11410 = vmatprep.subr.bf16.mxu0 %v18677_v39  ;;  %v18732_v54 = vld [vmem:[#allocation3 + $0xaa4] ss:$16 sps:$4 sm:$0xff]   ;;  %v18735_v39 = vld [vmem:[#allocation3 + $0xaac] ss:$16 sps:$4 sm:$0xff]  }
 0xdb7   : > { %11492 = vmatprep.subr.bf16.mxu1 %v18680_v48  ;;  %v18730_v48 = vld [vmem:[#allocation3 + $0xaa0] ss:$16 sps:$4 sm:$0xff]  }
 0xdb9   : > { %11411 = vmatpush1.bf16.msra.mxu0 %v18675_v53  ;;  %v18733_v53 = vld [vmem:[#allocation3 + $0xaa8] ss:$16 sps:$4 sm:$0xff]  }
 0xdba   : > { %11493 = vmatpush1.bf16.msra.mxu1 %v18678_v0  ;;  %11412 = vmatprep.subr.bf16.mxu0 %v18683_v50  ;;  %v18738_v0 = vld [vmem:[#allocation3 + $0xac4] ss:$16 sps:$4 sm:$0xff]   ;;  %v18741_v50 = vld [vmem:[#allocation3 + $0xacc] ss:$16 sps:$4 sm:$0xff]  }
 0xdbb   : > { %11494 = vmatprep.subr.bf16.mxu1 %v18686_v57  ;;  %v18736_v57 = vld [vmem:[#allocation3 + $0xac0] ss:$16 sps:$4 sm:$0xff]  }
 0xdbd   : > { %11413 = vmatpush1.bf16.msra.mxu0 %v18681_v51  ;;  %v18739_v51 = vld [vmem:[#allocation3 + $0xac8] ss:$16 sps:$4 sm:$0xff]  }
 0xdbe   : > { %11495 = vmatpush1.bf16.msra.mxu1 %v18684_v44  ;;  %11414 = vmatprep.subr.bf16.mxu0 %v18689_v6  ;;  %v18744_v44 = vld [vmem:[#allocation3 + $0xae4] ss:$16 sps:$4 sm:$0xff]   ;;  %v18747_v6 = vld [vmem:[#allocation3 + $0xaec] ss:$16 sps:$4 sm:$0xff]  }
 0xdbf   : > { %11496 = vmatprep.subr.bf16.mxu1 %v18692_v30  ;;  %v18742_v30 = vld [vmem:[#allocation3 + $0xae0] ss:$16 sps:$4 sm:$0xff]  }
 0xdc1   : > { %11415 = vmatpush1.bf16.msra.mxu0 %v18687_v32  ;;  %v18745_v32 = vld [vmem:[#allocation3 + $0xae8] ss:$16 sps:$4 sm:$0xff]  }
 0xdc2   : > { %11497 = vmatpush1.bf16.msra.mxu1 %v18690_v41  ;;  %11416 = vmatprep.subr.bf16.mxu0 %v18695_v58  ;;  %v18750_v41 = vld [vmem:[#allocation3 + $0xb04] ss:$16 sps:$4 sm:$0xff]   ;;  %v18753_v58 = vld [vmem:[#allocation3 + $0xb0c] ss:$16 sps:$4 sm:$0xff]  }
 0xdc3   : > { %11498 = vmatprep.subr.bf16.mxu1 %v18698_v49  ;;  %v18751_v49 = vld [vmem:[#allocation3 + $0xb08] ss:$16 sps:$4 sm:$0xff]  }
 0xdc5   : > { %11417 = vmatpush1.bf16.msra.mxu0 %v18693_v52  ;;  %v18756_v52 = vld [vmem:[#allocation3 + $0xb24] ss:$16 sps:$4 sm:$0xff]  }
 0xdc6   : > { %11499 = vmatpush1.bf16.msra.mxu1 %v18696_v55  ;;  %11418 = vmatprep.subr.bf16.mxu0 %v18701_v59  ;;  %v18759_v55 = vld [vmem:[#allocation3 + $0xb2c] ss:$16 sps:$4 sm:$0xff]   ;;  %v18754_v59 = vld [vmem:[#allocation3 + $0xb20] ss:$16 sps:$4 sm:$0xff]  }
 0xdc7   : > { %11500 = vmatprep.subr.bf16.mxu1 %v18704_v31  ;;  %v18757_v31 = vld [vmem:[#allocation3 + $0xb28] ss:$16 sps:$4 sm:$0xff]  }
 0xdc9   : > { %11419 = vmatpush1.bf16.msra.mxu0 %v18699_v60  ;;  %v18762_v60 = vld [vmem:[#allocation3 + $0xb44] ss:$16 sps:$4 sm:$0xff]  }
 0xdca   : > { %11501 = vmatpush1.bf16.msra.mxu1 %v18702_v61  ;;  %11420 = vmatprep.subr.bf16.mxu0 %v18707_v63  ;;  %v18765_v61 = vld [vmem:[#allocation3 + $0xb4c] ss:$16 sps:$4 sm:$0xff]   ;;  %v18760_v63 = vld [vmem:[#allocation3 + $0xb40] ss:$16 sps:$4 sm:$0xff]  }
 0xdcb   : > { %11502 = vmatprep.subr.bf16.mxu1 %v18710_v1  ;;  %v18763_v1 = vld [vmem:[#allocation3 + $0xb48] ss:$16 sps:$4 sm:$0xff]  }
 0xdcd   : > { %11421 = vmatpush1.bf16.msra.mxu0 %v18705_v2  ;;  %v18768_v2 = vld [vmem:[#allocation3 + $0xb64] ss:$16 sps:$4 sm:$0xff]  }
 0xdce   : > { %11503 = vmatpush1.bf16.msra.mxu1 %v18708_v5  ;;  %11422 = vmatprep.subr.bf16.mxu0 %v18713_v7  ;;  %v18771_v5 = vld [vmem:[#allocation3 + $0xb6c] ss:$16 sps:$4 sm:$0xff]   ;;  %v18766_v7 = vld [vmem:[#allocation3 + $0xb60] ss:$16 sps:$4 sm:$0xff]  }
 0xdcf   : > { %11504 = vmatprep.subr.bf16.mxu1 %v18716_v8  ;;  %v18769_v8 = vld [vmem:[#allocation3 + $0xb68] ss:$16 sps:$4 sm:$0xff]  }
 0xdd1   : > { %11423 = vmatpush1.bf16.msra.mxu0 %v18711_v9  ;;  %v18774_v9 = vld [vmem:[#allocation3 + $0xb84] ss:$16 sps:$4 sm:$0xff]  }
 0xdd2   : > { %11505 = vmatpush1.bf16.msra.mxu1 %v18714_v10  ;;  %11424 = vmatprep.subr.bf16.mxu0 %v18719_v12  ;;  %v18777_v10 = vld [vmem:[#allocation3 + $0xb8c] ss:$16 sps:$4 sm:$0xff]   ;;  %v18772_v12 = vld [vmem:[#allocation3 + $0xb80] ss:$16 sps:$4 sm:$0xff]  }
 0xdd3   : > { %11506 = vmatprep.subr.bf16.mxu1 %v18722_v16  ;;  %v18775_v16 = vld [vmem:[#allocation3 + $0xb88] ss:$16 sps:$4 sm:$0xff]  }
 0xdd5   : > { %11425 = vmatpush1.bf16.msra.mxu0 %v18717_v22  ;;  %v18780_v22 = vld [vmem:[#allocation3 + $0xba4] ss:$16 sps:$4 sm:$0xff]  }
 0xdd6   : > { %11507 = vmatpush1.bf16.msra.mxu1 %v18720_v56  ;;  %v18783_v56 = vld [vmem:[#allocation3 + $0xbac] ss:$16 sps:$4 sm:$0xff]  }
 0xdd8   : > { %11435 = vmatmul.mubr.bf16.vlgmr.msra.gmra.mrb[164].mxu0 %v22090_v37 }
 0xdd9   : > { %11517 = vmatmul.mubr.bf16.vlgmr.msra.gmra.mrb[72].mxu1 %v22090_v37  ;;  %11584 = vmatprep.mubr.bf16.mxu0 %v19130_v17 }
 0xdda   : > { %11627 = vmatprep.mubr.bf16.mxu1 %v19130_v17 }
 0xeab   : > { %v11436_v23 = vpop.f32.mrb[164].mxu0 }
 0xeac   : > { %v11528_v25 = vpack.c.bf16 %v11436_v23, %v11436_v23  ;;  %v11518_v26 = vpop.f32.mrb[72].mxu1  ;;  %v11438_v13 = vpop.f32.mrb[165].mxu0  ;;  %v18778_v23 = vld [vmem:[#allocation3 + $0xba0] ss:$16 sps:$4 sm:$0xff]  }
 0xead   : > { %v11530_v29 = vpack.c.bf16 %v11518_v26, %v11518_v26  ;;  %v11529_v34 = vpack.c.bf16 %v11438_v13, %v11438_v13  ;;  %v11520_v62 = vpop.f32.mrb[73].mxu1  ;;  %v11440_v3 = vpop.f32.mrb[166].mxu0  ;;  %v18786_v26 = vld [vmem:[#allocation3 + $0xbc4] ss:$16 sps:$4 sm:$0xff]   ;;  %v18789_v13 = vld [vmem:[#allocation3 + $0xbcc] ss:$16 sps:$4 sm:$0xff]  }
 0xeae   : > { %v11531_v42 = vpack.c.bf16 %v11520_v62, %v11520_v62  ;;  %v11522_v47 = vpop.f32.mrb[74].mxu1  ;;  %v11441_v43 = vpop.f32.mrb[167].mxu0  ;;  %v11541_v36 = vand.u32 %v11528_v25, %v22106_v11  ;;  %v18781_v25 = vld [vmem:[#allocation3 + $0xba8] ss:$16 sps:$4 sm:$0xff]   ;;  %v18792_v62 = vld [vmem:[#allocation3 + $0xbe4] ss:$16 sps:$4 sm:$0xff]  }
 0xeaf   : > { %v11544_v35 = vand.u32 %v11529_v34, %v22106_v11  ;;  %v11523_v28 = vpop.f32.mrb[75].mxu1  ;;  %v11547_v40 = vand.u32 %v11530_v29, %v22106_v11  ;;  %v18784_v29 = vld [vmem:[#allocation3 + $0xbc0] ss:$16 sps:$4 sm:$0xff]   ;;  %v18787_v34 = vld [vmem:[#allocation3 + $0xbc8] ss:$16 sps:$4 sm:$0xff]  }
 0xeb0   : > { %v11550_v38 = vand.u32 %v11531_v42, %v22106_v11  ;;  %v18795_v3 = vld [vmem:[#allocation3 + $0xbec] ss:$16 sps:$4 sm:$0xff]   ;;  %v18790_v42 = vld [vmem:[#allocation3 + $0xbe0] ss:$16 sps:$4 sm:$0xff]   ;;  %v18793_v47 = vld [vmem:[#allocation3 + $0xbe8] ss:$16 sps:$4 sm:$0xff]  }
 0xeb1   : > { %11552 = vmatprep.subr.bf16.mxu0 %v11544_v35  ;;  %v18798_v43 = vld [vmem:[#allocation3 + $0xc04] ss:$16 sps:$4 sm:$0xff]   ;;  %v18801_v35 = vld [vmem:[#allocation3 + $0xc0c] ss:$16 sps:$4 sm:$0xff]   ;;  %v18796_v28 = vld [vmem:[#allocation3 + $0xc00] ss:$16 sps:$4 sm:$0xff]  }
 0xeb2   : > { %11595 = vmatprep.subr.bf16.mxu1 %v11550_v38  ;;  %11553 = vmatpush1.bf16.msra.mxu0 %v11541_v36  ;;  %v18804_v36 = vld [vmem:[#allocation3 + $0xc24] ss:$16 sps:$4 sm:$0xff]   ;;  %v18807_v38 = vld [vmem:[#allocation3 + $0xc2c] ss:$16 sps:$4 sm:$0xff]  }
 0xeb3   : > { %11596 = vmatpush1.bf16.msra.mxu1 %v11547_v40  ;;  %12319 = vmatprep.subr.bf16.mxu0 %v18726_v33  ;;  %v18799_v33 = vld [vmem:[#allocation3 + $0xc08] ss:$16 sps:$4 sm:$0xff]  }
 0xeb4   : > { %12401 = vmatprep.subr.bf16.mxu1 %v18729_v27  ;;  %v18802_v27 = vld [vmem:[#allocation3 + $0xc20] ss:$16 sps:$4 sm:$0xff]   ;;  %v18805_v40 = vld [vmem:[#allocation3 + $0xc28] ss:$16 sps:$4 sm:$0xff]  }
 0xeb5   : > { %16267 = vmatmul.mubr.msk.bf16.vlgmr.msra.gmra.mrb[160].mxu0 %vm10476_vm11, %v18723_v4 }
 0xeb6   : > { %16268 = vmatmul.mubr.msk.bf16.vlgmr.msra.gmra.mrb[68].mxu1 %vm10476_vm11, %v18723_v4  ;;  %12320 = vmatpush1.bf16.msra.mxu0 %v18724_v45  ;;  %v18810_v4 = vld [vmem:[#allocation3 + $0xc44] ss:$16 sps:$4 sm:$0xff]   ;;  %v18813_v45 = vld [vmem:[#allocation3 + $0xc4c] ss:$16 sps:$4 sm:$0xff]  }
 0xeb7   : > { %12351 = vmatprep.mubr.bf16.mxu0 %v22076_v24  ;;  %12402 = vmatpush1.bf16.msra.mxu1 %v18727_v46  ;;  %v18808_v46 = vld [vmem:[#allocation3 + $0xc40] ss:$16 sps:$4 sm:$0xff]  }
 0xeb8   : > { %12433 = vmatprep.mubr.bf16.mxu1 %v22076_v24  ;;  %12321 = vmatprep.subr.bf16.mxu0 %v18732_v54  ;;  %v18748_v24 = vld [vmem:[#allocation3 + $0xb00] ss:$16 sps:$4 sm:$0xff]   ;;  %v18811_v54 = vld [vmem:[#allocation3 + $0xc48] ss:$16 sps:$4 sm:$0xff]  }
 0xeb9   : > { %12403 = vmatprep.subr.bf16.mxu1 %v18735_v39  ;;  %v18816_v39 = vld [vmem:[#allocation3 + $0xc64] ss:$16 sps:$4 sm:$0xff]  }
 0xeba   : > { %12322 = vmatpush1.bf16.msra.mxu0 %v18730_v48  ;;  %v18819_v48 = vld [vmem:[#allocation3 + $0xc6c] ss:$16 sps:$4 sm:$0xff]  }
 0xebb   : > { %12404 = vmatpush1.bf16.msra.mxu1 %v18733_v53  ;;  %12323 = vmatprep.subr.bf16.mxu0 %v18738_v0  ;;  %v18814_v53 = vld [vmem:[#allocation3 + $0xc60] ss:$16 sps:$4 sm:$0xff]   ;;  %v18817_v0 = vld [vmem:[#allocation3 + $0xc68] ss:$16 sps:$4 sm:$0xff]  }
 0xebc   : > { %12405 = vmatprep.subr.bf16.mxu1 %v18741_v50  ;;  %v18822_v50 = vld [vmem:[#allocation3 + $0xc84] ss:$16 sps:$4 sm:$0xff]  }
 0xebe   : > { %12324 = vmatpush1.bf16.msra.mxu0 %v18736_v57  ;;  %v18825_v57 = vld [vmem:[#allocation3 + $0xc8c] ss:$16 sps:$4 sm:$0xff]  }
 0xebf   : > { %12406 = vmatpush1.bf16.msra.mxu1 %v18739_v51  ;;  %12325 = vmatprep.subr.bf16.mxu0 %v18744_v44  ;;  %v18820_v51 = vld [vmem:[#allocation3 + $0xc80] ss:$16 sps:$4 sm:$0xff]   ;;  %v18823_v44 = vld [vmem:[#allocation3 + $0xc88] ss:$16 sps:$4 sm:$0xff]  }
 0xec0   : > { %12407 = vmatprep.subr.bf16.mxu1 %v18747_v6  ;;  %v18828_v6 = vld [vmem:[#allocation3 + $0xca4] ss:$16 sps:$4 sm:$0xff]  }
 0xec2   : > { %12326 = vmatpush1.bf16.msra.mxu0 %v18742_v30  ;;  %v18831_v30 = vld [vmem:[#allocation3 + $0xcac] ss:$16 sps:$4 sm:$0xff]  }
 0xec3   : > { %12408 = vmatpush1.bf16.msra.mxu1 %v18745_v32  ;;  %12327 = vmatprep.subr.bf16.mxu0 %v18750_v41  ;;  %v18826_v32 = vld [vmem:[#allocation3 + $0xca0] ss:$16 sps:$4 sm:$0xff]   ;;  %v18829_v41 = vld [vmem:[#allocation3 + $0xca8] ss:$16 sps:$4 sm:$0xff]  }
 0xec4   : > { %12409 = vmatprep.subr.bf16.mxu1 %v18753_v58  ;;  %v18834_v58 = vld [vmem:[#allocation3 + $0xcc4] ss:$16 sps:$4 sm:$0xff]  }
 0xec6   : > { %12328 = vmatpush1.bf16.msra.mxu0 %v18748_v24  ;;  %v18837_v24 = vld [vmem:[#allocation3 + $0xccc] ss:$16 sps:$4 sm:$0xff]  }
 0xec7   : > { %12410 = vmatpush1.bf16.msra.mxu1 %v18751_v49  ;;  %12329 = vmatprep.subr.bf16.mxu0 %v18756_v52  ;;  %v18832_v49 = vld [vmem:[#allocation3 + $0xcc0] ss:$16 sps:$4 sm:$0xff]   ;;  %v18835_v52 = vld [vmem:[#allocation3 + $0xcc8] ss:$16 sps:$4 sm:$0xff]  }
 0xec8   : > { %12411 = vmatprep.subr.bf16.mxu1 %v18759_v55  ;;  %v18843_v55 = vld [vmem:[#allocation3 + $0xcec] ss:$16 sps:$4 sm:$0xff]  }
 0xeca   : > { %12330 = vmatpush1.bf16.msra.mxu0 %v18754_v59  ;;  %v18838_v59 = vld [vmem:[#allocation3 + $0xce0] ss:$16 sps:$4 sm:$0xff]  }
 0xecb   : > { %12412 = vmatpush1.bf16.msra.mxu1 %v18757_v31  ;;  %12331 = vmatprep.subr.bf16.mxu0 %v18762_v60  ;;  %v18841_v31 = vld [vmem:[#allocation3 + $0xce8] ss:$16 sps:$4 sm:$0xff]   ;;  %v18846_v60 = vld [vmem:[#allocation3 + $0xd04] ss:$16 sps:$4 sm:$0xff]  }
 0xecc   : > { %12413 = vmatprep.subr.bf16.mxu1 %v18765_v61  ;;  %v18849_v61 = vld [vmem:[#allocation3 + $0xd0c] ss:$16 sps:$4 sm:$0xff]  }
 0xece   : > { %12332 = vmatpush1.bf16.msra.mxu0 %v18760_v63  ;;  %v18847_v63 = vld [vmem:[#allocation3 + $0xd08] ss:$16 sps:$4 sm:$0xff]  }
 0xecf   : > { %12414 = vmatpush1.bf16.msra.mxu1 %v18763_v1  ;;  %12333 = vmatprep.subr.bf16.mxu0 %v18768_v2  ;;  %v18852_v1 = vld [vmem:[#allocation3 + $0xd24] ss:$16 sps:$4 sm:$0xff]   ;;  %v18855_v2 = vld [vmem:[#allocation3 + $0xd2c] ss:$16 sps:$4 sm:$0xff]  }
 0xed0   : > { %12415 = vmatprep.subr.bf16.mxu1 %v18771_v5  ;;  %v18850_v5 = vld [vmem:[#allocation3 + $0xd20] ss:$16 sps:$4 sm:$0xff]  }
 0xed2   : > { %12334 = vmatpush1.bf16.msra.mxu0 %v18766_v7  ;;  %v18853_v7 = vld [vmem:[#allocation3 + $0xd28] ss:$16 sps:$4 sm:$0xff]  }
 0xed3   : > { %12416 = vmatpush1.bf16.msra.mxu1 %v18769_v8  ;;  %12335 = vmatprep.subr.bf16.mxu0 %v18774_v9  ;;  %v18858_v8 = vld [vmem:[#allocation3 + $0xd44] ss:$16 sps:$4 sm:$0xff]   ;;  %v18861_v9 = vld [vmem:[#allocation3 + $0xd4c] ss:$16 sps:$4 sm:$0xff]  }
 0xed4   : > { %12417 = vmatprep.subr.bf16.mxu1 %v18777_v10  ;;  %v18856_v10 = vld [vmem:[#allocation3 + $0xd40] ss:$16 sps:$4 sm:$0xff]  }
 0xed6   : > { %12336 = vmatpush1.bf16.msra.mxu0 %v18772_v12  ;;  %v18859_v12 = vld [vmem:[#allocation3 + $0xd48] ss:$16 sps:$4 sm:$0xff]  }
 0xed7   : > { %12418 = vmatpush1.bf16.msra.mxu1 %v18775_v16  ;;  %12337 = vmatprep.subr.bf16.mxu0 %v18780_v22  ;;  %v18864_v16 = vld [vmem:[#allocation3 + $0xd64] ss:$16 sps:$4 sm:$0xff]   ;;  %v18867_v22 = vld [vmem:[#allocation3 + $0xd6c] ss:$16 sps:$4 sm:$0xff]  }
 0xed8   : > { %12419 = vmatprep.subr.bf16.mxu1 %v18783_v56  ;;  %v18862_v56 = vld [vmem:[#allocation3 + $0xd60] ss:$16 sps:$4 sm:$0xff]  }
 0xeda   : > { %12338 = vmatpush1.bf16.msra.mxu0 %v18778_v23  ;;  %v18865_v23 = vld [vmem:[#allocation3 + $0xd68] ss:$16 sps:$4 sm:$0xff]  }
 0xedb   : > { %12420 = vmatpush1.bf16.msra.mxu1 %v18781_v25  ;;  %12339 = vmatprep.subr.bf16.mxu0 %v18786_v26  ;;  %v18870_v25 = vld [vmem:[#allocation3 + $0xd84] ss:$16 sps:$4 sm:$0xff]   ;;  %v18873_v26 = vld [vmem:[#allocation3 + $0xd8c] ss:$16 sps:$4 sm:$0xff]  }
 0xedc   : > { %12421 = vmatprep.subr.bf16.mxu1 %v18789_v13  ;;  %v18868_v13 = vld [vmem:[#allocation3 + $0xd80] ss:$16 sps:$4 sm:$0xff]  }
 0xede   : > { %12340 = vmatpush1.bf16.msra.mxu0 %v18784_v29  ;;  %v18871_v29 = vld [vmem:[#allocation3 + $0xd88] ss:$16 sps:$4 sm:$0xff]  }
 0xedf   : > { %12422 = vmatpush1.bf16.msra.mxu1 %v18787_v34  ;;  %12341 = vmatprep.subr.bf16.mxu0 %v18792_v62  ;;  %v18876_v34 = vld [vmem:[#allocation3 + $0xda4] ss:$16 sps:$4 sm:$0xff]   ;;  %v18879_v62 = vld [vmem:[#allocation3 + $0xdac] ss:$16 sps:$4 sm:$0xff]  }
 0xee0   : > { %12423 = vmatprep.subr.bf16.mxu1 %v18795_v3  ;;  %v18874_v3 = vld [vmem:[#allocation3 + $0xda0] ss:$16 sps:$4 sm:$0xff]  }
 0xee2   : > { %12342 = vmatpush1.bf16.msra.mxu0 %v18790_v42  ;;  %v18877_v42 = vld [vmem:[#allocation3 + $0xda8] ss:$16 sps:$4 sm:$0xff]  }
 0xee3   : > { %12424 = vmatpush1.bf16.msra.mxu1 %v18793_v47  ;;  %12343 = vmatprep.subr.bf16.mxu0 %v18798_v43  ;;  %v18882_v47 = vld [vmem:[#allocation3 + $0xdc4] ss:$16 sps:$4 sm:$0xff]   ;;  %v18885_v43 = vld [vmem:[#allocation3 + $0xdcc] ss:$16 sps:$4 sm:$0xff]  }
 0xee4   : > { %12425 = vmatprep.subr.bf16.mxu1 %v18801_v35  ;;  %v18880_v35 = vld [vmem:[#allocation3 + $0xdc0] ss:$16 sps:$4 sm:$0xff]  }
 0xee6   : > { %12344 = vmatpush1.bf16.msra.mxu0 %v18796_v28  ;;  %v18883_v28 = vld [vmem:[#allocation3 + $0xdc8] ss:$16 sps:$4 sm:$0xff]  }
 0xee7   : > { %12426 = vmatpush1.bf16.msra.mxu1 %v18799_v33  ;;  %12345 = vmatprep.subr.bf16.mxu0 %v18804_v36  ;;  %v18888_v33 = vld [vmem:[#allocation3 + $0xde4] ss:$16 sps:$4 sm:$0xff]   ;;  %v18891_v36 = vld [vmem:[#allocation3 + $0xdec] ss:$16 sps:$4 sm:$0xff]  }
 0xee8   : > { %12427 = vmatprep.subr.bf16.mxu1 %v18807_v38  ;;  %v18886_v38 = vld [vmem:[#allocation3 + $0xde0] ss:$16 sps:$4 sm:$0xff]  }
 0xeea   : > { %12346 = vmatpush1.bf16.msra.mxu0 %v18802_v27  ;;  %v18889_v27 = vld [vmem:[#allocation3 + $0xde8] ss:$16 sps:$4 sm:$0xff]  }
 0xeeb   : > { %12428 = vmatpush1.bf16.msra.mxu1 %v18805_v40  ;;  %12347 = vmatprep.subr.bf16.mxu0 %v18810_v4 }
 0xeec   : > { %12429 = vmatprep.subr.bf16.mxu1 %v18813_v45 }
 0xeee   : > { %12348 = vmatpush1.bf16.msra.mxu0 %v18808_v46 }
 0xeef   : > { %12430 = vmatpush1.bf16.msra.mxu1 %v18811_v54  ;;  %12349 = vmatprep.subr.bf16.mxu0 %v18816_v39 }
 0xef0   : > { %12431 = vmatprep.subr.bf16.mxu1 %v18819_v48 }
 0xef2   : > { %12350 = vmatpush1.bf16.msra.mxu0 %v18814_v53 }
 0xef3   : > { %12432 = vmatpush1.bf16.msra.mxu1 %v18817_v0  ;;  %12360 = vmatprep.subr.bf16.mxu0 %v18822_v50 }
 0xef4   : > { %12442 = vmatprep.subr.bf16.mxu1 %v18825_v57 }
 0xef5   : > { %12352 = vmatmul.mubr.bf16.vlgmr.msra.gmra.mrb[168].mxu0 %v22078_v21 }
 0xef6   : > { %12434 = vmatmul.mubr.bf16.vlgmr.msra.gmra.mrb[76].mxu1 %v22078_v21  ;;  %12361 = vmatpush1.bf16.msra.mxu0 %v18820_v51  ;;  %v18840_v21 = vld [vmem:[#allocation3 + $0xce4] ss:$16 sps:$4 sm:$0xff]  }
 0xef7   : > { %16381 = vmatprep.mubr.msk.bf16.mxu0 %vm2445_vm5, %v22084_v14  ;;  %12443 = vmatpush1.bf16.msra.mxu1 %v18823_v44 }
 0xef8   : > { %16382 = vmatprep.mubr.msk.bf16.mxu1 %vm2445_vm5, %v22084_v14  ;;  %12362 = vmatprep.subr.bf16.mxu0 %v18828_v6  ;;  %v18844_v14 = vld [vmem:[#allocation3 + $0xd00] ss:$16 sps:$4 sm:$0xff]  }
 0xef9   : > { %12444 = vmatprep.subr.bf16.mxu1 %v18831_v30 }
 0xefa   : > { %12363 = vmatpush1.bf16.msra.mxu0 %v18826_v32 }
 0xefb   : > { %12445 = vmatpush1.bf16.msra.mxu1 %v18829_v41  ;;  %12364 = vmatprep.subr.bf16.mxu0 %v18834_v58  ;;  %v18892_v41 = vld [vmem:[%s22694_s11 + $0x18] sm:$0x7f]   ;;  %v18898_v58 = vld [vmem:[%s22698_s15] sm:$0xff]  }
 0xefc   : > { %12446 = vmatprep.subr.bf16.mxu1 %v18837_v24  ;;  %v18893_v24 = vld [vmem:[%s22698_s15 + $0x80] sm:$0xff]  }
 0xefe   : > { %12365 = vmatpush1.bf16.msra.mxu0 %v18832_v49  ;;  %v18901_v49 = vld [vmem:[%s22698_s15 + $0x8] sm:$0xff]  }
 0xeff   : > { %12447 = vmatpush1.bf16.msra.mxu1 %v18835_v52  ;;  %12366 = vmatprep.subr.bf16.mxu0 %v18840_v21  ;;  %v18894_v52 = vld [vmem:[%s22698_s15 + $0x88] sm:$0xff]   ;;  %v18903_v21 = vld [vmem:[%s22698_s15 + $0x50] sm:$0xff]  }
 0xf00   : > { %12448 = vmatprep.subr.bf16.mxu1 %v18843_v55  ;;  %v18904_v55 = vld [vmem:[%s22698_s15 + $0x10] sm:$0xff]  }
 0xf02   : > { %12367 = vmatpush1.bf16.msra.mxu0 %v18838_v59  ;;  %v18895_v59 = vld [vmem:[%s22698_s15 + $0x90] sm:$0xff]  }
 0xf03   : > { %12449 = vmatpush1.bf16.msra.mxu1 %v18841_v31  ;;  %12368 = vmatprep.subr.bf16.mxu0 %v18846_v60  ;;  %v18906_v31 = vld [vmem:[%s22698_s15 + $0x58] sm:$0xff]  }
 0xf04   : > { %12450 = vmatprep.subr.bf16.mxu1 %v18849_v61  ;;  %v18907_v60 = vld [vmem:[%s22698_s15 + $0x18] sm:$0xff]  }
 0xf05   : > { %v18896_v61 = vld [vmem:[%s22698_s15 + $0x98] sm:$0xff]  }
 0xf06   : > { %12369 = vmatpush1.bf16.msra.mxu0 %v18844_v14  ;;  %v18909_v14 = vld [vmem:[%s22698_s15 + $0x60] sm:$0xff]  }
 0xf07   : > { %12451 = vmatpush1.bf16.msra.mxu1 %v18847_v63  ;;  %12370 = vmatprep.subr.bf16.mxu0 %v18852_v1  ;;  %v18910_v63 = vld [vmem:[%s22698_s15 + $0x20] sm:$0xff]  }
 0xf08   : > { %12452 = vmatprep.subr.bf16.mxu1 %v18855_v2  ;;  %v18899_v1 = vld [vmem:[%s22698_s15 + $0xa0] sm:$0xff]   ;;  %v18912_v2 = vld [vmem:[%s22698_s15 + $0x68] sm:$0xff]  }
 0xf0a   : > { %12371 = vmatpush1.bf16.msra.mxu0 %v18850_v5  ;;  %v18913_v5 = vld [vmem:[%s22698_s15 + $0x28] sm:$0xff]  }
 0xf0b   : > { %12453 = vmatpush1.bf16.msra.mxu1 %v18853_v7  ;;  %12372 = vmatprep.subr.bf16.mxu0 %v18858_v8  ;;  %v18902_v7 = vld [vmem:[%s22698_s15 + $0xa8] sm:$0xff]   ;;  %v18905_v8 = vld [vmem:[%s22698_s15 + $0xb0] sm:$0xff]  }
 0xf0c   : > { %12454 = vmatprep.subr.bf16.mxu1 %v18861_v9  ;;  %v18908_v9 = vld [vmem:[%s22698_s15 + $0xb8] sm:$0xff]  }
 0xf0e   : > { %12373 = vmatpush1.bf16.msra.mxu0 %v18856_v10  ;;  %v18911_v10 = vld [vmem:[%s22698_s15 + $0xc0] sm:$0xff]  }
 0xf0f   : > { %12455 = vmatpush1.bf16.msra.mxu1 %v18859_v12  ;;  %12374 = vmatprep.subr.bf16.mxu0 %v18864_v16  ;;  %v18914_v12 = vld [vmem:[%s22698_s15 + $0xc8] sm:$0xff]   ;;  %v18915_v16 = vld [vmem:[%s22698_s15 + $0x70] sm:$0xff]  }
 0xf10   : > { %12456 = vmatprep.subr.bf16.mxu1 %v18867_v22  ;;  %v18916_v22 = vld [vmem:[%s22698_s15 + $0x30] sm:$0xff]  }
 0xf12   : > { %12375 = vmatpush1.bf16.msra.mxu0 %v18862_v56  ;;  %v18917_v56 = vld [vmem:[%s22698_s15 + $0xd0] sm:$0xff]  }
 0xf13   : > { %12457 = vmatpush1.bf16.msra.mxu1 %v18865_v23  ;;  %12376 = vmatprep.subr.bf16.mxu0 %v18870_v25  ;;  %v18918_v23 = vld [vmem:[%s22698_s15 + $0x78] sm:$0xff]  }
 0xf14   : > { %12458 = vmatprep.subr.bf16.mxu1 %v18873_v26  ;;  %v18919_v25 = vld [vmem:[%s22698_s15 + $0x38] sm:$0xff]  }
 0xf15   : > { %v18920_v26 = vld [vmem:[%s22698_s15 + $0xd8] sm:$0xff]  }
 0xf16   : > { %12377 = vmatpush1.bf16.msra.mxu0 %v18868_v13  ;;  %v18921_v13 = vld [vmem:[%s22698_s15 + $0x120] sm:$0xff]  }
 0xf17   : > { %12459 = vmatpush1.bf16.msra.mxu1 %v18871_v29  ;;  %12378 = vmatprep.subr.bf16.mxu0 %v18876_v34  ;;  %v12604_v29 = vld [vmem:[%s22696_s13] sm:$0xf] }
 0xf18   : > { %12460 = vmatprep.subr.bf16.mxu1 %v18879_v62  ;;  %v12609_v34 = vrot.slane %v12604_v29, %v19505_v15  ;;  %v12617_v62 = vrot.slane %v12604_v29, %v19514_v19 }
 0xf1a   : > { %12379 = vmatpush1.bf16.msra.mxu0 %v18874_v3  ;;  %v12613_v3 = vrot.slane %v12604_v29, %v19511_v18 }
 0xf1b   : > { %12461 = vmatpush1.bf16.msra.mxu1 %v18877_v42  ;;  %12380 = vmatprep.subr.bf16.mxu0 %v18882_v47  ;;  %v12621_v42 = vrot.slane %v12604_v29, %v19517_v20  ;;  %v18952_v29 = vld [vmem:[%s22698_s15 + $0x258] sm:$0xff]  }
 0xf1c   : > { %12462 = vmatprep.subr.bf16.mxu1 %v18885_v43 }
 0xf1e   : > { %12381 = vmatpush1.bf16.msra.mxu0 %v18880_v35 }
 0xf1f   : > { %12463 = vmatpush1.bf16.msra.mxu1 %v18883_v28  ;;  %12382 = vmatprep.subr.bf16.mxu0 %v18888_v33 }
 0xf20   : > { %12464 = vmatprep.subr.bf16.mxu1 %v18891_v36 }
 0xf22   : > { %12383 = vmatpush1.bf16.msra.mxu0 %v18886_v38 }
 0xf23   : > { %12465 = vmatpush1.bf16.msra.mxu1 %v18889_v27 }
 0xf25   : > { %12393 = vmatmul.mubr.bf16.vlgmr.msra.gmra.mrb[168].mxu0 %v22090_v37 }
 0xf26   : > { %12475 = vmatmul.mubr.bf16.vlgmr.msra.gmra.mrb[76].mxu1 %v22090_v37  ;;  %12542 = vmatprep.mubr.bf16.mxu0 %v19130_v17  ;;  %v18897_v37 = vld [vmem:[%s22698_s15 + $0x40] sm:$0xff]  }
 0xf27   : > { %12585 = vmatprep.mubr.bf16.mxu1 %v19130_v17 }
 0xff8   : > { %v12394_v40 = vpop.f32.mrb[168].mxu0 }
 0xff9   : > { %v12486_v4 = vpack.c.bf16 %v12394_v40, %v12394_v40  ;;  %v12476_v45 = vpop.f32.mrb[76].mxu1  ;;  %v12396_v46 = vpop.f32.mrb[169].mxu0 }
 0xffa   : > { %v12488_v54 = vpack.c.bf16 %v12476_v45, %v12476_v45  ;;  %v12487_v39 = vpack.c.bf16 %v12396_v46, %v12396_v46  ;;  %v12478_v48 = vpop.f32.mrb[77].mxu1  ;;  %v12398_v53 = vpop.f32.mrb[170].mxu0 }
 0xffb   : > { %v12489_v0 = vpack.c.bf16 %v12478_v48, %v12478_v48  ;;  %v12480_v50 = vpop.f32.mrb[78].mxu1  ;;  %v12399_v57 = vpop.f32.mrb[171].mxu0  ;;  %v12499_v6 = vand.u32 %v12486_v4, %v22106_v11 }
 0xffc   : > { %v12502_v51 = vand.u32 %v12487_v39, %v22106_v11  ;;  %v12481_v44 = vpop.f32.mrb[79].mxu1  ;;  %v12505_v32 = vand.u32 %v12488_v54, %v22106_v11 }
 0xffd   : > { %v12508_v30 = vand.u32 %v12489_v0, %v22106_v11  ;;  %v18900_v11 = vld [vmem:[%s22698_s15 + $0x48] sm:$0xff]  }
 0xffe   : > { %12510 = vmatprep.subr.bf16.mxu0 %v12502_v51 }
 0xfff   : > { %12553 = vmatprep.subr.bf16.mxu1 %v12508_v30  ;;  %12511 = vmatpush1.bf16.msra.mxu0 %v12499_v6  ;;  %v18922_v30 = vld [vmem:[%s22698_s15 + $0xe0] sm:$0xff]  }
0x1000   : > { %12554 = vmatpush1.bf16.msra.mxu1 %v12505_v32  ;;  %16872 = vmatprep.subr.bf16.mxu0 %v18897_v37 }
0x1001   : > { %12914 = vmatprep.subr.bf16.mxu1 %v19130_v17 }
0x1002   : > { %16386 = vmatmul.mubr.msk.bf16.vlgmr.msra.gmra.mrb[160].mxu0 %vm10476_vm11, %v18892_v41 }
0x1003   : > { %16387 = vmatmul.mubr.msk.bf16.vlgmr.msra.gmra.mrb[68].mxu1 %vm10476_vm11, %v18892_v41  ;;  %16873 = vmatpush3.bf16.msra.mxu0 %v18898_v58  ;;  %v18923_v41 = vld [vmem:[%s22698_s15 + $0x160] sm:$0xff]   ;;  %v18924_v58 = vld [vmem:[%s22698_s15 + $0x128] sm:$0xff]  }
0x1004   : > { %12915 = vmatpush1.bf16.msra.mxu1 %v18893_v24  ;;  %16874 = vmatprep.subr.bf16.mxu0 %v18900_v11  ;;  %v18925_v24 = vld [vmem:[%s22698_s15 + $0xe8] sm:$0xff]  }
0x1005   : > { %12916 = vmatprep.subr.bf16.mxu1 %v19130_v17  ;;  %v18926_v11 = vld [vmem:[%s22698_s15 + $0x168] sm:$0xff]  }
0x1007   : > { %16875 = vmatpush3.bf16.msra.mxu0 %v18901_v49  ;;  %v18927_v49 = vld [vmem:[%s22698_s15 + $0x130] sm:$0xff]  }
0x1008   : > { %12917 = vmatpush1.bf16.msra.mxu1 %v18894_v52  ;;  %16876 = vmatprep.subr.bf16.mxu0 %v18903_v21  ;;  %v18928_v52 = vld [vmem:[%s22698_s15 + $0xf0] sm:$0xff]  }
0x1009   : > { %12918 = vmatprep.subr.bf16.mxu1 %v19130_v17  ;;  %v18929_v21 = vld [vmem:[%s22698_s15 + $0x170] sm:$0xff]  }
0x100b   : > { %16877 = vmatpush3.bf16.msra.mxu0 %v18904_v55  ;;  %v18930_v55 = vld [vmem:[%s22698_s15 + $0x138] sm:$0xff]  }
0x100c   : > { %12919 = vmatpush1.bf16.msra.mxu1 %v18895_v59  ;;  %16878 = vmatprep.subr.bf16.mxu0 %v18906_v31  ;;  %v18931_v59 = vld [vmem:[%s22698_s15 + $0xf8] sm:$0xff]  }
0x100d   : > { %12920 = vmatprep.subr.bf16.mxu1 %v19130_v17  ;;  %v18932_v31 = vld [vmem:[%s22698_s15 + $0x178] sm:$0xff]  }
0x100f   : > { %16879 = vmatpush3.bf16.msra.mxu0 %v18907_v60  ;;  %v18933_v60 = vld [vmem:[%s22698_s15 + $0x140] sm:$0xff]  }
0x1010   : > { %12921 = vmatpush1.bf16.msra.mxu1 %v18896_v61  ;;  %16880 = vmatprep.subr.bf16.mxu0 %v18909_v14  ;;  %v18934_v61 = vld [vmem:[%s22698_s15 + $0x100] sm:$0xff]  }
0x1011   : > { %12922 = vmatprep.subr.bf16.mxu1 %v19130_v17  ;;  %v18935_v14 = vld [vmem:[%s22698_s15 + $0x180] sm:$0xff]  }
0x1013   : > { %16881 = vmatpush3.bf16.msra.mxu0 %v18910_v63  ;;  %v18936_v63 = vld [vmem:[%s22698_s15 + $0x148] sm:$0xff]  }
0x1014   : > { %12923 = vmatpush1.bf16.msra.mxu1 %v18899_v1  ;;  %16882 = vmatprep.subr.bf16.mxu0 %v18912_v2  ;;  %v18937_v1 = vld [vmem:[%s22698_s15 + $0x108] sm:$0xff]  }
0x1015   : > { %12924 = vmatprep.subr.bf16.mxu1 %v19130_v17  ;;  %v18938_v2 = vld [vmem:[%s22698_s15 + $0x188] sm:$0xff]  }
0x1017   : > { %16883 = vmatpush3.bf16.msra.mxu0 %v18913_v5  ;;  %v18939_v5 = vld [vmem:[%s22698_s15 + $0x150] sm:$0xff]  }
0x1018   : > { %12925 = vmatpush1.bf16.msra.mxu1 %v18902_v7  ;;  %16884 = vmatprep.subr.bf16.mxu0 %v18915_v16  ;;  %v18940_v7 = vld [vmem:[%s22698_s15 + $0x110] sm:$0xff]   ;;  %v18945_v16 = vld [vmem:[%s22698_s15 + $0x1a0] sm:$0xff]  }
0x1019   : > { %12926 = vmatprep.subr.bf16.mxu1 %v19130_v17 }
0x101b   : > { %16885 = vmatpush3.bf16.msra.mxu0 %v18916_v22  ;;  %v18946_v22 = vld [vmem:[%s22698_s15 + $0x1a8] sm:$0xff]  }
0x101c   : > { %12927 = vmatpush1.bf16.msra.mxu1 %v18905_v8  ;;  %16886 = vmatprep.subr.bf16.mxu0 %v18918_v23  ;;  %v18941_v8 = vld [vmem:[%s22698_s15 + $0x190] sm:$0xff]   ;;  %v18948_v23 = vld [vmem:[%s22698_s15 + $0x1b8] sm:$0xff]  }
0x101d   : > { %12928 = vmatprep.subr.bf16.mxu1 %v19130_v17 }
0x101f   : > { %16887 = vmatpush3.bf16.msra.mxu0 %v18919_v25  ;;  %v18949_v25 = vld [vmem:[%s22698_s15 + $0x240] sm:$0xff]  }
0x1020   : > { %12929 = vmatpush1.bf16.msra.mxu1 %v18908_v9  ;;  %16894 = vmatprep.subr.bf16.mxu0 %v18921_v13  ;;  %v18942_v9 = vld [vmem:[%s22698_s15 + $0x158] sm:$0xff]   ;;  %v18951_v13 = vld [vmem:[%s22698_s15 + $0x250] sm:$0xff]  }
0x1021   : > { %12930 = vmatprep.subr.bf16.mxu1 %v19130_v17 }
0x1024   : > { %12931 = vmatpush1.bf16.msra.mxu1 %v18911_v10  ;;  %v18943_v10 = vld [vmem:[%s22698_s15 + $0x118] sm:$0xff]  }
0x1025   : > { %12932 = vmatprep.subr.bf16.mxu1 %v19130_v17 }
0x1028   : > { %12933 = vmatpush1.bf16.msra.mxu1 %v18914_v12  ;;  %v18944_v12 = vld [vmem:[%s22698_s15 + $0x198] sm:$0xff]  }
0x1029   : > { %12934 = vmatprep.subr.bf16.mxu1 %v19130_v17 }
0x102c   : > { %12935 = vmatpush1.bf16.msra.mxu1 %v18917_v56  ;;  %v18947_v56 = vld [vmem:[%s22698_s15 + $0x1b0] sm:$0xff]  }
0x102d   : > { %12936 = vmatprep.subr.bf16.mxu1 %v19130_v17 }
0x1030   : > { %12937 = vmatpush1.bf16.msra.mxu1 %v18920_v26  ;;  %v18950_v26 = vld [vmem:[%s22698_s15 + $0x248] sm:$0xff]  }
0x1031   : > { %13226 = vmatprep.subr.bf16.mxu1 %v19130_v17 }
0x10d5   : > { %v12544_v47 = vpop.f32.mrb[160].mxu0 }
0x10d6   : > { %v12626_v43 = vadd.f32 %v12609_v34, %v12544_v47  ;;  %v12587_v35 = vpop.f32.mrb[68].mxu1  ;;  %v12546_v28 = vpop.f32.mrb[161].mxu0  ;;  %v18957_v47 = vld [vmem:[%s22698_s15 + $0x280] sm:$0xff]  }
0x10d7   : > { %v12628_v33 = vadd.f32 %v12617_v62, %v12587_v35  ;;  %v12627_v36 = vadd.f32 %v12613_v3, %v12546_v28  ;;  %v12589_v38 = vpop.f32.mrb[69].mxu1  ;;  %v12548_v27 = vpop.f32.mrb[162].mxu0  ;;  %v18959_v35 = vld [vmem:[%s22698_s15 + $0x290] sm:$0xff]   ;;  %v18960_v28 = vld [vmem:[%s22698_s15 + $0x298] sm:$0xff]  }
0x10d8   : > { %v12629_v40 = vadd.f32 %v12621_v42, %v12589_v38  ;;  %v12630_v4 = vadd.f32 %v12609_v34, %v12548_v27  ;;  %v12591_v45 = vpop.f32.mrb[70].mxu1  ;;  %v12550_v46 = vpop.f32.mrb[163].mxu0  ;;  %v12634_v19 = vmax.f32 %v12626_v43, 0.0  ;;  %v18953_v34 = vld [vmem:[%s22698_s15 + $0x260] sm:$0xff]   ;;  %v18958_v43 = vld [vmem:[%s22698_s15 + $0x288] sm:$0xff]   ;;  %v18963_v38 = vld [vmem:[%s22698_s15 + $0x330] sm:$0xff]  }
0x10d9   : > { %v12632_v54 = vadd.f32 %v12617_v62, %v12591_v45  ;;  %v12631_v15 = vadd.f32 %v12613_v3, %v12550_v46  ;;  %v12593_v39 = vpop.f32.mrb[71].mxu1  ;;  %v12636_v53 = vmax.f32 %v12628_v33, 0.0  ;;  %v12635_v20 = vmax.f32 %v12627_v36, 0.0  ;;  %v18954_v62 = vld [vmem:[%s22698_s15 + $0x268] sm:$0xff]   ;;  %v18955_v3 = vld [vmem:[%s22698_s15 + $0x270] sm:$0xff]   ;;  %v18961_v33 = vld [vmem:[%s22698_s15 + $0x320] sm:$0xff]  }
0x10da   : > { %v12638_v48 = vmax.f32 %v12630_v4, 0.0  ;;  %v12633_v18 = vadd.f32 %v12621_v42, %v12593_v39  ;;  %v12637_v57 = vmax.f32 %v12629_v40, 0.0  ;;  %v18956_v42 = vld [vmem:[%s22698_s15 + $0x278] sm:$0xff]   ;;  %v18962_v36 = vld [vmem:[%s22698_s15 + $0x328] sm:$0xff]   ;;  %v18965_v40 = vld [vmem:[%s22698_s15 + $0x340] sm:$0xff]  }
0x10db   : > { %v12640_v0 = vmax.f32 %v12632_v54, 0.0  ;;  %v12639_v50 = vmax.f32 %v12631_v15, 0.0  ;;  %v18964_v27 = vld [vmem:[%s22698_s15 + $0x338] sm:$0xff]   ;;  %v18966_v4 = vld [vmem:[%s22698_s15 + $0x348] sm:$0xff]   ;;  %v18967_v45 = vld [vmem:[%s22698_s15 + $0x350] sm:$0xff]  }
0x10dc   : > { %v22277_v51 = vpack.c.bf16 %v12638_v48, %v12634_v19  ;;  %v12641_v44 = vmax.f32 %v12633_v18, 0.0  ;;  %v18968_v46 = vld [vmem:[%s22698_s15 + $0x358] sm:$0xff]   ;;  %v18969_v54 = vld [vmem:[%s22698_s15 + $0x360] sm:$0xff]   ;;  %v18970_v15 = vld [vmem:[%s22698_s15 + $0x368] sm:$0xff]  }
0x10dd   : > { %v22279_v37 = vpack.c.bf16 %v12640_v0, %v12636_v53  ;;  %v22281_v6 = vpack.c.bf16 %v12639_v50, %v12635_v20  ;;  %v18971_v39 = vld [vmem:[%s22698_s15 + $0x370] sm:$0xff]   ;;  %v18972_v19 = vld [vmem:[%s22698_s15 + $0x378] sm:$0xff]  }
0x10de   : > { %v22286_v32 = vpack.c.bf16 %v12641_v44, %v12637_v57  ;;  %v18973_v48 = vld [vmem:[%s22697_s14 + $0x10] sm:$0xff]  }
0x10df   : > { %12905 = vmatprep.mubr.bf16.mxu0 %v22281_v6 }
0x10e0   : > { %16416 = vmatprep.mubr.msk.bf16.mxu1 %vm2445_vm5, %v22286_v32  ;;  %12906 = vmatmul.mubr.bf16.vlgmr.msra.gmra.mrb[172].mxu0 %v22277_v51 }
0x10e1   : > { %12947 = vmatmul.mubr.bf16.vlgmr.msra.gmra.mrb[80].mxu1 %v22279_v37  ;;  %16895 = vmatpush3.bf16.msra.mxu0 %v18922_v30 }
0x10e2   : > { %13227 = vmatpush1.bf16.msra.mxu1 %v18923_v41  ;;  %13217 = vmatprep.mubr.bf16.mxu0 %v22281_v6 }
0x10e3   : > { %16501 = vmatprep.mubr.msk.bf16.mxu1 %vm2445_vm5, %v22286_v32  ;;  %16896 = vmatprep.subr.bf16.mxu0 %v18924_v58 }
0x10e4   : > { %13228 = vmatprep.subr.bf16.mxu1 %v19130_v17 }
0x10e5   : > { %16897 = vmatpush3.bf16.msra.mxu0 %v18925_v24 }
0x10e6   : > { %13229 = vmatpush1.bf16.msra.mxu1 %v18926_v11  ;;  %16898 = vmatprep.subr.bf16.mxu0 %v18927_v49 }
0x10e7   : > { %13230 = vmatprep.subr.bf16.mxu1 %v19130_v17 }
0x10e9   : > { %16899 = vmatpush3.bf16.msra.mxu0 %v18928_v52 }
0x10ea   : > { %13231 = vmatpush1.bf16.msra.mxu1 %v18929_v21  ;;  %16900 = vmatprep.subr.bf16.mxu0 %v18930_v55 }
0x10eb   : > { %13232 = vmatprep.subr.bf16.mxu1 %v19130_v17 }
0x10ed   : > { %16901 = vmatpush3.bf16.msra.mxu0 %v18931_v59 }
0x10ee   : > { %13233 = vmatpush1.bf16.msra.mxu1 %v18932_v31  ;;  %16902 = vmatprep.subr.bf16.mxu0 %v18933_v60 }
0x10ef   : > { %13234 = vmatprep.subr.bf16.mxu1 %v19130_v17 }
0x10f1   : > { %16903 = vmatpush3.bf16.msra.mxu0 %v18934_v61 }
0x10f2   : > { %13235 = vmatpush1.bf16.msra.mxu1 %v18935_v14  ;;  %16904 = vmatprep.subr.bf16.mxu0 %v18936_v63 }
0x10f3   : > { %13236 = vmatprep.subr.bf16.mxu1 %v19130_v17 }
0x10f5   : > { %16905 = vmatpush3.bf16.msra.mxu0 %v18937_v1 }
0x10f6   : > { %13237 = vmatpush1.bf16.msra.mxu1 %v18938_v2  ;;  %16906 = vmatprep.subr.bf16.mxu0 %v18939_v5  ;;  %v18974_v5 = vld [vmem:[%s22697_s14 + $0x18] sm:$0x3f]  }
0x10f7   : > { %13238 = vmatprep.subr.bf16.mxu1 %v19130_v17 }
0x10f9   : > { %16907 = vmatpush3.bf16.msra.mxu0 %v18940_v7  ;;  %v18975_v7 = vld [vmem:[%s22697_s14] sm:$0xff]  }
0x10fa   : > { %13239 = vmatpush1.bf16.msra.mxu1 %v18941_v8  ;;  %16908 = vmatprep.subr.bf16.mxu0 %v18942_v9  ;;  %v18976_v8 = vld [vmem:[%s22698_s15 + $0x200] sm:$0xff]  }
0x10fb   : > { %13240 = vmatprep.subr.bf16.mxu1 %v19130_v17 }
0x10fd   : > { %16909 = vmatpush3.bf16.msra.mxu0 %v18943_v10  ;;  %v18977_v10 = vld [vmem:[%s22697_s14 + $0x8] sm:$0x3f]  }
0x10fe   : > { %13241 = vmatpush1.bf16.msra.mxu1 %v18944_v12  ;;  %v18978_v12 = vld [vmem:[%s22698_s15 + $0x1c0] sm:$0xff]  }
0x10ff   : > { %13242 = vmatprep.subr.bf16.mxu1 %v19130_v17 }
0x1100   : > { %13218 = vmatmul.mubr.bf16.vlgmr.msra.gmra.mrb[176].mxu0 %v22277_v51 }
0x1101   : > { %17006 = vmatprep.mubr.msk.bf16.mxu0 %vm1466_vm4, %v18973_v48 }
0x1102   : > { %13243 = vmatpush1.bf16.msra.mxu1 %v18945_v16  ;;  %v18979_v16 = vld [vmem:[%s22698_s15 + $0x208] sm:$0xff]  }
0x1103   : > { %13244 = vmatprep.subr.bf16.mxu1 %v19130_v17 }
0x1106   : > { %13245 = vmatpush1.bf16.msra.mxu1 %v18946_v22  ;;  %v18980_v22 = vld [vmem:[%s22698_s15 + $0x1c8] sm:$0xff]  }
0x1107   : > { %13246 = vmatprep.subr.bf16.mxu1 %v19130_v17 }
0x110a   : > { %13247 = vmatpush1.bf16.msra.mxu1 %v18947_v56  ;;  %v18981_v56 = vld [vmem:[%s22698_s15 + $0x210] sm:$0xff]  }
0x110b   : > { %13248 = vmatprep.subr.bf16.mxu1 %v19130_v17 }
0x110e   : > { %13249 = vmatpush1.bf16.msra.mxu1 %v18948_v23  ;;  %v18982_v23 = vld [vmem:[%s22698_s15 + $0x1d0] sm:$0xff]  }
0x110f   : > { %13675 = vmatprep.subr.bf16.mxu1 %v19130_v17 }
0x1111   : > { %13259 = vmatmul.mubr.bf16.vlgmr.msra.gmra.mrb[84].mxu1 %v22279_v37 }
0x1112   : > { %13676 = vmatpush1.bf16.msra.mxu1 %v18949_v25  ;;  %16598 = vmatprep.mubr.msk.bf16.mxu1 %vm2445_vm5, %v22286_v32  ;;  %v18983_v25 = vld [vmem:[%s22698_s15 + $0x218] sm:$0xff]  }
0x1113   : > { %13677 = vmatprep.subr.bf16.mxu1 %v19130_v17 }
0x1116   : > { %13678 = vmatpush1.bf16.msra.mxu1 %v18950_v26  ;;  %v18984_v26 = vld [vmem:[%s22698_s15 + $0x1d8] sm:$0xff]  }
0x1117   : > { %13679 = vmatprep.subr.bf16.mxu1 %v19130_v17 }
0x111a   : > { %13680 = vmatpush1.bf16.msra.mxu1 %v18951_v13  ;;  %v18985_v13 = vld [vmem:[%s22698_s15 + $0x220] sm:$0xff]  }
0x111b   : > { %13681 = vmatprep.subr.bf16.mxu1 %v19130_v17 }
0x111e   : > { %13682 = vmatpush1.bf16.msra.mxu1 %v18952_v29  ;;  %v18986_v29 = vld [vmem:[%s22698_s15 + $0x1e0] sm:$0xff]  }
0x111f   : > { %13683 = vmatprep.subr.bf16.mxu1 %v19130_v17 }
0x1122   : > { %13684 = vmatpush1.bf16.msra.mxu1 %v18953_v34  ;;  %v18987_v34 = vld [vmem:[%s22698_s15 + $0x228] sm:$0xff]  }
0x1123   : > { %13685 = vmatprep.subr.bf16.mxu1 %v19130_v17 }
0x1126   : > { %13686 = vmatpush1.bf16.msra.mxu1 %v18954_v62  ;;  %v18988_v62 = vld [vmem:[%s22698_s15 + $0x1e8] sm:$0xff]  }
0x1127   : > { %13687 = vmatprep.subr.bf16.mxu1 %v19130_v17 }
0x112a   : > { %13688 = vmatpush1.bf16.msra.mxu1 %v18955_v3  ;;  %v18989_v3 = vld [vmem:[%s22698_s15 + $0x230] sm:$0xff]  }
0x112b   : > { %13689 = vmatprep.subr.bf16.mxu1 %v19130_v17 }
0x112e   : > { %13690 = vmatpush1.bf16.msra.mxu1 %v18956_v42  ;;  %v18990_v42 = vld [vmem:[%s22698_s15 + $0x1f0] sm:$0xff]  }
0x112f   : > { %13691 = vmatprep.subr.bf16.mxu1 %v19130_v17 }
0x1132   : > { %13692 = vmatpush1.bf16.msra.mxu1 %v18957_v47  ;;  %v18991_v47 = vld [vmem:[%s22698_s15 + $0x238] sm:$0xff]  }
0x1133   : > { %13693 = vmatprep.subr.bf16.mxu1 %v19130_v17 }
0x1136   : > { %13694 = vmatpush1.bf16.msra.mxu1 %v18958_v43 }
0x1137   : > { %13695 = vmatprep.subr.bf16.mxu1 %v19130_v17 }
0x113a   : > { %13696 = vmatpush1.bf16.msra.mxu1 %v18959_v35  ;;  %v18992_v35 = vld [vmem:[%s22698_s15 + $0x1f8] sm:$0xff]  }
0x113b   : > { %13697 = vmatprep.subr.bf16.mxu1 %v19130_v17 }
0x113e   : > { %13698 = vmatpush1.bf16.msra.mxu1 %v18960_v28 }
0x113f   : > { %14060 = vmatprep.subr.bf16.mxu1 %v19130_v17 }
0x1141   : > { %13708 = vmatmul.mubr.bf16.vlgmr.msra.gmra.mrb[88].mxu1 %v22279_v37 }
0x1142   : > { %14061 = vmatpush1.bf16.msra.mxu1 %v18961_v33  ;;  %16691 = vmatprep.mubr.msk.bf16.mxu1 %vm2445_vm5, %v22286_v32 }
0x1143   : > { %14062 = vmatprep.subr.bf16.mxu1 %v19130_v17 }
0x1146   : > { %14063 = vmatpush1.bf16.msra.mxu1 %v18962_v36 }
0x1147   : > { %14064 = vmatprep.subr.bf16.mxu1 %v19130_v17 }
0x114a   : > { %14065 = vmatpush1.bf16.msra.mxu1 %v18963_v38 }
0x114b   : > { %14066 = vmatprep.subr.bf16.mxu1 %v19130_v17 }
0x114e   : > { %14067 = vmatpush1.bf16.msra.mxu1 %v18964_v27 }
0x114f   : > { %14068 = vmatprep.subr.bf16.mxu1 %v19130_v17 }
0x1152   : > { %14069 = vmatpush1.bf16.msra.mxu1 %v18965_v40 }
0x1153   : > { %14070 = vmatprep.subr.bf16.mxu1 %v19130_v17 }
0x1156   : > { %14071 = vmatpush1.bf16.msra.mxu1 %v18966_v4 }
0x1157   : > { %14072 = vmatprep.subr.bf16.mxu1 %v19130_v17 }
0x115a   : > { %14073 = vmatpush1.bf16.msra.mxu1 %v18967_v45  ;;  %v18993_v45 = vld [vmem:[%s22697_s14 + $0x20] sm:$0xff]  }
0x115b   : > { %14074 = vmatprep.subr.bf16.mxu1 %v19130_v17 }
0x115e   : > { %14075 = vmatpush1.bf16.msra.mxu1 %v18968_v46 }
0x115f   : > { %14076 = vmatprep.subr.bf16.mxu1 %v19130_v17 }
0x1162   : > { %14077 = vmatpush1.bf16.msra.mxu1 %v18969_v54 }
0x1163   : > { %14078 = vmatprep.subr.bf16.mxu1 %v19130_v17 }
0x1166   : > { %14079 = vmatpush1.bf16.msra.mxu1 %v18970_v15 }
0x1167   : > { %14080 = vmatprep.subr.bf16.mxu1 %v19130_v17 }
0x116a   : > { %14081 = vmatpush1.bf16.msra.mxu1 %v18971_v39 }
0x116b   : > { %14082 = vmatprep.subr.bf16.mxu1 %v19130_v17 }
0x116e   : > { %14083 = vmatpush1.bf16.msra.mxu1 %v18972_v19 }
0x1171   : > { %14093 = vmatmul.mubr.bf16.vlgmr.msra.gmra.mrb[92].mxu1 %v22279_v37 }
0x11b3   : > { %v16888_v18 = vpop.f32.mrb[172].mxu0 }
0x11b4   : > { %v12948_v53 = vpop.f32.mrb[80].mxu1  ;;  %v16889_v20 = vpop.f32.mrb[173].mxu0 }
0x11b5   : > { %v16890_v0 = vadd.f32 %v16889_v20, %v16888_v18  ;;  %v12950_v50 = vpop.f32.mrb[81].mxu1  ;;  %v16891_v57 = vpop.f32.mrb[174].mxu0 }
0x11b6   : > { %v12951_v44 = vpop.f32.mrb[82].mxu1  ;;  %v16892_v30 = vpop.f32.mrb[175].mxu0 }
0x11b7   : > { %v12949_v32 = vadd.f32 %v16890_v0, %v12948_v53  ;;  %v16893_v41 = vadd.f32 %v16892_v30, %v16891_v57  ;;  %v12953_v17 = vpop.f32.mrb[83].mxu1  ;;  %v18995_v0 = vld [vmem:[%s22698_s15 + $0x2e0] sm:$0xff]   ;;  %v18994_v57 = vld [vmem:[%s22697_s14 + $0x28] sm:$0x3f]  }
0x11b8   : > { %v18997_v30 = vld [vmem:[%s22698_s15 + $0x2e8] sm:$0xff]   ;;  %v19000_v17 = vld [vmem:[%s22698_s15 + $0x2b0] sm:$0xff]  }
0x11b9   : > { %v12952_v58 = vadd.f32 %v16893_v41, %v12951_v44  ;;  %v18996_v44 = vld [vmem:[%s22698_s15 + $0x2a0] sm:$0xff]   ;;  %v18999_v41 = vld [vmem:[%s22698_s15 + $0x2f0] sm:$0xff]  }
0x11bb   : > { %v12959_v24 = vpack.c.bf16 %v12952_v58, %v12949_v32  ;;  %v18998_v32 = vld [vmem:[%s22698_s15 + $0x2a8] sm:$0xff]   ;;  %v19001_v58 = vld [vmem:[%s22698_s15 + $0x2f8] sm:$0xff]  }
0x11bd   : > { %v13358_v9 = vsel %vm1470_vm3, %v12959_v24, 0 }
0x11d3   : > { %v16910_v11 = vpop.f32.mrb[176].mxu0 }
0x11d4   : > { %v16911_v49 = vpop.f32.mrb[177].mxu0 }
0x11d5   : > { %v16912_v52 = vadd.f32 %v16911_v49, %v16910_v11  ;;  %v16913_v21 = vpop.f32.mrb[178].mxu0  ;;  %v19004_v11 = vld [vmem:[%s22698_s15 + $0x2c0] sm:$0xff]   ;;  %v19005_v49 = vld [vmem:[%s22698_s15 + $0x308] sm:$0xff]  }
0x11d6   : > { %v16914_v55 = vpop.f32.mrb[179].mxu0 }
0x11d7   : > { %v16915_v59 = vadd.f32 %v16914_v55, %v16913_v21  ;;  %v19007_v21 = vld [vmem:[%s22698_s15 + $0x310] sm:$0xff]  }
0x11d8   : > { %v19008_v55 = vld [vmem:[%s22698_s15 + $0x2d0] sm:$0xff]  }
0x11e4   : > { %v13260_v37 = vpop.f32.mrb[84].mxu1 }
0x11e5   : > { %v13261_v31 = vadd.f32 %v16912_v52, %v13260_v37  ;;  %v13262_v60 = vpop.f32.mrb[85].mxu1  ;;  %v19006_v52 = vld [vmem:[%s22698_s15 + $0x2c8] sm:$0xff]   ;;  %v19010_v37 = vld [vmem:[%s22698_s15 + $0x2d8] sm:$0xff]  }
0x11e6   : > { %v13263_v61 = vpop.f32.mrb[86].mxu1 }
0x11e7   : > { %v13264_v14 = vadd.f32 %v16915_v59, %v13263_v61  ;;  %v13265_v63 = vpop.f32.mrb[87].mxu1  ;;  %v19009_v59 = vld [vmem:[%s22698_s15 + $0x318] sm:$0xff]  }
0x11e9   : > { %v13272_v1 = vpack.c.bf16 %v13264_v14, %v13261_v31  ;;  %v19011_v31 = vld [vmem:[%s22697_s14 + $0x30] sm:$0xff]  }
0x11eb   : > { %17152 = vmatprep.subr.msk.bf16.mxu0 %vm1470_vm3, %v13272_v1  ;;  %v13290_v2 = vsel %vm1470_vm3, %v13272_v1, 0 }
0x11ec   : > { %17005 = vmatpush3.bf16.msra.mxu0 %v13290_v2 }
0x11ed   : > { %17153 = vmatprep.subr.msk.bf16.mxu0 %vm1470_vm3, %v12959_v24  ;;  %v19003_v24 = vld [vmem:[%s22698_s15 + $0x300] sm:$0xff]  }
0x11ef   : > { %17007 = vmatmul.mubr.msk.bf16.vlgmr.msra.gmra.mrb[180].mxu0 %vm1466_vm4, %v18974_v5 }
0x11f0   : > { %17011 = vmatpush3.bf16.msra.mxu0 %v13358_v9  ;;  %17012 = vmatprep.mubr.msk.bf16.mxu0 %vm1466_vm4, %v18975_v7  ;;  %v19012_v9 = vld [vmem:[%s22697_s14 + $0x38] sm:$0x3f]  }
0x11f1   : > { %16922 = vmatprep.subr.bf16.mxu0 %v18976_v8 }
0x11fb   : > { %17013 = vmatmul.mubr.msk.bf16.vlgmr.msra.gmra.mrb[180].mxu0 %vm1466_vm4, %v18977_v10 }
0x11fc   : > { %16923 = vmatpush3.bf16.msra.mxu0 %v18978_v12  ;;  %13666 = vmatprep.mubr.bf16.mxu0 %v22281_v6 }
0x11fd   : > { %16924 = vmatprep.subr.bf16.mxu0 %v18979_v16 }
0x1200   : > { %16925 = vmatpush3.bf16.msra.mxu0 %v18980_v22 }
0x1201   : > { %16926 = vmatprep.subr.bf16.mxu0 %v18981_v56 }
0x1204   : > { %16927 = vmatpush3.bf16.msra.mxu0 %v18982_v23 }
0x1205   : > { %16928 = vmatprep.subr.bf16.mxu0 %v18983_v25 }
0x1208   : > { %16929 = vmatpush3.bf16.msra.mxu0 %v18984_v26 }
0x1209   : > { %16930 = vmatprep.subr.bf16.mxu0 %v18985_v13 }
0x120c   : > { %16931 = vmatpush3.bf16.msra.mxu0 %v18986_v29 }
0x120d   : > { %16932 = vmatprep.subr.bf16.mxu0 %v18987_v34 }
0x1210   : > { %16933 = vmatpush3.bf16.msra.mxu0 %v18988_v62 }
0x1211   : > { %16934 = vmatprep.subr.bf16.mxu0 %v18989_v3 }
0x1214   : > { %16935 = vmatpush3.bf16.msra.mxu0 %v18990_v42  ;;  %v13709_v43 = vpop.f32.mrb[88].mxu1 }
0x1215   : > { %v13711_v28 = vpop.f32.mrb[89].mxu1  ;;  %16936 = vmatprep.subr.bf16.mxu0 %v18991_v47 }
0x1216   : > { %v13712_v33 = vpop.f32.mrb[90].mxu1 }
0x1217   : > { %v13714_v36 = vpop.f32.mrb[91].mxu1 }
0x1218   : > { %16937 = vmatpush3.bf16.msra.mxu0 %v18992_v35 }
0x121b   : > { %13667 = vmatmul.mubr.bf16.vlgmr.msra.gmra.mrb[184].mxu0 %v22277_v51 }
0x121c   : > { %17018 = vmatprep.mubr.msk.bf16.mxu0 %vm1466_vm4, %v18993_v45 }
0x1244   : > { %v14094_v38 = vpop.f32.mrb[92].mxu1 }
0x1245   : > { %v14096_v27 = vpop.f32.mrb[93].mxu1 }
0x1246   : > { %v14097_v40 = vpop.f32.mrb[94].mxu1 }
0x1247   : > { %v14099_v4 = vpop.f32.mrb[95].mxu1 }
0x12ee   : > { %v16938_v46 = vpop.f32.mrb[184].mxu0 }
0x12ef   : > { %v16939_v54 = vpop.f32.mrb[185].mxu0 }
0x12f0   : > { %v16940_v15 = vadd.f32 %v16939_v54, %v16938_v46  ;;  %v16941_v39 = vpop.f32.mrb[186].mxu0 }
0x12f1   : > { %v16942_v19 = vpop.f32.mrb[187].mxu0 }
0x12f2   : > { %v13710_v48 = vadd.f32 %v16940_v15, %v13709_v43  ;;  %v16943_v18 = vadd.f32 %v16942_v19, %v16941_v39 }
0x12f4   : > { %v13713_v53 = vadd.f32 %v16943_v18, %v13712_v33 }
0x12f6   : > { %v13721_v20 = vpack.c.bf16 %v13713_v53, %v13710_v48 }
0x12f8   : > { %17154 = vmatprep.subr.msk.bf16.mxu0 %vm1470_vm3, %v13721_v20  ;;  %v13739_v50 = vsel %vm1470_vm3, %v13721_v20, 0 }
0x12f9   : > { %17017 = vmatpush3.bf16.msra.mxu0 %v13739_v50 }
0x12fa   : > { %16947 = vmatprep.subr.bf16.mxu0 %v18995_v0 }
0x12fc   : > { %17019 = vmatmul.mubr.msk.bf16.vlgmr.msra.gmra.mrb[180].mxu0 %vm1466_vm4, %v18994_v57 }
0x12fd   : > { %16948 = vmatpush3.bf16.msra.mxu0 %v18996_v44  ;;  %14051 = vmatprep.mubr.bf16.mxu0 %v22281_v6  ;;  %v19002_v6 = vld [vmem:[%s22698_s15 + $0x2b8] sm:$0xff]  }
0x12fe   : > { %16949 = vmatprep.subr.bf16.mxu0 %v18997_v30 }
0x1301   : > { %16950 = vmatpush3.bf16.msra.mxu0 %v18998_v32 }
0x1302   : > { %16951 = vmatprep.subr.bf16.mxu0 %v18999_v41 }
0x1305   : > { %16952 = vmatpush3.bf16.msra.mxu0 %v19000_v17 }
0x1306   : > { %16953 = vmatprep.subr.bf16.mxu0 %v19001_v58 }
0x1309   : > { %16954 = vmatpush3.bf16.msra.mxu0 %v19002_v6 }
0x130a   : > { %16955 = vmatprep.subr.bf16.mxu0 %v19003_v24 }
0x130d   : > { %16956 = vmatpush3.bf16.msra.mxu0 %v19004_v11 }
0x130e   : > { %16957 = vmatprep.subr.bf16.mxu0 %v19005_v49 }
0x1311   : > { %16958 = vmatpush3.bf16.msra.mxu0 %v19006_v52 }
0x1312   : > { %16959 = vmatprep.subr.bf16.mxu0 %v19007_v21 }
0x1315   : > { %16960 = vmatpush3.bf16.msra.mxu0 %v19008_v55 }
0x1316   : > { %16961 = vmatprep.subr.bf16.mxu0 %v19009_v59 }
0x1319   : > { %16962 = vmatpush3.bf16.msra.mxu0 %v19010_v37 }
0x131c   : > { %14052 = vmatmul.mubr.bf16.vlgmr.msra.gmra.mrb[188].mxu0 %v22277_v51 }
0x131d   : > { %17024 = vmatprep.mubr.msk.bf16.mxu0 %vm1466_vm4, %v19011_v31 }
0x13ef   : > { %v16963_v60 = vpop.f32.mrb[188].mxu0 }
0x13f0   : > { %v16964_v61 = vpop.f32.mrb[189].mxu0 }
0x13f1   : > { %v16965_v14 = vadd.f32 %v16964_v61, %v16963_v60  ;;  %v16966_v63 = vpop.f32.mrb[190].mxu0 }
0x13f2   : > { %v16967_v1 = vpop.f32.mrb[191].mxu0 }
0x13f3   : > { %v14095_v2 = vadd.f32 %v16965_v14, %v14094_v38  ;;  %v16968_v5 = vadd.f32 %v16967_v1, %v16966_v63 }
0x13f5   : > { %v14098_v7 = vadd.f32 %v16968_v5, %v14097_v40 }
0x13f7   : > { %v14106_v8 = vpack.c.bf16 %v14098_v7, %v14095_v2 }
0x13f9   : > { %17155 = vmatprep.subr.msk.bf16.mxu0 %vm1470_vm3, %v14106_v8  ;;  %v14124_v51 = vsel %vm1470_vm3, %v14106_v8, 0 }
0x13fa   : > { %17023 = vmatpush3.bf16.msra.mxu0 %v14124_v51 }
0x13fd   : > { %17025 = vmatmul.mubr.msk.bf16.vlgmr.msra.gmra.mrb[180].mxu0 %vm1466_vm4, %v19012_v9 }
0x13fe   : > { %19070 = shalt.err (!%p19067_p7)
}
0x13ff   : > { %s19071_s0 = scalar_lea.hbm %s22634_s21, 16  ;;  %s19075_s1 = scalar_lea.hbm %s22700_s17, 32 }
0x1400   : > { %p19072_p8 = scmp.ne.s32.totalorder %s22634_s21, %s19071_s0  ;;  %p19076_p1 = scmp.lt.u32.totalorder %s22634_s21, %s22700_s17 }
0x1401   : > { %p19077_p0 = scmp.lt.u32.totalorder %s19075_s1, %s19071_s0  ;;  %p19079_p6 = scmp.lt.u32.totalorder %s19071_s0, %s22634_s21 }
0x1402   : > { %p19073_p11 = pnand %p19072_p8, %p22742_p9 }
0x1403   : > { %p19078_p5 = por %p19077_p0, %p19076_p1 }
0x1404   : > { %p19074_p13 = pneg %p19073_p11 }
0x1405   : > { %p19080_p10 = por %p19079_p6, %p19078_p5 }
0x1407   : > { %p19081_p12 = pnand %p19080_p10, %p19074_p13 }
0x1409   : > { %19084 = shalt.err (!%p19081_p12)
}
0x140a   : > { %17160 = dma.vmem_to_hbm [thread:$0]  (%p22742_p9), %s14250_s29, 16, %s22634_s21, %s14232_s24   ;;  %v16700_v10 = vld [vmem:[%s22699_s16] ss:$0 sm:$0xff]  ;;  %vm14229_vm15 = vcmask 224256  }
0x140b   : > { %s22743_s2 = sshll.u32 %s19317_s27, 5 }
0x140c   : > { %s600_s24 = scalar_lea.vmem %s22701_s18, %s22743_s2 }
0x14d0   : > { %v17026_v12 = vpop.f32.mrb[180].mxu0 }
0x14d1   : > { %v14188_v16 = vadd.f32 %v17026_v12, %v16700_v10  ;;  %v14160_v22 = vpop.f32.mrb[181].mxu0 }
0x14d2   : > { %v14186_v56 = vadd.f32 %v16700_v10, %v14160_v22  ;;  %v17027_v23 = vpop.f32.mrb[182].mxu0 }
0x14d3   : > { %v14192_v25 = vand.u32 2147483647, %v14188_v16  ;;  %v14189_v26 = vadd.f32 %v17027_v23, %v16700_v10  ;;  %v14163_v13 = vpop.f32.mrb[183].mxu0  ;;  %vm14208_vm12 = vcmp.ge.f32.partialorder %v14188_v16, 0.0 }
0x14d4   : > { %v14190_v29 = vand.u32 2147483647, %v14186_v56  ;;  %v14187_v34 = vadd.f32 %v16700_v10, %v14163_v13  ;;  %vm14206_vm13 = vcmp.ge.f32.partialorder %v14186_v56, 0.0 }
0x14d5   : > { %v14196_v62 = vsub.f32 0.0, %v14192_v25  ;;  %v14193_v3 = vand.u32 2147483647, %v14189_v26  ;;  %vm14209_vm14 = vcmp.ge.f32.partialorder %v14189_v26, 0.0 }
0x14d6   : > { %v14194_v42 = vsub.f32 0.0, %v14190_v29  ;;  %v14191_v47 = vand.u32 2147483647, %v14187_v34  ;;  %vm14207_vm0 = vcmp.ge.f32.partialorder %v14187_v34, 0.0 }
0x14d7   : > { %v14202_v43 = vmul.f32 1.442695, %v14196_v62  ;;  %v14197_v35 = vsub.f32 0.0, %v14193_v3 }
0x14d8   : > { %v14198_v28 = vmul.f32 1.442695, %v14194_v42  ;;  %v14195_v33 = vsub.f32 0.0, %v14191_v47 }
0x14d9   : > { %19013 = vpow2.f32 %v14202_v43  ;;  %v14204_v36 = vmul.f32 1.442695, %v14197_v35 }
0x14da   : > { %19015 = vpow2.f32 %v14198_v28  ;;  %v14200_v38 = vmul.f32 1.442695, %v14195_v33 }
0x14db   : > { %19017 = vpow2.f32 %v14204_v36 }
0x14dc   : > { %19019 = vpow2.f32 %v14200_v38 }
0x14e3   : > { %v19014_v27 = vpop.eup %19013 }
0x14e4   : > { %v19016_v40 = vpop.eup %19015  ;;  %v14216_v4 = vadd.f32 1.0, %v19014_v27  ;;  %v14212_v48 = vsel %vm14208_vm12, 1.0, %v19014_v27 }
0x14e5   : > { %v19018_v45 = vpop.eup %19017  ;;  %v14214_v46 = vadd.f32 1.0, %v19016_v40  ;;  %v14210_v20 = vsel %vm14206_vm13, 1.0, %v19016_v40 }
0x14e6   : > { %v19020_v54 = vpop.eup %19019  ;;  %19021 = vrcp.f32 %v14216_v4  ;;  %v14217_v15 = vadd.f32 1.0, %v19018_v45  ;;  %v14213_v57 = vsel %vm14209_vm14, 1.0, %v19018_v45 }
0x14e7   : > { %19023 = vrcp.f32 %v14214_v46  ;;  %v14215_v39 = vadd.f32 1.0, %v19020_v54  ;;  %v14211_v32 = vsel %vm14207_vm0, 1.0, %v19020_v54 }
0x14e8   : > { %19025 = vrcp.f32 %v14217_v15 }
0x14e9   : > { %19027 = vrcp.f32 %v14215_v39 }
0x14f0   : > { %v19022_v19 = vpop.eup %19021 }
0x14f1   : > { %v19024_v18 = vpop.eup %19023  ;;  %v14223_v53 = vmul.f32 %v19022_v19, %v14212_v48 }
0x14f2   : > { %v19026_v0 = vpop.eup %19025  ;;  %v14219_v50 = vmul.f32 %v19024_v18, %v14210_v20 }
0x14f3   : > { %v19028_v44 = vpop.eup %19027  ;;  %14228 = vst.msk [vmem:[%s600_s24 + $0x10] sm:$0xff] %vm615_vm2, %v14223_v53  ;;  %v14225_v30 = vmul.f32 %v19026_v0, %v14213_v57 }
0x14f4   : > { %14226 = vst.msk [vmem:[%s600_s24] sm:$0xff] %vm615_vm2, %v14219_v50  ;;  %v14221_v41 = vmul.f32 %v19028_v44, %v14211_v32 }
0x14f5   : > { %14230 = vst.msk [vmem:[%s600_s24 + $0x18] sm:$0xf] %vm14229_vm15, %v14225_v30 }
0x14f6   : > { %14227 = vst.msk [vmem:[%s600_s24 + $0x8] sm:$0xff] %vm615_vm2, %v14221_v41 }
0x14f7 PF: > { %s22744_s27 = sld [smem:[#allocation11_spill]]  ;;  %s22745_s22 = sld [smem:[#allocation9_spill]] }
0x14f8   : > { %s22746_s26 = sld [smem:[#allocation14_spill]] }
0x14fd   : > { %p17172_p9 = scmp.ge.s32.totalorder %s22744_s27, 2  ;;  %s14264_s0 = sand.u32 1, %s22745_s22  }
0x14fe   : > { %p22747_p2 = scmp.ne.s32.totalorder %s22746_s26, 0  ;;  %s14265_s25 = scalar_lea.sflag [#allocation5], %s14264_s0 }
0x1500   : > { %p17167_p3 = pnand %p17172_p9, %p22747_p2 }
0x1502   : > { %19106 = dma.done.wait (!%p17167_p3), %s14265_s25, 16  }
0x1503   : > { %19108 = vsyncadd (!%p17167_p3), %s14265_s25, 4294967280  ;;  %s22748_s30 = sld [smem:[#allocation12_spill]]  ;;  %s22749_s19 = sld [smem:[#allocation10_spill]] }
0x1504   : > { %s22750_s29 = sld [smem:[#allocation13_spill]]  ;;  %s22751_s27 = smov %s19115_s28 }
0x1509   : > { %p30_p4 = scmp.ge.s32.totalorder %s22748_s30, 4   ;;  %s22752_s28 = smov %s22749_s19 }
0x150b   :  { %32 = sbr.rel (!%p30_p4) target bundleno = 10 (0xa), region = 188 }
0x1512   :  { %14277 = vsyncpa [#allocation4], 1 }
0x1513   :  { %14279 = vsyncpa [#allocation4 + $0x1], 1 }
0x1514   :  { %14280 = vsyncpa [#allocation5], 1 }
0x1515   :  { %14282 = vsyncpa [#allocation5 + $0x1], 1 }

</bundles_post_ra>
